<compile_context>
chip_gen: v5e
topology: v5e:2x2
jax: 0.10.0
libtpu: 0.0.40
codegen_flags: <defaults>
</compile_context>

<pallas_src>
import jax
import jax.numpy as jnp
from jax.experimental import pallas as pl
from jax.experimental.pallas import tpu as pltpu

BN_EPS = 1e-5
NORM_MEAN = 0.45
NORM_STD = 0.255


# ----------------------------- Pallas kernels -----------------------------

def _make_conv_bn_kernel(relu, has_residual):
    """Tiled conv-as-matmul with BN shift (scale pre-folded into weights), optional
    residual add and optional ReLU.  Grid = (M tiles, K tiles); K is the reduction axis."""
    if has_residual:
        def kernel(p_ref, w_ref, shift_ref, res_ref, o_ref, acc_ref):
            @pl.when(pl.program_id(1) == 0)
            def _():
                acc_ref[...] = jnp.zeros_like(acc_ref)

            acc_ref[...] += jnp.dot(p_ref[...], w_ref[...],
                                    preferred_element_type=jnp.float32)

            @pl.when(pl.program_id(1) == pl.num_programs(1) - 1)
            def _():
                y = acc_ref[...] + shift_ref[...] + res_ref[...]
                if relu:
                    y = jnp.maximum(y, 0.0)
                o_ref[...] = y.astype(o_ref.dtype)
        return kernel

    def kernel(p_ref, w_ref, shift_ref, o_ref, acc_ref):
        @pl.when(pl.program_id(1) == 0)
        def _():
            acc_ref[...] = jnp.zeros_like(acc_ref)

        acc_ref[...] += jnp.dot(p_ref[...], w_ref[...],
                                preferred_element_type=jnp.float32)

        @pl.when(pl.program_id(1) == pl.num_programs(1) - 1)
        def _():
            y = acc_ref[...] + shift_ref[...]
            if relu:
                y = jnp.maximum(y, 0.0)
            o_ref[...] = y.astype(o_ref.dtype)
    return kernel


# ----------------------------- small helpers -----------------------------

def _round_up(x, m):
    return (x + m - 1) // m * m


def _choose_tm(m):
    """Row-tile size (multiple of 8; 256 when M is large enough)."""
    if m >= 256:
        return 256, _round_up(m, 256)
    tm = _round_up(m, 8)
    return tm, tm


def _choose_tk(k_pad):
    return 256 if k_pad % 256 == 0 else 128


def _im2col(x, kh, kw, stride, padding, dilation, pad_value=0.0):
    """x: [B,H,W,C] -> patches [B,OH,OW,KH*KW,C] (kernel-position order (kh,kw))."""
    B, H, W, C = x.shape
    if padding > 0:
        x = jnp.pad(x, ((0, 0), (padding, padding), (padding, padding), (0, 0)),
                    mode="constant", constant_values=pad_value)
    Hp, Wp = H + 2 * padding, W + 2 * padding
    eff_kh = dilation * (kh - 1) + 1
    eff_kw = dilation * (kw - 1) + 1
    OH = (Hp - eff_kh) // stride + 1
    OW = (Wp - eff_kw) // stride + 1
    cols = []
    for i in range(kh):
        for j in range(kw):
            r0, c0 = i * dilation, j * dilation
            cols.append(x[:, r0:r0 + stride * (OH - 1) + 1:stride,
                             c0:c0 + stride * (OW - 1) + 1:stride, :])
    patches = jnp.stack(cols, axis=3)  # [B, OH, OW, KH*KW, C]
    return patches, OH, OW


# ----------------------------- wrapped ops -----------------------------

def conv_bn(x, fw, kh, kw, *, stride=1, padding=0, dilation=1, relu=False,
            residual=None, pad_value=0.0):
    """x: [B,H,W,Cin] NHWC f32; fw: {'w': [K_pad,Cout] bf16 (BN scale folded),
    'shift': [1,Cout] f32}.  Tiled Pallas matmul with fused epilogue."""
    B, H, W, Cin = x.shape
    w2, shift = fw["w"], fw["shift"]
    K = kh * kw * Cin
    K_pad, Cout = w2.shape

    patches, OH, OW = _im2col(x, kh, kw, stride, padding, dilation, pad_value=pad_value)
    M = B * OH * OW
    p2 = patches.reshape(M, K).astype(jnp.bfloat16)
    if K_pad != K:
        p2 = jnp.pad(p2, ((0, 0), (0, K_pad - K)))

    TM, M_pad = _choose_tm(M)
    if M_pad != M:
        p2 = jnp.pad(p2, ((0, M_pad - M), (0, 0)))
    TK = _choose_tk(K_pad)
    mt, kt = M_pad // TM, K_pad // TK

    args = [p2, w2, shift]
    in_specs = [
        pl.BlockSpec((TM, TK), lambda m, k: (m, k)),
        pl.BlockSpec((TK, Cout), lambda m, k: (k, 0)),
        pl.BlockSpec((1, Cout), lambda m, k: (0, 0)),
    ]
    if residual is not None:
        r2 = residual.reshape(M, Cout)
        if M_pad != M:
            r2 = jnp.pad(r2, ((0, M_pad - M), (0, 0)))
        args.append(r2)
        in_specs.append(pl.BlockSpec((TM, Cout), lambda m, k: (m, 0)))

    out = pl.pallas_call(
        _make_conv_bn_kernel(relu, residual is not None),
        grid=(mt, kt),
        in_specs=in_specs,
        out_specs=pl.BlockSpec((TM, Cout), lambda m, k: (m, 0)),
        out_shape=jax.ShapeDtypeStruct((M_pad, Cout), jnp.float32),
        scratch_shapes=[pltpu.VMEM((TM, Cout), jnp.float32)],
        compiler_params=pltpu.CompilerParams(
            dimension_semantics=("parallel", "arbitrary")),
    )(*args)
    return out[:M].reshape(B, OH, OW, Cout)


def maxpool_3x3_s2_p1(x):
    """3x3 / stride-2 / pad-1 max pool.  Pure fused-XLA 9-way max of shifted slices
    (perf review: no benefit from a Pallas call here; avoids 9x patch materialization)."""
    B, H, W, C = x.shape
    xp = jnp.pad(x, ((0, 0), (1, 1), (1, 1), (0, 0)),
                 mode="constant", constant_values=-jnp.inf)
    OH = (H + 2 - 3) // 2 + 1
    OW = (W + 2 - 3) // 2 + 1
    out = None
    for i in range(3):
        for j in range(3):
            s = xp[:, i:i + 2 * (OH - 1) + 1:2, j:j + 2 * (OW - 1) + 1:2, :]
            out = s if out is None else jnp.maximum(out, s)
    return out


# ----------------------------- network definition -----------------------------

# name, cin, cout, (conv1: stride, pad, dil), (conv2: pad, dil), downsample-stride (or None)
# Dilation/stride values reproduce ResNetEightLayers with _nostride_dilate(dilate_scale=8).
BLOCK_CFG = [
    ("layer11", 64,  64,  (1, 1, 1), (1, 1), None),
    ("layer12", 64,  64,  (1, 1, 1), (1, 1), None),
    ("layer21", 64,  128, (2, 1, 1), (1, 1), 2),
    ("layer22", 128, 128, (1, 1, 1), (1, 1), None),
    ("layer31", 128, 256, (1, 1, 1), (2, 2), 1),
    ("layer32", 256, 256, (1, 2, 2), (2, 2), None),
    ("layer41", 256, 512, (1, 2, 2), (4, 4), 1),
    ("layer42", 512, 512, (1, 4, 4), (4, 4), None),
]


def _conv_init(key, cout, cin, kh, kw):
    fan_out = cout * kh * kw
    std = (2.0 / fan_out) ** 0.5  # kaiming normal, fan_out, relu
    return jax.random.normal(key, (cout, cin, kh, kw), jnp.float32) * std


def _bn_init(c):
    return dict(gamma=jnp.ones((c,), jnp.float32), beta=jnp.zeros((c,), jnp.float32),
                mean=jnp.zeros((c,), jnp.float32), var=jnp.ones((c,), jnp.float32))


def init_params(key):
    keys = jax.random.split(key, 1 + 3 * len(BLOCK_CFG))
    params = {"conv1": _conv_init(keys[0], 64, 3, 7, 7), "bn1": _bn_init(64)}
    ki = 1
    for name, cin, cout, _c1, _c2, ds in BLOCK_CFG:
        blk = {
            "conv1": _conv_init(keys[ki], cout, cin, 3, 3), "bn1": _bn_init(cout),
            "conv2": _conv_init(keys[ki + 1], cout, cout, 3, 3), "bn2": _bn_init(cout),
        }
        if ds is not None:
            blk["ds_conv"] = _conv_init(keys[ki + 2], cout, cin, 1, 1)
            blk["ds_bn"] = _bn_init(cout)
        params[name] = blk
        ki += 3
    return params


def _fuse_conv_bn(w, bn, *, fold_norm=False):
    """Fold eval-mode BN scale into the conv weight ([K_pad, Cout] bf16, K padded to 128)
    and return the remaining per-channel f32 shift.  For the stem, also fold the
    (x-0.45)/0.255 input normalization (im2col must then pad the RAW input with 0.45)."""
    Cout, Cin, KH, KW = w.shape
    inv_std = 1.0 / jnp.sqrt(bn["var"] + BN_EPS)
    scale = bn["gamma"] * inv_std                     # [Cout]
    shift = bn["beta"] - bn["mean"] * scale           # [Cout]
    w2 = jnp.transpose(w, (2, 3, 1, 0)).reshape(KH * KW * Cin, Cout)  # (kh,kw,cin) x cout
    if fold_norm:
        shift = shift - scale * (NORM_MEAN / NORM_STD) * jnp.sum(w2, axis=0)
        w2 = w2 / NORM_STD
    w2 = w2 * scale[None, :]
    k_pad = _round_up(w2.shape[0], 128)
    if k_pad != w2.shape[0]:
        w2 = jnp.pad(w2, ((0, k_pad - w2.shape[0]), (0, 0)))
    return {"w": w2.astype(jnp.bfloat16),
            "shift": shift.reshape(1, Cout).astype(jnp.float32)}


def prepare_params(params):
    """One-time weight prep (transpose/fold/pad/cast) kept out of the hot forward."""
    fused = {"conv1": _fuse_conv_bn(params["conv1"], params["bn1"], fold_norm=True)}
    for name, _cin, _cout, _c1, _c2, ds in BLOCK_CFG:
        blk = params[name]
        fb = {"conv1": _fuse_conv_bn(blk["conv1"], blk["bn1"]),
              "conv2": _fuse_conv_bn(blk["conv2"], blk["bn2"])}
        if ds is not None:
            fb["ds"] = _fuse_conv_bn(blk["ds_conv"], blk["ds_bn"])
        fused[name] = fb
    return fused


def basic_block(x, fp, cfg):
    _name, _cin, _cout, (s1, p1, d1), (p2, d2), ds = cfg
    out = conv_bn(x, fp["conv1"], 3, 3, stride=s1, padding=p1, dilation=d1, relu=True)
    if ds is not None:
        identity = conv_bn(x, fp["ds"], 1, 1, stride=ds, padding=0, dilation=1, relu=False)
    else:
        identity = x
    # relu(bn2(conv2(out)) + identity) fused into one Pallas call.
    out = conv_bn(out, fp["conv2"], 3, 3, stride=1, padding=p2, dilation=d2,
                  relu=True, residual=identity)
    return out


def resnet_encoder_mtan_forward(fused_params, input_image):
    """input_image: NCHW float32, 3 input channels. Returns (o1..o9) in NCHW.
    Input normalization (x-0.45)/0.255 is folded into the stem conv weights; the stem's
    zero-padding of the normalized input is preserved by padding the raw input with 0.45."""
    x = jnp.transpose(input_image, (0, 2, 3, 1))     # NCHW -> NHWC
    o1 = conv_bn(x, fused_params["conv1"], 7, 7,
                 stride=2, padding=3, dilation=1, relu=True, pad_value=NORM_MEAN)
    feats = [o1]
    h = maxpool_3x3_s2_p1(o1)
    for cfg in BLOCK_CFG:
        h = basic_block(h, fused_params[cfg[0]], cfg)
        feats.append(h)
    return tuple(jnp.transpose(f, (0, 3, 1, 2)) for f in feats)   # back to NCHW


# ----------------------------- main -----------------------------

if __name__ == "__main__":
    key = jax.random.PRNGKey(0)
    pkey, xkey = jax.random.split(key)
    params = init_params(pkey)
    fused = prepare_params(params)
    x = jax.random.uniform(xkey, (2, 3, 32, 32), jnp.float32)

    fwd = jax.jit(resnet_encoder_mtan_forward)
    outs = fwd(fused, x)
    outs = jax.block_until_ready(outs)

    expected = [(2, 64, 16, 16), (2, 64, 8, 8), (2, 64, 8, 8),
                (2, 128, 4, 4), (2, 128, 4, 4),
                (2, 256, 4, 4), (2, 256, 4, 4),
                (2, 512, 4, 4), (2, 512, 4, 4)]
    got = [tuple(int(d) for d in o.shape) for o in outs]
    assert got == expected, f"shape mismatch: {got} vs {expected}"
    assert all(o.dtype == jnp.float32 for o in outs)
    assert all(bool(jnp.isfinite(o).all()) for o in outs)
    print("KERNEL_OK")
</pallas_src>

<mosaic_0001>
module attributes {stable_mosaic.version = 11 : i64} {
  func.func @kernel(%arg0: i32, %arg1: i32, %arg2: memref<256x256xbf16, #tpu.memory_space<vmem>>, %arg3: memref<256x64xbf16, #tpu.memory_space<vmem>>, %arg4: memref<1x64xf32, #tpu.memory_space<vmem>>, %arg5: memref<256x64xf32, #tpu.memory_space<vmem>>, %arg6: memref<256x64xf32, #tpu.memory_space<vmem>>) attributes {dimension_semantics = [#tpu.dimension_semantics<parallel>, #tpu.dimension_semantics<arbitrary>], iteration_bounds = array<i64: 2, 1>, scalar_prefetch = 0 : i64, scratch_operands = 1 : i64, tpu.core_type = #tpu.core_type<tc>, window_params = [{transform_indices = @transform_0, window_bounds = array<i64: 256, 256>}, {transform_indices = @transform_1, window_bounds = array<i64: 256, 64>}, {pipeline_mode = #tpu.pipeline_mode<synchronous>, transform_indices = @transform_2, window_bounds = array<i64: 1, 64>}, {transform_indices = @transform_3, window_bounds = array<i64: 256, 64>}]} {
    %c0_i32 = arith.constant 0 : i32
    %0 = arith.cmpi eq, %arg1, %c0_i32 : i32
    %1 = arith.extui %0 : i1 to i32
    %c0_i32_0 = arith.constant 0 : i32
    %2 = arith.cmpi ne, %1, %c0_i32_0 : i32
    scf.if %2 {
      %cst_10 = arith.constant 0.000000e+00 : f32
      %12 = vector.broadcast %cst_10 : f32 to vector<256x64xf32>
      %c0_11 = arith.constant 0 : index
      %c0_12 = arith.constant 0 : index
      %13 = vector.load %arg6[%c0_11, %c0_12] : memref<256x64xf32, #tpu.memory_space<vmem>>, vector<256x64xf32>
      tpu.vector_store %arg6[%c0_11, %c0_12], %12 {strides = array<i32>} : memref<256x64xf32, #tpu.memory_space<vmem>>, vector<256x64xf32>,
    } else {
    }
    %c0 = arith.constant 0 : index
    %c0_1 = arith.constant 0 : index
    %3 = vector.load %arg6[%c0, %c0_1] : memref<256x64xf32, #tpu.memory_space<vmem>>, vector<256x64xf32>
    %c0_2 = arith.constant 0 : index
    %c0_3 = arith.constant 0 : index
    %4 = vector.load %arg2[%c0_2, %c0_3] : memref<256x256xbf16, #tpu.memory_space<vmem>>, vector<256x256xbf16>
    %c0_4 = arith.constant 0 : index
    %c0_5 = arith.constant 0 : index
    %5 = vector.load %arg3[%c0_4, %c0_5] : memref<256x64xbf16, #tpu.memory_space<vmem>>, vector<256x64xbf16>
    %cst = arith.constant dense<0.000000e+00> : vector<256x64xf32>
    %6 = tpu.matmul %4, %5, %cst {dimension_numbers = #tpu.dot_dimension_numbers<[1], [0], [0], [1], [0, 0, 1, 1], [], []>} : vector<256x256xbf16>, vector<256x64xbf16>, vector<256x64xf32> -> vector<256x64xf32>
    %7 = arith.addf %3, %6 : vector<256x64xf32>
    %c0_6 = arith.constant 0 : index
    %c0_7 = arith.constant 0 : index
    %8 = vector.load %arg6[%c0_6, %c0_7] : memref<256x64xf32, #tpu.memory_space<vmem>>, vector<256x64xf32>
    tpu.vector_store %arg6[%c0_6, %c0_7], %7 {strides = array<i32>} : memref<256x64xf32, #tpu.memory_space<vmem>>, vector<256x64xf32>,
    %c0_i32_8 = arith.constant 0 : i32
    %9 = arith.cmpi eq, %arg1, %c0_i32_8 : i32
    %10 = arith.extui %9 : i1 to i32
    %c0_i32_9 = arith.constant 0 : i32
    %11 = arith.cmpi ne, %10, %c0_i32_9 : i32
    scf.if %11 {
      %c0_10 = arith.constant 0 : index
      %c0_11 = arith.constant 0 : index
      %12 = vector.load %arg6[%c0_10, %c0_11] : memref<256x64xf32, #tpu.memory_space<vmem>>, vector<256x64xf32>
      %c0_12 = arith.constant 0 : index
      %c0_13 = arith.constant 0 : index
      %13 = vector.load %arg4[%c0_12, %c0_13] : memref<1x64xf32, #tpu.memory_space<vmem>>, vector<1x64xf32>
      %14 = vector.broadcast %13 : vector<1x64xf32> to vector<256x64xf32>
      %15 = arith.addf %12, %14 : vector<256x64xf32>
      %cst_14 = arith.constant 0.000000e+00 : f32
      %16 = vector.broadcast %cst_14 : f32 to vector<256x64xf32>
      %17 = arith.maximumf %15, %16 : vector<256x64xf32>
      %c0_15 = arith.constant 0 : index
      %c0_16 = arith.constant 0 : index
      %18 = vector.load %arg5[%c0_15, %c0_16] : memref<256x64xf32, #tpu.memory_space<vmem>>, vector<256x64xf32>
      tpu.vector_store %arg5[%c0_15, %c0_16], %17 {strides = array<i32>} : memref<256x64xf32, #tpu.memory_space<vmem>>, vector<256x64xf32>,
    } else {
    }
    return
  }
  func.func @transform_0(%arg0: i32, %arg1: i32) -> (i32, i32) {
    %c0_i32 = arith.constant 0 : i32
    return %arg0, %arg1 : i32, i32
  }
  func.func @transform_1(%arg0: i32, %arg1: i32) -> (i32, i32) {
    %c0_i32 = arith.constant 0 : i32
    %c0_i32_0 = arith.constant 0 : i32
    return %arg1, %c0_i32 : i32, i32
  }
  func.func @transform_2(%arg0: i32, %arg1: i32) -> (i32, i32) {
    %c0_i32 = arith.constant 0 : i32
    %c0_i32_0 = arith.constant 0 : i32
    %c0_i32_1 = arith.constant 0 : i32
    return %c0_i32, %c0_i32_0 : i32, i32
  }
  func.func @transform_3(%arg0: i32, %arg1: i32) -> (i32, i32) {
    %c0_i32 = arith.constant 0 : i32
    %c0_i32_0 = arith.constant 0 : i32
    return %arg0, %c0_i32 : i32, i32
  }
}

module attributes {stable_mosaic.version = 11 : i64} {
  func.func @kernel(%arg0: i32, %arg1: i32, %arg2: memref<128x128xbf16, #tpu.memory_space<vmem>>, %arg3: memref<128x64xbf16, #tpu.memory_space<vmem>>, %arg4: memref<1x64xf32, #tpu.memory_space<vmem>>, %arg5: memref<128x64xf32, #tpu.memory_space<vmem>>, %arg6: memref<128x64xf32, #tpu.memory_space<vmem>>) attributes {dimension_semantics = [#tpu.dimension_semantics<parallel>, #tpu.dimension_semantics<arbitrary>], iteration_bounds = array<i64: 1, 5>, scalar_prefetch = 0 : i64, scratch_operands = 1 : i64, tpu.core_type = #tpu.core_type<tc>, window_params = [{transform_indices = @transform_0, window_bounds = array<i64: 128, 128>}, {transform_indices = @transform_1, window_bounds = array<i64: 128, 64>}, {pipeline_mode = #tpu.pipeline_mode<synchronous>, transform_indices = @transform_2, window_bounds = array<i64: 1, 64>}, {transform_indices = @transform_3, window_bounds = array<i64: 128, 64>}]} {
    %c0_i32 = arith.constant 0 : i32
    %0 = arith.cmpi eq, %arg1, %c0_i32 : i32
    %1 = arith.extui %0 : i1 to i32
    %c0_i32_0 = arith.constant 0 : i32
    %2 = arith.cmpi ne, %1, %c0_i32_0 : i32
    scf.if %2 {
      %cst_9 = arith.constant 0.000000e+00 : f32
      %12 = vector.broadcast %cst_9 : f32 to vector<128x64xf32>
      %c0_10 = arith.constant 0 : index
      %c0_11 = arith.constant 0 : index
      %13 = vector.load %arg6[%c0_10, %c0_11] : memref<128x64xf32, #tpu.memory_space<vmem>>, vector<128x64xf32>
      tpu.vector_store %arg6[%c0_10, %c0_11], %12 {strides = array<i32>} : memref<128x64xf32, #tpu.memory_space<vmem>>, vector<128x64xf32>,
    } else {
    }
    %c0 = arith.constant 0 : index
    %c0_1 = arith.constant 0 : index
    %3 = vector.load %arg6[%c0, %c0_1] : memref<128x64xf32, #tpu.memory_space<vmem>>, vector<128x64xf32>
    %c0_2 = arith.constant 0 : index
    %c0_3 = arith.constant 0 : index
    %4 = vector.load %arg2[%c0_2, %c0_3] : memref<128x128xbf16, #tpu.memory_space<vmem>>, vector<128x128xbf16>
    %c0_4 = arith.constant 0 : index
    %c0_5 = arith.constant 0 : index
    %5 = vector.load %arg3[%c0_4, %c0_5] : memref<128x64xbf16, #tpu.memory_space<vmem>>, vector<128x64xbf16>
    %cst = arith.constant dense<0.000000e+00> : vector<128x64xf32>
    %6 = tpu.matmul %4, %5, %cst {dimension_numbers = #tpu.dot_dimension_numbers<[1], [0], [0], [1], [0, 0, 1, 1], [], []>} : vector<128x128xbf16>, vector<128x64xbf16>, vector<128x64xf32> -> vector<128x64xf32>
    %7 = arith.addf %3, %6 : vector<128x64xf32>
    %c0_6 = arith.constant 0 : index
    %c0_7 = arith.constant 0 : index
    %8 = vector.load %arg6[%c0_6, %c0_7] : memref<128x64xf32, #tpu.memory_space<vmem>>, vector<128x64xf32>
    tpu.vector_store %arg6[%c0_6, %c0_7], %7 {strides = array<i32>} : memref<128x64xf32, #tpu.memory_space<vmem>>, vector<128x64xf32>,
    %c4_i32 = arith.constant 4 : i32
    %9 = arith.cmpi eq, %arg1, %c4_i32 : i32
    %10 = arith.extui %9 : i1 to i32
    %c0_i32_8 = arith.constant 0 : i32
    %11 = arith.cmpi ne, %10, %c0_i32_8 : i32
    scf.if %11 {
      %c0_9 = arith.constant 0 : index
      %c0_10 = arith.constant 0 : index
      %12 = vector.load %arg6[%c0_9, %c0_10] : memref<128x64xf32, #tpu.memory_space<vmem>>, vector<128x64xf32>
      %c0_11 = arith.constant 0 : index
      %c0_12 = arith.constant 0 : index
      %13 = vector.load %arg4[%c0_11, %c0_12] : memref<1x64xf32, #tpu.memory_space<vmem>>, vector<1x64xf32>
      %14 = vector.broadcast %13 : vector<1x64xf32> to vector<128x64xf32>
      %15 = arith.addf %12, %14 : vector<128x64xf32>
      %cst_13 = arith.constant 0.000000e+00 : f32
      %16 = vector.broadcast %cst_13 : f32 to vector<128x64xf32>
      %17 = arith.maximumf %15, %16 : vector<128x64xf32>
      %c0_14 = arith.constant 0 : index
      %c0_15 = arith.constant 0 : index
      %18 = vector.load %arg5[%c0_14, %c0_15] : memref<128x64xf32, #tpu.memory_space<vmem>>, vector<128x64xf32>
      tpu.vector_store %arg5[%c0_14, %c0_15], %17 {strides = array<i32>} : memref<128x64xf32, #tpu.memory_space<vmem>>, vector<128x64xf32>,
    } else {
    }
    return
  }
  func.func @transform_0(%arg0: i32, %arg1: i32) -> (i32, i32) {
    %c0_i32 = arith.constant 0 : i32
    return %arg0, %arg1 : i32, i32
  }
  func.func @transform_1(%arg0: i32, %arg1: i32) -> (i32, i32) {
    %c0_i32 = arith.constant 0 : i32
    %c0_i32_0 = arith.constant 0 : i32
    return %arg1, %c0_i32 : i32, i32
  }
  func.func @transform_2(%arg0: i32, %arg1: i32) -> (i32, i32) {
    %c0_i32 = arith.constant 0 : i32
    %c0_i32_0 = arith.constant 0 : i32
    %c0_i32_1 = arith.constant 0 : i32
    return %c0_i32, %c0_i32_0 : i32, i32
  }
  func.func @transform_3(%arg0: i32, %arg1: i32) -> (i32, i32) {
    %c0_i32 = arith.constant 0 : i32
    %c0_i32_0 = arith.constant 0 : i32
    return %arg0, %c0_i32 : i32, i32
  }
}

module attributes {stable_mosaic.version = 11 : i64} {
  func.func @kernel(%arg0: i32, %arg1: i32, %arg2: memref<128x128xbf16, #tpu.memory_space<vmem>>, %arg3: memref<128x64xbf16, #tpu.memory_space<vmem>>, %arg4: memref<1x64xf32, #tpu.memory_space<vmem>>, %arg5: memref<128x64xf32, #tpu.memory_space<vmem>>, %arg6: memref<128x64xf32, #tpu.memory_space<vmem>>, %arg7: memref<128x64xf32, #tpu.memory_space<vmem>>) attributes {dimension_semantics = [#tpu.dimension_semantics<parallel>, #tpu.dimension_semantics<arbitrary>], iteration_bounds = array<i64: 1, 5>, scalar_prefetch = 0 : i64, scratch_operands = 1 : i64, tpu.core_type = #tpu.core_type<tc>, window_params = [{transform_indices = @transform_0, window_bounds = array<i64: 128, 128>}, {transform_indices = @transform_1, window_bounds = array<i64: 128, 64>}, {pipeline_mode = #tpu.pipeline_mode<synchronous>, transform_indices = @transform_2, window_bounds = array<i64: 1, 64>}, {transform_indices = @transform_3, window_bounds = array<i64: 128, 64>}, {transform_indices = @transform_4, window_bounds = array<i64: 128, 64>}]} {
    %c0_i32 = arith.constant 0 : i32
    %0 = arith.cmpi eq, %arg1, %c0_i32 : i32
    %1 = arith.extui %0 : i1 to i32
    %c0_i32_0 = arith.constant 0 : i32
    %2 = arith.cmpi ne, %1, %c0_i32_0 : i32
    scf.if %2 {
      %cst_9 = arith.constant 0.000000e+00 : f32
      %12 = vector.broadcast %cst_9 : f32 to vector<128x64xf32>
      %c0_10 = arith.constant 0 : index
      %c0_11 = arith.constant 0 : index
      %13 = vector.load %arg7[%c0_10, %c0_11] : memref<128x64xf32, #tpu.memory_space<vmem>>, vector<128x64xf32>
      tpu.vector_store %arg7[%c0_10, %c0_11], %12 {strides = array<i32>} : memref<128x64xf32, #tpu.memory_space<vmem>>, vector<128x64xf32>,
    } else {
    }
    %c0 = arith.constant 0 : index
    %c0_1 = arith.constant 0 : index
    %3 = vector.load %arg7[%c0, %c0_1] : memref<128x64xf32, #tpu.memory_space<vmem>>, vector<128x64xf32>
    %c0_2 = arith.constant 0 : index
    %c0_3 = arith.constant 0 : index
    %4 = vector.load %arg2[%c0_2, %c0_3] : memref<128x128xbf16, #tpu.memory_space<vmem>>, vector<128x128xbf16>
    %c0_4 = arith.constant 0 : index
    %c0_5 = arith.constant 0 : index
    %5 = vector.load %arg3[%c0_4, %c0_5] : memref<128x64xbf16, #tpu.memory_space<vmem>>, vector<128x64xbf16>
    %cst = arith.constant dense<0.000000e+00> : vector<128x64xf32>
    %6 = tpu.matmul %4, %5, %cst {dimension_numbers = #tpu.dot_dimension_numbers<[1], [0], [0], [1], [0, 0, 1, 1], [], []>} : vector<128x128xbf16>, vector<128x64xbf16>, vector<128x64xf32> -> vector<128x64xf32>
    %7 = arith.addf %3, %6 : vector<128x64xf32>
    %c0_6 = arith.constant 0 : index
    %c0_7 = arith.constant 0 : index
    %8 = vector.load %arg7[%c0_6, %c0_7] : memref<128x64xf32, #tpu.memory_space<vmem>>, vector<128x64xf32>
    tpu.vector_store %arg7[%c0_6, %c0_7], %7 {strides = array<i32>} : memref<128x64xf32, #tpu.memory_space<vmem>>, vector<128x64xf32>,
    %c4_i32 = arith.constant 4 : i32
    %9 = arith.cmpi eq, %arg1, %c4_i32 : i32
    %10 = arith.extui %9 : i1 to i32
    %c0_i32_8 = arith.constant 0 : i32
    %11 = arith.cmpi ne, %10, %c0_i32_8 : i32
    scf.if %11 {
      %c0_9 = arith.constant 0 : index
      %c0_10 = arith.constant 0 : index
      %12 = vector.load %arg7[%c0_9, %c0_10] : memref<128x64xf32, #tpu.memory_space<vmem>>, vector<128x64xf32>
      %c0_11 = arith.constant 0 : index
      %c0_12 = arith.constant 0 : index
      %13 = vector.load %arg4[%c0_11, %c0_12] : memref<1x64xf32, #tpu.memory_space<vmem>>, vector<1x64xf32>
      %14 = vector.broadcast %13 : vector<1x64xf32> to vector<128x64xf32>
      %15 = arith.addf %12, %14 : vector<128x64xf32>
      %c0_13 = arith.constant 0 : index
      %c0_14 = arith.constant 0 : index
      %16 = vector.load %arg5[%c0_13, %c0_14] : memref<128x64xf32, #tpu.memory_space<vmem>>, vector<128x64xf32>
      %17 = arith.addf %15, %16 : vector<128x64xf32>
      %cst_15 = arith.constant 0.000000e+00 : f32
      %18 = vector.broadcast %cst_15 : f32 to vector<128x64xf32>
      %19 = arith.maximumf %17, %18 : vector<128x64xf32>
      %c0_16 = arith.constant 0 : index
      %c0_17 = arith.constant 0 : index
      %20 = vector.load %arg6[%c0_16, %c0_17] : memref<128x64xf32, #tpu.memory_space<vmem>>, vector<128x64xf32>
      tpu.vector_store %arg6[%c0_16, %c0_17], %19 {strides = array<i32>} : memref<128x64xf32, #tpu.memory_space<vmem>>, vector<128x64xf32>,
    } else {
    }
    return
  }
  func.func @transform_0(%arg0: i32, %arg1: i32) -> (i32, i32) {
    %c0_i32 = arith.constant 0 : i32
    return %arg0, %arg1 : i32, i32
  }
  func.func @transform_1(%arg0: i32, %arg1: i32) -> (i32, i32) {
    %c0_i32 = arith.constant 0 : i32
    %c0_i32_0 = arith.constant 0 : i32
    return %arg1, %c0_i32 : i32, i32
  }
  func.func @transform_2(%arg0: i32, %arg1: i32) -> (i32, i32) {
    %c0_i32 = arith.constant 0 : i32
    %c0_i32_0 = arith.constant 0 : i32
    %c0_i32_1 = arith.constant 0 : i32
    return %c0_i32, %c0_i32_0 : i32, i32
  }
  func.func @transform_3(%arg0: i32, %arg1: i32) -> (i32, i32) {
    %c0_i32 = arith.constant 0 : i32
    %c0_i32_0 = arith.constant 0 : i32
    return %arg0, %c0_i32 : i32, i32
  }
  func.func @transform_4(%arg0: i32, %arg1: i32) -> (i32, i32) {
    %c0_i32 = arith.constant 0 : i32
    %c0_i32_0 = arith.constant 0 : i32
    return %arg0, %c0_i32 : i32, i32
  }
}

module attributes {stable_mosaic.version = 11 : i64} {
  func.func @kernel(%arg0: i32, %arg1: i32, %arg2: memref<32x128xbf16, #tpu.memory_space<vmem>>, %arg3: memref<128x128xbf16, #tpu.memory_space<vmem>>, %arg4: memref<1x128xf32, #tpu.memory_space<vmem>>, %arg5: memref<32x128xf32, #tpu.memory_space<vmem>>, %arg6: memref<32x128xf32, #tpu.memory_space<vmem>>) attributes {dimension_semantics = [#tpu.dimension_semantics<parallel>, #tpu.dimension_semantics<arbitrary>], iteration_bounds = array<i64: 1, 5>, scalar_prefetch = 0 : i64, scratch_operands = 1 : i64, tpu.core_type = #tpu.core_type<tc>, window_params = [{transform_indices = @transform_0, window_bounds = array<i64: 32, 128>}, {transform_indices = @transform_1, window_bounds = array<i64: 128, 128>}, {pipeline_mode = #tpu.pipeline_mode<synchronous>, transform_indices = @transform_2, window_bounds = array<i64: 1, 128>}, {transform_indices = @transform_3, window_bounds = array<i64: 32, 128>}]} {
    %c0_i32 = arith.constant 0 : i32
    %0 = arith.cmpi eq, %arg1, %c0_i32 : i32
    %1 = arith.extui %0 : i1 to i32
    %c0_i32_0 = arith.constant 0 : i32
    %2 = arith.cmpi ne, %1, %c0_i32_0 : i32
    scf.if %2 {
      %cst_9 = arith.constant 0.000000e+00 : f32
      %12 = vector.broadcast %cst_9 : f32 to vector<32x128xf32>
      %c0_10 = arith.constant 0 : index
      %c0_11 = arith.constant 0 : index
      %13 = vector.load %arg6[%c0_10, %c0_11] : memref<32x128xf32, #tpu.memory_space<vmem>>, vector<32x128xf32>
      tpu.vector_store %arg6[%c0_10, %c0_11], %12 {strides = array<i32>} : memref<32x128xf32, #tpu.memory_space<vmem>>, vector<32x128xf32>,
    } else {
    }
    %c0 = arith.constant 0 : index
    %c0_1 = arith.constant 0 : index
    %3 = vector.load %arg6[%c0, %c0_1] : memref<32x128xf32, #tpu.memory_space<vmem>>, vector<32x128xf32>
    %c0_2 = arith.constant 0 : index
    %c0_3 = arith.constant 0 : index
    %4 = vector.load %arg2[%c0_2, %c0_3] : memref<32x128xbf16, #tpu.memory_space<vmem>>, vector<32x128xbf16>
    %c0_4 = arith.constant 0 : index
    %c0_5 = arith.constant 0 : index
    %5 = vector.load %arg3[%c0_4, %c0_5] : memref<128x128xbf16, #tpu.memory_space<vmem>>, vector<128x128xbf16>
    %cst = arith.constant dense<0.000000e+00> : vector<32x128xf32>
    %6 = tpu.matmul %4, %5, %cst {dimension_numbers = #tpu.dot_dimension_numbers<[1], [0], [0], [1], [0, 0, 1, 1], [], []>} : vector<32x128xbf16>, vector<128x128xbf16>, vector<32x128xf32> -> vector<32x128xf32>
    %7 = arith.addf %3, %6 : vector<32x128xf32>
    %c0_6 = arith.constant 0 : index
    %c0_7 = arith.constant 0 : index
    %8 = vector.load %arg6[%c0_6, %c0_7] : memref<32x128xf32, #tpu.memory_space<vmem>>, vector<32x128xf32>
    tpu.vector_store %arg6[%c0_6, %c0_7], %7 {strides = array<i32>} : memref<32x128xf32, #tpu.memory_space<vmem>>, vector<32x128xf32>,
    %c4_i32 = arith.constant 4 : i32
    %9 = arith.cmpi eq, %arg1, %c4_i32 : i32
    %10 = arith.extui %9 : i1 to i32
    %c0_i32_8 = arith.constant 0 : i32
    %11 = arith.cmpi ne, %10, %c0_i32_8 : i32
    scf.if %11 {
      %c0_9 = arith.constant 0 : index
      %c0_10 = arith.constant 0 : index
      %12 = vector.load %arg6[%c0_9, %c0_10] : memref<32x128xf32, #tpu.memory_space<vmem>>, vector<32x128xf32>
      %c0_11 = arith.constant 0 : index
      %c0_12 = arith.constant 0 : index
      %13 = vector.load %arg4[%c0_11, %c0_12] : memref<1x128xf32, #tpu.memory_space<vmem>>, vector<1x128xf32>
      %14 = vector.broadcast %13 : vector<1x128xf32> to vector<32x128xf32>
      %15 = arith.addf %12, %14 : vector<32x128xf32>
      %cst_13 = arith.constant 0.000000e+00 : f32
      %16 = vector.broadcast %cst_13 : f32 to vector<32x128xf32>
      %17 = arith.maximumf %15, %16 : vector<32x128xf32>
      %c0_14 = arith.constant 0 : index
      %c0_15 = arith.constant 0 : index
      %18 = vector.load %arg5[%c0_14, %c0_15] : memref<32x128xf32, #tpu.memory_space<vmem>>, vector<32x128xf32>
      tpu.vector_store %arg5[%c0_14, %c0_15], %17 {strides = array<i32>} : memref<32x128xf32, #tpu.memory_space<vmem>>, vector<32x128xf32>,
    } else {
    }
    return
  }
  func.func @transform_0(%arg0: i32, %arg1: i32) -> (i32, i32) {
    %c0_i32 = arith.constant 0 : i32
    return %arg0, %arg1 : i32, i32
  }
  func.func @transform_1(%arg0: i32, %arg1: i32) -> (i32, i32) {
    %c0_i32 = arith.constant 0 : i32
    %c0_i32_0 = arith.constant 0 : i32
    return %arg1, %c0_i32 : i32, i32
  }
  func.func @transform_2(%arg0: i32, %arg1: i32) -> (i32, i32) {
    %c0_i32 = arith.constant 0 : i32
    %c0_i32_0 = arith.constant 0 : i32
    %c0_i32_1 = arith.constant 0 : i32
    return %c0_i32, %c0_i32_0 : i32, i32
  }
  func.func @transform_3(%arg0: i32, %arg1: i32) -> (i32, i32) {
    %c0_i32 = arith.constant 0 : i32
    %c0_i32_0 = arith.constant 0 : i32
    return %arg0, %c0_i32 : i32, i32
  }
}

module attributes {stable_mosaic.version = 11 : i64} {
  func.func @kernel(%arg0: i32, %arg1: i32, %arg2: memref<32x128xbf16, #tpu.memory_space<vmem>>, %arg3: memref<128x128xbf16, #tpu.memory_space<vmem>>, %arg4: memref<1x128xf32, #tpu.memory_space<vmem>>, %arg5: memref<32x128xf32, #tpu.memory_space<vmem>>, %arg6: memref<32x128xf32, #tpu.memory_space<vmem>>) attributes {dimension_semantics = [#tpu.dimension_semantics<parallel>, #tpu.dimension_semantics<arbitrary>], iteration_bounds = array<i64: 1, 9>, scalar_prefetch = 0 : i64, scratch_operands = 1 : i64, tpu.core_type = #tpu.core_type<tc>, window_params = [{transform_indices = @transform_0, window_bounds = array<i64: 32, 128>}, {transform_indices = @transform_1, window_bounds = array<i64: 128, 128>}, {pipeline_mode = #tpu.pipeline_mode<synchronous>, transform_indices = @transform_2, window_bounds = array<i64: 1, 128>}, {transform_indices = @transform_3, window_bounds = array<i64: 32, 128>}]} {
    %c0_i32 = arith.constant 0 : i32
    %0 = arith.cmpi eq, %arg1, %c0_i32 : i32
    %1 = arith.extui %0 : i1 to i32
    %c0_i32_0 = arith.constant 0 : i32
    %2 = arith.cmpi ne, %1, %c0_i32_0 : i32
    scf.if %2 {
      %cst_9 = arith.constant 0.000000e+00 : f32
      %12 = vector.broadcast %cst_9 : f32 to vector<32x128xf32>
      %c0_10 = arith.constant 0 : index
      %c0_11 = arith.constant 0 : index
      %13 = vector.load %arg6[%c0_10, %c0_11] : memref<32x128xf32, #tpu.memory_space<vmem>>, vector<32x128xf32>
      tpu.vector_store %arg6[%c0_10, %c0_11], %12 {strides = array<i32>} : memref<32x128xf32, #tpu.memory_space<vmem>>, vector<32x128xf32>,
    } else {
    }
    %c0 = arith.constant 0 : index
    %c0_1 = arith.constant 0 : index
    %3 = vector.load %arg6[%c0, %c0_1] : memref<32x128xf32, #tpu.memory_space<vmem>>, vector<32x128xf32>
    %c0_2 = arith.constant 0 : index
    %c0_3 = arith.constant 0 : index
    %4 = vector.load %arg2[%c0_2, %c0_3] : memref<32x128xbf16, #tpu.memory_space<vmem>>, vector<32x128xbf16>
    %c0_4 = arith.constant 0 : index
    %c0_5 = arith.constant 0 : index
    %5 = vector.load %arg3[%c0_4, %c0_5] : memref<128x128xbf16, #tpu.memory_space<vmem>>, vector<128x128xbf16>
    %cst = arith.constant dense<0.000000e+00> : vector<32x128xf32>
    %6 = tpu.matmul %4, %5, %cst {dimension_numbers = #tpu.dot_dimension_numbers<[1], [0], [0], [1], [0, 0, 1, 1], [], []>} : vector<32x128xbf16>, vector<128x128xbf16>, vector<32x128xf32> -> vector<32x128xf32>
    %7 = arith.addf %3, %6 : vector<32x128xf32>
    %c0_6 = arith.constant 0 : index
    %c0_7 = arith.constant 0 : index
    %8 = vector.load %arg6[%c0_6, %c0_7] : memref<32x128xf32, #tpu.memory_space<vmem>>, vector<32x128xf32>
    tpu.vector_store %arg6[%c0_6, %c0_7], %7 {strides = array<i32>} : memref<32x128xf32, #tpu.memory_space<vmem>>, vector<32x128xf32>,
    %c8_i32 = arith.constant 8 : i32
    %9 = arith.cmpi eq, %arg1, %c8_i32 : i32
    %10 = arith.extui %9 : i1 to i32
    %c0_i32_8 = arith.constant 0 : i32
    %11 = arith.cmpi ne, %10, %c0_i32_8 : i32
    scf.if %11 {
      %c0_9 = arith.constant 0 : index
      %c0_10 = arith.constant 0 : index
      %12 = vector.load %arg6[%c0_9, %c0_10] : memref<32x128xf32, #tpu.memory_space<vmem>>, vector<32x128xf32>
      %c0_11 = arith.constant 0 : index
      %c0_12 = arith.constant 0 : index
      %13 = vector.load %arg4[%c0_11, %c0_12] : memref<1x128xf32, #tpu.memory_space<vmem>>, vector<1x128xf32>
      %14 = vector.broadcast %13 : vector<1x128xf32> to vector<32x128xf32>
      %15 = arith.addf %12, %14 : vector<32x128xf32>
      %cst_13 = arith.constant 0.000000e+00 : f32
      %16 = vector.broadcast %cst_13 : f32 to vector<32x128xf32>
      %17 = arith.maximumf %15, %16 : vector<32x128xf32>
      %c0_14 = arith.constant 0 : index
      %c0_15 = arith.constant 0 : index
      %18 = vector.load %arg5[%c0_14, %c0_15] : memref<32x128xf32, #tpu.memory_space<vmem>>, vector<32x128xf32>
      tpu.vector_store %arg5[%c0_14, %c0_15], %17 {strides = array<i32>} : memref<32x128xf32, #tpu.memory_space<vmem>>, vector<32x128xf32>,
    } else {
    }
    return
  }
  func.func @transform_0(%arg0: i32, %arg1: i32) -> (i32, i32) {
    %c0_i32 = arith.constant 0 : i32
    return %arg0, %arg1 : i32, i32
  }
  func.func @transform_1(%arg0: i32, %arg1: i32) -> (i32, i32) {
    %c0_i32 = arith.constant 0 : i32
    %c0_i32_0 = arith.constant 0 : i32
    return %arg1, %c0_i32 : i32, i32
  }
  func.func @transform_2(%arg0: i32, %arg1: i32) -> (i32, i32) {
    %c0_i32 = arith.constant 0 : i32
    %c0_i32_0 = arith.constant 0 : i32
    %c0_i32_1 = arith.constant 0 : i32
    return %c0_i32, %c0_i32_0 : i32, i32
  }
  func.func @transform_3(%arg0: i32, %arg1: i32) -> (i32, i32) {
    %c0_i32 = arith.constant 0 : i32
    %c0_i32_0 = arith.constant 0 : i32
    return %arg0, %c0_i32 : i32, i32
  }
}

module attributes {stable_mosaic.version = 11 : i64} {
  func.func @kernel(%arg0: i32, %arg1: i32, %arg2: memref<32x128xbf16, #tpu.memory_space<vmem>>, %arg3: memref<128x128xbf16, #tpu.memory_space<vmem>>, %arg4: memref<1x128xf32, #tpu.memory_space<vmem>>, %arg5: memref<32x128xf32, #tpu.memory_space<vmem>>, %arg6: memref<32x128xf32, #tpu.memory_space<vmem>>, %arg7: memref<32x128xf32, #tpu.memory_space<vmem>>) attributes {dimension_semantics = [#tpu.dimension_semantics<parallel>, #tpu.dimension_semantics<arbitrary>], iteration_bounds = array<i64: 1, 9>, scalar_prefetch = 0 : i64, scratch_operands = 1 : i64, tpu.core_type = #tpu.core_type<tc>, window_params = [{transform_indices = @transform_0, window_bounds = array<i64: 32, 128>}, {transform_indices = @transform_1, window_bounds = array<i64: 128, 128>}, {pipeline_mode = #tpu.pipeline_mode<synchronous>, transform_indices = @transform_2, window_bounds = array<i64: 1, 128>}, {transform_indices = @transform_3, window_bounds = array<i64: 32, 128>}, {transform_indices = @transform_4, window_bounds = array<i64: 32, 128>}]} {
    %c0_i32 = arith.constant 0 : i32
    %0 = arith.cmpi eq, %arg1, %c0_i32 : i32
    %1 = arith.extui %0 : i1 to i32
    %c0_i32_0 = arith.constant 0 : i32
    %2 = arith.cmpi ne, %1, %c0_i32_0 : i32
    scf.if %2 {
      %cst_9 = arith.constant 0.000000e+00 : f32
      %12 = vector.broadcast %cst_9 : f32 to vector<32x128xf32>
      %c0_10 = arith.constant 0 : index
      %c0_11 = arith.constant 0 : index
      %13 = vector.load %arg7[%c0_10, %c0_11] : memref<32x128xf32, #tpu.memory_space<vmem>>, vector<32x128xf32>
      tpu.vector_store %arg7[%c0_10, %c0_11], %12 {strides = array<i32>} : memref<32x128xf32, #tpu.memory_space<vmem>>, vector<32x128xf32>,
    } else {
    }
    %c0 = arith.constant 0 : index
    %c0_1 = arith.constant 0 : index
    %3 = vector.load %arg7[%c0, %c0_1] : memref<32x128xf32, #tpu.memory_space<vmem>>, vector<32x128xf32>
    %c0_2 = arith.constant 0 : index
    %c0_3 = arith.constant 0 : index
    %4 = vector.load %arg2[%c0_2, %c0_3] : memref<32x128xbf16, #tpu.memory_space<vmem>>, vector<32x128xbf16>
    %c0_4 = arith.constant 0 : index
    %c0_5 = arith.constant 0 : index
    %5 = vector.load %arg3[%c0_4, %c0_5] : memref<128x128xbf16, #tpu.memory_space<vmem>>, vector<128x128xbf16>
    %cst = arith.constant dense<0.000000e+00> : vector<32x128xf32>
    %6 = tpu.matmul %4, %5, %cst {dimension_numbers = #tpu.dot_dimension_numbers<[1], [0], [0], [1], [0, 0, 1, 1], [], []>} : vector<32x128xbf16>, vector<128x128xbf16>, vector<32x128xf32> -> vector<32x128xf32>
    %7 = arith.addf %3, %6 : vector<32x128xf32>
    %c0_6 = arith.constant 0 : index
    %c0_7 = arith.constant 0 : index
    %8 = vector.load %arg7[%c0_6, %c0_7] : memref<32x128xf32, #tpu.memory_space<vmem>>, vector<32x128xf32>
    tpu.vector_store %arg7[%c0_6, %c0_7], %7 {strides = array<i32>} : memref<32x128xf32, #tpu.memory_space<vmem>>, vector<32x128xf32>,
    %c8_i32 = arith.constant 8 : i32
    %9 = arith.cmpi eq, %arg1, %c8_i32 : i32
    %10 = arith.extui %9 : i1 to i32
    %c0_i32_8 = arith.constant 0 : i32
    %11 = arith.cmpi ne, %10, %c0_i32_8 : i32
    scf.if %11 {
      %c0_9 = arith.constant 0 : index
      %c0_10 = arith.constant 0 : index
      %12 = vector.load %arg7[%c0_9, %c0_10] : memref<32x128xf32, #tpu.memory_space<vmem>>, vector<32x128xf32>
      %c0_11 = arith.constant 0 : index
      %c0_12 = arith.constant 0 : index
      %13 = vector.load %arg4[%c0_11, %c0_12] : memref<1x128xf32, #tpu.memory_space<vmem>>, vector<1x128xf32>
      %14 = vector.broadcast %13 : vector<1x128xf32> to vector<32x128xf32>
      %15 = arith.addf %12, %14 : vector<32x128xf32>
      %c0_13 = arith.constant 0 : index
      %c0_14 = arith.constant 0 : index
      %16 = vector.load %arg5[%c0_13, %c0_14] : memref<32x128xf32, #tpu.memory_space<vmem>>, vector<32x128xf32>
      %17 = arith.addf %15, %16 : vector<32x128xf32>
      %cst_15 = arith.constant 0.000000e+00 : f32
      %18 = vector.broadcast %cst_15 : f32 to vector<32x128xf32>
      %19 = arith.maximumf %17, %18 : vector<32x128xf32>
      %c0_16 = arith.constant 0 : index
      %c0_17 = arith.constant 0 : index
      %20 = vector.load %arg6[%c0_16, %c0_17] : memref<32x128xf32, #tpu.memory_space<vmem>>, vector<32x128xf32>
      tpu.vector_store %arg6[%c0_16, %c0_17], %19 {strides = array<i32>} : memref<32x128xf32, #tpu.memory_space<vmem>>, vector<32x128xf32>,
    } else {
    }
    return
  }
  func.func @transform_0(%arg0: i32, %arg1: i32) -> (i32, i32) {
    %c0_i32 = arith.constant 0 : i32
    return %arg0, %arg1 : i32, i32
  }
  func.func @transform_1(%arg0: i32, %arg1: i32) -> (i32, i32) {
    %c0_i32 = arith.constant 0 : i32
    %c0_i32_0 = arith.constant 0 : i32
    return %arg1, %c0_i32 : i32, i32
  }
  func.func @transform_2(%arg0: i32, %arg1: i32) -> (i32, i32) {
    %c0_i32 = arith.constant 0 : i32
    %c0_i32_0 = arith.constant 0 : i32
    %c0_i32_1 = arith.constant 0 : i32
    return %c0_i32, %c0_i32_0 : i32, i32
  }
  func.func @transform_3(%arg0: i32, %arg1: i32) -> (i32, i32) {
    %c0_i32 = arith.constant 0 : i32
    %c0_i32_0 = arith.constant 0 : i32
    return %arg0, %c0_i32 : i32, i32
  }
  func.func @transform_4(%arg0: i32, %arg1: i32) -> (i32, i32) {
    %c0_i32 = arith.constant 0 : i32
    %c0_i32_0 = arith.constant 0 : i32
    return %arg0, %c0_i32 : i32, i32
  }
}

module attributes {stable_mosaic.version = 11 : i64} {
  func.func @kernel(%arg0: i32, %arg1: i32, %arg2: memref<32x128xbf16, #tpu.memory_space<vmem>>, %arg3: memref<128x128xbf16, #tpu.memory_space<vmem>>, %arg4: memref<1x128xf32, #tpu.memory_space<vmem>>, %arg5: memref<32x128xf32, #tpu.memory_space<vmem>>, %arg6: memref<32x128xf32, #tpu.memory_space<vmem>>) attributes {dimension_semantics = [#tpu.dimension_semantics<parallel>, #tpu.dimension_semantics<arbitrary>], iteration_bounds = array<i64: 1, 1>, scalar_prefetch = 0 : i64, scratch_operands = 1 : i64, tpu.core_type = #tpu.core_type<tc>, window_params = [{transform_indices = @transform_0, window_bounds = array<i64: 32, 128>}, {transform_indices = @transform_1, window_bounds = array<i64: 128, 128>}, {pipeline_mode = #tpu.pipeline_mode<synchronous>, transform_indices = @transform_2, window_bounds = array<i64: 1, 128>}, {transform_indices = @transform_3, window_bounds = array<i64: 32, 128>}]} {
    %c0_i32 = arith.constant 0 : i32
    %0 = arith.cmpi eq, %arg1, %c0_i32 : i32
    %1 = arith.extui %0 : i1 to i32
    %c0_i32_0 = arith.constant 0 : i32
    %2 = arith.cmpi ne, %1, %c0_i32_0 : i32
    scf.if %2 {
      %cst_10 = arith.constant 0.000000e+00 : f32
      %12 = vector.broadcast %cst_10 : f32 to vector<32x128xf32>
      %c0_11 = arith.constant 0 : index
      %c0_12 = arith.constant 0 : index
      %13 = vector.load %arg6[%c0_11, %c0_12] : memref<32x128xf32, #tpu.memory_space<vmem>>, vector<32x128xf32>
      tpu.vector_store %arg6[%c0_11, %c0_12], %12 {strides = array<i32>} : memref<32x128xf32, #tpu.memory_space<vmem>>, vector<32x128xf32>,
    } else {
    }
    %c0 = arith.constant 0 : index
    %c0_1 = arith.constant 0 : index
    %3 = vector.load %arg6[%c0, %c0_1] : memref<32x128xf32, #tpu.memory_space<vmem>>, vector<32x128xf32>
    %c0_2 = arith.constant 0 : index
    %c0_3 = arith.constant 0 : index
    %4 = vector.load %arg2[%c0_2, %c0_3] : memref<32x128xbf16, #tpu.memory_space<vmem>>, vector<32x128xbf16>
    %c0_4 = arith.constant 0 : index
    %c0_5 = arith.constant 0 : index
    %5 = vector.load %arg3[%c0_4, %c0_5] : memref<128x128xbf16, #tpu.memory_space<vmem>>, vector<128x128xbf16>
    %cst = arith.constant dense<0.000000e+00> : vector<32x128xf32>
    %6 = tpu.matmul %4, %5, %cst {dimension_numbers = #tpu.dot_dimension_numbers<[1], [0], [0], [1], [0, 0, 1, 1], [], []>} : vector<32x128xbf16>, vector<128x128xbf16>, vector<32x128xf32> -> vector<32x128xf32>
    %7 = arith.addf %3, %6 : vector<32x128xf32>
    %c0_6 = arith.constant 0 : index
    %c0_7 = arith.constant 0 : index
    %8 = vector.load %arg6[%c0_6, %c0_7] : memref<32x128xf32, #tpu.memory_space<vmem>>, vector<32x128xf32>
    tpu.vector_store %arg6[%c0_6, %c0_7], %7 {strides = array<i32>} : memref<32x128xf32, #tpu.memory_space<vmem>>, vector<32x128xf32>,
    %c0_i32_8 = arith.constant 0 : i32
    %9 = arith.cmpi eq, %arg1, %c0_i32_8 : i32
    %10 = arith.extui %9 : i1 to i32
    %c0_i32_9 = arith.constant 0 : i32
    %11 = arith.cmpi ne, %10, %c0_i32_9 : i32
    scf.if %11 {
      %c0_10 = arith.constant 0 : index
      %c0_11 = arith.constant 0 : index
      %12 = vector.load %arg6[%c0_10, %c0_11] : memref<32x128xf32, #tpu.memory_space<vmem>>, vector<32x128xf32>
      %c0_12 = arith.constant 0 : index
      %c0_13 = arith.constant 0 : index
      %13 = vector.load %arg4[%c0_12, %c0_13] : memref<1x128xf32, #tpu.memory_space<vmem>>, vector<1x128xf32>
      %14 = vector.broadcast %13 : vector<1x128xf32> to vector<32x128xf32>
      %15 = arith.addf %12, %14 : vector<32x128xf32>
      %c0_14 = arith.constant 0 : index
      %c0_15 = arith.constant 0 : index
      %16 = vector.load %arg5[%c0_14, %c0_15] : memref<32x128xf32, #tpu.memory_space<vmem>>, vector<32x128xf32>
      tpu.vector_store %arg5[%c0_14, %c0_15], %15 {strides = array<i32>} : memref<32x128xf32, #tpu.memory_space<vmem>>, vector<32x128xf32>,
    } else {
    }
    return
  }
  func.func @transform_0(%arg0: i32, %arg1: i32) -> (i32, i32) {
    %c0_i32 = arith.constant 0 : i32
    return %arg0, %arg1 : i32, i32
  }
  func.func @transform_1(%arg0: i32, %arg1: i32) -> (i32, i32) {
    %c0_i32 = arith.constant 0 : i32
    %c0_i32_0 = arith.constant 0 : i32
    return %arg1, %c0_i32 : i32, i32
  }
  func.func @transform_2(%arg0: i32, %arg1: i32) -> (i32, i32) {
    %c0_i32 = arith.constant 0 : i32
    %c0_i32_0 = arith.constant 0 : i32
    %c0_i32_1 = arith.constant 0 : i32
    return %c0_i32, %c0_i32_0 : i32, i32
  }
  func.func @transform_3(%arg0: i32, %arg1: i32) -> (i32, i32) {
    %c0_i32 = arith.constant 0 : i32
    %c0_i32_0 = arith.constant 0 : i32
    return %arg0, %c0_i32 : i32, i32
  }
}

module attributes {stable_mosaic.version = 11 : i64} {
  func.func @kernel(%arg0: i32, %arg1: i32, %arg2: memref<32x128xbf16, #tpu.memory_space<vmem>>, %arg3: memref<128x128xbf16, #tpu.memory_space<vmem>>, %arg4: memref<1x128xf32, #tpu.memory_space<vmem>>, %arg5: memref<32x128xf32, #tpu.memory_space<vmem>>, %arg6: memref<32x128xf32, #tpu.memory_space<vmem>>, %arg7: memref<32x128xf32, #tpu.memory_space<vmem>>) attributes {dimension_semantics = [#tpu.dimension_semantics<parallel>, #tpu.dimension_semantics<arbitrary>], iteration_bounds = array<i64: 1, 9>, scalar_prefetch = 0 : i64, scratch_operands = 1 : i64, tpu.core_type = #tpu.core_type<tc>, window_params = [{transform_indices = @transform_0, window_bounds = array<i64: 32, 128>}, {transform_indices = @transform_1, window_bounds = array<i64: 128, 128>}, {pipeline_mode = #tpu.pipeline_mode<synchronous>, transform_indices = @transform_2, window_bounds = array<i64: 1, 128>}, {transform_indices = @transform_3, window_bounds = array<i64: 32, 128>}, {transform_indices = @transform_4, window_bounds = array<i64: 32, 128>}]} {
    %c0_i32 = arith.constant 0 : i32
    %0 = arith.cmpi eq, %arg1, %c0_i32 : i32
    %1 = arith.extui %0 : i1 to i32
    %c0_i32_0 = arith.constant 0 : i32
    %2 = arith.cmpi ne, %1, %c0_i32_0 : i32
    scf.if %2 {
      %cst_9 = arith.constant 0.000000e+00 : f32
      %12 = vector.broadcast %cst_9 : f32 to vector<32x128xf32>
      %c0_10 = arith.constant 0 : index
      %c0_11 = arith.constant 0 : index
      %13 = vector.load %arg7[%c0_10, %c0_11] : memref<32x128xf32, #tpu.memory_space<vmem>>, vector<32x128xf32>
      tpu.vector_store %arg7[%c0_10, %c0_11], %12 {strides = array<i32>} : memref<32x128xf32, #tpu.memory_space<vmem>>, vector<32x128xf32>,
    } else {
    }
    %c0 = arith.constant 0 : index
    %c0_1 = arith.constant 0 : index
    %3 = vector.load %arg7[%c0, %c0_1] : memref<32x128xf32, #tpu.memory_space<vmem>>, vector<32x128xf32>
    %c0_2 = arith.constant 0 : index
    %c0_3 = arith.constant 0 : index
    %4 = vector.load %arg2[%c0_2, %c0_3] : memref<32x128xbf16, #tpu.memory_space<vmem>>, vector<32x128xbf16>
    %c0_4 = arith.constant 0 : index
    %c0_5 = arith.constant 0 : index
    %5 = vector.load %arg3[%c0_4, %c0_5] : memref<128x128xbf16, #tpu.memory_space<vmem>>, vector<128x128xbf16>
    %cst = arith.constant dense<0.000000e+00> : vector<32x128xf32>
    %6 = tpu.matmul %4, %5, %cst {dimension_numbers = #tpu.dot_dimension_numbers<[1], [0], [0], [1], [0, 0, 1, 1], [], []>} : vector<32x128xbf16>, vector<128x128xbf16>, vector<32x128xf32> -> vector<32x128xf32>
    %7 = arith.addf %3, %6 : vector<32x128xf32>
    %c0_6 = arith.constant 0 : index
    %c0_7 = arith.constant 0 : index
    %8 = vector.load %arg7[%c0_6, %c0_7] : memref<32x128xf32, #tpu.memory_space<vmem>>, vector<32x128xf32>
    tpu.vector_store %arg7[%c0_6, %c0_7], %7 {strides = array<i32>} : memref<32x128xf32, #tpu.memory_space<vmem>>, vector<32x128xf32>,
    %c8_i32 = arith.constant 8 : i32
    %9 = arith.cmpi eq, %arg1, %c8_i32 : i32
    %10 = arith.extui %9 : i1 to i32
    %c0_i32_8 = arith.constant 0 : i32
    %11 = arith.cmpi ne, %10, %c0_i32_8 : i32
    scf.if %11 {
      %c0_9 = arith.constant 0 : index
      %c0_10 = arith.constant 0 : index
      %12 = vector.load %arg7[%c0_9, %c0_10] : memref<32x128xf32, #tpu.memory_space<vmem>>, vector<32x128xf32>
      %c0_11 = arith.constant 0 : index
      %c0_12 = arith.constant 0 : index
      %13 = vector.load %arg4[%c0_11, %c0_12] : memref<1x128xf32, #tpu.memory_space<vmem>>, vector<1x128xf32>
      %14 = vector.broadcast %13 : vector<1x128xf32> to vector<32x128xf32>
      %15 = arith.addf %12, %14 : vector<32x128xf32>
      %c0_13 = arith.constant 0 : index
      %c0_14 = arith.constant 0 : index
      %16 = vector.load %arg5[%c0_13, %c0_14] : memref<32x128xf32, #tpu.memory_space<vmem>>, vector<32x128xf32>
      %17 = arith.addf %15, %16 : vector<32x128xf32>
      %cst_15 = arith.constant 0.000000e+00 : f32
      %18 = vector.broadcast %cst_15 : f32 to vector<32x128xf32>
      %19 = arith.maximumf %17, %18 : vector<32x128xf32>
      %c0_16 = arith.constant 0 : index
      %c0_17 = arith.constant 0 : index
      %20 = vector.load %arg6[%c0_16, %c0_17] : memref<32x128xf32, #tpu.memory_space<vmem>>, vector<32x128xf32>
      tpu.vector_store %arg6[%c0_16, %c0_17], %19 {strides = array<i32>} : memref<32x128xf32, #tpu.memory_space<vmem>>, vector<32x128xf32>,
    } else {
    }
    return
  }
  func.func @transform_0(%arg0: i32, %arg1: i32) -> (i32, i32) {
    %c0_i32 = arith.constant 0 : i32
    return %arg0, %arg1 : i32, i32
  }
  func.func @transform_1(%arg0: i32, %arg1: i32) -> (i32, i32) {
    %c0_i32 = arith.constant 0 : i32
    %c0_i32_0 = arith.constant 0 : i32
    return %arg1, %c0_i32 : i32, i32
  }
  func.func @transform_2(%arg0: i32, %arg1: i32) -> (i32, i32) {
    %c0_i32 = arith.constant 0 : i32
    %c0_i32_0 = arith.constant 0 : i32
    %c0_i32_1 = arith.constant 0 : i32
    return %c0_i32, %c0_i32_0 : i32, i32
  }
  func.func @transform_3(%arg0: i32, %arg1: i32) -> (i32, i32) {
    %c0_i32 = arith.constant 0 : i32
    %c0_i32_0 = arith.constant 0 : i32
    return %arg0, %c0_i32 : i32, i32
  }
  func.func @transform_4(%arg0: i32, %arg1: i32) -> (i32, i32) {
    %c0_i32 = arith.constant 0 : i32
    %c0_i32_0 = arith.constant 0 : i32
    return %arg0, %c0_i32 : i32, i32
  }
}

module attributes {stable_mosaic.version = 11 : i64} {
  func.func @kernel(%arg0: i32, %arg1: i32, %arg2: memref<32x128xbf16, #tpu.memory_space<vmem>>, %arg3: memref<128x256xbf16, #tpu.memory_space<vmem>>, %arg4: memref<1x256xf32, #tpu.memory_space<vmem>>, %arg5: memref<32x256xf32, #tpu.memory_space<vmem>>, %arg6: memref<32x256xf32, #tpu.memory_space<vmem>>) attributes {dimension_semantics = [#tpu.dimension_semantics<parallel>, #tpu.dimension_semantics<arbitrary>], iteration_bounds = array<i64: 1, 9>, scalar_prefetch = 0 : i64, scratch_operands = 1 : i64, tpu.core_type = #tpu.core_type<tc>, window_params = [{transform_indices = @transform_0, window_bounds = array<i64: 32, 128>}, {transform_indices = @transform_1, window_bounds = array<i64: 128, 256>}, {pipeline_mode = #tpu.pipeline_mode<synchronous>, transform_indices = @transform_2, window_bounds = array<i64: 1, 256>}, {transform_indices = @transform_3, window_bounds = array<i64: 32, 256>}]} {
    %c0_i32 = arith.constant 0 : i32
    %0 = arith.cmpi eq, %arg1, %c0_i32 : i32
    %1 = arith.extui %0 : i1 to i32
    %c0_i32_0 = arith.constant 0 : i32
    %2 = arith.cmpi ne, %1, %c0_i32_0 : i32
    scf.if %2 {
      %cst_9 = arith.constant 0.000000e+00 : f32
      %12 = vector.broadcast %cst_9 : f32 to vector<32x256xf32>
      %c0_10 = arith.constant 0 : index
      %c0_11 = arith.constant 0 : index
      %13 = vector.load %arg6[%c0_10, %c0_11] : memref<32x256xf32, #tpu.memory_space<vmem>>, vector<32x256xf32>
      tpu.vector_store %arg6[%c0_10, %c0_11], %12 {strides = array<i32>} : memref<32x256xf32, #tpu.memory_space<vmem>>, vector<32x256xf32>,
    } else {
    }
    %c0 = arith.constant 0 : index
    %c0_1 = arith.constant 0 : index
    %3 = vector.load %arg6[%c0, %c0_1] : memref<32x256xf32, #tpu.memory_space<vmem>>, vector<32x256xf32>
    %c0_2 = arith.constant 0 : index
    %c0_3 = arith.constant 0 : index
    %4 = vector.load %arg2[%c0_2, %c0_3] : memref<32x128xbf16, #tpu.memory_space<vmem>>, vector<32x128xbf16>
    %c0_4 = arith.constant 0 : index
    %c0_5 = arith.constant 0 : index
    %5 = vector.load %arg3[%c0_4, %c0_5] : memref<128x256xbf16, #tpu.memory_space<vmem>>, vector<128x256xbf16>
    %cst = arith.constant dense<0.000000e+00> : vector<32x256xf32>
    %6 = tpu.matmul %4, %5, %cst {dimension_numbers = #tpu.dot_dimension_numbers<[1], [0], [0], [1], [0, 0, 1, 1], [], []>} : vector<32x128xbf16>, vector<128x256xbf16>, vector<32x256xf32> -> vector<32x256xf32>
    %7 = arith.addf %3, %6 : vector<32x256xf32>
    %c0_6 = arith.constant 0 : index
    %c0_7 = arith.constant 0 : index
    %8 = vector.load %arg6[%c0_6, %c0_7] : memref<32x256xf32, #tpu.memory_space<vmem>>, vector<32x256xf32>
    tpu.vector_store %arg6[%c0_6, %c0_7], %7 {strides = array<i32>} : memref<32x256xf32, #tpu.memory_space<vmem>>, vector<32x256xf32>,
    %c8_i32 = arith.constant 8 : i32
    %9 = arith.cmpi eq, %arg1, %c8_i32 : i32
    %10 = arith.extui %9 : i1 to i32
    %c0_i32_8 = arith.constant 0 : i32
    %11 = arith.cmpi ne, %10, %c0_i32_8 : i32
    scf.if %11 {
      %c0_9 = arith.constant 0 : index
      %c0_10 = arith.constant 0 : index
      %12 = vector.load %arg6[%c0_9, %c0_10] : memref<32x256xf32, #tpu.memory_space<vmem>>, vector<32x256xf32>
      %c0_11 = arith.constant 0 : index
      %c0_12 = arith.constant 0 : index
      %13 = vector.load %arg4[%c0_11, %c0_12] : memref<1x256xf32, #tpu.memory_space<vmem>>, vector<1x256xf32>
      %14 = vector.broadcast %13 : vector<1x256xf32> to vector<32x256xf32>
      %15 = arith.addf %12, %14 : vector<32x256xf32>
      %cst_13 = arith.constant 0.000000e+00 : f32
      %16 = vector.broadcast %cst_13 : f32 to vector<32x256xf32>
      %17 = arith.maximumf %15, %16 : vector<32x256xf32>
      %c0_14 = arith.constant 0 : index
      %c0_15 = arith.constant 0 : index
      %18 = vector.load %arg5[%c0_14, %c0_15] : memref<32x256xf32, #tpu.memory_space<vmem>>, vector<32x256xf32>
      tpu.vector_store %arg5[%c0_14, %c0_15], %17 {strides = array<i32>} : memref<32x256xf32, #tpu.memory_space<vmem>>, vector<32x256xf32>,
    } else {
    }
    return
  }
  func.func @transform_0(%arg0: i32, %arg1: i32) -> (i32, i32) {
    %c0_i32 = arith.constant 0 : i32
    return %arg0, %arg1 : i32, i32
  }
  func.func @transform_1(%arg0: i32, %arg1: i32) -> (i32, i32) {
    %c0_i32 = arith.constant 0 : i32
    %c0_i32_0 = arith.constant 0 : i32
    return %arg1, %c0_i32 : i32, i32
  }
  func.func @transform_2(%arg0: i32, %arg1: i32) -> (i32, i32) {
    %c0_i32 = arith.constant 0 : i32
    %c0_i32_0 = arith.constant 0 : i32
    %c0_i32_1 = arith.constant 0 : i32
    return %c0_i32, %c0_i32_0 : i32, i32
  }
  func.func @transform_3(%arg0: i32, %arg1: i32) -> (i32, i32) {
    %c0_i32 = arith.constant 0 : i32
    %c0_i32_0 = arith.constant 0 : i32
    return %arg0, %c0_i32 : i32, i32
  }
}

module attributes {stable_mosaic.version = 11 : i64} {
  func.func @kernel(%arg0: i32, %arg1: i32, %arg2: memref<32x128xbf16, #tpu.memory_space<vmem>>, %arg3: memref<128x256xbf16, #tpu.memory_space<vmem>>, %arg4: memref<1x256xf32, #tpu.memory_space<vmem>>, %arg5: memref<32x256xf32, #tpu.memory_space<vmem>>, %arg6: memref<32x256xf32, #tpu.memory_space<vmem>>) attributes {dimension_semantics = [#tpu.dimension_semantics<parallel>, #tpu.dimension_semantics<arbitrary>], iteration_bounds = array<i64: 1, 1>, scalar_prefetch = 0 : i64, scratch_operands = 1 : i64, tpu.core_type = #tpu.core_type<tc>, window_params = [{transform_indices = @transform_0, window_bounds = array<i64: 32, 128>}, {transform_indices = @transform_1, window_bounds = array<i64: 128, 256>}, {pipeline_mode = #tpu.pipeline_mode<synchronous>, transform_indices = @transform_2, window_bounds = array<i64: 1, 256>}, {transform_indices = @transform_3, window_bounds = array<i64: 32, 256>}]} {
    %c0_i32 = arith.constant 0 : i32
    %0 = arith.cmpi eq, %arg1, %c0_i32 : i32
    %1 = arith.extui %0 : i1 to i32
    %c0_i32_0 = arith.constant 0 : i32
    %2 = arith.cmpi ne, %1, %c0_i32_0 : i32
    scf.if %2 {
      %cst_10 = arith.constant 0.000000e+00 : f32
      %12 = vector.broadcast %cst_10 : f32 to vector<32x256xf32>
      %c0_11 = arith.constant 0 : index
      %c0_12 = arith.constant 0 : index
      %13 = vector.load %arg6[%c0_11, %c0_12] : memref<32x256xf32, #tpu.memory_space<vmem>>, vector<32x256xf32>
      tpu.vector_store %arg6[%c0_11, %c0_12], %12 {strides = array<i32>} : memref<32x256xf32, #tpu.memory_space<vmem>>, vector<32x256xf32>,
    } else {
    }
    %c0 = arith.constant 0 : index
    %c0_1 = arith.constant 0 : index
    %3 = vector.load %arg6[%c0, %c0_1] : memref<32x256xf32, #tpu.memory_space<vmem>>, vector<32x256xf32>
    %c0_2 = arith.constant 0 : index
    %c0_3 = arith.constant 0 : index
    %4 = vector.load %arg2[%c0_2, %c0_3] : memref<32x128xbf16, #tpu.memory_space<vmem>>, vector<32x128xbf16>
    %c0_4 = arith.constant 0 : index
    %c0_5 = arith.constant 0 : index
    %5 = vector.load %arg3[%c0_4, %c0_5] : memref<128x256xbf16, #tpu.memory_space<vmem>>, vector<128x256xbf16>
    %cst = arith.constant dense<0.000000e+00> : vector<32x256xf32>
    %6 = tpu.matmul %4, %5, %cst {dimension_numbers = #tpu.dot_dimension_numbers<[1], [0], [0], [1], [0, 0, 1, 1], [], []>} : vector<32x128xbf16>, vector<128x256xbf16>, vector<32x256xf32> -> vector<32x256xf32>
    %7 = arith.addf %3, %6 : vector<32x256xf32>
    %c0_6 = arith.constant 0 : index
    %c0_7 = arith.constant 0 : index
    %8 = vector.load %arg6[%c0_6, %c0_7] : memref<32x256xf32, #tpu.memory_space<vmem>>, vector<32x256xf32>
    tpu.vector_store %arg6[%c0_6, %c0_7], %7 {strides = array<i32>} : memref<32x256xf32, #tpu.memory_space<vmem>>, vector<32x256xf32>,
    %c0_i32_8 = arith.constant 0 : i32
    %9 = arith.cmpi eq, %arg1, %c0_i32_8 : i32
    %10 = arith.extui %9 : i1 to i32
    %c0_i32_9 = arith.constant 0 : i32
    %11 = arith.cmpi ne, %10, %c0_i32_9 : i32
    scf.if %11 {
      %c0_10 = arith.constant 0 : index
      %c0_11 = arith.constant 0 : index
      %12 = vector.load %arg6[%c0_10, %c0_11] : memref<32x256xf32, #tpu.memory_space<vmem>>, vector<32x256xf32>
      %c0_12 = arith.constant 0 : index
      %c0_13 = arith.constant 0 : index
      %13 = vector.load %arg4[%c0_12, %c0_13] : memref<1x256xf32, #tpu.memory_space<vmem>>, vector<1x256xf32>
      %14 = vector.broadcast %13 : vector<1x256xf32> to vector<32x256xf32>
      %15 = arith.addf %12, %14 : vector<32x256xf32>
      %c0_14 = arith.constant 0 : index
      %c0_15 = arith.constant 0 : index
      %16 = vector.load %arg5[%c0_14, %c0_15] : memref<32x256xf32, #tpu.memory_space<vmem>>, vector<32x256xf32>
      tpu.vector_store %arg5[%c0_14, %c0_15], %15 {strides = array<i32>} : memref<32x256xf32, #tpu.memory_space<vmem>>, vector<32x256xf32>,
    } else {
    }
    return
  }
  func.func @transform_0(%arg0: i32, %arg1: i32) -> (i32, i32) {
    %c0_i32 = arith.constant 0 : i32
    return %arg0, %arg1 : i32, i32
  }
  func.func @transform_1(%arg0: i32, %arg1: i32) -> (i32, i32) {
    %c0_i32 = arith.constant 0 : i32
    %c0_i32_0 = arith.constant 0 : i32
    return %arg1, %c0_i32 : i32, i32
  }
  func.func @transform_2(%arg0: i32, %arg1: i32) -> (i32, i32) {
    %c0_i32 = arith.constant 0 : i32
    %c0_i32_0 = arith.constant 0 : i32
    %c0_i32_1 = arith.constant 0 : i32
    return %c0_i32, %c0_i32_0 : i32, i32
  }
  func.func @transform_3(%arg0: i32, %arg1: i32) -> (i32, i32) {
    %c0_i32 = arith.constant 0 : i32
    %c0_i32_0 = arith.constant 0 : i32
    return %arg0, %c0_i32 : i32, i32
  }
}

module attributes {stable_mosaic.version = 11 : i64} {
  func.func @kernel(%arg0: i32, %arg1: i32, %arg2: memref<32x256xbf16, #tpu.memory_space<vmem>>, %arg3: memref<256x256xbf16, #tpu.memory_space<vmem>>, %arg4: memref<1x256xf32, #tpu.memory_space<vmem>>, %arg5: memref<32x256xf32, #tpu.memory_space<vmem>>, %arg6: memref<32x256xf32, #tpu.memory_space<vmem>>, %arg7: memref<32x256xf32, #tpu.memory_space<vmem>>) attributes {dimension_semantics = [#tpu.dimension_semantics<parallel>, #tpu.dimension_semantics<arbitrary>], iteration_bounds = array<i64: 1, 9>, scalar_prefetch = 0 : i64, scratch_operands = 1 : i64, tpu.core_type = #tpu.core_type<tc>, window_params = [{transform_indices = @transform_0, window_bounds = array<i64: 32, 256>}, {transform_indices = @transform_1, window_bounds = array<i64: 256, 256>}, {pipeline_mode = #tpu.pipeline_mode<synchronous>, transform_indices = @transform_2, window_bounds = array<i64: 1, 256>}, {transform_indices = @transform_3, window_bounds = array<i64: 32, 256>}, {transform_indices = @transform_4, window_bounds = array<i64: 32, 256>}]} {
    %c0_i32 = arith.constant 0 : i32
    %0 = arith.cmpi eq, %arg1, %c0_i32 : i32
    %1 = arith.extui %0 : i1 to i32
    %c0_i32_0 = arith.constant 0 : i32
    %2 = arith.cmpi ne, %1, %c0_i32_0 : i32
    scf.if %2 {
      %cst_9 = arith.constant 0.000000e+00 : f32
      %12 = vector.broadcast %cst_9 : f32 to vector<32x256xf32>
      %c0_10 = arith.constant 0 : index
      %c0_11 = arith.constant 0 : index
      %13 = vector.load %arg7[%c0_10, %c0_11] : memref<32x256xf32, #tpu.memory_space<vmem>>, vector<32x256xf32>
      tpu.vector_store %arg7[%c0_10, %c0_11], %12 {strides = array<i32>} : memref<32x256xf32, #tpu.memory_space<vmem>>, vector<32x256xf32>,
    } else {
    }
    %c0 = arith.constant 0 : index
    %c0_1 = arith.constant 0 : index
    %3 = vector.load %arg7[%c0, %c0_1] : memref<32x256xf32, #tpu.memory_space<vmem>>, vector<32x256xf32>
    %c0_2 = arith.constant 0 : index
    %c0_3 = arith.constant 0 : index
    %4 = vector.load %arg2[%c0_2, %c0_3] : memref<32x256xbf16, #tpu.memory_space<vmem>>, vector<32x256xbf16>
    %c0_4 = arith.constant 0 : index
    %c0_5 = arith.constant 0 : index
    %5 = vector.load %arg3[%c0_4, %c0_5] : memref<256x256xbf16, #tpu.memory_space<vmem>>, vector<256x256xbf16>
    %cst = arith.constant dense<0.000000e+00> : vector<32x256xf32>
    %6 = tpu.matmul %4, %5, %cst {dimension_numbers = #tpu.dot_dimension_numbers<[1], [0], [0], [1], [0, 0, 1, 1], [], []>} : vector<32x256xbf16>, vector<256x256xbf16>, vector<32x256xf32> -> vector<32x256xf32>
    %7 = arith.addf %3, %6 : vector<32x256xf32>
    %c0_6 = arith.constant 0 : index
    %c0_7 = arith.constant 0 : index
    %8 = vector.load %arg7[%c0_6, %c0_7] : memref<32x256xf32, #tpu.memory_space<vmem>>, vector<32x256xf32>
    tpu.vector_store %arg7[%c0_6, %c0_7], %7 {strides = array<i32>} : memref<32x256xf32, #tpu.memory_space<vmem>>, vector<32x256xf32>,
    %c8_i32 = arith.constant 8 : i32
    %9 = arith.cmpi eq, %arg1, %c8_i32 : i32
    %10 = arith.extui %9 : i1 to i32
    %c0_i32_8 = arith.constant 0 : i32
    %11 = arith.cmpi ne, %10, %c0_i32_8 : i32
    scf.if %11 {
      %c0_9 = arith.constant 0 : index
      %c0_10 = arith.constant 0 : index
      %12 = vector.load %arg7[%c0_9, %c0_10] : memref<32x256xf32, #tpu.memory_space<vmem>>, vector<32x256xf32>
      %c0_11 = arith.constant 0 : index
      %c0_12 = arith.constant 0 : index
      %13 = vector.load %arg4[%c0_11, %c0_12] : memref<1x256xf32, #tpu.memory_space<vmem>>, vector<1x256xf32>
      %14 = vector.broadcast %13 : vector<1x256xf32> to vector<32x256xf32>
      %15 = arith.addf %12, %14 : vector<32x256xf32>
      %c0_13 = arith.constant 0 : index
      %c0_14 = arith.constant 0 : index
      %16 = vector.load %arg5[%c0_13, %c0_14] : memref<32x256xf32, #tpu.memory_space<vmem>>, vector<32x256xf32>
      %17 = arith.addf %15, %16 : vector<32x256xf32>
      %cst_15 = arith.constant 0.000000e+00 : f32
      %18 = vector.broadcast %cst_15 : f32 to vector<32x256xf32>
      %19 = arith.maximumf %17, %18 : vector<32x256xf32>
      %c0_16 = arith.constant 0 : index
      %c0_17 = arith.constant 0 : index
      %20 = vector.load %arg6[%c0_16, %c0_17] : memref<32x256xf32, #tpu.memory_space<vmem>>, vector<32x256xf32>
      tpu.vector_store %arg6[%c0_16, %c0_17], %19 {strides = array<i32>} : memref<32x256xf32, #tpu.memory_space<vmem>>, vector<32x256xf32>,
    } else {
    }
    return
  }
  func.func @transform_0(%arg0: i32, %arg1: i32) -> (i32, i32) {
    %c0_i32 = arith.constant 0 : i32
    return %arg0, %arg1 : i32, i32
  }
  func.func @transform_1(%arg0: i32, %arg1: i32) -> (i32, i32) {
    %c0_i32 = arith.constant 0 : i32
    %c0_i32_0 = arith.constant 0 : i32
    return %arg1, %c0_i32 : i32, i32
  }
  func.func @transform_2(%arg0: i32, %arg1: i32) -> (i32, i32) {
    %c0_i32 = arith.constant 0 : i32
    %c0_i32_0 = arith.constant 0 : i32
    %c0_i32_1 = arith.constant 0 : i32
    return %c0_i32, %c0_i32_0 : i32, i32
  }
  func.func @transform_3(%arg0: i32, %arg1: i32) -> (i32, i32) {
    %c0_i32 = arith.constant 0 : i32
    %c0_i32_0 = arith.constant 0 : i32
    return %arg0, %c0_i32 : i32, i32
  }
  func.func @transform_4(%arg0: i32, %arg1: i32) -> (i32, i32) {
    %c0_i32 = arith.constant 0 : i32
    %c0_i32_0 = arith.constant 0 : i32
    return %arg0, %c0_i32 : i32, i32
  }
}

module attributes {stable_mosaic.version = 11 : i64} {
  func.func @kernel(%arg0: i32, %arg1: i32, %arg2: memref<32x256xbf16, #tpu.memory_space<vmem>>, %arg3: memref<256x256xbf16, #tpu.memory_space<vmem>>, %arg4: memref<1x256xf32, #tpu.memory_space<vmem>>, %arg5: memref<32x256xf32, #tpu.memory_space<vmem>>, %arg6: memref<32x256xf32, #tpu.memory_space<vmem>>) attributes {dimension_semantics = [#tpu.dimension_semantics<parallel>, #tpu.dimension_semantics<arbitrary>], iteration_bounds = array<i64: 1, 9>, scalar_prefetch = 0 : i64, scratch_operands = 1 : i64, tpu.core_type = #tpu.core_type<tc>, window_params = [{transform_indices = @transform_0, window_bounds = array<i64: 32, 256>}, {transform_indices = @transform_1, window_bounds = array<i64: 256, 256>}, {pipeline_mode = #tpu.pipeline_mode<synchronous>, transform_indices = @transform_2, window_bounds = array<i64: 1, 256>}, {transform_indices = @transform_3, window_bounds = array<i64: 32, 256>}]} {
    %c0_i32 = arith.constant 0 : i32
    %0 = arith.cmpi eq, %arg1, %c0_i32 : i32
    %1 = arith.extui %0 : i1 to i32
    %c0_i32_0 = arith.constant 0 : i32
    %2 = arith.cmpi ne, %1, %c0_i32_0 : i32
    scf.if %2 {
      %cst_9 = arith.constant 0.000000e+00 : f32
      %12 = vector.broadcast %cst_9 : f32 to vector<32x256xf32>
      %c0_10 = arith.constant 0 : index
      %c0_11 = arith.constant 0 : index
      %13 = vector.load %arg6[%c0_10, %c0_11] : memref<32x256xf32, #tpu.memory_space<vmem>>, vector<32x256xf32>
      tpu.vector_store %arg6[%c0_10, %c0_11], %12 {strides = array<i32>} : memref<32x256xf32, #tpu.memory_space<vmem>>, vector<32x256xf32>,
    } else {
    }
    %c0 = arith.constant 0 : index
    %c0_1 = arith.constant 0 : index
    %3 = vector.load %arg6[%c0, %c0_1] : memref<32x256xf32, #tpu.memory_space<vmem>>, vector<32x256xf32>
    %c0_2 = arith.constant 0 : index
    %c0_3 = arith.constant 0 : index
    %4 = vector.load %arg2[%c0_2, %c0_3] : memref<32x256xbf16, #tpu.memory_space<vmem>>, vector<32x256xbf16>
    %c0_4 = arith.constant 0 : index
    %c0_5 = arith.constant 0 : index
    %5 = vector.load %arg3[%c0_4, %c0_5] : memref<256x256xbf16, #tpu.memory_space<vmem>>, vector<256x256xbf16>
    %cst = arith.constant dense<0.000000e+00> : vector<32x256xf32>
    %6 = tpu.matmul %4, %5, %cst {dimension_numbers = #tpu.dot_dimension_numbers<[1], [0], [0], [1], [0, 0, 1, 1], [], []>} : vector<32x256xbf16>, vector<256x256xbf16>, vector<32x256xf32> -> vector<32x256xf32>
    %7 = arith.addf %3, %6 : vector<32x256xf32>
    %c0_6 = arith.constant 0 : index
    %c0_7 = arith.constant 0 : index
    %8 = vector.load %arg6[%c0_6, %c0_7] : memref<32x256xf32, #tpu.memory_space<vmem>>, vector<32x256xf32>
    tpu.vector_store %arg6[%c0_6, %c0_7], %7 {strides = array<i32>} : memref<32x256xf32, #tpu.memory_space<vmem>>, vector<32x256xf32>,
    %c8_i32 = arith.constant 8 : i32
    %9 = arith.cmpi eq, %arg1, %c8_i32 : i32
    %10 = arith.extui %9 : i1 to i32
    %c0_i32_8 = arith.constant 0 : i32
    %11 = arith.cmpi ne, %10, %c0_i32_8 : i32
    scf.if %11 {
      %c0_9 = arith.constant 0 : index
      %c0_10 = arith.constant 0 : index
      %12 = vector.load %arg6[%c0_9, %c0_10] : memref<32x256xf32, #tpu.memory_space<vmem>>, vector<32x256xf32>
      %c0_11 = arith.constant 0 : index
      %c0_12 = arith.constant 0 : index
      %13 = vector.load %arg4[%c0_11, %c0_12] : memref<1x256xf32, #tpu.memory_space<vmem>>, vector<1x256xf32>
      %14 = vector.broadcast %13 : vector<1x256xf32> to vector<32x256xf32>
      %15 = arith.addf %12, %14 : vector<32x256xf32>
      %cst_13 = arith.constant 0.000000e+00 : f32
      %16 = vector.broadcast %cst_13 : f32 to vector<32x256xf32>
      %17 = arith.maximumf %15, %16 : vector<32x256xf32>
      %c0_14 = arith.constant 0 : index
      %c0_15 = arith.constant 0 : index
      %18 = vector.load %arg5[%c0_14, %c0_15] : memref<32x256xf32, #tpu.memory_space<vmem>>, vector<32x256xf32>
      tpu.vector_store %arg5[%c0_14, %c0_15], %17 {strides = array<i32>} : memref<32x256xf32, #tpu.memory_space<vmem>>, vector<32x256xf32>,
    } else {
    }
    return
  }
  func.func @transform_0(%arg0: i32, %arg1: i32) -> (i32, i32) {
    %c0_i32 = arith.constant 0 : i32
    return %arg0, %arg1 : i32, i32
  }
  func.func @transform_1(%arg0: i32, %arg1: i32) -> (i32, i32) {
    %c0_i32 = arith.constant 0 : i32
    %c0_i32_0 = arith.constant 0 : i32
    return %arg1, %c0_i32 : i32, i32
  }
  func.func @transform_2(%arg0: i32, %arg1: i32) -> (i32, i32) {
    %c0_i32 = arith.constant 0 : i32
    %c0_i32_0 = arith.constant 0 : i32
    %c0_i32_1 = arith.constant 0 : i32
    return %c0_i32, %c0_i32_0 : i32, i32
  }
  func.func @transform_3(%arg0: i32, %arg1: i32) -> (i32, i32) {
    %c0_i32 = arith.constant 0 : i32
    %c0_i32_0 = arith.constant 0 : i32
    return %arg0, %c0_i32 : i32, i32
  }
}

module attributes {stable_mosaic.version = 11 : i64} {
  func.func @kernel(%arg0: i32, %arg1: i32, %arg2: memref<32x256xbf16, #tpu.memory_space<vmem>>, %arg3: memref<256x512xbf16, #tpu.memory_space<vmem>>, %arg4: memref<1x512xf32, #tpu.memory_space<vmem>>, %arg5: memref<32x512xf32, #tpu.memory_space<vmem>>, %arg6: memref<32x512xf32, #tpu.memory_space<vmem>>) attributes {dimension_semantics = [#tpu.dimension_semantics<parallel>, #tpu.dimension_semantics<arbitrary>], iteration_bounds = array<i64: 1, 9>, scalar_prefetch = 0 : i64, scratch_operands = 1 : i64, tpu.core_type = #tpu.core_type<tc>, window_params = [{transform_indices = @transform_0, window_bounds = array<i64: 32, 256>}, {transform_indices = @transform_1, window_bounds = array<i64: 256, 512>}, {pipeline_mode = #tpu.pipeline_mode<synchronous>, transform_indices = @transform_2, window_bounds = array<i64: 1, 512>}, {transform_indices = @transform_3, window_bounds = array<i64: 32, 512>}]} {
    %c0_i32 = arith.constant 0 : i32
    %0 = arith.cmpi eq, %arg1, %c0_i32 : i32
    %1 = arith.extui %0 : i1 to i32
    %c0_i32_0 = arith.constant 0 : i32
    %2 = arith.cmpi ne, %1, %c0_i32_0 : i32
    scf.if %2 {
      %cst_9 = arith.constant 0.000000e+00 : f32
      %12 = vector.broadcast %cst_9 : f32 to vector<32x512xf32>
      %c0_10 = arith.constant 0 : index
      %c0_11 = arith.constant 0 : index
      %13 = vector.load %arg6[%c0_10, %c0_11] : memref<32x512xf32, #tpu.memory_space<vmem>>, vector<32x512xf32>
      tpu.vector_store %arg6[%c0_10, %c0_11], %12 {strides = array<i32>} : memref<32x512xf32, #tpu.memory_space<vmem>>, vector<32x512xf32>,
    } else {
    }
    %c0 = arith.constant 0 : index
    %c0_1 = arith.constant 0 : index
    %3 = vector.load %arg6[%c0, %c0_1] : memref<32x512xf32, #tpu.memory_space<vmem>>, vector<32x512xf32>
    %c0_2 = arith.constant 0 : index
    %c0_3 = arith.constant 0 : index
    %4 = vector.load %arg2[%c0_2, %c0_3] : memref<32x256xbf16, #tpu.memory_space<vmem>>, vector<32x256xbf16>
    %c0_4 = arith.constant 0 : index
    %c0_5 = arith.constant 0 : index
    %5 = vector.load %arg3[%c0_4, %c0_5] : memref<256x512xbf16, #tpu.memory_space<vmem>>, vector<256x512xbf16>
    %cst = arith.constant dense<0.000000e+00> : vector<32x512xf32>
    %6 = tpu.matmul %4, %5, %cst {dimension_numbers = #tpu.dot_dimension_numbers<[1], [0], [0], [1], [0, 0, 1, 1], [], []>} : vector<32x256xbf16>, vector<256x512xbf16>, vector<32x512xf32> -> vector<32x512xf32>
    %7 = arith.addf %3, %6 : vector<32x512xf32>
    %c0_6 = arith.constant 0 : index
    %c0_7 = arith.constant 0 : index
    %8 = vector.load %arg6[%c0_6, %c0_7] : memref<32x512xf32, #tpu.memory_space<vmem>>, vector<32x512xf32>
    tpu.vector_store %arg6[%c0_6, %c0_7], %7 {strides = array<i32>} : memref<32x512xf32, #tpu.memory_space<vmem>>, vector<32x512xf32>,
    %c8_i32 = arith.constant 8 : i32
    %9 = arith.cmpi eq, %arg1, %c8_i32 : i32
    %10 = arith.extui %9 : i1 to i32
    %c0_i32_8 = arith.constant 0 : i32
    %11 = arith.cmpi ne, %10, %c0_i32_8 : i32
    scf.if %11 {
      %c0_9 = arith.constant 0 : index
      %c0_10 = arith.constant 0 : index
      %12 = vector.load %arg6[%c0_9, %c0_10] : memref<32x512xf32, #tpu.memory_space<vmem>>, vector<32x512xf32>
      %c0_11 = arith.constant 0 : index
      %c0_12 = arith.constant 0 : index
      %13 = vector.load %arg4[%c0_11, %c0_12] : memref<1x512xf32, #tpu.memory_space<vmem>>, vector<1x512xf32>
      %14 = vector.broadcast %13 : vector<1x512xf32> to vector<32x512xf32>
      %15 = arith.addf %12, %14 : vector<32x512xf32>
      %cst_13 = arith.constant 0.000000e+00 : f32
      %16 = vector.broadcast %cst_13 : f32 to vector<32x512xf32>
      %17 = arith.maximumf %15, %16 : vector<32x512xf32>
      %c0_14 = arith.constant 0 : index
      %c0_15 = arith.constant 0 : index
      %18 = vector.load %arg5[%c0_14, %c0_15] : memref<32x512xf32, #tpu.memory_space<vmem>>, vector<32x512xf32>
      tpu.vector_store %arg5[%c0_14, %c0_15], %17 {strides = array<i32>} : memref<32x512xf32, #tpu.memory_space<vmem>>, vector<32x512xf32>,
    } else {
    }
    return
  }
  func.func @transform_0(%arg0: i32, %arg1: i32) -> (i32, i32) {
    %c0_i32 = arith.constant 0 : i32
    return %arg0, %arg1 : i32, i32
  }
  func.func @transform_1(%arg0: i32, %arg1: i32) -> (i32, i32) {
    %c0_i32 = arith.constant 0 : i32
    %c0_i32_0 = arith.constant 0 : i32
    return %arg1, %c0_i32 : i32, i32
  }
  func.func @transform_2(%arg0: i32, %arg1: i32) -> (i32, i32) {
    %c0_i32 = arith.constant 0 : i32
    %c0_i32_0 = arith.constant 0 : i32
    %c0_i32_1 = arith.constant 0 : i32
    return %c0_i32, %c0_i32_0 : i32, i32
  }
  func.func @transform_3(%arg0: i32, %arg1: i32) -> (i32, i32) {
    %c0_i32 = arith.constant 0 : i32
    %c0_i32_0 = arith.constant 0 : i32
    return %arg0, %c0_i32 : i32, i32
  }
}

module attributes {stable_mosaic.version = 11 : i64} {
  func.func @kernel(%arg0: i32, %arg1: i32, %arg2: memref<32x256xbf16, #tpu.memory_space<vmem>>, %arg3: memref<256x512xbf16, #tpu.memory_space<vmem>>, %arg4: memref<1x512xf32, #tpu.memory_space<vmem>>, %arg5: memref<32x512xf32, #tpu.memory_space<vmem>>, %arg6: memref<32x512xf32, #tpu.memory_space<vmem>>) attributes {dimension_semantics = [#tpu.dimension_semantics<parallel>, #tpu.dimension_semantics<arbitrary>], iteration_bounds = array<i64: 1, 1>, scalar_prefetch = 0 : i64, scratch_operands = 1 : i64, tpu.core_type = #tpu.core_type<tc>, window_params = [{transform_indices = @transform_0, window_bounds = array<i64: 32, 256>}, {transform_indices = @transform_1, window_bounds = array<i64: 256, 512>}, {pipeline_mode = #tpu.pipeline_mode<synchronous>, transform_indices = @transform_2, window_bounds = array<i64: 1, 512>}, {transform_indices = @transform_3, window_bounds = array<i64: 32, 512>}]} {
    %c0_i32 = arith.constant 0 : i32
    %0 = arith.cmpi eq, %arg1, %c0_i32 : i32
    %1 = arith.extui %0 : i1 to i32
    %c0_i32_0 = arith.constant 0 : i32
    %2 = arith.cmpi ne, %1, %c0_i32_0 : i32
    scf.if %2 {
      %cst_10 = arith.constant 0.000000e+00 : f32
      %12 = vector.broadcast %cst_10 : f32 to vector<32x512xf32>
      %c0_11 = arith.constant 0 : index
      %c0_12 = arith.constant 0 : index
      %13 = vector.load %arg6[%c0_11, %c0_12] : memref<32x512xf32, #tpu.memory_space<vmem>>, vector<32x512xf32>
      tpu.vector_store %arg6[%c0_11, %c0_12], %12 {strides = array<i32>} : memref<32x512xf32, #tpu.memory_space<vmem>>, vector<32x512xf32>,
    } else {
    }
    %c0 = arith.constant 0 : index
    %c0_1 = arith.constant 0 : index
    %3 = vector.load %arg6[%c0, %c0_1] : memref<32x512xf32, #tpu.memory_space<vmem>>, vector<32x512xf32>
    %c0_2 = arith.constant 0 : index
    %c0_3 = arith.constant 0 : index
    %4 = vector.load %arg2[%c0_2, %c0_3] : memref<32x256xbf16, #tpu.memory_space<vmem>>, vector<32x256xbf16>
    %c0_4 = arith.constant 0 : index
    %c0_5 = arith.constant 0 : index
    %5 = vector.load %arg3[%c0_4, %c0_5] : memref<256x512xbf16, #tpu.memory_space<vmem>>, vector<256x512xbf16>
    %cst = arith.constant dense<0.000000e+00> : vector<32x512xf32>
    %6 = tpu.matmul %4, %5, %cst {dimension_numbers = #tpu.dot_dimension_numbers<[1], [0], [0], [1], [0, 0, 1, 1], [], []>} : vector<32x256xbf16>, vector<256x512xbf16>, vector<32x512xf32> -> vector<32x512xf32>
    %7 = arith.addf %3, %6 : vector<32x512xf32>
    %c0_6 = arith.constant 0 : index
    %c0_7 = arith.constant 0 : index
    %8 = vector.load %arg6[%c0_6, %c0_7] : memref<32x512xf32, #tpu.memory_space<vmem>>, vector<32x512xf32>
    tpu.vector_store %arg6[%c0_6, %c0_7], %7 {strides = array<i32>} : memref<32x512xf32, #tpu.memory_space<vmem>>, vector<32x512xf32>,
    %c0_i32_8 = arith.constant 0 : i32
    %9 = arith.cmpi eq, %arg1, %c0_i32_8 : i32
    %10 = arith.extui %9 : i1 to i32
    %c0_i32_9 = arith.constant 0 : i32
    %11 = arith.cmpi ne, %10, %c0_i32_9 : i32
    scf.if %11 {
      %c0_10 = arith.constant 0 : index
      %c0_11 = arith.constant 0 : index
      %12 = vector.load %arg6[%c0_10, %c0_11] : memref<32x512xf32, #tpu.memory_space<vmem>>, vector<32x512xf32>
      %c0_12 = arith.constant 0 : index
      %c0_13 = arith.constant 0 : index
      %13 = vector.load %arg4[%c0_12, %c0_13] : memref<1x512xf32, #tpu.memory_space<vmem>>, vector<1x512xf32>
      %14 = vector.broadcast %13 : vector<1x512xf32> to vector<32x512xf32>
      %15 = arith.addf %12, %14 : vector<32x512xf32>
      %c0_14 = arith.constant 0 : index
      %c0_15 = arith.constant 0 : index
      %16 = vector.load %arg5[%c0_14, %c0_15] : memref<32x512xf32, #tpu.memory_space<vmem>>, vector<32x512xf32>
      tpu.vector_store %arg5[%c0_14, %c0_15], %15 {strides = array<i32>} : memref<32x512xf32, #tpu.memory_space<vmem>>, vector<32x512xf32>,
    } else {
    }
    return
  }
  func.func @transform_0(%arg0: i32, %arg1: i32) -> (i32, i32) {
    %c0_i32 = arith.constant 0 : i32
    return %arg0, %arg1 : i32, i32
  }
  func.func @transform_1(%arg0: i32, %arg1: i32) -> (i32, i32) {
    %c0_i32 = arith.constant 0 : i32
    %c0_i32_0 = arith.constant 0 : i32
    return %arg1, %c0_i32 : i32, i32
  }
  func.func @transform_2(%arg0: i32, %arg1: i32) -> (i32, i32) {
    %c0_i32 = arith.constant 0 : i32
    %c0_i32_0 = arith.constant 0 : i32
    %c0_i32_1 = arith.constant 0 : i32
    return %c0_i32, %c0_i32_0 : i32, i32
  }
  func.func @transform_3(%arg0: i32, %arg1: i32) -> (i32, i32) {
    %c0_i32 = arith.constant 0 : i32
    %c0_i32_0 = arith.constant 0 : i32
    return %arg0, %c0_i32 : i32, i32
  }
}

module attributes {stable_mosaic.version = 11 : i64} {
  func.func @kernel(%arg0: i32, %arg1: i32, %arg2: memref<32x256xbf16, #tpu.memory_space<vmem>>, %arg3: memref<256x512xbf16, #tpu.memory_space<vmem>>, %arg4: memref<1x512xf32, #tpu.memory_space<vmem>>, %arg5: memref<32x512xf32, #tpu.memory_space<vmem>>, %arg6: memref<32x512xf32, #tpu.memory_space<vmem>>, %arg7: memref<32x512xf32, #tpu.memory_space<vmem>>) attributes {dimension_semantics = [#tpu.dimension_semantics<parallel>, #tpu.dimension_semantics<arbitrary>], iteration_bounds = array<i64: 1, 18>, scalar_prefetch = 0 : i64, scratch_operands = 1 : i64, tpu.core_type = #tpu.core_type<tc>, window_params = [{transform_indices = @transform_0, window_bounds = array<i64: 32, 256>}, {transform_indices = @transform_1, window_bounds = array<i64: 256, 512>}, {pipeline_mode = #tpu.pipeline_mode<synchronous>, transform_indices = @transform_2, window_bounds = array<i64: 1, 512>}, {transform_indices = @transform_3, window_bounds = array<i64: 32, 512>}, {transform_indices = @transform_4, window_bounds = array<i64: 32, 512>}]} {
    %c0_i32 = arith.constant 0 : i32
    %0 = arith.cmpi eq, %arg1, %c0_i32 : i32
    %1 = arith.extui %0 : i1 to i32
    %c0_i32_0 = arith.constant 0 : i32
    %2 = arith.cmpi ne, %1, %c0_i32_0 : i32
    scf.if %2 {
      %cst_9 = arith.constant 0.000000e+00 : f32
      %12 = vector.broadcast %cst_9 : f32 to vector<32x512xf32>
      %c0_10 = arith.constant 0 : index
      %c0_11 = arith.constant 0 : index
      %13 = vector.load %arg7[%c0_10, %c0_11] : memref<32x512xf32, #tpu.memory_space<vmem>>, vector<32x512xf32>
      tpu.vector_store %arg7[%c0_10, %c0_11], %12 {strides = array<i32>} : memref<32x512xf32, #tpu.memory_space<vmem>>, vector<32x512xf32>,
    } else {
    }
    %c0 = arith.constant 0 : index
    %c0_1 = arith.constant 0 : index
    %3 = vector.load %arg7[%c0, %c0_1] : memref<32x512xf32, #tpu.memory_space<vmem>>, vector<32x512xf32>
    %c0_2 = arith.constant 0 : index
    %c0_3 = arith.constant 0 : index
    %4 = vector.load %arg2[%c0_2, %c0_3] : memref<32x256xbf16, #tpu.memory_space<vmem>>, vector<32x256xbf16>
    %c0_4 = arith.constant 0 : index
    %c0_5 = arith.constant 0 : index
    %5 = vector.load %arg3[%c0_4, %c0_5] : memref<256x512xbf16, #tpu.memory_space<vmem>>, vector<256x512xbf16>
    %cst = arith.constant dense<0.000000e+00> : vector<32x512xf32>
    %6 = tpu.matmul %4, %5, %cst {dimension_numbers = #tpu.dot_dimension_numbers<[1], [0], [0], [1], [0, 0, 1, 1], [], []>} : vector<32x256xbf16>, vector<256x512xbf16>, vector<32x512xf32> -> vector<32x512xf32>
    %7 = arith.addf %3, %6 : vector<32x512xf32>
    %c0_6 = arith.constant 0 : index
    %c0_7 = arith.constant 0 : index
    %8 = vector.load %arg7[%c0_6, %c0_7] : memref<32x512xf32, #tpu.memory_space<vmem>>, vector<32x512xf32>
    tpu.vector_store %arg7[%c0_6, %c0_7], %7 {strides = array<i32>} : memref<32x512xf32, #tpu.memory_space<vmem>>, vector<32x512xf32>,
    %c17_i32 = arith.constant 17 : i32
    %9 = arith.cmpi eq, %arg1, %c17_i32 : i32
    %10 = arith.extui %9 : i1 to i32
    %c0_i32_8 = arith.constant 0 : i32
    %11 = arith.cmpi ne, %10, %c0_i32_8 : i32
    scf.if %11 {
      %c0_9 = arith.constant 0 : index
      %c0_10 = arith.constant 0 : index
      %12 = vector.load %arg7[%c0_9, %c0_10] : memref<32x512xf32, #tpu.memory_space<vmem>>, vector<32x512xf32>
      %c0_11 = arith.constant 0 : index
      %c0_12 = arith.constant 0 : index
      %13 = vector.load %arg4[%c0_11, %c0_12] : memref<1x512xf32, #tpu.memory_space<vmem>>, vector<1x512xf32>
      %14 = vector.broadcast %13 : vector<1x512xf32> to vector<32x512xf32>
      %15 = arith.addf %12, %14 : vector<32x512xf32>
      %c0_13 = arith.constant 0 : index
      %c0_14 = arith.constant 0 : index
      %16 = vector.load %arg5[%c0_13, %c0_14] : memref<32x512xf32, #tpu.memory_space<vmem>>, vector<32x512xf32>
      %17 = arith.addf %15, %16 : vector<32x512xf32>
      %cst_15 = arith.constant 0.000000e+00 : f32
      %18 = vector.broadcast %cst_15 : f32 to vector<32x512xf32>
      %19 = arith.maximumf %17, %18 : vector<32x512xf32>
      %c0_16 = arith.constant 0 : index
      %c0_17 = arith.constant 0 : index
      %20 = vector.load %arg6[%c0_16, %c0_17] : memref<32x512xf32, #tpu.memory_space<vmem>>, vector<32x512xf32>
      tpu.vector_store %arg6[%c0_16, %c0_17], %19 {strides = array<i32>} : memref<32x512xf32, #tpu.memory_space<vmem>>, vector<32x512xf32>,
    } else {
    }
    return
  }
  func.func @transform_0(%arg0: i32, %arg1: i32) -> (i32, i32) {
    %c0_i32 = arith.constant 0 : i32
    return %arg0, %arg1 : i32, i32
  }
  func.func @transform_1(%arg0: i32, %arg1: i32) -> (i32, i32) {
    %c0_i32 = arith.constant 0 : i32
    %c0_i32_0 = arith.constant 0 : i32
    return %arg1, %c0_i32 : i32, i32
  }
  func.func @transform_2(%arg0: i32, %arg1: i32) -> (i32, i32) {
    %c0_i32 = arith.constant 0 : i32
    %c0_i32_0 = arith.constant 0 : i32
    %c0_i32_1 = arith.constant 0 : i32
    return %c0_i32, %c0_i32_0 : i32, i32
  }
  func.func @transform_3(%arg0: i32, %arg1: i32) -> (i32, i32) {
    %c0_i32 = arith.constant 0 : i32
    %c0_i32_0 = arith.constant 0 : i32
    return %arg0, %c0_i32 : i32, i32
  }
  func.func @transform_4(%arg0: i32, %arg1: i32) -> (i32, i32) {
    %c0_i32 = arith.constant 0 : i32
    %c0_i32_0 = arith.constant 0 : i32
    return %arg0, %c0_i32 : i32, i32
  }
}

module attributes {stable_mosaic.version = 11 : i64} {
  func.func @kernel(%arg0: i32, %arg1: i32, %arg2: memref<32x256xbf16, #tpu.memory_space<vmem>>, %arg3: memref<256x512xbf16, #tpu.memory_space<vmem>>, %arg4: memref<1x512xf32, #tpu.memory_space<vmem>>, %arg5: memref<32x512xf32, #tpu.memory_space<vmem>>, %arg6: memref<32x512xf32, #tpu.memory_space<vmem>>) attributes {dimension_semantics = [#tpu.dimension_semantics<parallel>, #tpu.dimension_semantics<arbitrary>], iteration_bounds = array<i64: 1, 18>, scalar_prefetch = 0 : i64, scratch_operands = 1 : i64, tpu.core_type = #tpu.core_type<tc>, window_params = [{transform_indices = @transform_0, window_bounds = array<i64: 32, 256>}, {transform_indices = @transform_1, window_bounds = array<i64: 256, 512>}, {pipeline_mode = #tpu.pipeline_mode<synchronous>, transform_indices = @transform_2, window_bounds = array<i64: 1, 512>}, {transform_indices = @transform_3, window_bounds = array<i64: 32, 512>}]} {
    %c0_i32 = arith.constant 0 : i32
    %0 = arith.cmpi eq, %arg1, %c0_i32 : i32
    %1 = arith.extui %0 : i1 to i32
    %c0_i32_0 = arith.constant 0 : i32
    %2 = arith.cmpi ne, %1, %c0_i32_0 : i32
    scf.if %2 {
      %cst_9 = arith.constant 0.000000e+00 : f32
      %12 = vector.broadcast %cst_9 : f32 to vector<32x512xf32>
      %c0_10 = arith.constant 0 : index
      %c0_11 = arith.constant 0 : index
      %13 = vector.load %arg6[%c0_10, %c0_11] : memref<32x512xf32, #tpu.memory_space<vmem>>, vector<32x512xf32>
      tpu.vector_store %arg6[%c0_10, %c0_11], %12 {strides = array<i32>} : memref<32x512xf32, #tpu.memory_space<vmem>>, vector<32x512xf32>,
    } else {
    }
    %c0 = arith.constant 0 : index
    %c0_1 = arith.constant 0 : index
    %3 = vector.load %arg6[%c0, %c0_1] : memref<32x512xf32, #tpu.memory_space<vmem>>, vector<32x512xf32>
    %c0_2 = arith.constant 0 : index
    %c0_3 = arith.constant 0 : index
    %4 = vector.load %arg2[%c0_2, %c0_3] : memref<32x256xbf16, #tpu.memory_space<vmem>>, vector<32x256xbf16>
    %c0_4 = arith.constant 0 : index
    %c0_5 = arith.constant 0 : index
    %5 = vector.load %arg3[%c0_4, %c0_5] : memref<256x512xbf16, #tpu.memory_space<vmem>>, vector<256x512xbf16>
    %cst = arith.constant dense<0.000000e+00> : vector<32x512xf32>
    %6 = tpu.matmul %4, %5, %cst {dimension_numbers = #tpu.dot_dimension_numbers<[1], [0], [0], [1], [0, 0, 1, 1], [], []>} : vector<32x256xbf16>, vector<256x512xbf16>, vector<32x512xf32> -> vector<32x512xf32>
    %7 = arith.addf %3, %6 : vector<32x512xf32>
    %c0_6 = arith.constant 0 : index
    %c0_7 = arith.constant 0 : index
    %8 = vector.load %arg6[%c0_6, %c0_7] : memref<32x512xf32, #tpu.memory_space<vmem>>, vector<32x512xf32>
    tpu.vector_store %arg6[%c0_6, %c0_7], %7 {strides = array<i32>} : memref<32x512xf32, #tpu.memory_space<vmem>>, vector<32x512xf32>,
    %c17_i32 = arith.constant 17 : i32
    %9 = arith.cmpi eq, %arg1, %c17_i32 : i32
    %10 = arith.extui %9 : i1 to i32
    %c0_i32_8 = arith.constant 0 : i32
    %11 = arith.cmpi ne, %10, %c0_i32_8 : i32
    scf.if %11 {
      %c0_9 = arith.constant 0 : index
      %c0_10 = arith.constant 0 : index
      %12 = vector.load %arg6[%c0_9, %c0_10] : memref<32x512xf32, #tpu.memory_space<vmem>>, vector<32x512xf32>
      %c0_11 = arith.constant 0 : index
      %c0_12 = arith.constant 0 : index
      %13 = vector.load %arg4[%c0_11, %c0_12] : memref<1x512xf32, #tpu.memory_space<vmem>>, vector<1x512xf32>
      %14 = vector.broadcast %13 : vector<1x512xf32> to vector<32x512xf32>
      %15 = arith.addf %12, %14 : vector<32x512xf32>
      %cst_13 = arith.constant 0.000000e+00 : f32
      %16 = vector.broadcast %cst_13 : f32 to vector<32x512xf32>
      %17 = arith.maximumf %15, %16 : vector<32x512xf32>
      %c0_14 = arith.constant 0 : index
      %c0_15 = arith.constant 0 : index
      %18 = vector.load %arg5[%c0_14, %c0_15] : memref<32x512xf32, #tpu.memory_space<vmem>>, vector<32x512xf32>
      tpu.vector_store %arg5[%c0_14, %c0_15], %17 {strides = array<i32>} : memref<32x512xf32, #tpu.memory_space<vmem>>, vector<32x512xf32>,
    } else {
    }
    return
  }
  func.func @transform_0(%arg0: i32, %arg1: i32) -> (i32, i32) {
    %c0_i32 = arith.constant 0 : i32
    return %arg0, %arg1 : i32, i32
  }
  func.func @transform_1(%arg0: i32, %arg1: i32) -> (i32, i32) {
    %c0_i32 = arith.constant 0 : i32
    %c0_i32_0 = arith.constant 0 : i32
    return %arg1, %c0_i32 : i32, i32
  }
  func.func @transform_2(%arg0: i32, %arg1: i32) -> (i32, i32) {
    %c0_i32 = arith.constant 0 : i32
    %c0_i32_0 = arith.constant 0 : i32
    %c0_i32_1 = arith.constant 0 : i32
    return %c0_i32, %c0_i32_0 : i32, i32
  }
  func.func @transform_3(%arg0: i32, %arg1: i32) -> (i32, i32) {
    %c0_i32 = arith.constant 0 : i32
    %c0_i32_0 = arith.constant 0 : i32
    return %arg0, %c0_i32 : i32, i32
  }
}

</mosaic_0001>

<bundles_post_ra>
// kernel: resnet_encoder_mtan_forward.20
= control target key start
LH: loop header
LB: loop body
LE: loop exit
PB: predicated region body
PF: predicated region fallthrough
CT: control target
= control target key end

     0   :  { %s1421_s12 = smov 0   ;;  %s1423_s13 = smov 0   ;;  %s1745_s0 = inlined_call_operand.vmem [shape: bf16[512,256], index: 0, kind: input, shape index: {}]   ;;  %s1746_s1 = inlined_call_operand.vmem [shape: bf16[256,64], index: 1, kind: input, shape index: {}]   ;;  %s1747_s2 = inlined_call_operand.vmem [shape: f32[1,64], index: 2, kind: input, shape index: {}]   ;;  %s1748_s3 = inlined_call_operand.vmem [shape: f32[512,64], index: 3, kind: output, shape index: {}]  }
   0x1   :  { %s1425_s14 = smov 0  }
   0x2 LB: > { %s25_s15 = sadd.s32 1, %s1394_s13  ;;  %p1085_p0 = scmp.ge.s32.totalorder %s1398_s14, 1  ;;  %s1398_s14 = sphi %s1425_s14, %s13_s14   ;;  %s1394_s13 = sphi %s1423_s13, %s1750_s13   ;;  %s1390_s12 = sphi %s1421_s12, %s1749_s12  }
   0x3   : > { %p27_p1 = scmp.ge.s32.totalorder %s25_s15, 2  ;;  %p169_p2 = scmp.lt.s32.totalorder %s1398_s14, 3 }
   0x5   : > { %s1752_s15 = smov (%p27_p1, %s25_s15), 0  ;;  %p170_p3 = pnand %p1085_p0, %p169_p2 }
   0x6   : > { %s1086_s28 = sshll.u32 (!%p170_p3), %s1390_s12, 5 }
   0x7   : > { %173 = sbr.rel (%p170_p3) target bundleno = 314 (0x13a), region = 32  ;;  %p205_p4 = scmp.lt.s32.totalorder (!%p170_p3), %s1086_s28, 63 }
   0xc   : > { %v1325_v0 = vld [vmem:[%s1746_s1 + $0x38] sm:$0xff]  ;;  %v1324_v2 = vld [vmem:[%s1746_s1 + $0x30] sm:$0xff]  ;;  %v1323_v4 = vld [vmem:[%s1746_s1 + $0x28] sm:$0xff]  ;;  %s1754_s28 = smov (!%p205_p4, %s1086_s28), 63  ;;  %vm231_vm0 = vcmask 523264  }
   0xd   : > { %v1333_v1 = vld [vmem:[%s1746_s1 + $0x78] sm:$0xff]  ;;  %616 = vmatpush.bf16.msra.mxu0 %v1325_v0  ;;  %1334 = vmatpush.bf16.msra.mxu2 %v1325_v0  ;;  %v1332_v3 = vld [vmem:[%s1746_s1 + $0x70] sm:$0xff]  ;;  %v1331_v5 = vld [vmem:[%s1746_s1 + $0x68] sm:$0xff]  ;;  %s1285_s17 = sshll.u32 %s1754_s28, 3 }
   0xe   : > { %705 = vmatpush.bf16.msra.mxu1 %v1333_v1  ;;  %1342 = vmatpush.bf16.msra.mxu3 %v1333_v1  ;;  %v1322_v6 = vld [vmem:[%s1746_s1 + $0x20] sm:$0xff]  ;;  %v1321_v8 = vld [vmem:[%s1746_s1 + $0x18] sm:$0xff]  ;;  %v1320_v10 = vld [vmem:[%s1746_s1 + $0x10] sm:$0xff]  ;;  %s1489_s22 = scalar_lea.vmem %s1745_s0, %s1285_s17  ;;  %s1610_s7 = scalar_lea.vmem %s1748_s3, %s1285_s17 }
   0xf   : > { %v1330_v7 = vld [vmem:[%s1746_s1 + $0x60] sm:$0xff]  ;;  %v1329_v9 = vld [vmem:[%s1746_s1 + $0x58] sm:$0xff]  ;;  %v1328_v11 = vld [vmem:[%s1746_s1 + $0x50] sm:$0xff] }
  0x10   : > { %v1319_v12 = vld [vmem:[%s1746_s1 + $0x8] sm:$0xff]  ;;  %v1318_v14 = vld [vmem:[%s1746_s1] sm:$0xff]  ;;  %v1101_v28 = vld [vmem:[%s1489_s22 + $0x10] sm:$0xf] }
  0x11   : > { %617 = vmatpush.bf16.msra.mxu0 %v1324_v2  ;;  %1335 = vmatpush.bf16.msra.mxu2 %v1324_v2  ;;  %v1327_v13 = vld [vmem:[%s1746_s1 + $0x48] sm:$0xff]  ;;  %v1326_v15 = vld [vmem:[%s1746_s1 + $0x40] sm:$0xff]  ;;  %v1289_v29 = vld [vmem:[%s1489_s22 + $0x14] sm:$0xf0] }
  0x12   : > { %706 = vmatpush.bf16.msra.mxu1 %v1332_v3  ;;  %1343 = vmatpush.bf16.msra.mxu3 %v1332_v3  ;;  %v1093_v16 = vld [vmem:[%s1489_s22] sm:$0xf]  ;;  %v1287_v17 = vld [vmem:[%s1489_s22 + $0x4] sm:$0xf0]  ;;  %v1286_v20 = vld [vmem:[%s1489_s22 + $0x4] sm:$0xf]  ;;  %v1102_v36 = vor.u32 %v1289_v29, %v1101_v28 }
  0x13   : > { %v1157_v18 = vld [vmem:[%s1489_s22 + $0x80] sm:$0xf]  ;;  %v1303_v19 = vld [vmem:[%s1489_s22 + $0x84] sm:$0xf0]  ;;  %v1095_v21 = vld [vmem:[%s1489_s22 + $0x8] sm:$0xf0]  ;;  %v1094_v24 = vor.u32 %v1287_v17, %v1093_v16 }
  0x14   : > { %v1302_v22 = vld [vmem:[%s1489_s22 + $0x84] sm:$0xf]  ;;  %v1159_v23 = vld [vmem:[%s1489_s22 + $0x88] sm:$0xf0]  ;;  %v1158_v25 = vor.u32 %v1303_v19, %v1157_v18  ;;  %v1098_v26 = vor.u32 %v1286_v20, %v1095_v21  ;;  %v1165_v30 = vld [vmem:[%s1489_s22 + $0x90] sm:$0xf] }
  0x15   : > { %618 = vmatpush.bf16.msra.mxu0 %v1323_v4  ;;  %1336 = vmatpush.bf16.msra.mxu2 %v1323_v4  ;;  %v1162_v27 = vor.u32 %v1302_v22, %v1159_v23  ;;  %v1305_v31 = vld [vmem:[%s1489_s22 + $0x94] sm:$0xf0]  ;;  %v1288_v32 = vld [vmem:[%s1489_s22 + $0x14] sm:$0xf]  ;;  %v1103_v33 = vld [vmem:[%s1489_s22 + $0x18] sm:$0xf0] }
  0x16   : > { %707 = vmatpush.bf16.msra.mxu1 %v1331_v5  ;;  %1344 = vmatpush.bf16.msra.mxu3 %v1331_v5  ;;  %v1304_v34 = vld [vmem:[%s1489_s22 + $0x94] sm:$0xf]  ;;  %v1167_v35 = vld [vmem:[%s1489_s22 + $0x98] sm:$0xf0]  ;;  %v1166_v37 = vor.u32 %v1305_v31, %v1165_v30  ;;  %v1106_v38 = vor.u32 %v1288_v32, %v1103_v33  ;;  %v1109_v40 = vld [vmem:[%s1489_s22 + $0x20] sm:$0xf] }
  0x17   : > { %v1170_v39 = vor.u32 %v1304_v34, %v1167_v35  ;;  %v1291_v41 = vld [vmem:[%s1489_s22 + $0x24] sm:$0xf0]  ;;  %v1173_v42 = vld [vmem:[%s1489_s22 + $0xa0] sm:$0xf]  ;;  %v1290_v44 = vld [vmem:[%s1489_s22 + $0x24] sm:$0xf] }
  0x18   : > { %v1307_v43 = vld [vmem:[%s1489_s22 + $0xa4] sm:$0xf0]  ;;  %v1111_v45 = vld [vmem:[%s1489_s22 + $0x28] sm:$0xf0]  ;;  %v1306_v46 = vld [vmem:[%s1489_s22 + $0xa4] sm:$0xf]  ;;  %v1110_v48 = vor.u32 %v1291_v41, %v1109_v40 }
  0x19   : > { %619 = vmatpush.bf16.msra.mxu0 %v1322_v6  ;;  %1337 = vmatpush.bf16.msra.mxu2 %v1322_v6  ;;  %v1175_v47 = vld [vmem:[%s1489_s22 + $0xa8] sm:$0xf0]  ;;  %v1174_v49 = vor.u32 %v1307_v43, %v1173_v42  ;;  %v1114_v50 = vor.u32 %v1290_v44, %v1111_v45  ;;  %v1117_v52 = vld [vmem:[%s1489_s22 + $0x30] sm:$0xf]  ;;  %v1293_v53 = vld [vmem:[%s1489_s22 + $0x34] sm:$0xf0] }
  0x1a   : > { %708 = vmatpush.bf16.msra.mxu1 %v1330_v7  ;;  %1345 = vmatpush.bf16.msra.mxu3 %v1330_v7  ;;  %v1178_v51 = vor.u32 %v1306_v46, %v1175_v47  ;;  %v1181_v54 = vld [vmem:[%s1489_s22 + $0xb0] sm:$0xf]  ;;  %v1309_v55 = vld [vmem:[%s1489_s22 + $0xb4] sm:$0xf0]  ;;  %v1292_v56 = vld [vmem:[%s1489_s22 + $0x34] sm:$0xf]  ;;  %v1118_v60 = vor.u32 %v1293_v53, %v1117_v52 }
  0x1b   : > { %v1119_v57 = vld [vmem:[%s1489_s22 + $0x38] sm:$0xf0]  ;;  %v1308_v58 = vld [vmem:[%s1489_s22 + $0xb4] sm:$0xf]  ;;  %v1182_v61 = vor.u32 %v1309_v55, %v1181_v54  ;;  %v1125_v0 = vld [vmem:[%s1489_s22 + $0x40] sm:$0xf] }
  0x1c   : > { %v1183_v59 = vld [vmem:[%s1489_s22 + $0xb8] sm:$0xf0]  ;;  %v1122_v62 = vor.u32 %v1292_v56, %v1119_v57  ;;  %v1295_v1 = vld [vmem:[%s1489_s22 + $0x44] sm:$0xf0]  ;;  %v1189_v2 = vld [vmem:[%s1489_s22 + $0xc0] sm:$0xf] }
  0x1d   : > { %620 = vmatpush.bf16.msra.mxu0 %v1321_v8  ;;  %1338 = vmatpush.bf16.msra.mxu2 %v1321_v8  ;;  %v1186_v63 = vor.u32 %v1308_v58, %v1183_v59  ;;  %v1311_v3 = vld [vmem:[%s1489_s22 + $0xc4] sm:$0xf0]  ;;  %v1294_v4 = vld [vmem:[%s1489_s22 + $0x44] sm:$0xf]  ;;  %v1127_v5 = vld [vmem:[%s1489_s22 + $0x48] sm:$0xf0]  ;;  %v1126_v8 = vor.u32 %v1295_v1, %v1125_v0 }
  0x1e   : > { %709 = vmatpush.bf16.msra.mxu1 %v1329_v9  ;;  %1346 = vmatpush.bf16.msra.mxu3 %v1329_v9  ;;  %v1310_v6 = vld [vmem:[%s1489_s22 + $0xc4] sm:$0xf]  ;;  %v1191_v7 = vld [vmem:[%s1489_s22 + $0xc8] sm:$0xf0]  ;;  %v1190_v9 = vor.u32 %v1311_v3, %v1189_v2  ;;  %v1296_v16 = vld [vmem:[%s1489_s22 + $0x54] sm:$0xf] }
  0x1f   : > { %v1135_v17 = vld [vmem:[%s1489_s22 + $0x58] sm:$0xf0]  ;;  %v1312_v18 = vld [vmem:[%s1489_s22 + $0xd4] sm:$0xf]  ;;  %v1298_v28 = vld [vmem:[%s1489_s22 + $0x64] sm:$0xf] }
  0x20   : > { %v1199_v19 = vld [vmem:[%s1489_s22 + $0xd8] sm:$0xf0]  ;;  %v1138_v22 = vor.u32 %v1296_v16, %v1135_v17  ;;  %v1143_v29 = vld [vmem:[%s1489_s22 + $0x68] sm:$0xf0]  ;;  %v1314_v30 = vld [vmem:[%s1489_s22 + $0xe4] sm:$0xf] }
  0x21   : > { %621 = vmatpush.bf16.msra.mxu0 %v1320_v10  ;;  %1339 = vmatpush.bf16.msra.mxu2 %v1320_v10  ;;  %v1130_v10 = vor.u32 %v1294_v4, %v1127_v5  ;;  %v1202_v23 = vor.u32 %v1312_v18, %v1199_v19  ;;  %v1207_v31 = vld [vmem:[%s1489_s22 + $0xe8] sm:$0xf0]  ;;  %v1146_v34 = vor.u32 %v1298_v28, %v1143_v29  ;;  %v1317_v40 = vld [vmem:[%s1489_s22 + $0xf4] sm:$0xf0]  ;;  %v1300_v41 = vld [vmem:[%s1489_s22 + $0x74] sm:$0xf] }
  0x22   : > { %710 = vmatpush.bf16.msra.mxu1 %v1328_v11  ;;  %1347 = vmatpush.bf16.msra.mxu3 %v1328_v11  ;;  %v1194_v11 = vor.u32 %v1310_v6, %v1191_v7  ;;  %v1210_v35 = vor.u32 %v1314_v30, %v1207_v31  ;;  %v1151_v42 = vld [vmem:[%s1489_s22 + $0x78] sm:$0xf0]  ;;  %v1316_v43 = vld [vmem:[%s1489_s22 + $0xf4] sm:$0xf] }
  0x23   : > { %v1215_v44 = vld [vmem:[%s1489_s22 + $0xf8] sm:$0xf0]  ;;  %v1154_v47 = vor.u32 %v1300_v41, %v1151_v42 }
  0x25   : > { %622 = vmatpush.bf16.msra.mxu0 %v1319_v12  ;;  %1340 = vmatpush.bf16.msra.mxu2 %v1319_v12  ;;  %v1133_v12 = vld [vmem:[%s1489_s22 + $0x50] sm:$0xf] }
  0x26   : > { %711 = vmatpush.bf16.msra.mxu1 %v1327_v13  ;;  %1348 = vmatpush.bf16.msra.mxu3 %v1327_v13  ;;  %v1297_v13 = vld [vmem:[%s1489_s22 + $0x54] sm:$0xf0] }
  0x27   : > { %v1134_v20 = vor.u32 %v1297_v13, %v1133_v12 }
  0x29   : > { %623 = vmatpush.bf16.msra.mxu0 %v1318_v14  ;;  %1341 = vmatpush.bf16.msra.mxu2 %v1318_v14  ;;  %v1197_v14 = vld [vmem:[%s1489_s22 + $0xd0] sm:$0xf] }
  0x2a   : > { %712 = vmatpush.bf16.msra.mxu1 %v1326_v15  ;;  %1349 = vmatpush.bf16.msra.mxu3 %v1326_v15  ;;  %v1313_v15 = vld [vmem:[%s1489_s22 + $0xd4] sm:$0xf0] }
  0x2b   : > { %v1198_v21 = vor.u32 %v1313_v15, %v1197_v14 }
  0x2c   : > { %624 = vmatmul.bf16.vlgmr.msra.gmra.mxu0 %v1094_v24  ;;  %664 = vmatmul.bf16.vlgmr.msra.gmra.mxu2 %v1158_v25  ;;  %v1141_v24 = vld [vmem:[%s1489_s22 + $0x60] sm:$0xf]  ;;  %v1299_v25 = vld [vmem:[%s1489_s22 + $0x64] sm:$0xf0] }
  0x2d   : > { %713 = vmatmul.bf16.vlgmr.msra.gmra.mxu1 %v1098_v26  ;;  %753 = vmatmul.bf16.vlgmr.msra.gmra.mxu3 %v1162_v27  ;;  %v1205_v26 = vld [vmem:[%s1489_s22 + $0xe0] sm:$0xf]  ;;  %v1315_v27 = vld [vmem:[%s1489_s22 + $0xe4] sm:$0xf0]  ;;  %v1142_v32 = vor.u32 %v1299_v25, %v1141_v24 }
  0x2e   : > { %v1206_v33 = vor.u32 %v1315_v27, %v1205_v26 }
  0x3c   : > { %629 = vmatmul.bf16.gmra.mxu0 %v1102_v36  ;;  %669 = vmatmul.bf16.gmra.mxu2 %v1166_v37  ;;  %v1400_v36 = vmov 0.0   ;;  %v1149_v37 = vld [vmem:[%s1489_s22 + $0x70] sm:$0xf] }
  0x3d   : > { %718 = vmatmul.bf16.gmra.mxu1 %v1106_v38  ;;  %758 = vmatmul.bf16.gmra.mxu3 %v1170_v39  ;;  %232 = vst.msk [vmem:[#allocation2] sm:$0xff] %vm231_vm0, %v1400_v36  ;;  %v1301_v38 = vld [vmem:[%s1489_s22 + $0x74] sm:$0xf0]  ;;  %v1213_v39 = vld [vmem:[%s1489_s22 + $0xf0] sm:$0xf] }
  0x3e   : > { %233 = vst.msk [vmem:[#allocation2 + $0x8] sm:$0xff] %vm231_vm0, %v1400_v36  ;;  %v1150_v45 = vor.u32 %v1301_v38, %v1149_v37  ;;  %v1214_v46 = vor.u32 %v1317_v40, %v1213_v39 }
  0x3f   : > { %234 = vst.msk [vmem:[#allocation2 + $0x10] sm:$0xff] %vm231_vm0, %v1400_v36 }
  0x40   : > { %235 = vst.msk [vmem:[#allocation2 + $0x18] sm:$0xff] %vm231_vm0, %v1400_v36 }
  0x41   : > { %236 = vst.msk [vmem:[#allocation2 + $0x20] sm:$0xff] %vm231_vm0, %v1400_v36 }
  0x42   : > { %237 = vst.msk [vmem:[#allocation2 + $0x28] sm:$0xff] %vm231_vm0, %v1400_v36 }
  0x43   : > { %238 = vst.msk [vmem:[#allocation2 + $0x30] sm:$0xff] %vm231_vm0, %v1400_v36 }
  0x44   : > { %239 = vst.msk [vmem:[#allocation2 + $0x38] sm:$0xff] %vm231_vm0, %v1400_v36 }
  0x45   : > { %240 = vst.msk [vmem:[#allocation2 + $0x40] sm:$0xff] %vm231_vm0, %v1400_v36  ;;  %v265_v59 = vld [vmem:[#allocation2 + $0x8] sm:$0xff] }
  0x46   : > { %241 = vst.msk [vmem:[#allocation2 + $0x48] sm:$0xff] %vm231_vm0, %v1400_v36 }
  0x47   : > { %242 = vst.msk [vmem:[#allocation2 + $0x50] sm:$0xff] %vm231_vm0, %v1400_v36  ;;  %v267_v25 = vld [vmem:[#allocation2 + $0x18] sm:$0xff] }
  0x48   : > { %243 = vst.msk [vmem:[#allocation2 + $0x58] sm:$0xff] %vm231_vm0, %v1400_v36  ;;  %v268_v41 = vld [vmem:[#allocation2 + $0x20] sm:$0xff] }
  0x49   : > { %244 = vst.msk [vmem:[#allocation2 + $0x60] sm:$0xff] %vm231_vm0, %v1400_v36 }
  0x4a   : > { %245 = vst.msk [vmem:[#allocation2 + $0x68] sm:$0xff] %vm231_vm0, %v1400_v36 }
  0x4b   : > { %246 = vst.msk [vmem:[#allocation2 + $0x70] sm:$0xff] %vm231_vm0, %v1400_v36 }
  0x4c   : > { %634 = vmatmul.bf16.gmra.mxu0 %v1110_v48  ;;  %674 = vmatmul.bf16.gmra.mxu2 %v1174_v49  ;;  %v1218_v48 = vor.u32 %v1316_v43, %v1215_v44  ;;  %247 = vst.msk [vmem:[#allocation2 + $0x78] sm:$0xff] %vm231_vm0, %v1400_v36 }
  0x4d   : > { %723 = vmatmul.bf16.gmra.mxu1 %v1114_v50  ;;  %763 = vmatmul.bf16.gmra.mxu3 %v1178_v51  ;;  %248 = vst.msk [vmem:[#allocation2 + $0x80] sm:$0xff] %vm231_vm0, %v1400_v36  ;;  %v264_v50 = vld [vmem:[#allocation2] sm:$0xff] }
  0x4e   : > { %249 = vst.msk [vmem:[#allocation2 + $0x88] sm:$0xff] %vm231_vm0, %v1400_v36 }
  0x4f   : > { %250 = vst.msk [vmem:[#allocation2 + $0x90] sm:$0xff] %vm231_vm0, %v1400_v36 }
  0x50   : > { %251 = vst.msk [vmem:[#allocation2 + $0x98] sm:$0xff] %vm231_vm0, %v1400_v36 }
  0x51   : > { %252 = vst.msk [vmem:[#allocation2 + $0xa0] sm:$0xff] %vm231_vm0, %v1400_v36 }
  0x52   : > { %253 = vst.msk [vmem:[#allocation2 + $0xa8] sm:$0xff] %vm231_vm0, %v1400_v36 }
  0x53   : > { %254 = vst.msk [vmem:[#allocation2 + $0xb0] sm:$0xff] %vm231_vm0, %v1400_v36 }
  0x54   : > { %255 = vst.msk [vmem:[#allocation2 + $0xb8] sm:$0xff] %vm231_vm0, %v1400_v36  ;;  %v280_v55 = vld [vmem:[#allocation2 + $0x80] sm:$0xff] }
  0x55   : > { %256 = vst.msk [vmem:[#allocation2 + $0xc0] sm:$0xff] %vm231_vm0, %v1400_v36  ;;  %v281_v4 = vld [vmem:[#allocation2 + $0x88] sm:$0xff] }
  0x56   : > { %257 = vst.msk [vmem:[#allocation2 + $0xc8] sm:$0xff] %vm231_vm0, %v1400_v36 }
  0x57   : > { %258 = vst.msk [vmem:[#allocation2 + $0xd0] sm:$0xff] %vm231_vm0, %v1400_v36 }
  0x58   : > { %259 = vst.msk [vmem:[#allocation2 + $0xd8] sm:$0xff] %vm231_vm0, %v1400_v36 }
  0x59   : > { %260 = vst.msk [vmem:[#allocation2 + $0xe0] sm:$0xff] %vm231_vm0, %v1400_v36 }
  0x5a   : > { %261 = vst.msk [vmem:[#allocation2 + $0xe8] sm:$0xff] %vm231_vm0, %v1400_v36 }
  0x5b   : > { %262 = vst.msk [vmem:[#allocation2 + $0xf0] sm:$0xff] %vm231_vm0, %v1400_v36 }
  0x5c   : > { %639 = vmatmul.bf16.gmra.mxu0 %v1118_v60  ;;  %679 = vmatmul.bf16.gmra.mxu2 %v1182_v61  ;;  %263 = vst.msk [vmem:[#allocation2 + $0xf8] sm:$0xff] %vm231_vm0, %v1400_v36  ;;  %v1600_v61 = vld [vmem:[%s1747_s2] ss:$0 sm:$0xff]  ;;  %v283_v36 = vld [vmem:[#allocation2 + $0x98] sm:$0xff] }
  0x5d   : > { %728 = vmatmul.bf16.gmra.mxu1 %v1122_v62  ;;  %768 = vmatmul.bf16.gmra.mxu3 %v1186_v63 }
  0x6c   : > { %644 = vmatmul.bf16.gmra.mxu0 %v1126_v8  ;;  %684 = vmatmul.bf16.gmra.mxu2 %v1190_v9  ;;  %v266_v9 = vld [vmem:[#allocation2 + $0x10] sm:$0xff] }
  0x6d   : > { %733 = vmatmul.bf16.gmra.mxu1 %v1130_v10  ;;  %773 = vmatmul.bf16.gmra.mxu3 %v1194_v11 }
  0x7c   : > { %649 = vmatmul.bf16.gmra.mxu0 %v1134_v20  ;;  %689 = vmatmul.bf16.gmra.mxu2 %v1198_v21  ;;  %v282_v20 = vld [vmem:[#allocation2 + $0x90] sm:$0xff] }
  0x7d   : > { %738 = vmatmul.bf16.gmra.mxu1 %v1138_v22  ;;  %778 = vmatmul.bf16.gmra.mxu3 %v1202_v23 }
  0x8c   : > { %654 = vmatmul.bf16.gmra.mxu0 %v1142_v32  ;;  %694 = vmatmul.bf16.gmra.mxu2 %v1206_v33 }
  0x8d   : > { %743 = vmatmul.bf16.gmra.mxu1 %v1146_v34  ;;  %783 = vmatmul.bf16.gmra.mxu3 %v1210_v35 }
  0x9c   : > { %659 = vmatmul.bf16.gmra.mxu0 %v1150_v45  ;;  %699 = vmatmul.bf16.gmra.mxu2 %v1214_v46 }
  0x9d   : > { %748 = vmatmul.bf16.gmra.mxu1 %v1154_v47  ;;  %788 = vmatmul.bf16.gmra.mxu3 %v1218_v48 }
  0xa9   : > { %v625_v49 = vpop.f32.mrf.mxu0 }
  0xaa   : > { %v714_v51 = vpop.f32.mrf.mxu1 }
  0xab   : > { %v715_v52 = vadd.f32 %v714_v51, %v625_v49 }
  0xad   : > { %v794_v53 = vadd.f32 %v715_v52, %v264_v50  ;;  %v284_v52 = vld [vmem:[#allocation2 + $0xa0] sm:$0xff] }
  0xaf   : > { %827 = vst.msk [vmem:[#allocation2] sm:$0xff] %vm231_vm0, %v794_v53  ;;  %v665_v54 = vpop.f32.mrf.mxu2 }
  0xb0   : > { %v754_v56 = vpop.f32.mrf.mxu3 }
  0xb1   : > { %v755_v57 = vadd.f32 %v754_v56, %v665_v54  ;;  %v627_v58 = vpop.f32.mrf.mxu0 }
  0xb2   : > { %v716_v60 = vpop.f32.mrf.mxu1 }
  0xb3   : > { %v810_v62 = vadd.f32 %v755_v57, %v280_v55  ;;  %v717_v63 = vadd.f32 %v716_v60, %v627_v58  ;;  %v269_v57 = vld [vmem:[#allocation2 + $0x28] sm:$0xff] }
  0xb5   : > { %843 = vst.msk [vmem:[#allocation2 + $0x80] sm:$0xff] %vm231_vm0, %v810_v62  ;;  %v795_v0 = vadd.f32 %v717_v63, %v265_v59 }
  0xb6   : > { %v862_v1 = vld [vmem:[#allocation2] sm:$0xff] }
  0xb7   : > { %v898_v2 = vadd.f32 %v1600_v61, %v862_v1  ;;  %828 = vst.msk [vmem:[#allocation2 + $0x8] sm:$0xff] %vm231_vm0, %v795_v0  ;;  %v667_v3 = vpop.f32.mrf.mxu2 }
  0xb8   : > { %v756_v5 = vpop.f32.mrf.mxu3 }
  0xb9   : > { %v930_v6 = vmax.f32 %v898_v2, 0.0  ;;  %v757_v7 = vadd.f32 %v756_v5, %v667_v3  ;;  %v630_v8 = vpop.f32.mrf.mxu0  ;;  %v285_v5 = vld [vmem:[#allocation2 + $0xa8] sm:$0xff] }
  0xba   : > { %v719_v10 = vpop.f32.mrf.mxu1 }
  0xbb   : > { %962 = vst.msk [vmem:[%s1610_s7] sm:$0xff] %vm231_vm0, %v930_v6  ;;  %v811_v11 = vadd.f32 %v757_v7, %v281_v4  ;;  %v720_v12 = vadd.f32 %v719_v10, %v630_v8  ;;  %v270_v10 = vld [vmem:[#allocation2 + $0x30] sm:$0xff] }
  0xbc   : > { %v878_v13 = vld [vmem:[#allocation2 + $0x80] sm:$0xff] }
  0xbd   : > { %v914_v14 = vadd.f32 %v1600_v61, %v878_v13  ;;  %844 = vst.msk [vmem:[#allocation2 + $0x88] sm:$0xff] %vm231_vm0, %v811_v11  ;;  %v796_v15 = vadd.f32 %v720_v12, %v266_v9 }
  0xbe   : > { %v863_v16 = vld [vmem:[#allocation2 + $0x8] sm:$0xff] }
  0xbf   : > { %v946_v17 = vmax.f32 %v914_v14, 0.0  ;;  %v899_v18 = vadd.f32 %v1600_v61, %v863_v16  ;;  %829 = vst.msk [vmem:[#allocation2 + $0x10] sm:$0xff] %vm231_vm0, %v796_v15  ;;  %v670_v19 = vpop.f32.mrf.mxu2 }
  0xc0   : > { %v759_v21 = vpop.f32.mrf.mxu3 }
  0xc1   : > { %978 = vst.msk [vmem:[%s1610_s7 + $0x80] sm:$0xff] %vm231_vm0, %v946_v17  ;;  %v931_v22 = vmax.f32 %v899_v18, 0.0  ;;  %v760_v23 = vadd.f32 %v759_v21, %v670_v19  ;;  %v632_v24 = vpop.f32.mrf.mxu0  ;;  %v286_v21 = vld [vmem:[#allocation2 + $0xb0] sm:$0xff] }
  0xc2   : > { %v721_v26 = vpop.f32.mrf.mxu1 }
  0xc3   : > { %963 = vst.msk [vmem:[%s1610_s7 + $0x8] sm:$0xff] %vm231_vm0, %v931_v22  ;;  %v812_v27 = vadd.f32 %v760_v23, %v282_v20  ;;  %v722_v28 = vadd.f32 %v721_v26, %v632_v24  ;;  %v271_v26 = vld [vmem:[#allocation2 + $0x38] sm:$0xff] }
  0xc4   : > { %v879_v29 = vld [vmem:[#allocation2 + $0x88] sm:$0xff] }
  0xc5   : > { %v915_v30 = vadd.f32 %v1600_v61, %v879_v29  ;;  %845 = vst.msk [vmem:[#allocation2 + $0x90] sm:$0xff] %vm231_vm0, %v812_v27  ;;  %v797_v31 = vadd.f32 %v722_v28, %v267_v25 }
  0xc6   : > { %v864_v32 = vld [vmem:[#allocation2 + $0x10] sm:$0xff] }
  0xc7   : > { %v947_v33 = vmax.f32 %v915_v30, 0.0  ;;  %v900_v34 = vadd.f32 %v1600_v61, %v864_v32  ;;  %830 = vst.msk [vmem:[#allocation2 + $0x18] sm:$0xff] %vm231_vm0, %v797_v31  ;;  %v672_v35 = vpop.f32.mrf.mxu2 }
  0xc8   : > { %v761_v37 = vpop.f32.mrf.mxu3 }
  0xc9   : > { %979 = vst.msk [vmem:[%s1610_s7 + $0x88] sm:$0xff] %vm231_vm0, %v947_v33  ;;  %v932_v38 = vmax.f32 %v900_v34, 0.0  ;;  %v762_v39 = vadd.f32 %v761_v37, %v672_v35  ;;  %v635_v40 = vpop.f32.mrf.mxu0  ;;  %v287_v37 = vld [vmem:[#allocation2 + $0xb8] sm:$0xff] }
  0xca   : > { %v724_v42 = vpop.f32.mrf.mxu1 }
  0xcb   : > { %964 = vst.msk [vmem:[%s1610_s7 + $0x10] sm:$0xff] %vm231_vm0, %v932_v38  ;;  %v813_v43 = vadd.f32 %v762_v39, %v283_v36  ;;  %v725_v44 = vadd.f32 %v724_v42, %v635_v40  ;;  %v272_v42 = vld [vmem:[#allocation2 + $0x40] sm:$0xff] }
  0xcc   : > { %v880_v45 = vld [vmem:[#allocation2 + $0x90] sm:$0xff] }
  0xcd   : > { %v916_v46 = vadd.f32 %v1600_v61, %v880_v45  ;;  %846 = vst.msk [vmem:[#allocation2 + $0x98] sm:$0xff] %vm231_vm0, %v813_v43  ;;  %v798_v47 = vadd.f32 %v725_v44, %v268_v41 }
  0xce   : > { %v865_v48 = vld [vmem:[#allocation2 + $0x18] sm:$0xff] }
  0xcf   : > { %v948_v49 = vmax.f32 %v916_v46, 0.0  ;;  %v901_v50 = vadd.f32 %v1600_v61, %v865_v48  ;;  %831 = vst.msk [vmem:[#allocation2 + $0x20] sm:$0xff] %vm231_vm0, %v798_v47  ;;  %v675_v51 = vpop.f32.mrf.mxu2 }
  0xd0   : > { %v764_v53 = vpop.f32.mrf.mxu3 }
  0xd1   : > { %980 = vst.msk [vmem:[%s1610_s7 + $0x90] sm:$0xff] %vm231_vm0, %v948_v49  ;;  %v933_v54 = vmax.f32 %v901_v50, 0.0  ;;  %v765_v55 = vadd.f32 %v764_v53, %v675_v51  ;;  %v637_v56 = vpop.f32.mrf.mxu0  ;;  %v288_v53 = vld [vmem:[#allocation2 + $0xc0] sm:$0xff] }
  0xd2   : > { %v726_v58 = vpop.f32.mrf.mxu1 }
  0xd3   : > { %965 = vst.msk [vmem:[%s1610_s7 + $0x18] sm:$0xff] %vm231_vm0, %v933_v54  ;;  %v814_v59 = vadd.f32 %v765_v55, %v284_v52  ;;  %v727_v60 = vadd.f32 %v726_v58, %v637_v56  ;;  %v273_v58 = vld [vmem:[#allocation2 + $0x48] sm:$0xff] }
  0xd4   : > { %v881_v62 = vld [vmem:[#allocation2 + $0x98] sm:$0xff] }
  0xd5   : > { %v917_v63 = vadd.f32 %v1600_v61, %v881_v62  ;;  %847 = vst.msk [vmem:[#allocation2 + $0xa0] sm:$0xff] %vm231_vm0, %v814_v59  ;;  %v799_v0 = vadd.f32 %v727_v60, %v269_v57 }
  0xd6   : > { %v866_v1 = vld [vmem:[#allocation2 + $0x20] sm:$0xff] }
  0xd7   : > { %v949_v2 = vmax.f32 %v917_v63, 0.0  ;;  %v902_v3 = vadd.f32 %v1600_v61, %v866_v1  ;;  %832 = vst.msk [vmem:[#allocation2 + $0x28] sm:$0xff] %vm231_vm0, %v799_v0  ;;  %v677_v4 = vpop.f32.mrf.mxu2 }
  0xd8   : > { %v766_v6 = vpop.f32.mrf.mxu3 }
  0xd9   : > { %981 = vst.msk [vmem:[%s1610_s7 + $0x98] sm:$0xff] %vm231_vm0, %v949_v2  ;;  %v934_v7 = vmax.f32 %v902_v3, 0.0  ;;  %v767_v8 = vadd.f32 %v766_v6, %v677_v4  ;;  %v640_v9 = vpop.f32.mrf.mxu0  ;;  %v289_v6 = vld [vmem:[#allocation2 + $0xc8] sm:$0xff] }
  0xda   : > { %v729_v11 = vpop.f32.mrf.mxu1 }
  0xdb   : > { %966 = vst.msk [vmem:[%s1610_s7 + $0x20] sm:$0xff] %vm231_vm0, %v934_v7  ;;  %v815_v12 = vadd.f32 %v767_v8, %v285_v5  ;;  %v730_v13 = vadd.f32 %v729_v11, %v640_v9  ;;  %v274_v11 = vld [vmem:[#allocation2 + $0x50] sm:$0xff] }
  0xdc   : > { %v882_v14 = vld [vmem:[#allocation2 + $0xa0] sm:$0xff] }
  0xdd   : > { %v918_v15 = vadd.f32 %v1600_v61, %v882_v14  ;;  %848 = vst.msk [vmem:[#allocation2 + $0xa8] sm:$0xff] %vm231_vm0, %v815_v12  ;;  %v800_v16 = vadd.f32 %v730_v13, %v270_v10 }
  0xde   : > { %v867_v17 = vld [vmem:[#allocation2 + $0x28] sm:$0xff] }
  0xdf   : > { %v950_v18 = vmax.f32 %v918_v15, 0.0  ;;  %v903_v19 = vadd.f32 %v1600_v61, %v867_v17  ;;  %833 = vst.msk [vmem:[#allocation2 + $0x30] sm:$0xff] %vm231_vm0, %v800_v16  ;;  %v680_v20 = vpop.f32.mrf.mxu2 }
  0xe0   : > { %v769_v22 = vpop.f32.mrf.mxu3 }
  0xe1   : > { %982 = vst.msk [vmem:[%s1610_s7 + $0xa0] sm:$0xff] %vm231_vm0, %v950_v18  ;;  %v935_v23 = vmax.f32 %v903_v19, 0.0  ;;  %v770_v24 = vadd.f32 %v769_v22, %v680_v20  ;;  %v642_v25 = vpop.f32.mrf.mxu0  ;;  %v290_v22 = vld [vmem:[#allocation2 + $0xd0] sm:$0xff] }
  0xe2   : > { %v731_v27 = vpop.f32.mrf.mxu1 }
  0xe3   : > { %967 = vst.msk [vmem:[%s1610_s7 + $0x28] sm:$0xff] %vm231_vm0, %v935_v23  ;;  %v816_v28 = vadd.f32 %v770_v24, %v286_v21  ;;  %v732_v29 = vadd.f32 %v731_v27, %v642_v25  ;;  %v275_v27 = vld [vmem:[#allocation2 + $0x58] sm:$0xff] }
  0xe4   : > { %v883_v30 = vld [vmem:[#allocation2 + $0xa8] sm:$0xff] }
  0xe5   : > { %v919_v31 = vadd.f32 %v1600_v61, %v883_v30  ;;  %849 = vst.msk [vmem:[#allocation2 + $0xb0] sm:$0xff] %vm231_vm0, %v816_v28  ;;  %v801_v32 = vadd.f32 %v732_v29, %v271_v26 }
  0xe6   : > { %v868_v33 = vld [vmem:[#allocation2 + $0x30] sm:$0xff] }
  0xe7   : > { %v951_v34 = vmax.f32 %v919_v31, 0.0  ;;  %v904_v35 = vadd.f32 %v1600_v61, %v868_v33  ;;  %834 = vst.msk [vmem:[#allocation2 + $0x38] sm:$0xff] %vm231_vm0, %v801_v32  ;;  %v682_v36 = vpop.f32.mrf.mxu2 }
  0xe8   : > { %v771_v38 = vpop.f32.mrf.mxu3 }
  0xe9   : > { %983 = vst.msk [vmem:[%s1610_s7 + $0xa8] sm:$0xff] %vm231_vm0, %v951_v34  ;;  %v936_v39 = vmax.f32 %v904_v35, 0.0  ;;  %v772_v40 = vadd.f32 %v771_v38, %v682_v36  ;;  %v645_v41 = vpop.f32.mrf.mxu0  ;;  %v291_v38 = vld [vmem:[#allocation2 + $0xd8] sm:$0xff] }
  0xea   : > { %v734_v43 = vpop.f32.mrf.mxu1 }
  0xeb   : > { %968 = vst.msk [vmem:[%s1610_s7 + $0x30] sm:$0xff] %vm231_vm0, %v936_v39  ;;  %v817_v44 = vadd.f32 %v772_v40, %v287_v37  ;;  %v735_v45 = vadd.f32 %v734_v43, %v645_v41  ;;  %v276_v43 = vld [vmem:[#allocation2 + $0x60] sm:$0xff] }
  0xec   : > { %v884_v46 = vld [vmem:[#allocation2 + $0xb0] sm:$0xff] }
  0xed   : > { %v920_v47 = vadd.f32 %v1600_v61, %v884_v46  ;;  %850 = vst.msk [vmem:[#allocation2 + $0xb8] sm:$0xff] %vm231_vm0, %v817_v44  ;;  %v802_v48 = vadd.f32 %v735_v45, %v272_v42 }
  0xee   : > { %v869_v49 = vld [vmem:[#allocation2 + $0x38] sm:$0xff] }
  0xef   : > { %v952_v50 = vmax.f32 %v920_v47, 0.0  ;;  %v905_v51 = vadd.f32 %v1600_v61, %v869_v49  ;;  %835 = vst.msk [vmem:[#allocation2 + $0x40] sm:$0xff] %vm231_vm0, %v802_v48  ;;  %v685_v52 = vpop.f32.mrf.mxu2 }
  0xf0   : > { %v774_v54 = vpop.f32.mrf.mxu3 }
  0xf1   : > { %984 = vst.msk [vmem:[%s1610_s7 + $0xb0] sm:$0xff] %vm231_vm0, %v952_v50  ;;  %v937_v55 = vmax.f32 %v905_v51, 0.0  ;;  %v775_v56 = vadd.f32 %v774_v54, %v685_v52  ;;  %v647_v57 = vpop.f32.mrf.mxu0  ;;  %v292_v54 = vld [vmem:[#allocation2 + $0xe0] sm:$0xff] }
  0xf2   : > { %v736_v59 = vpop.f32.mrf.mxu1 }
  0xf3   : > { %969 = vst.msk [vmem:[%s1610_s7 + $0x38] sm:$0xff] %vm231_vm0, %v937_v55  ;;  %v818_v60 = vadd.f32 %v775_v56, %v288_v53  ;;  %v737_v62 = vadd.f32 %v736_v59, %v647_v57  ;;  %v277_v59 = vld [vmem:[#allocation2 + $0x68] sm:$0xff] }
  0xf4   : > { %v885_v63 = vld [vmem:[#allocation2 + $0xb8] sm:$0xff] }
  0xf5   : > { %v921_v0 = vadd.f32 %v1600_v61, %v885_v63  ;;  %851 = vst.msk [vmem:[#allocation2 + $0xc0] sm:$0xff] %vm231_vm0, %v818_v60  ;;  %v803_v1 = vadd.f32 %v737_v62, %v273_v58 }
  0xf6   : > { %v870_v2 = vld [vmem:[#allocation2 + $0x40] sm:$0xff] }
  0xf7   : > { %v953_v3 = vmax.f32 %v921_v0, 0.0  ;;  %v906_v4 = vadd.f32 %v1600_v61, %v870_v2  ;;  %836 = vst.msk [vmem:[#allocation2 + $0x48] sm:$0xff] %vm231_vm0, %v803_v1  ;;  %v687_v5 = vpop.f32.mrf.mxu2 }
  0xf8   : > { %v776_v7 = vpop.f32.mrf.mxu3 }
  0xf9   : > { %985 = vst.msk [vmem:[%s1610_s7 + $0xb8] sm:$0xff] %vm231_vm0, %v953_v3  ;;  %v938_v8 = vmax.f32 %v906_v4, 0.0  ;;  %v777_v9 = vadd.f32 %v776_v7, %v687_v5  ;;  %v650_v10 = vpop.f32.mrf.mxu0  ;;  %v293_v7 = vld [vmem:[#allocation2 + $0xe8] sm:$0xff] }
  0xfa   : > { %v739_v12 = vpop.f32.mrf.mxu1 }
  0xfb   : > { %970 = vst.msk [vmem:[%s1610_s7 + $0x40] sm:$0xff] %vm231_vm0, %v938_v8  ;;  %v819_v13 = vadd.f32 %v777_v9, %v289_v6  ;;  %v740_v14 = vadd.f32 %v739_v12, %v650_v10  ;;  %v278_v12 = vld [vmem:[#allocation2 + $0x70] sm:$0xff] }
  0xfc   : > { %v886_v15 = vld [vmem:[#allocation2 + $0xc0] sm:$0xff] }
  0xfd   : > { %v922_v16 = vadd.f32 %v1600_v61, %v886_v15  ;;  %852 = vst.msk [vmem:[#allocation2 + $0xc8] sm:$0xff] %vm231_vm0, %v819_v13  ;;  %v804_v17 = vadd.f32 %v740_v14, %v274_v11 }
  0xfe   : > { %v871_v18 = vld [vmem:[#allocation2 + $0x48] sm:$0xff] }
  0xff   : > { %v954_v19 = vmax.f32 %v922_v16, 0.0  ;;  %v907_v20 = vadd.f32 %v1600_v61, %v871_v18  ;;  %837 = vst.msk [vmem:[#allocation2 + $0x50] sm:$0xff] %vm231_vm0, %v804_v17  ;;  %v690_v21 = vpop.f32.mrf.mxu2 }
 0x100   : > { %v779_v23 = vpop.f32.mrf.mxu3 }
 0x101   : > { %986 = vst.msk [vmem:[%s1610_s7 + $0xc0] sm:$0xff] %vm231_vm0, %v954_v19  ;;  %v939_v24 = vmax.f32 %v907_v20, 0.0  ;;  %v780_v25 = vadd.f32 %v779_v23, %v690_v21  ;;  %v652_v26 = vpop.f32.mrf.mxu0  ;;  %v294_v23 = vld [vmem:[#allocation2 + $0xf0] sm:$0xff] }
 0x102   : > { %v741_v28 = vpop.f32.mrf.mxu1 }
 0x103   : > { %971 = vst.msk [vmem:[%s1610_s7 + $0x48] sm:$0xff] %vm231_vm0, %v939_v24  ;;  %v820_v29 = vadd.f32 %v780_v25, %v290_v22  ;;  %v742_v30 = vadd.f32 %v741_v28, %v652_v26  ;;  %v279_v28 = vld [vmem:[#allocation2 + $0x78] sm:$0xff] }
 0x104   : > { %v887_v31 = vld [vmem:[#allocation2 + $0xc8] sm:$0xff] }
 0x105   : > { %v923_v32 = vadd.f32 %v1600_v61, %v887_v31  ;;  %853 = vst.msk [vmem:[#allocation2 + $0xd0] sm:$0xff] %vm231_vm0, %v820_v29  ;;  %v805_v33 = vadd.f32 %v742_v30, %v275_v27 }
 0x106   : > { %v872_v34 = vld [vmem:[#allocation2 + $0x50] sm:$0xff] }
 0x107   : > { %v955_v35 = vmax.f32 %v923_v32, 0.0  ;;  %v908_v36 = vadd.f32 %v1600_v61, %v872_v34  ;;  %838 = vst.msk [vmem:[#allocation2 + $0x58] sm:$0xff] %vm231_vm0, %v805_v33  ;;  %v692_v37 = vpop.f32.mrf.mxu2 }
 0x108   : > { %v781_v39 = vpop.f32.mrf.mxu3 }
 0x109   : > { %987 = vst.msk [vmem:[%s1610_s7 + $0xc8] sm:$0xff] %vm231_vm0, %v955_v35  ;;  %v940_v40 = vmax.f32 %v908_v36, 0.0  ;;  %v782_v41 = vadd.f32 %v781_v39, %v692_v37  ;;  %v655_v42 = vpop.f32.mrf.mxu0  ;;  %v295_v39 = vld [vmem:[#allocation2 + $0xf8] sm:$0xff] }
 0x10a   : > { %v744_v44 = vpop.f32.mrf.mxu1 }
 0x10b   : > { %972 = vst.msk [vmem:[%s1610_s7 + $0x50] sm:$0xff] %vm231_vm0, %v940_v40  ;;  %v821_v45 = vadd.f32 %v782_v41, %v291_v38  ;;  %v745_v46 = vadd.f32 %v744_v44, %v655_v42 }
 0x10c   : > { %v888_v47 = vld [vmem:[#allocation2 + $0xd0] sm:$0xff] }
 0x10d   : > { %v924_v48 = vadd.f32 %v1600_v61, %v888_v47  ;;  %854 = vst.msk [vmem:[#allocation2 + $0xd8] sm:$0xff] %vm231_vm0, %v821_v45  ;;  %v806_v49 = vadd.f32 %v745_v46, %v276_v43 }
 0x10e   : > { %v873_v50 = vld [vmem:[#allocation2 + $0x58] sm:$0xff] }
 0x10f   : > { %v956_v51 = vmax.f32 %v924_v48, 0.0  ;;  %v909_v52 = vadd.f32 %v1600_v61, %v873_v50  ;;  %839 = vst.msk [vmem:[#allocation2 + $0x60] sm:$0xff] %vm231_vm0, %v806_v49  ;;  %v695_v53 = vpop.f32.mrf.mxu2 }
 0x110   : > { %v784_v55 = vpop.f32.mrf.mxu3 }
 0x111   : > { %988 = vst.msk [vmem:[%s1610_s7 + $0xd0] sm:$0xff] %vm231_vm0, %v956_v51  ;;  %v941_v56 = vmax.f32 %v909_v52, 0.0  ;;  %v785_v57 = vadd.f32 %v784_v55, %v695_v53  ;;  %v657_v58 = vpop.f32.mrf.mxu0 }
 0x112   : > { %v746_v60 = vpop.f32.mrf.mxu1 }
 0x113   : > { %973 = vst.msk [vmem:[%s1610_s7 + $0x58] sm:$0xff] %vm231_vm0, %v941_v56  ;;  %v822_v62 = vadd.f32 %v785_v57, %v292_v54  ;;  %v747_v63 = vadd.f32 %v746_v60, %v657_v58 }
 0x114   : > { %v889_v0 = vld [vmem:[#allocation2 + $0xd8] sm:$0xff] }
 0x115   : > { %v925_v1 = vadd.f32 %v1600_v61, %v889_v0  ;;  %855 = vst.msk [vmem:[#allocation2 + $0xe0] sm:$0xff] %vm231_vm0, %v822_v62  ;;  %v807_v2 = vadd.f32 %v747_v63, %v277_v59 }
 0x116   : > { %v874_v3 = vld [vmem:[#allocation2 + $0x60] sm:$0xff] }
 0x117   : > { %v957_v4 = vmax.f32 %v925_v1, 0.0  ;;  %v910_v5 = vadd.f32 %v1600_v61, %v874_v3  ;;  %840 = vst.msk [vmem:[#allocation2 + $0x68] sm:$0xff] %vm231_vm0, %v807_v2  ;;  %v697_v6 = vpop.f32.mrf.mxu2 }
 0x118   : > { %v786_v8 = vpop.f32.mrf.mxu3 }
 0x119   : > { %989 = vst.msk [vmem:[%s1610_s7 + $0xd8] sm:$0xff] %vm231_vm0, %v957_v4  ;;  %v942_v9 = vmax.f32 %v910_v5, 0.0  ;;  %v787_v10 = vadd.f32 %v786_v8, %v697_v6  ;;  %v660_v11 = vpop.f32.mrf.mxu0 }
 0x11a   : > { %v749_v13 = vpop.f32.mrf.mxu1 }
 0x11b   : > { %974 = vst.msk [vmem:[%s1610_s7 + $0x60] sm:$0xff] %vm231_vm0, %v942_v9  ;;  %v823_v14 = vadd.f32 %v787_v10, %v293_v7  ;;  %v750_v15 = vadd.f32 %v749_v13, %v660_v11 }
 0x11c   : > { %v890_v16 = vld [vmem:[#allocation2 + $0xe0] sm:$0xff] }
 0x11d   : > { %v926_v17 = vadd.f32 %v1600_v61, %v890_v16  ;;  %856 = vst.msk [vmem:[#allocation2 + $0xe8] sm:$0xff] %vm231_vm0, %v823_v14  ;;  %v808_v18 = vadd.f32 %v750_v15, %v278_v12 }
 0x11e   : > { %v875_v19 = vld [vmem:[#allocation2 + $0x68] sm:$0xff] }
 0x11f   : > { %v958_v20 = vmax.f32 %v926_v17, 0.0  ;;  %v911_v21 = vadd.f32 %v1600_v61, %v875_v19  ;;  %841 = vst.msk [vmem:[#allocation2 + $0x70] sm:$0xff] %vm231_vm0, %v808_v18  ;;  %v700_v22 = vpop.f32.mrf.mxu2 }
 0x120   : > { %v789_v24 = vpop.f32.mrf.mxu3 }
 0x121   : > { %990 = vst.msk [vmem:[%s1610_s7 + $0xe0] sm:$0xff] %vm231_vm0, %v958_v20  ;;  %v943_v25 = vmax.f32 %v911_v21, 0.0  ;;  %v790_v26 = vadd.f32 %v789_v24, %v700_v22  ;;  %v662_v27 = vpop.f32.mrf.mxu0 }
 0x122   : > { %v751_v29 = vpop.f32.mrf.mxu1 }
 0x123   : > { %975 = vst.msk [vmem:[%s1610_s7 + $0x68] sm:$0xff] %vm231_vm0, %v943_v25  ;;  %v824_v30 = vadd.f32 %v790_v26, %v294_v23  ;;  %v752_v31 = vadd.f32 %v751_v29, %v662_v27 }
 0x124   : > { %v891_v32 = vld [vmem:[#allocation2 + $0xe8] sm:$0xff] }
 0x125   : > { %v927_v33 = vadd.f32 %v1600_v61, %v891_v32  ;;  %857 = vst.msk [vmem:[#allocation2 + $0xf0] sm:$0xff] %vm231_vm0, %v824_v30  ;;  %v809_v34 = vadd.f32 %v752_v31, %v279_v28 }
 0x126   : > { %v876_v35 = vld [vmem:[#allocation2 + $0x70] sm:$0xff] }
 0x127   : > { %v959_v36 = vmax.f32 %v927_v33, 0.0  ;;  %v912_v37 = vadd.f32 %v1600_v61, %v876_v35  ;;  %842 = vst.msk [vmem:[#allocation2 + $0x78] sm:$0xff] %vm231_vm0, %v809_v34  ;;  %v702_v38 = vpop.f32.mrf.mxu2 }
 0x128   : > { %v791_v40 = vpop.f32.mrf.mxu3 }
 0x129   : > { %991 = vst.msk [vmem:[%s1610_s7 + $0xe8] sm:$0xff] %vm231_vm0, %v959_v36  ;;  %v944_v41 = vmax.f32 %v912_v37, 0.0  ;;  %v792_v42 = vadd.f32 %v791_v40, %v702_v38 }
 0x12b   : > { %976 = vst.msk [vmem:[%s1610_s7 + $0x70] sm:$0xff] %vm231_vm0, %v944_v41  ;;  %v825_v43 = vadd.f32 %v792_v42, %v295_v39 }
 0x12c   : > { %v892_v44 = vld [vmem:[#allocation2 + $0xf0] sm:$0xff] }
 0x12d   : > { %v928_v45 = vadd.f32 %v1600_v61, %v892_v44  ;;  %858 = vst.msk [vmem:[#allocation2 + $0xf8] sm:$0xff] %vm231_vm0, %v825_v43 }
 0x12e   : > { %v877_v46 = vld [vmem:[#allocation2 + $0x78] sm:$0xff] }
 0x12f   : > { %v960_v47 = vmax.f32 %v928_v45, 0.0  ;;  %v913_v48 = vadd.f32 %v1600_v61, %v877_v46 }
 0x131   : > { %992 = vst.msk [vmem:[%s1610_s7 + $0xf0] sm:$0xff] %vm231_vm0, %v960_v47  ;;  %v945_v49 = vmax.f32 %v913_v48, 0.0 }
 0x133   : > { %977 = vst.msk [vmem:[%s1610_s7 + $0x78] sm:$0xff] %vm231_vm0, %v945_v49 }
 0x134   : > { %v893_v50 = vld [vmem:[#allocation2 + $0xf8] sm:$0xff] }
 0x135   : > { %v929_v51 = vadd.f32 %v1600_v61, %v893_v50 }
 0x137   : > { %v961_v52 = vmax.f32 %v929_v51, 0.0 }
 0x139   : > { %993 = vst.msk [vmem:[%s1610_s7 + $0xf8] sm:$0xff] %vm231_vm0, %v961_v52 }
 0x13a PF: > { %s13_s14 = sadd.s32 1, %s1398_s14   ;;  %s1749_s12 = smov %s1394_s13 }
 0x13b   : > { %p10_p5 = scmp.ge.s32.totalorder %s13_s14, 4   ;;  %s1750_s13 = smov %s1752_s15 }
 0x13d   :  { %12 = sbr.rel (!%p10_p5) target bundleno = 2 (0x2), region = 73 }

// kernel: resnet_encoder_mtan_forward.21
= control target key start
LH: loop header
LB: loop body
LE: loop exit
PB: predicated region body
PF: predicated region fallthrough
CT: control target
= control target key end

     0   :  { %s938_s12 = smov 0   ;;  %s940_s13 = smov 0   ;;  %s1142_s0 = inlined_call_operand.vmem [shape: bf16[128,640], index: 0, kind: input, shape index: {}]   ;;  %s1143_s1 = inlined_call_operand.vmem [shape: bf16[640,64], index: 1, kind: input, shape index: {}]   ;;  %s1144_s2 = inlined_call_operand.vmem [shape: f32[1,64], index: 2, kind: input, shape index: {}]   ;;  %s1145_s3 = inlined_call_operand.vmem [shape: f32[128,64], index: 3, kind: output, shape index: {}]  }
   0x1   :  { %s942_s14 = smov 0   ;;  %s944_s15 = smov 0  }
   0x2   :  { %s946_s16 = smov 0  }
   0x3 LB: > { %s22_s17 = sadd.s32 1, %s911_s15  ;;  %p41_p1 = scmp.ne.s32.totalorder %s903_s13, %s899_s12  ;;  %s915_s16 = sphi %s946_s16, %s13_s16   ;;  %s911_s15 = sphi %s944_s15, %s1149_s15   ;;  %s907_s14 = sphi %s942_s14, %s1148_s14   ;;  %s903_s13 = sphi %s940_s13, %s1147_s13   ;;  %s899_s12 = sphi %s938_s12, %s1146_s12  }
   0x4   : > { %p23_p0 = scmp.ge.s32.totalorder %s22_s17, 5  ;;  %p42_p2 = scmp.eq.s32.totalorder %s915_s16, 0 }
   0x5   : > { %s34_s19 = sadd.s32 1, %s903_s13  ;;  %p718_p5 = scmp.ge.s32.totalorder %s915_s16, 5 }
   0x6   : > { %s1151_s17 = smov (%p23_p0, %s22_s17), 0  ;;  %p43_p3 = por %p42_p2, %p41_p1 }
   0x7   : > { %s30_s18 = ssub.s32 %s911_s15, %s1151_s17  ;;  %143 = sbr.rel (%p718_p5) target bundleno = 32 (0x20), region = 20 }
   0x8   : > { %p32_p4 = scmp.eq.s32.totalorder %s30_s18, 0 }
   0xa   : > { %s973_s20 = scalar_select %p32_p4, %s903_s13, %s34_s19  }
   0xc   : > { %146 = sbr.rel (!%p43_p3) target bundleno = 32 (0x20), region = 24  ;;  %s148_s21 = sand.u32 (%p43_p3), 1, %s903_s13  }
   0xd   : > { %s720_s22 = sshll.u32 (%p43_p3), %s911_s15, 2  ;;  %s719_s23 = sshll.u32 (%p43_p3), %s148_s21, 6 }
   0xe   : > { %s981_s26 = scalar_lea.vmem (%p43_p3), %s1142_s0, %s720_s22  ;;  %s150_s27 = scalar_lea.vmem (%p43_p3), [#allocation3], %s719_s23 }
   0xf   : > { %v172_v0 = vld [vmem:[%s981_s26] sm:$0xf] (%p43_p3)  ;;  %v174_v1 = vld [vmem:[%s981_s26 + $0x14] sm:$0xf] (%p43_p3)  ;;  %v176_v2 = vld [vmem:[%s981_s26 + $0x28] sm:$0xf] (%p43_p3) }
  0x10   : > { %173 = vst [vmem:[%s150_s27] sm:$0xf] (%p43_p3), %v172_v0  ;;  %v178_v3 = vld [vmem:[%s981_s26 + $0x3c] sm:$0xf] (%p43_p3)  ;;  %v180_v4 = vld [vmem:[%s981_s26 + $0x50] sm:$0xf] (%p43_p3) }
  0x11   : > { %175 = vst [vmem:[%s150_s27 + $0x4] sm:$0xf] %v174_v1  ;;  %v182_v5 = vld [vmem:[%s981_s26 + $0x64] sm:$0xf]  ;;  %v184_v6 = vld [vmem:[%s981_s26 + $0x78] sm:$0xf] }
  0x12   : > { %177 = vst [vmem:[%s150_s27 + $0x8] sm:$0xf] %v176_v2  ;;  %v186_v7 = vld [vmem:[%s981_s26 + $0x8c] sm:$0xf]  ;;  %v188_v8 = vld [vmem:[%s981_s26 + $0xa0] sm:$0xf] }
  0x13   : > { %179 = vst [vmem:[%s150_s27 + $0xc] sm:$0xf] %v178_v3  ;;  %v190_v9 = vld [vmem:[%s981_s26 + $0xb4] sm:$0xf]  ;;  %v192_v10 = vld [vmem:[%s981_s26 + $0xc8] sm:$0xf] }
  0x14   : > { %181 = vst [vmem:[%s150_s27 + $0x10] sm:$0xf] %v180_v4  ;;  %v194_v11 = vld [vmem:[%s981_s26 + $0xdc] sm:$0xf]  ;;  %v196_v12 = vld [vmem:[%s981_s26 + $0xf0] sm:$0xf] }
  0x15   : > { %183 = vst [vmem:[%s150_s27 + $0x14] sm:$0xf] %v182_v5  ;;  %v198_v13 = vld [vmem:[%s981_s26 + $0x104] sm:$0xf]  ;;  %v200_v14 = vld [vmem:[%s981_s26 + $0x118] sm:$0xf] }
  0x16   : > { %185 = vst [vmem:[%s150_s27 + $0x18] sm:$0xf] %v184_v6  ;;  %v202_v15 = vld [vmem:[%s981_s26 + $0x12c] sm:$0xf] }
  0x17   : > { %187 = vst [vmem:[%s150_s27 + $0x1c] sm:$0xf] %v186_v7 }
  0x18   : > { %189 = vst [vmem:[%s150_s27 + $0x20] sm:$0xf] %v188_v8 }
  0x19   : > { %191 = vst [vmem:[%s150_s27 + $0x24] sm:$0xf] %v190_v9 }
  0x1a   : > { %193 = vst [vmem:[%s150_s27 + $0x28] sm:$0xf] %v192_v10 }
  0x1b   : > { %195 = vst [vmem:[%s150_s27 + $0x2c] sm:$0xf] %v194_v11 }
  0x1c   : > { %197 = vst [vmem:[%s150_s27 + $0x30] sm:$0xf] %v196_v12 }
  0x1d   : > { %199 = vst [vmem:[%s150_s27 + $0x34] sm:$0xf] %v198_v13 }
  0x1e   : > { %201 = vst [vmem:[%s150_s27 + $0x38] sm:$0xf] %v200_v14 }
  0x1f   : > { %203 = vst [vmem:[%s150_s27 + $0x3c] sm:$0xf] %v202_v15 }
  0x20 PF: > { %p721_p6 = scmp.ge.s32.totalorder %s915_s16, 1  ;;  %p267_p7 = scmp.lt.s32.totalorder %s915_s16, 6 }
  0x22   : > { %p268_p8 = pnand %p721_p6, %p267_p7 }
  0x23   : > { %s274_s28 = sand.u32 (!%p268_p8), 1, %s899_s12   ;;  %s723_s29 = sshll.u32 (!%p268_p8), %s907_s14, 4 }
  0x24   : > { %271 = sbr.rel (%p268_p8) target bundleno = 278 (0x116), region = 69  ;;  %s722_s30 = sshll.u32 (!%p268_p8), %s274_s28, 6 }
  0x25   : > { %p304_p9 = scmp.lt.s32.totalorder (!%p268_p8), %s723_s29, 79  ;;  %s1008_s8 = scalar_lea.vmem (!%p268_p8), [#allocation3], %s722_s30 }
  0x26   : > { %p725_p10 = scmp.ne.s32.totalorder (!%p268_p8), %s907_s14, 0 }
  0x29   : > { %s1153_s29 = smov (!%p304_p9, %s723_s29), 79  ;;  %318 = sbr.rel (%p725_p10) target bundleno = 63 (0x3f), region = 77 }
  0x2a   : > { %s724_s4 = sshll.u32 %s1153_s29, 2 }
  0x2b   : > { %s1006_s7 = scalar_lea.vmem %s1143_s1, %s724_s4 }
  0x2e   : > { %vm319_vm0 = vcmask 523264   ;;  %v917_v16 = vmov 0.0  }
  0x2f   : > { %320 = vst.msk [vmem:[#allocation2] sm:$0xff] %vm319_vm0, %v917_v16 }
  0x30   : > { %321 = vst.msk [vmem:[#allocation2 + $0x8] sm:$0xff] %vm319_vm0, %v917_v16 }
  0x31   : > { %322 = vst.msk [vmem:[#allocation2 + $0x10] sm:$0xff] %vm319_vm0, %v917_v16 }
  0x32   : > { %323 = vst.msk [vmem:[#allocation2 + $0x18] sm:$0xff] %vm319_vm0, %v917_v16 }
  0x33   : > { %324 = vst.msk [vmem:[#allocation2 + $0x20] sm:$0xff] %vm319_vm0, %v917_v16 }
  0x34   : > { %325 = vst.msk [vmem:[#allocation2 + $0x28] sm:$0xff] %vm319_vm0, %v917_v16 }
  0x35   : > { %326 = vst.msk [vmem:[#allocation2 + $0x30] sm:$0xff] %vm319_vm0, %v917_v16 }
  0x36   : > { %327 = vst.msk [vmem:[#allocation2 + $0x38] sm:$0xff] %vm319_vm0, %v917_v16 }
  0x37   : > { %328 = vst.msk [vmem:[#allocation2 + $0x40] sm:$0xff] %vm319_vm0, %v917_v16 }
  0x38   : > { %329 = vst.msk [vmem:[#allocation2 + $0x48] sm:$0xff] %vm319_vm0, %v917_v16 }
  0x39   : > { %330 = vst.msk [vmem:[#allocation2 + $0x50] sm:$0xff] %vm319_vm0, %v917_v16 }
  0x3a   : > { %331 = vst.msk [vmem:[#allocation2 + $0x58] sm:$0xff] %vm319_vm0, %v917_v16 }
  0x3b   : > { %332 = vst.msk [vmem:[#allocation2 + $0x60] sm:$0xff] %vm319_vm0, %v917_v16 }
  0x3c   : > { %333 = vst.msk [vmem:[#allocation2 + $0x68] sm:$0xff] %vm319_vm0, %v917_v16 }
  0x3d   : > { %334 = vst.msk [vmem:[#allocation2 + $0x70] sm:$0xff] %vm319_vm0, %v917_v16 }
  0x3e   : > { %335 = vst.msk [vmem:[#allocation2 + $0x78] sm:$0xff] %vm319_vm0, %v917_v16 }
  0x3f PF: > { %v810_v17 = vld [vmem:[%s1006_s7 + $0x38] sm:$0xff]  ;;  %v809_v18 = vld [vmem:[%s1006_s7 + $0x30] sm:$0xff]  ;;  %v808_v19 = vld [vmem:[%s1006_s7 + $0x28] sm:$0xff]  ;;  %vm545_vm1 = vcmask 523264   ;;  %p790_p11 = scmp.ne.s32.totalorder %s907_s14, 4 }
  0x40   : > { %480 = vmatpush.bf16.msra.mxu0 %v810_v17  ;;  %811 = vmatpush.bf16.msra.mxu1 %v810_v17  ;;  %v807_v20 = vld [vmem:[%s1006_s7 + $0x20] sm:$0xff]  ;;  %v806_v21 = vld [vmem:[%s1006_s7 + $0x18] sm:$0xff]  ;;  %v805_v22 = vld [vmem:[%s1006_s7 + $0x10] sm:$0xff] }
  0x41   : > { %812 = vmatpush.bf16.msra.mxu2 %v810_v17  ;;  %813 = vmatpush.bf16.msra.mxu3 %v810_v17  ;;  %v804_v23 = vld [vmem:[%s1006_s7 + $0x8] sm:$0xff]  ;;  %v803_v24 = vld [vmem:[%s1006_s7] sm:$0xff]  ;;  %v797_v26 = vld [vmem:[%s1008_s8 + $0x10] sm:$0xff] }
  0x42   : > { %v795_v25 = vld [vmem:[%s1008_s8] sm:$0xff]  ;;  %v801_v28 = vld [vmem:[%s1008_s8 + $0x30] sm:$0xff]  ;;  %v796_v29 = vld [vmem:[%s1008_s8 + $0x8] sm:$0xff] }
  0x43   : > { %v799_v27 = vld [vmem:[%s1008_s8 + $0x20] sm:$0xff]  ;;  %v798_v30 = vld [vmem:[%s1008_s8 + $0x18] sm:$0xff]  ;;  %v800_v31 = vld [vmem:[%s1008_s8 + $0x28] sm:$0xff] }
  0x44   : > { %481 = vmatpush.bf16.msra.mxu0 %v809_v18  ;;  %814 = vmatpush.bf16.msra.mxu1 %v809_v18  ;;  %v802_v32 = vld [vmem:[%s1008_s8 + $0x38] sm:$0xff]  ;;  %v336_v33 = vld [vmem:[#allocation2] sm:$0xff]  ;;  %v337_v41 = vld [vmem:[#allocation2 + $0x8] sm:$0xff] }
  0x45   : > { %815 = vmatpush.bf16.msra.mxu2 %v809_v18  ;;  %816 = vmatpush.bf16.msra.mxu3 %v809_v18  ;;  %v340_v34 = vld [vmem:[#allocation2 + $0x20] sm:$0xff]  ;;  %v341_v42 = vld [vmem:[#allocation2 + $0x28] sm:$0xff]  ;;  %v338_v53 = vld [vmem:[#allocation2 + $0x10] sm:$0xff] }
  0x46   : > { %v344_v39 = vld [vmem:[#allocation2 + $0x40] sm:$0xff]  ;;  %v345_v51 = vld [vmem:[#allocation2 + $0x48] sm:$0xff]  ;;  %v342_v54 = vld [vmem:[#allocation2 + $0x30] sm:$0xff] }
  0x47   : > { %v348_v40 = vld [vmem:[#allocation2 + $0x60] sm:$0xff]  ;;  %v349_v52 = vld [vmem:[#allocation2 + $0x68] sm:$0xff]  ;;  %v346_v63 = vld [vmem:[#allocation2 + $0x50] sm:$0xff] }
  0x48   : > { %482 = vmatpush.bf16.msra.mxu0 %v808_v19  ;;  %817 = vmatpush.bf16.msra.mxu1 %v808_v19  ;;  %v350_v0 = vld [vmem:[#allocation2 + $0x70] sm:$0xff]  ;;  %v339_v1 = vld [vmem:[#allocation2 + $0x18] sm:$0xff] }
  0x49   : > { %818 = vmatpush.bf16.msra.mxu2 %v808_v19  ;;  %819 = vmatpush.bf16.msra.mxu3 %v808_v19  ;;  %v343_v2 = vld [vmem:[#allocation2 + $0x38] sm:$0xff] }
  0x4a   : > { %v347_v11 = vld [vmem:[#allocation2 + $0x58] sm:$0xff] }
  0x4b   : > { %v351_v12 = vld [vmem:[#allocation2 + $0x78] sm:$0xff] }
  0x4c   : > { %483 = vmatpush.bf16.msra.mxu0 %v807_v20  ;;  %820 = vmatpush.bf16.msra.mxu1 %v807_v20 }
  0x4d   : > { %821 = vmatpush.bf16.msra.mxu2 %v807_v20  ;;  %822 = vmatpush.bf16.msra.mxu3 %v807_v20 }
  0x50   : > { %484 = vmatpush.bf16.msra.mxu0 %v806_v21  ;;  %823 = vmatpush.bf16.msra.mxu1 %v806_v21 }
  0x51   : > { %824 = vmatpush.bf16.msra.mxu2 %v806_v21  ;;  %825 = vmatpush.bf16.msra.mxu3 %v806_v21 }
  0x54   : > { %485 = vmatpush.bf16.msra.mxu0 %v805_v22  ;;  %826 = vmatpush.bf16.msra.mxu1 %v805_v22 }
  0x55   : > { %827 = vmatpush.bf16.msra.mxu2 %v805_v22  ;;  %828 = vmatpush.bf16.msra.mxu3 %v805_v22 }
  0x58   : > { %486 = vmatpush.bf16.msra.mxu0 %v804_v23  ;;  %829 = vmatpush.bf16.msra.mxu1 %v804_v23 }
  0x59   : > { %830 = vmatpush.bf16.msra.mxu2 %v804_v23  ;;  %831 = vmatpush.bf16.msra.mxu3 %v804_v23 }
  0x5c   : > { %487 = vmatpush.bf16.msra.mxu0 %v803_v24  ;;  %832 = vmatpush.bf16.msra.mxu1 %v803_v24 }
  0x5d   : > { %833 = vmatpush.bf16.msra.mxu2 %v803_v24  ;;  %834 = vmatpush.bf16.msra.mxu3 %v803_v24 }
  0x5f   : > { %488 = vmatmul.bf16.vlgmr.msra.gmra.mxu0 %v795_v25  ;;  %498 = vmatmul.bf16.vlgmr.msra.gmra.mxu1 %v797_v26 }
  0x60   : > { %508 = vmatmul.bf16.vlgmr.msra.gmra.mxu2 %v799_v27  ;;  %518 = vmatmul.bf16.vlgmr.msra.gmra.mxu3 %v801_v28 }
  0x6f   : > { %493 = vmatmul.bf16.gmra.mxu0 %v796_v29  ;;  %503 = vmatmul.bf16.gmra.mxu1 %v798_v30 }
  0x70   : > { %513 = vmatmul.bf16.gmra.mxu2 %v800_v31  ;;  %523 = vmatmul.bf16.gmra.mxu3 %v802_v32 }
  0xdc   : > { %v489_v35 = vpop.f32.mrf.mxu0  ;;  %v499_v36 = vpop.f32.mrf.mxu1 }
  0xdd   : > { %v529_v37 = vadd.f32 %v489_v35, %v336_v33  ;;  %v533_v38 = vadd.f32 %v499_v36, %v340_v34 }
  0xdf   : > { %546 = vst.msk [vmem:[#allocation2] sm:$0xff] %vm545_vm1, %v529_v37 }
  0xe0   : > { %550 = vst.msk [vmem:[#allocation2 + $0x20] sm:$0xff] %vm545_vm1, %v533_v38 }
  0xe3   : > { %v509_v43 = vpop.f32.mrf.mxu2  ;;  %v519_v44 = vpop.f32.mrf.mxu3 }
  0xe4   : > { %v537_v45 = vadd.f32 %v509_v43, %v344_v39  ;;  %v541_v46 = vadd.f32 %v519_v44, %v348_v40  ;;  %v491_v47 = vpop.f32.mrf.mxu0  ;;  %v501_v48 = vpop.f32.mrf.mxu1 }
  0xe5   : > { %v530_v49 = vadd.f32 %v491_v47, %v337_v41  ;;  %v534_v50 = vadd.f32 %v501_v48, %v341_v42 }
  0xe6   : > { %554 = vst.msk [vmem:[#allocation2 + $0x40] sm:$0xff] %vm545_vm1, %v537_v45 }
  0xe7   : > { %558 = vst.msk [vmem:[#allocation2 + $0x60] sm:$0xff] %vm545_vm1, %v541_v46 }
  0xe8   : > { %547 = vst.msk [vmem:[#allocation2 + $0x8] sm:$0xff] %vm545_vm1, %v530_v49 }
  0xe9   : > { %551 = vst.msk [vmem:[#allocation2 + $0x28] sm:$0xff] %vm545_vm1, %v534_v50 }
  0xeb   : > { %v511_v55 = vpop.f32.mrf.mxu2  ;;  %v521_v56 = vpop.f32.mrf.mxu3 }
  0xec   : > { %v538_v57 = vadd.f32 %v511_v55, %v345_v51  ;;  %v542_v58 = vadd.f32 %v521_v56, %v349_v52  ;;  %v494_v59 = vpop.f32.mrf.mxu0  ;;  %v504_v60 = vpop.f32.mrf.mxu1 }
  0xed   : > { %v531_v61 = vadd.f32 %v494_v59, %v338_v53  ;;  %v535_v62 = vadd.f32 %v504_v60, %v342_v54 }
  0xee   : > { %555 = vst.msk [vmem:[#allocation2 + $0x48] sm:$0xff] %vm545_vm1, %v538_v57 }
  0xef   : > { %559 = vst.msk [vmem:[#allocation2 + $0x68] sm:$0xff] %vm545_vm1, %v542_v58 }
  0xf0   : > { %548 = vst.msk [vmem:[#allocation2 + $0x10] sm:$0xff] %vm545_vm1, %v531_v61 }
  0xf1   : > { %552 = vst.msk [vmem:[#allocation2 + $0x30] sm:$0xff] %vm545_vm1, %v535_v62 }
  0xf3   : > { %v514_v3 = vpop.f32.mrf.mxu2  ;;  %v524_v4 = vpop.f32.mrf.mxu3 }
  0xf4   : > { %v539_v5 = vadd.f32 %v514_v3, %v346_v63  ;;  %v543_v6 = vadd.f32 %v524_v4, %v350_v0  ;;  %v496_v7 = vpop.f32.mrf.mxu0  ;;  %v506_v8 = vpop.f32.mrf.mxu1 }
  0xf5   : > { %v532_v9 = vadd.f32 %v496_v7, %v339_v1  ;;  %v536_v10 = vadd.f32 %v506_v8, %v343_v2 }
  0xf6   : > { %556 = vst.msk [vmem:[#allocation2 + $0x50] sm:$0xff] %vm545_vm1, %v539_v5 }
  0xf7   : > { %560 = vst.msk [vmem:[#allocation2 + $0x70] sm:$0xff] %vm545_vm1, %v543_v6 }
  0xf8   : > { %549 = vst.msk [vmem:[#allocation2 + $0x18] sm:$0xff] %vm545_vm1, %v532_v9 }
  0xf9   : > { %553 = vst.msk [vmem:[#allocation2 + $0x38] sm:$0xff] %vm545_vm1, %v536_v10 }
  0xfb   : > { %v516_v13 = vpop.f32.mrf.mxu2  ;;  %v526_v14 = vpop.f32.mrf.mxu3  ;;  %565 = sbr.rel (%p790_p11) target bundleno = 278 (0x116), region = 81 }
  0xfc   : > { %v540_v15 = vadd.f32 %v516_v13, %v347_v11  ;;  %v544_v16 = vadd.f32 %v526_v14, %v351_v12 }
  0xfe   : > { %557 = vst.msk [vmem:[#allocation2 + $0x58] sm:$0xff] %vm545_vm1, %v540_v15 }
  0xff   : > { %561 = vst.msk [vmem:[#allocation2 + $0x78] sm:$0xff] %vm545_vm1, %v544_v16 }
 0x100   : > { %v566_v17 = vld [vmem:[#allocation2] sm:$0xff]  ;;  %v567_v19 = vld [vmem:[#allocation2 + $0x8] sm:$0xff]  ;;  %v568_v20 = vld [vmem:[#allocation2 + $0x10] sm:$0xff] }
 0x101   : > { %v876_v18 = vld [vmem:[%s1144_s2] ss:$0 sm:$0xff]  ;;  %v569_v21 = vld [vmem:[#allocation2 + $0x18] sm:$0xff]  ;;  %v571_v27 = vld [vmem:[#allocation2 + $0x28] sm:$0xff] }
 0x102   : > { %v586_v22 = vadd.f32 %v876_v18, %v566_v17  ;;  %v587_v23 = vadd.f32 %v876_v18, %v567_v19  ;;  %v588_v24 = vadd.f32 %v876_v18, %v568_v20  ;;  %v589_v25 = vadd.f32 %v876_v18, %v569_v21  ;;  %v570_v26 = vld [vmem:[#allocation2 + $0x20] sm:$0xff]  ;;  %v572_v28 = vld [vmem:[#allocation2 + $0x30] sm:$0xff]  ;;  %v573_v31 = vld [vmem:[#allocation2 + $0x38] sm:$0xff] }
 0x103   : > { %v590_v29 = vadd.f32 %v876_v18, %v570_v26  ;;  %v591_v30 = vadd.f32 %v876_v18, %v571_v27  ;;  %v574_v32 = vld [vmem:[#allocation2 + $0x40] sm:$0xff]  ;;  %v592_v36 = vadd.f32 %v876_v18, %v572_v28  ;;  %v575_v37 = vld [vmem:[#allocation2 + $0x48] sm:$0xff]  ;;  %v593_v39 = vadd.f32 %v876_v18, %v573_v31  ;;  %v576_v40 = vld [vmem:[#allocation2 + $0x50] sm:$0xff] }
 0x104   : > { %v602_v33 = vmax.f32 %v586_v22, 0.0  ;;  %v603_v34 = vmax.f32 %v587_v23, 0.0  ;;  %v604_v35 = vmax.f32 %v588_v24, 0.0  ;;  %v605_v38 = vmax.f32 %v589_v25, 0.0  ;;  %v578_v46 = vld [vmem:[#allocation2 + $0x60] sm:$0xff]  ;;  %v579_v49 = vld [vmem:[#allocation2 + $0x68] sm:$0xff] }
 0x105   : > { %v606_v41 = vmax.f32 %v590_v29, 0.0  ;;  %v594_v42 = vadd.f32 %v876_v18, %v574_v32  ;;  %v577_v43 = vld [vmem:[#allocation2 + $0x58] sm:$0xff]  ;;  %v607_v44 = vmax.f32 %v591_v30, 0.0  ;;  %v595_v45 = vadd.f32 %v876_v18, %v575_v37  ;;  %v580_v52 = vld [vmem:[#allocation2 + $0x70] sm:$0xff] }
 0x106   : > { %618 = vst.msk [vmem:[%s1145_s3] sm:$0xff] %vm545_vm1, %v602_v33  ;;  %v608_v47 = vmax.f32 %v592_v36, 0.0  ;;  %v596_v48 = vadd.f32 %v876_v18, %v576_v40  ;;  %v609_v50 = vmax.f32 %v593_v39, 0.0  ;;  %v597_v51 = vadd.f32 %v876_v18, %v577_v43  ;;  %v581_v55 = vld [vmem:[#allocation2 + $0x78] sm:$0xff] }
 0x107   : > { %619 = vst.msk [vmem:[%s1145_s3 + $0x8] sm:$0xff] %vm545_vm1, %v603_v34  ;;  %v610_v53 = vmax.f32 %v594_v42, 0.0  ;;  %v598_v54 = vadd.f32 %v876_v18, %v578_v46  ;;  %v611_v56 = vmax.f32 %v595_v45, 0.0  ;;  %v599_v57 = vadd.f32 %v876_v18, %v579_v49 }
 0x108   : > { %620 = vst.msk [vmem:[%s1145_s3 + $0x10] sm:$0xff] %vm545_vm1, %v604_v35  ;;  %v612_v58 = vmax.f32 %v596_v48, 0.0  ;;  %v600_v59 = vadd.f32 %v876_v18, %v580_v52  ;;  %v613_v60 = vmax.f32 %v597_v51, 0.0  ;;  %v601_v61 = vadd.f32 %v876_v18, %v581_v55 }
 0x109   : > { %621 = vst.msk [vmem:[%s1145_s3 + $0x18] sm:$0xff] %vm545_vm1, %v605_v38  ;;  %v614_v62 = vmax.f32 %v598_v54, 0.0  ;;  %v615_v63 = vmax.f32 %v599_v57, 0.0 }
 0x10a   : > { %622 = vst.msk [vmem:[%s1145_s3 + $0x20] sm:$0xff] %vm545_vm1, %v606_v41  ;;  %v616_v0 = vmax.f32 %v600_v59, 0.0  ;;  %v617_v1 = vmax.f32 %v601_v61, 0.0 }
 0x10b   : > { %623 = vst.msk [vmem:[%s1145_s3 + $0x28] sm:$0xff] %vm545_vm1, %v607_v44 }
 0x10c   : > { %624 = vst.msk [vmem:[%s1145_s3 + $0x30] sm:$0xff] %vm545_vm1, %v608_v47 }
 0x10d   : > { %625 = vst.msk [vmem:[%s1145_s3 + $0x38] sm:$0xff] %vm545_vm1, %v609_v50 }
 0x10e   : > { %626 = vst.msk [vmem:[%s1145_s3 + $0x40] sm:$0xff] %vm545_vm1, %v610_v53 }
 0x10f   : > { %627 = vst.msk [vmem:[%s1145_s3 + $0x48] sm:$0xff] %vm545_vm1, %v611_v56 }
 0x110   : > { %628 = vst.msk [vmem:[%s1145_s3 + $0x50] sm:$0xff] %vm545_vm1, %v612_v58 }
 0x111   : > { %629 = vst.msk [vmem:[%s1145_s3 + $0x58] sm:$0xff] %vm545_vm1, %v613_v60 }
 0x112   : > { %630 = vst.msk [vmem:[%s1145_s3 + $0x60] sm:$0xff] %vm545_vm1, %v614_v62 }
 0x113   : > { %631 = vst.msk [vmem:[%s1145_s3 + $0x68] sm:$0xff] %vm545_vm1, %v615_v63 }
 0x114   : > { %632 = vst.msk [vmem:[%s1145_s3 + $0x70] sm:$0xff] %vm545_vm1, %v616_v0 }
 0x115   : > { %633 = vst.msk [vmem:[%s1145_s3 + $0x78] sm:$0xff] %vm545_vm1, %v617_v1 }
 0x116 PF: > { %s13_s16 = sadd.s32 1, %s915_s16   ;;  %s1146_s12 = smov %s903_s13 }
 0x117   : > { %p10_p12 = scmp.ge.s32.totalorder %s13_s16, 7   ;;  %s1147_s13 = smov %s973_s20 }
 0x118   : > { %s1148_s14 = smov %s911_s15  ;;  %s1149_s15 = smov %s1151_s17 }
 0x119   :  { %12 = sbr.rel (!%p10_p12) target bundleno = 3 (0x3), region = 119 }

// kernel: resnet_encoder_mtan_forward.22
= control target key start
LH: loop header
LB: loop body
LE: loop exit
PB: predicated region body
PF: predicated region fallthrough
CT: control target
= control target key end

     0   :  { %s1040_s15 = smov 0   ;;  %s1042_s16 = smov 0   ;;  %s1310_s0 = inlined_call_operand.vmem [shape: bf16[128,640], index: 0, kind: input, shape index: {}]   ;;  %s1311_s1 = inlined_call_operand.vmem [shape: bf16[640,64], index: 1, kind: input, shape index: {}]   ;;  %s1312_s2 = inlined_call_operand.vmem [shape: f32[1,64], index: 2, kind: input, shape index: {}]   ;;  %s1313_s3 = inlined_call_operand.vmem [shape: f32[128,64], index: 3, kind: input, shape index: {}]   ;;  %s1314_s4 = inlined_call_operand.vmem [shape: f32[128,64], index: 4, kind: output, shape index: {}]  }
   0x1   :  { %s1044_s17 = smov 0   ;;  %s1046_s18 = smov 0  }
   0x2   :  { %s1048_s19 = smov 0  }
   0x3 LB: > { %s23_s20 = sadd.s32 1, %s1008_s18  ;;  %p42_p1 = scmp.ne.s32.totalorder %s1000_s16, %s996_s15  ;;  %s1012_s19 = sphi %s1048_s19, %s14_s19   ;;  %s1008_s18 = sphi %s1046_s18, %s1318_s18   ;;  %s1004_s17 = sphi %s1044_s17, %s1317_s17   ;;  %s1000_s16 = sphi %s1042_s16, %s1316_s16   ;;  %s996_s15 = sphi %s1040_s15, %s1315_s15  }
   0x4   : > { %p24_p0 = scmp.ge.s32.totalorder %s23_s20, 5  ;;  %p43_p2 = scmp.eq.s32.totalorder %s1012_s19, 0 }
   0x5   : > { %s35_s22 = sadd.s32 1, %s1000_s16  ;;  %p815_p5 = scmp.ge.s32.totalorder %s1012_s19, 5 }
   0x6   : > { %s1320_s20 = smov (%p24_p0, %s23_s20), 0  ;;  %p44_p3 = por %p43_p2, %p42_p1 }
   0x7   : > { %s31_s21 = ssub.s32 %s1008_s18, %s1320_s20  ;;  %179 = sbr.rel (%p815_p5) target bundleno = 32 (0x20), region = 24 }
   0x8   : > { %p33_p4 = scmp.eq.s32.totalorder %s31_s21, 0 }
   0xa   : > { %s1075_s23 = scalar_select %p33_p4, %s1000_s16, %s35_s22  }
   0xc   : > { %182 = sbr.rel (!%p44_p3) target bundleno = 32 (0x20), region = 28  ;;  %s184_s24 = sand.u32 (%p44_p3), 1, %s1000_s16  }
   0xd   : > { %s817_s25 = sshll.u32 (%p44_p3), %s1008_s18, 2  ;;  %s816_s26 = sshll.u32 (%p44_p3), %s184_s24, 6 }
   0xe   : > { %s1083_s29 = scalar_lea.vmem (%p44_p3), %s1310_s0, %s817_s25  ;;  %s186_s30 = scalar_lea.vmem (%p44_p3), [#allocation3], %s816_s26 }
   0xf   : > { %v208_v0 = vld [vmem:[%s1083_s29] sm:$0xf] (%p44_p3)  ;;  %v210_v1 = vld [vmem:[%s1083_s29 + $0x14] sm:$0xf] (%p44_p3)  ;;  %v212_v2 = vld [vmem:[%s1083_s29 + $0x28] sm:$0xf] (%p44_p3) }
  0x10   : > { %209 = vst [vmem:[%s186_s30] sm:$0xf] (%p44_p3), %v208_v0  ;;  %v214_v3 = vld [vmem:[%s1083_s29 + $0x3c] sm:$0xf] (%p44_p3)  ;;  %v216_v4 = vld [vmem:[%s1083_s29 + $0x50] sm:$0xf] (%p44_p3) }
  0x11   : > { %211 = vst [vmem:[%s186_s30 + $0x4] sm:$0xf] %v210_v1  ;;  %v218_v5 = vld [vmem:[%s1083_s29 + $0x64] sm:$0xf]  ;;  %v220_v6 = vld [vmem:[%s1083_s29 + $0x78] sm:$0xf] }
  0x12   : > { %213 = vst [vmem:[%s186_s30 + $0x8] sm:$0xf] %v212_v2  ;;  %v222_v7 = vld [vmem:[%s1083_s29 + $0x8c] sm:$0xf]  ;;  %v224_v8 = vld [vmem:[%s1083_s29 + $0xa0] sm:$0xf] }
  0x13   : > { %215 = vst [vmem:[%s186_s30 + $0xc] sm:$0xf] %v214_v3  ;;  %v226_v9 = vld [vmem:[%s1083_s29 + $0xb4] sm:$0xf]  ;;  %v228_v10 = vld [vmem:[%s1083_s29 + $0xc8] sm:$0xf] }
  0x14   : > { %217 = vst [vmem:[%s186_s30 + $0x10] sm:$0xf] %v216_v4  ;;  %v230_v11 = vld [vmem:[%s1083_s29 + $0xdc] sm:$0xf]  ;;  %v232_v12 = vld [vmem:[%s1083_s29 + $0xf0] sm:$0xf] }
  0x15   : > { %219 = vst [vmem:[%s186_s30 + $0x14] sm:$0xf] %v218_v5  ;;  %v234_v13 = vld [vmem:[%s1083_s29 + $0x104] sm:$0xf]  ;;  %v236_v14 = vld [vmem:[%s1083_s29 + $0x118] sm:$0xf] }
  0x16   : > { %221 = vst [vmem:[%s186_s30 + $0x18] sm:$0xf] %v220_v6  ;;  %v238_v15 = vld [vmem:[%s1083_s29 + $0x12c] sm:$0xf] }
  0x17   : > { %223 = vst [vmem:[%s186_s30 + $0x1c] sm:$0xf] %v222_v7 }
  0x18   : > { %225 = vst [vmem:[%s186_s30 + $0x20] sm:$0xf] %v224_v8 }
  0x19   : > { %227 = vst [vmem:[%s186_s30 + $0x24] sm:$0xf] %v226_v9 }
  0x1a   : > { %229 = vst [vmem:[%s186_s30 + $0x28] sm:$0xf] %v228_v10 }
  0x1b   : > { %231 = vst [vmem:[%s186_s30 + $0x2c] sm:$0xf] %v230_v11 }
  0x1c   : > { %233 = vst [vmem:[%s186_s30 + $0x30] sm:$0xf] %v232_v12 }
  0x1d   : > { %235 = vst [vmem:[%s186_s30 + $0x34] sm:$0xf] %v234_v13 }
  0x1e   : > { %237 = vst [vmem:[%s186_s30 + $0x38] sm:$0xf] %v236_v14 }
  0x1f   : > { %239 = vst [vmem:[%s186_s30 + $0x3c] sm:$0xf] %v238_v15 }
  0x20 PF: > { %p818_p6 = scmp.ge.s32.totalorder %s1012_s19, 1  ;;  %p303_p7 = scmp.lt.s32.totalorder %s1012_s19, 6 }
  0x22   : > { %p304_p8 = pnand %p818_p6, %p303_p7 }
  0x23   : > { %s310_s5 = sand.u32 (!%p304_p8), 1, %s996_s15   ;;  %s820_s6 = sshll.u32 (!%p304_p8), %s1004_s17, 4 }
  0x24   : > { %307 = sbr.rel (%p304_p8) target bundleno = 280 (0x118), region = 73  ;;  %s819_s7 = sshll.u32 (!%p304_p8), %s310_s5, 6 }
  0x25   : > { %p347_p9 = scmp.lt.s32.totalorder (!%p304_p8), %s820_s6, 79  ;;  %s1110_s12 = scalar_lea.vmem (!%p304_p8), [#allocation3], %s819_s7 }
  0x26   : > { %p822_p10 = scmp.ne.s32.totalorder (!%p304_p8), %s1004_s17, 0 }
  0x29   : > { %s1322_s6 = smov (!%p347_p9, %s820_s6), 79  ;;  %367 = sbr.rel (%p822_p10) target bundleno = 63 (0x3f), region = 81 }
  0x2a   : > { %s821_s8 = sshll.u32 %s1322_s6, 2 }
  0x2b   : > { %s1108_s11 = scalar_lea.vmem %s1311_s1, %s821_s8 }
  0x2e   : > { %vm368_vm0 = vcmask 523264   ;;  %v1014_v16 = vmov 0.0  }
  0x2f   : > { %369 = vst.msk [vmem:[#allocation2] sm:$0xff] %vm368_vm0, %v1014_v16 }
  0x30   : > { %370 = vst.msk [vmem:[#allocation2 + $0x8] sm:$0xff] %vm368_vm0, %v1014_v16 }
  0x31   : > { %371 = vst.msk [vmem:[#allocation2 + $0x10] sm:$0xff] %vm368_vm0, %v1014_v16 }
  0x32   : > { %372 = vst.msk [vmem:[#allocation2 + $0x18] sm:$0xff] %vm368_vm0, %v1014_v16 }
  0x33   : > { %373 = vst.msk [vmem:[#allocation2 + $0x20] sm:$0xff] %vm368_vm0, %v1014_v16 }
  0x34   : > { %374 = vst.msk [vmem:[#allocation2 + $0x28] sm:$0xff] %vm368_vm0, %v1014_v16 }
  0x35   : > { %375 = vst.msk [vmem:[#allocation2 + $0x30] sm:$0xff] %vm368_vm0, %v1014_v16 }
  0x36   : > { %376 = vst.msk [vmem:[#allocation2 + $0x38] sm:$0xff] %vm368_vm0, %v1014_v16 }
  0x37   : > { %377 = vst.msk [vmem:[#allocation2 + $0x40] sm:$0xff] %vm368_vm0, %v1014_v16 }
  0x38   : > { %378 = vst.msk [vmem:[#allocation2 + $0x48] sm:$0xff] %vm368_vm0, %v1014_v16 }
  0x39   : > { %379 = vst.msk [vmem:[#allocation2 + $0x50] sm:$0xff] %vm368_vm0, %v1014_v16 }
  0x3a   : > { %380 = vst.msk [vmem:[#allocation2 + $0x58] sm:$0xff] %vm368_vm0, %v1014_v16 }
  0x3b   : > { %381 = vst.msk [vmem:[#allocation2 + $0x60] sm:$0xff] %vm368_vm0, %v1014_v16 }
  0x3c   : > { %382 = vst.msk [vmem:[#allocation2 + $0x68] sm:$0xff] %vm368_vm0, %v1014_v16 }
  0x3d   : > { %383 = vst.msk [vmem:[#allocation2 + $0x70] sm:$0xff] %vm368_vm0, %v1014_v16 }
  0x3e   : > { %384 = vst.msk [vmem:[#allocation2 + $0x78] sm:$0xff] %vm368_vm0, %v1014_v16 }
  0x3f PF: > { %v907_v17 = vld [vmem:[%s1108_s11 + $0x38] sm:$0xff]  ;;  %v906_v18 = vld [vmem:[%s1108_s11 + $0x30] sm:$0xff]  ;;  %v905_v19 = vld [vmem:[%s1108_s11 + $0x28] sm:$0xff]  ;;  %vm594_vm1 = vcmask 523264   ;;  %p887_p11 = scmp.ne.s32.totalorder %s1004_s17, 4 }
  0x40   : > { %529 = vmatpush.bf16.msra.mxu0 %v907_v17  ;;  %908 = vmatpush.bf16.msra.mxu1 %v907_v17  ;;  %v904_v20 = vld [vmem:[%s1108_s11 + $0x20] sm:$0xff]  ;;  %v903_v21 = vld [vmem:[%s1108_s11 + $0x18] sm:$0xff]  ;;  %v902_v22 = vld [vmem:[%s1108_s11 + $0x10] sm:$0xff] }
  0x41   : > { %909 = vmatpush.bf16.msra.mxu2 %v907_v17  ;;  %910 = vmatpush.bf16.msra.mxu3 %v907_v17  ;;  %v901_v23 = vld [vmem:[%s1108_s11 + $0x8] sm:$0xff]  ;;  %v900_v24 = vld [vmem:[%s1108_s11] sm:$0xff]  ;;  %v894_v26 = vld [vmem:[%s1110_s12 + $0x10] sm:$0xff] }
  0x42   : > { %v892_v25 = vld [vmem:[%s1110_s12] sm:$0xff]  ;;  %v898_v28 = vld [vmem:[%s1110_s12 + $0x30] sm:$0xff]  ;;  %v893_v29 = vld [vmem:[%s1110_s12 + $0x8] sm:$0xff] }
  0x43   : > { %v896_v27 = vld [vmem:[%s1110_s12 + $0x20] sm:$0xff]  ;;  %v895_v30 = vld [vmem:[%s1110_s12 + $0x18] sm:$0xff]  ;;  %v897_v31 = vld [vmem:[%s1110_s12 + $0x28] sm:$0xff] }
  0x44   : > { %530 = vmatpush.bf16.msra.mxu0 %v906_v18  ;;  %911 = vmatpush.bf16.msra.mxu1 %v906_v18  ;;  %v899_v32 = vld [vmem:[%s1110_s12 + $0x38] sm:$0xff]  ;;  %v385_v33 = vld [vmem:[#allocation2] sm:$0xff]  ;;  %v386_v41 = vld [vmem:[#allocation2 + $0x8] sm:$0xff] }
  0x45   : > { %912 = vmatpush.bf16.msra.mxu2 %v906_v18  ;;  %913 = vmatpush.bf16.msra.mxu3 %v906_v18  ;;  %v389_v34 = vld [vmem:[#allocation2 + $0x20] sm:$0xff]  ;;  %v390_v42 = vld [vmem:[#allocation2 + $0x28] sm:$0xff]  ;;  %v387_v53 = vld [vmem:[#allocation2 + $0x10] sm:$0xff] }
  0x46   : > { %v393_v39 = vld [vmem:[#allocation2 + $0x40] sm:$0xff]  ;;  %v394_v51 = vld [vmem:[#allocation2 + $0x48] sm:$0xff]  ;;  %v391_v54 = vld [vmem:[#allocation2 + $0x30] sm:$0xff] }
  0x47   : > { %v397_v40 = vld [vmem:[#allocation2 + $0x60] sm:$0xff]  ;;  %v398_v52 = vld [vmem:[#allocation2 + $0x68] sm:$0xff]  ;;  %v395_v63 = vld [vmem:[#allocation2 + $0x50] sm:$0xff] }
  0x48   : > { %531 = vmatpush.bf16.msra.mxu0 %v905_v19  ;;  %914 = vmatpush.bf16.msra.mxu1 %v905_v19  ;;  %v399_v0 = vld [vmem:[#allocation2 + $0x70] sm:$0xff]  ;;  %v388_v1 = vld [vmem:[#allocation2 + $0x18] sm:$0xff] }
  0x49   : > { %915 = vmatpush.bf16.msra.mxu2 %v905_v19  ;;  %916 = vmatpush.bf16.msra.mxu3 %v905_v19  ;;  %v392_v2 = vld [vmem:[#allocation2 + $0x38] sm:$0xff] }
  0x4a   : > { %v396_v11 = vld [vmem:[#allocation2 + $0x58] sm:$0xff] }
  0x4b   : > { %v400_v12 = vld [vmem:[#allocation2 + $0x78] sm:$0xff] }
  0x4c   : > { %532 = vmatpush.bf16.msra.mxu0 %v904_v20  ;;  %917 = vmatpush.bf16.msra.mxu1 %v904_v20 }
  0x4d   : > { %918 = vmatpush.bf16.msra.mxu2 %v904_v20  ;;  %919 = vmatpush.bf16.msra.mxu3 %v904_v20 }
  0x50   : > { %533 = vmatpush.bf16.msra.mxu0 %v903_v21  ;;  %920 = vmatpush.bf16.msra.mxu1 %v903_v21 }
  0x51   : > { %921 = vmatpush.bf16.msra.mxu2 %v903_v21  ;;  %922 = vmatpush.bf16.msra.mxu3 %v903_v21 }
  0x54   : > { %534 = vmatpush.bf16.msra.mxu0 %v902_v22  ;;  %923 = vmatpush.bf16.msra.mxu1 %v902_v22 }
  0x55   : > { %924 = vmatpush.bf16.msra.mxu2 %v902_v22  ;;  %925 = vmatpush.bf16.msra.mxu3 %v902_v22 }
  0x58   : > { %535 = vmatpush.bf16.msra.mxu0 %v901_v23  ;;  %926 = vmatpush.bf16.msra.mxu1 %v901_v23 }
  0x59   : > { %927 = vmatpush.bf16.msra.mxu2 %v901_v23  ;;  %928 = vmatpush.bf16.msra.mxu3 %v901_v23 }
  0x5c   : > { %536 = vmatpush.bf16.msra.mxu0 %v900_v24  ;;  %929 = vmatpush.bf16.msra.mxu1 %v900_v24 }
  0x5d   : > { %930 = vmatpush.bf16.msra.mxu2 %v900_v24  ;;  %931 = vmatpush.bf16.msra.mxu3 %v900_v24 }
  0x5f   : > { %537 = vmatmul.bf16.vlgmr.msra.gmra.mxu0 %v892_v25  ;;  %547 = vmatmul.bf16.vlgmr.msra.gmra.mxu1 %v894_v26 }
  0x60   : > { %557 = vmatmul.bf16.vlgmr.msra.gmra.mxu2 %v896_v27  ;;  %567 = vmatmul.bf16.vlgmr.msra.gmra.mxu3 %v898_v28 }
  0x6f   : > { %542 = vmatmul.bf16.gmra.mxu0 %v893_v29  ;;  %552 = vmatmul.bf16.gmra.mxu1 %v895_v30 }
  0x70   : > { %562 = vmatmul.bf16.gmra.mxu2 %v897_v31  ;;  %572 = vmatmul.bf16.gmra.mxu3 %v899_v32 }
  0xdc   : > { %v538_v35 = vpop.f32.mrf.mxu0  ;;  %v548_v36 = vpop.f32.mrf.mxu1 }
  0xdd   : > { %v578_v37 = vadd.f32 %v538_v35, %v385_v33  ;;  %v582_v38 = vadd.f32 %v548_v36, %v389_v34 }
  0xdf   : > { %595 = vst.msk [vmem:[#allocation2] sm:$0xff] %vm594_vm1, %v578_v37 }
  0xe0   : > { %599 = vst.msk [vmem:[#allocation2 + $0x20] sm:$0xff] %vm594_vm1, %v582_v38 }
  0xe3   : > { %v558_v43 = vpop.f32.mrf.mxu2  ;;  %v568_v44 = vpop.f32.mrf.mxu3 }
  0xe4   : > { %v586_v45 = vadd.f32 %v558_v43, %v393_v39  ;;  %v590_v46 = vadd.f32 %v568_v44, %v397_v40  ;;  %v540_v47 = vpop.f32.mrf.mxu0  ;;  %v550_v48 = vpop.f32.mrf.mxu1 }
  0xe5   : > { %v579_v49 = vadd.f32 %v540_v47, %v386_v41  ;;  %v583_v50 = vadd.f32 %v550_v48, %v390_v42 }
  0xe6   : > { %603 = vst.msk [vmem:[#allocation2 + $0x40] sm:$0xff] %vm594_vm1, %v586_v45 }
  0xe7   : > { %607 = vst.msk [vmem:[#allocation2 + $0x60] sm:$0xff] %vm594_vm1, %v590_v46 }
  0xe8   : > { %596 = vst.msk [vmem:[#allocation2 + $0x8] sm:$0xff] %vm594_vm1, %v579_v49 }
  0xe9   : > { %600 = vst.msk [vmem:[#allocation2 + $0x28] sm:$0xff] %vm594_vm1, %v583_v50 }
  0xeb   : > { %v560_v55 = vpop.f32.mrf.mxu2  ;;  %v570_v56 = vpop.f32.mrf.mxu3 }
  0xec   : > { %v587_v57 = vadd.f32 %v560_v55, %v394_v51  ;;  %v591_v58 = vadd.f32 %v570_v56, %v398_v52  ;;  %v543_v59 = vpop.f32.mrf.mxu0  ;;  %v553_v60 = vpop.f32.mrf.mxu1 }
  0xed   : > { %v580_v61 = vadd.f32 %v543_v59, %v387_v53  ;;  %v584_v62 = vadd.f32 %v553_v60, %v391_v54 }
  0xee   : > { %604 = vst.msk [vmem:[#allocation2 + $0x48] sm:$0xff] %vm594_vm1, %v587_v57 }
  0xef   : > { %608 = vst.msk [vmem:[#allocation2 + $0x68] sm:$0xff] %vm594_vm1, %v591_v58 }
  0xf0   : > { %597 = vst.msk [vmem:[#allocation2 + $0x10] sm:$0xff] %vm594_vm1, %v580_v61 }
  0xf1   : > { %601 = vst.msk [vmem:[#allocation2 + $0x30] sm:$0xff] %vm594_vm1, %v584_v62 }
  0xf3   : > { %v563_v3 = vpop.f32.mrf.mxu2  ;;  %v573_v4 = vpop.f32.mrf.mxu3 }
  0xf4   : > { %v588_v5 = vadd.f32 %v563_v3, %v395_v63  ;;  %v592_v6 = vadd.f32 %v573_v4, %v399_v0  ;;  %v545_v7 = vpop.f32.mrf.mxu0  ;;  %v555_v8 = vpop.f32.mrf.mxu1 }
  0xf5   : > { %v581_v9 = vadd.f32 %v545_v7, %v388_v1  ;;  %v585_v10 = vadd.f32 %v555_v8, %v392_v2 }
  0xf6   : > { %605 = vst.msk [vmem:[#allocation2 + $0x50] sm:$0xff] %vm594_vm1, %v588_v5 }
  0xf7   : > { %609 = vst.msk [vmem:[#allocation2 + $0x70] sm:$0xff] %vm594_vm1, %v592_v6 }
  0xf8   : > { %598 = vst.msk [vmem:[#allocation2 + $0x18] sm:$0xff] %vm594_vm1, %v581_v9 }
  0xf9   : > { %602 = vst.msk [vmem:[#allocation2 + $0x38] sm:$0xff] %vm594_vm1, %v585_v10 }
  0xfb   : > { %v565_v13 = vpop.f32.mrf.mxu2  ;;  %v575_v14 = vpop.f32.mrf.mxu3  ;;  %614 = sbr.rel (%p887_p11) target bundleno = 280 (0x118), region = 85 }
  0xfc   : > { %v589_v15 = vadd.f32 %v565_v13, %v396_v11  ;;  %v593_v16 = vadd.f32 %v575_v14, %v400_v12 }
  0xfe   : > { %606 = vst.msk [vmem:[#allocation2 + $0x58] sm:$0xff] %vm594_vm1, %v589_v15 }
  0xff   : > { %610 = vst.msk [vmem:[#allocation2 + $0x78] sm:$0xff] %vm594_vm1, %v593_v16 }
 0x100   : > { %v615_v17 = vld [vmem:[#allocation2] sm:$0xff]  ;;  %v616_v20 = vld [vmem:[#allocation2 + $0x8] sm:$0xff]  ;;  %v617_v24 = vld [vmem:[#allocation2 + $0x10] sm:$0xff] }
 0x101   : > { %v1165_v18 = vld [vmem:[%s1312_s2] ss:$0 sm:$0xff]  ;;  %v652_v21 = vld [vmem:[%s1313_s3 + $0x8] sm:$0xff]  ;;  %v653_v25 = vld [vmem:[%s1313_s3 + $0x10] sm:$0xff] }
 0x102   : > { %v651_v19 = vld [vmem:[%s1313_s3] sm:$0xff]  ;;  %v635_v22 = vadd.f32 %v1165_v18, %v615_v17  ;;  %v636_v23 = vadd.f32 %v1165_v18, %v616_v20  ;;  %v618_v26 = vld [vmem:[#allocation2 + $0x18] sm:$0xff]  ;;  %v637_v27 = vadd.f32 %v1165_v18, %v617_v24  ;;  %v620_v35 = vld [vmem:[#allocation2 + $0x28] sm:$0xff] }
 0x103   : > { %v638_v28 = vadd.f32 %v1165_v18, %v618_v26  ;;  %v654_v29 = vld [vmem:[%s1313_s3 + $0x18] sm:$0xff]  ;;  %v619_v30 = vld [vmem:[#allocation2 + $0x20] sm:$0xff]  ;;  %v656_v36 = vld [vmem:[%s1313_s3 + $0x28] sm:$0xff]  ;;  %v640_v40 = vadd.f32 %v1165_v18, %v620_v35 }
 0x104   : > { %v655_v31 = vld [vmem:[%s1313_s3 + $0x20] sm:$0xff]  ;;  %v667_v32 = vadd.f32 %v651_v19, %v635_v22  ;;  %v668_v33 = vadd.f32 %v652_v21, %v636_v23  ;;  %v639_v34 = vadd.f32 %v1165_v18, %v619_v30  ;;  %v621_v37 = vld [vmem:[#allocation2 + $0x30] sm:$0xff]  ;;  %v669_v38 = vadd.f32 %v653_v25, %v637_v27  ;;  %v622_v43 = vld [vmem:[#allocation2 + $0x38] sm:$0xff] }
 0x105   : > { %v670_v39 = vadd.f32 %v654_v29, %v638_v28  ;;  %v641_v41 = vadd.f32 %v1165_v18, %v621_v37  ;;  %v657_v42 = vld [vmem:[%s1313_s3 + $0x30] sm:$0xff]  ;;  %v658_v44 = vld [vmem:[%s1313_s3 + $0x38] sm:$0xff]  ;;  %v642_v48 = vadd.f32 %v1165_v18, %v622_v43  ;;  %v623_v49 = vld [vmem:[#allocation2 + $0x40] sm:$0xff]  ;;  %v672_v54 = vadd.f32 %v656_v36, %v640_v40 }
 0x106   : > { %v683_v45 = vmax.f32 %v667_v32, 0.0  ;;  %v684_v46 = vmax.f32 %v668_v33, 0.0  ;;  %v671_v47 = vadd.f32 %v655_v31, %v639_v34  ;;  %v659_v50 = vld [vmem:[%s1313_s3 + $0x40] sm:$0xff]  ;;  %v624_v51 = vld [vmem:[#allocation2 + $0x48] sm:$0xff]  ;;  %v685_v52 = vmax.f32 %v669_v38, 0.0  ;;  %v625_v57 = vld [vmem:[#allocation2 + $0x50] sm:$0xff] }
 0x107   : > { %v686_v53 = vmax.f32 %v670_v39, 0.0  ;;  %v673_v55 = vadd.f32 %v657_v42, %v641_v41  ;;  %v660_v56 = vld [vmem:[%s1313_s3 + $0x48] sm:$0xff]  ;;  %v661_v58 = vld [vmem:[%s1313_s3 + $0x50] sm:$0xff]  ;;  %v674_v60 = vadd.f32 %v658_v44, %v642_v48  ;;  %v643_v61 = vadd.f32 %v1165_v18, %v623_v49  ;;  %v626_v63 = vld [vmem:[#allocation2 + $0x58] sm:$0xff] }
 0x108   : > { %699 = vst.msk [vmem:[%s1314_s4] sm:$0xff] %vm594_vm1, %v683_v45  ;;  %v687_v59 = vmax.f32 %v671_v47, 0.0  ;;  %v644_v62 = vadd.f32 %v1165_v18, %v624_v51  ;;  %v662_v0 = vld [vmem:[%s1313_s3 + $0x58] sm:$0xff]  ;;  %v627_v1 = vld [vmem:[#allocation2 + $0x60] sm:$0xff]  ;;  %v688_v2 = vmax.f32 %v672_v54, 0.0  ;;  %v645_v4 = vadd.f32 %v1165_v18, %v625_v57  ;;  %v628_v7 = vld [vmem:[#allocation2 + $0x68] sm:$0xff] }
 0x109   : > { %700 = vst.msk [vmem:[%s1314_s4 + $0x8] sm:$0xff] %vm594_vm1, %v684_v46  ;;  %v689_v3 = vmax.f32 %v673_v55, 0.0  ;;  %v646_v5 = vadd.f32 %v1165_v18, %v626_v63  ;;  %v663_v6 = vld [vmem:[%s1313_s3 + $0x60] sm:$0xff]  ;;  %v690_v8 = vmax.f32 %v674_v60, 0.0  ;;  %v675_v9 = vadd.f32 %v659_v50, %v643_v61  ;;  %v664_v12 = vld [vmem:[%s1313_s3 + $0x68] sm:$0xff]  ;;  %v629_v13 = vld [vmem:[#allocation2 + $0x70] sm:$0xff] }
 0x10a   : > { %701 = vst.msk [vmem:[%s1314_s4 + $0x10] sm:$0xff] %vm594_vm1, %v685_v52  ;;  %v676_v10 = vadd.f32 %v660_v56, %v644_v62  ;;  %v647_v11 = vadd.f32 %v1165_v18, %v627_v1  ;;  %v630_v14 = vld [vmem:[#allocation2 + $0x78] sm:$0xff]  ;;  %v677_v15 = vadd.f32 %v661_v58, %v645_v4  ;;  %v648_v17 = vadd.f32 %v1165_v18, %v628_v7  ;;  %v665_v20 = vld [vmem:[%s1313_s3 + $0x70] sm:$0xff] }
 0x10b   : > { %702 = vst.msk [vmem:[%s1314_s4 + $0x18] sm:$0xff] %vm594_vm1, %v686_v53  ;;  %v678_v16 = vadd.f32 %v662_v0, %v646_v5  ;;  %v649_v19 = vadd.f32 %v1165_v18, %v629_v13  ;;  %v691_v21 = vmax.f32 %v675_v9, 0.0  ;;  %v650_v23 = vadd.f32 %v1165_v18, %v630_v14  ;;  %v666_v24 = vld [vmem:[%s1313_s3 + $0x78] sm:$0xff] }
 0x10c   : > { %703 = vst.msk [vmem:[%s1314_s4 + $0x20] sm:$0xff] %vm594_vm1, %v687_v59  ;;  %v679_v22 = vadd.f32 %v663_v6, %v647_v11  ;;  %v692_v25 = vmax.f32 %v676_v10, 0.0  ;;  %v680_v26 = vadd.f32 %v664_v12, %v648_v17  ;;  %v693_v27 = vmax.f32 %v677_v15, 0.0 }
 0x10d   : > { %704 = vst.msk [vmem:[%s1314_s4 + $0x28] sm:$0xff] %vm594_vm1, %v688_v2  ;;  %v681_v28 = vadd.f32 %v665_v20, %v649_v19  ;;  %v694_v18 = vmax.f32 %v678_v16, 0.0  ;;  %v682_v29 = vadd.f32 %v666_v24, %v650_v23 }
 0x10e   : > { %705 = vst.msk [vmem:[%s1314_s4 + $0x30] sm:$0xff] %vm594_vm1, %v689_v3  ;;  %v695_v30 = vmax.f32 %v679_v22, 0.0  ;;  %v696_v31 = vmax.f32 %v680_v26, 0.0 }
 0x10f   : > { %706 = vst.msk [vmem:[%s1314_s4 + $0x38] sm:$0xff] %vm594_vm1, %v690_v8  ;;  %v697_v32 = vmax.f32 %v681_v28, 0.0  ;;  %v698_v33 = vmax.f32 %v682_v29, 0.0 }
 0x110   : > { %707 = vst.msk [vmem:[%s1314_s4 + $0x40] sm:$0xff] %vm594_vm1, %v691_v21 }
 0x111   : > { %708 = vst.msk [vmem:[%s1314_s4 + $0x48] sm:$0xff] %vm594_vm1, %v692_v25 }
 0x112   : > { %709 = vst.msk [vmem:[%s1314_s4 + $0x50] sm:$0xff] %vm594_vm1, %v693_v27 }
 0x113   : > { %710 = vst.msk [vmem:[%s1314_s4 + $0x58] sm:$0xff] %vm594_vm1, %v694_v18 }
 0x114   : > { %711 = vst.msk [vmem:[%s1314_s4 + $0x60] sm:$0xff] %vm594_vm1, %v695_v30 }
 0x115   : > { %712 = vst.msk [vmem:[%s1314_s4 + $0x68] sm:$0xff] %vm594_vm1, %v696_v31 }
 0x116   : > { %713 = vst.msk [vmem:[%s1314_s4 + $0x70] sm:$0xff] %vm594_vm1, %v697_v32 }
 0x117   : > { %714 = vst.msk [vmem:[%s1314_s4 + $0x78] sm:$0xff] %vm594_vm1, %v698_v33 }
 0x118 PF: > { %s14_s19 = sadd.s32 1, %s1012_s19   ;;  %s1315_s15 = smov %s1000_s16 }
 0x119   : > { %p11_p12 = scmp.ge.s32.totalorder %s14_s19, 7   ;;  %s1316_s16 = smov %s1075_s23 }
 0x11a   : > { %s1317_s17 = smov %s1008_s18  ;;  %s1318_s18 = smov %s1320_s20 }
 0x11b   :  { %13 = sbr.rel (!%p11_p12) target bundleno = 3 (0x3), region = 126 }

// kernel: resnet_encoder_mtan_forward.25
= control target key start
LH: loop header
LB: loop body
LE: loop exit
PB: predicated region body
PF: predicated region fallthrough
CT: control target
= control target key end

     0   :  { %s668_s12 = smov 0   ;;  %s670_s13 = smov 0   ;;  %s767_s0 = inlined_call_operand.vmem [shape: bf16[32,640], index: 0, kind: input, shape index: {}]   ;;  %s768_s1 = inlined_call_operand.vmem [shape: bf16[640,128], index: 1, kind: input, shape index: {}]   ;;  %s769_s2 = inlined_call_operand.vmem [shape: f32[1,128], index: 2, kind: input, shape index: {}]   ;;  %s770_s3 = inlined_call_operand.vmem [shape: f32[32,128], index: 3, kind: output, shape index: {}]  }
   0x1   :  { %s672_s14 = smov 0   ;;  %s674_s15 = smov 0  }
   0x2   :  { %s676_s16 = smov 0  }
   0x3 LB: > { %s22_s17 = sadd.s32 1, %s641_s15  ;;  %p41_p1 = scmp.ne.s32.totalorder %s633_s13, %s629_s12  ;;  %s645_s16 = sphi %s676_s16, %s13_s16   ;;  %s641_s15 = sphi %s674_s15, %s774_s15   ;;  %s637_s14 = sphi %s672_s14, %s773_s14   ;;  %s633_s13 = sphi %s670_s13, %s772_s13   ;;  %s629_s12 = sphi %s668_s12, %s771_s12  }
   0x4   : > { %p23_p0 = scmp.ge.s32.totalorder %s22_s17, 5  ;;  %p42_p2 = scmp.eq.s32.totalorder %s645_s16, 0 }
   0x5   : > { %s34_s19 = sadd.s32 1, %s633_s13  ;;  %p494_p5 = scmp.ge.s32.totalorder %s645_s16, 5 }
   0x6   : > { %s776_s17 = smov (%p23_p0, %s22_s17), 0  ;;  %p43_p3 = por %p42_p2, %p41_p1 }
   0x7   : > { %s30_s18 = ssub.s32 %s641_s15, %s776_s17  ;;  %143 = sbr.rel (%p494_p5) target bundleno = 20 (0x14), region = 20 }
   0x8   : > { %p32_p4 = scmp.eq.s32.totalorder %s30_s18, 0 }
   0xa   : > { %s703_s20 = scalar_select %p32_p4, %s633_s13, %s34_s19  }
   0xc   : > { %146 = sbr.rel (!%p43_p3) target bundleno = 20 (0x14), region = 24  ;;  %s148_s21 = sand.u32 (%p43_p3), 1, %s633_s13  }
   0xd   : > { %s496_s22 = sshll.u32 (%p43_p3), %s641_s15, 2  ;;  %s495_s23 = sshll.u32 (%p43_p3), %s148_s21, 4 }
   0xe   : > { %s155_s26 = scalar_lea.vmem (%p43_p3), %s767_s0, %s496_s22  ;;  %s150_s27 = scalar_lea.vmem (%p43_p3), [#allocation3], %s495_s23 }
   0xf   : > { %v172_v0 = vld [vmem:[%s155_s26] sm:$0xf] (%p43_p3)  ;;  %v174_v1 = vld [vmem:[%s155_s26 + $0x14] sm:$0xf] (%p43_p3)  ;;  %v176_v2 = vld [vmem:[%s155_s26 + $0x28] sm:$0xf] (%p43_p3) }
  0x10   : > { %173 = vst [vmem:[%s150_s27] sm:$0xf] (%p43_p3), %v172_v0  ;;  %v178_v3 = vld [vmem:[%s155_s26 + $0x3c] sm:$0xf] (%p43_p3) }
  0x11   : > { %175 = vst [vmem:[%s150_s27 + $0x4] sm:$0xf] %v174_v1 }
  0x12   : > { %177 = vst [vmem:[%s150_s27 + $0x8] sm:$0xf] %v176_v2 }
  0x13   : > { %179 = vst [vmem:[%s150_s27 + $0xc] sm:$0xf] %v178_v3 }
  0x14 PF: > { %p497_p6 = scmp.ge.s32.totalorder %s645_s16, 1  ;;  %p219_p7 = scmp.lt.s32.totalorder %s645_s16, 6 }
  0x16   : > { %p220_p8 = pnand %p497_p6, %p219_p7 }
  0x17   : > { %s226_s28 = sand.u32 (!%p220_p8), 1, %s629_s12   ;;  %s499_s29 = sshll.u32 (!%p220_p8), %s637_s14, 4 }
  0x18   : > { %223 = sbr.rel (%p220_p8) target bundleno = 221 (0xdd), region = 69  ;;  %s715_s30 = sshll.u32 (!%p220_p8), %s226_s28, 4 }
  0x19   : > { %p256_p9 = scmp.lt.s32.totalorder (!%p220_p8), %s499_s29, 79  ;;  %s228_s8 = scalar_lea.vmem (!%p220_p8), [#allocation3], %s715_s30 }
  0x1a   : > { %p501_p10 = scmp.ne.s32.totalorder (!%p220_p8), %s637_s14, 0 }
  0x1d   : > { %s778_s29 = smov (!%p256_p9, %s499_s29), 79  ;;  %270 = sbr.rel (%p501_p10) target bundleno = 39 (0x27), region = 77 }
  0x1e   : > { %s500_s4 = sshll.u32 %s778_s29, 2 }
  0x1f   : > { %s720_s7 = scalar_lea.vmem %s768_s1, %s500_s4 }
  0x22   : > { %v647_v4 = vmov 0.0  }
  0x23   : > { %271 = vst [vmem:[#allocation2 + $0x10] sm:$0xff] %v647_v4 }
  0x24   : > { %272 = vst [vmem:[#allocation2] sm:$0xff] %v647_v4 }
  0x25   : > { %273 = vst [vmem:[#allocation2 + $0x18] sm:$0xff] %v647_v4 }
  0x26   : > { %274 = vst [vmem:[#allocation2 + $0x8] sm:$0xff] %v647_v4 }
  0x27 PF: > { %v556_v5 = vld [vmem:[%s720_s7 + $0x38] sm:$0xff]  ;;  %v555_v6 = vld [vmem:[%s720_s7 + $0x30] sm:$0xff]  ;;  %v554_v7 = vld [vmem:[%s720_s7 + $0x28] sm:$0xff]  ;;  %p542_p11 = scmp.ne.s32.totalorder %s637_s14, 4 }
  0x28   : > { %359 = vmatpush.bf16.msra.mxu0 %v556_v5  ;;  %557 = vmatpush.bf16.msra.mxu1 %v556_v5  ;;  %v553_v8 = vld [vmem:[%s720_s7 + $0x20] sm:$0xff]  ;;  %v552_v9 = vld [vmem:[%s720_s7 + $0x18] sm:$0xff]  ;;  %v551_v10 = vld [vmem:[%s720_s7 + $0x10] sm:$0xff] }
  0x29   : > { %v550_v11 = vld [vmem:[%s720_s7 + $0x8] sm:$0xff]  ;;  %v549_v12 = vld [vmem:[%s720_s7] sm:$0xff] }
  0x2a   : > { %v547_v13 = vld [vmem:[%s228_s8] sm:$0xff]  ;;  %v548_v14 = vld [vmem:[%s228_s8 + $0x8] sm:$0xff] }
  0x2b   : > { %v275_v15 = vld [vmem:[#allocation2 + $0x10] sm:$0xff]  ;;  %v276_v21 = vld [vmem:[#allocation2] sm:$0xff] }
  0x2c   : > { %360 = vmatpush.bf16.msra.mxu0 %v555_v6  ;;  %558 = vmatpush.bf16.msra.mxu1 %v555_v6  ;;  %v277_v16 = vld [vmem:[#allocation2 + $0x18] sm:$0xff] }
  0x2d   : > { %v278_v22 = vld [vmem:[#allocation2 + $0x8] sm:$0xff] }
  0x30   : > { %361 = vmatpush.bf16.msra.mxu0 %v554_v7  ;;  %559 = vmatpush.bf16.msra.mxu1 %v554_v7 }
  0x34   : > { %362 = vmatpush.bf16.msra.mxu0 %v553_v8  ;;  %560 = vmatpush.bf16.msra.mxu1 %v553_v8 }
  0x38   : > { %363 = vmatpush.bf16.msra.mxu0 %v552_v9  ;;  %561 = vmatpush.bf16.msra.mxu1 %v552_v9 }
  0x3c   : > { %364 = vmatpush.bf16.msra.mxu0 %v551_v10  ;;  %562 = vmatpush.bf16.msra.mxu1 %v551_v10 }
  0x40   : > { %365 = vmatpush.bf16.msra.mxu0 %v550_v11  ;;  %563 = vmatpush.bf16.msra.mxu1 %v550_v11 }
  0x44   : > { %366 = vmatpush.bf16.msra.mxu0 %v549_v12  ;;  %564 = vmatpush.bf16.msra.mxu1 %v549_v12 }
  0x47   : > { %367 = vmatmul.bf16.vlgmr.msra.gmra.mxu0 %v547_v13  ;;  %372 = vmatmul.bf16.vlgmr.msra.gmra.mxu1 %v548_v14 }
  0xc4   : > { %v368_v17 = vpop.f32.mrf.mxu0  ;;  %v373_v18 = vpop.f32.mrf.mxu1 }
  0xc5   : > { %v378_v19 = vadd.f32 %v368_v17, %v275_v15  ;;  %v380_v20 = vadd.f32 %v373_v18, %v277_v16 }
  0xc7   : > { %382 = vst [vmem:[#allocation2 + $0x10] sm:$0xff] %v378_v19 }
  0xc8   : > { %384 = vst [vmem:[#allocation2 + $0x18] sm:$0xff] %v380_v20 }
  0xcc   : > { %v370_v23 = vpop.f32.mrf.mxu0  ;;  %v375_v24 = vpop.f32.mrf.mxu1  ;;  %389 = sbr.rel (%p542_p11) target bundleno = 221 (0xdd), region = 81 }
  0xcd   : > { %v379_v25 = vadd.f32 %v370_v23, %v276_v21  ;;  %v381_v26 = vadd.f32 %v375_v24, %v278_v22 }
  0xcf   : > { %383 = vst [vmem:[#allocation2] sm:$0xff] %v379_v25 }
  0xd0   : > { %385 = vst [vmem:[#allocation2 + $0x8] sm:$0xff] %v381_v26 }
  0xd1   : > { %v390_v27 = vld [vmem:[#allocation2 + $0x10] sm:$0xff]  ;;  %v606_v28 = vld [vmem:[%s769_s2] ss:$0 sm:$0xff]  ;;  %v392_v30 = vld [vmem:[#allocation2 + $0x18] sm:$0xff] }
  0xd2   : > { %v398_v32 = vadd.f32 %v606_v28, %v390_v27  ;;  %v400_v34 = vadd.f32 %v606_v28, %v392_v30 }
  0xd4   : > { %v402_v36 = vmax.f32 %v398_v32, 0.0  ;;  %v404_v38 = vmax.f32 %v400_v34, 0.0 }
  0xd6   : > { %v391_v29 = vld [vmem:[#allocation2] sm:$0xff]  ;;  %406 = vst [vmem:[%s770_s3] sm:$0xff] %v402_v36 }
  0xd7   : > { %v393_v31 = vld [vmem:[#allocation2 + $0x8] sm:$0xff]  ;;  %v399_v33 = vadd.f32 %v606_v28, %v391_v29  ;;  %408 = vst [vmem:[%s770_s3 + $0x10] sm:$0xff] %v404_v38 }
  0xd8   : > { %v401_v35 = vadd.f32 %v606_v28, %v393_v31 }
  0xd9   : > { %v403_v37 = vmax.f32 %v399_v33, 0.0 }
  0xda   : > { %v405_v39 = vmax.f32 %v401_v35, 0.0 }
  0xdb   : > { %407 = vst [vmem:[%s770_s3 + $0x8] sm:$0xff] %v403_v37 }
  0xdc   : > { %409 = vst [vmem:[%s770_s3 + $0x18] sm:$0xff] %v405_v39 }
  0xdd PF: > { %s13_s16 = sadd.s32 1, %s645_s16   ;;  %s771_s12 = smov %s633_s13 }
  0xde   : > { %p10_p12 = scmp.ge.s32.totalorder %s13_s16, 7   ;;  %s772_s13 = smov %s703_s20 }
  0xdf   : > { %s773_s14 = smov %s641_s15  ;;  %s774_s15 = smov %s776_s17 }
  0xe0   :  { %12 = sbr.rel (!%p10_p12) target bundleno = 3 (0x3), region = 119 }

// kernel: resnet_encoder_mtan_forward.28
= control target key start
LH: loop header
LB: loop body
LE: loop exit
PB: predicated region body
PF: predicated region fallthrough
CT: control target
= control target key end

     0   :  { %8 = vsyncpa [#allocation5], 0  ;;  %s743_s12 = smov 0   ;;  %s745_s13 = smov 0   ;;  %s857_s0 = inlined_call_operand.vmem [shape: bf16[32,1152], index: 0, kind: input, shape index: {}]   ;;  %s858_s1 = inlined_call_operand.vmem [shape: bf16[1152,128], index: 1, kind: input, shape index: {}]   ;;  %s859_s2 = inlined_call_operand.hbm [shape: f32[1,128], index: 2, kind: input, shape index: {}]   ;;  %s860_s3 = inlined_call_operand.vmem [shape: f32[32,128], index: 3, kind: output, shape index: {}]  }
   0x1   :  { %s747_s14 = smov 0   ;;  %s749_s15 = smov 0  }
   0x2   :  { %s751_s16 = smov 0  }
   0x3 LB: > { %s519_s17 = sadd.s32 4294967295, %s719_s16   ;;  %s23_s18 = sadd.s32 1, %s715_s15  ;;  %s719_s16 = sphi %s751_s16, %s14_s16   ;;  %s715_s15 = sphi %s749_s15, %s867_s15   ;;  %s711_s14 = sphi %s747_s14, %s866_s14   ;;  %s707_s13 = sphi %s745_s13, %s865_s13   ;;  %s703_s12 = sphi %s743_s12, %s864_s12  }
   0x4   : > { %p24_p0 = scmp.ge.s32.totalorder %s23_s18, 9  ;;  %s35_s19 = sadd.s32 1, %s707_s13 }
   0x5   : > { %p42_p1 = scmp.ne.s32.totalorder %s707_s13, %s703_s12  ;;  %p43_p2 = scmp.eq.s32.totalorder %s719_s16, 0 }
   0x6   : > { %s869_s18 = smov (%p24_p0, %s23_s18), 0  ;;  %p520_p4 = scmp.ge.s32.totalorder %s719_s16, 1 }
   0x7   : > { %p776_p3 = por %p43_p2, %p42_p1  ;;  %s31_s21 = ssub.s32 %s715_s15, %s869_s18 }
   0x8   : > { %p132_p5 = scmp.lt.s32.totalorder %s719_s16, 10  ;;  %p33_p6 = scmp.eq.s32.totalorder %s31_s21, 0 }
   0x9   : > { %p788_p8 = scmp.eq.s32.totalorder %s519_s17, 0  ;;  %s144_s27 = sshll.u32 %s859_s2, 4  ;;  %s145_s27 = int_to_ptr.hbm [resolvable:$true] %s144_s27 }
   0xa   : > { %p784_p7 = pnand %p520_p4, %p132_p5  ;;  %s721_s28 = smov [#allocation4]  }
   0xb   : > { %s793_s24 = scalar_select %p33_p6, %s707_s13, %s35_s19  }
   0xc   : > { %p598_p9 = pneg %p784_p7  ;;  %s146_s29 = sshll.u32 %s721_s28, 4  ;;  %s147_s29 = int_to_ptr.vmem [resolvable:$true] %s146_s29 }
   0xd   : > { %p522_p11 = scmp.ge.s32.totalorder %s719_s16, 9 }
   0xe   : > { %p599_p10 = pnand %p788_p8, %p598_p9 }
   0xf   : > { %153 = sbr.rel (%p522_p11) target bundleno = 28 (0x1c), region = 20 }
  0x10   : > { %601 = dma.hbm_to_vmem [thread:$0]  (!%p599_p10), %s145_s27, 16, %s147_s29, [#allocation5]  }
  0x14   : > { %156 = sbr.rel (!%p776_p3) target bundleno = 28 (0x1c), region = 24  ;;  %s158_s30 = sand.u32 (%p776_p3), 1, %s707_s13  }
  0x15   : > { %s524_s4 = sshll.u32 (%p776_p3), %s715_s15, 2  ;;  %s523_s5 = sshll.u32 (%p776_p3), %s158_s30, 4 }
  0x16   : > { %s165_s8 = scalar_lea.vmem (%p776_p3), %s857_s0, %s524_s4  ;;  %s160_s9 = scalar_lea.vmem (%p776_p3), [#allocation3], %s523_s5 }
  0x17   : > { %v182_v0 = vld [vmem:[%s165_s8] sm:$0xf] (%p776_p3)  ;;  %v184_v1 = vld [vmem:[%s165_s8 + $0x24] sm:$0xf] (%p776_p3)  ;;  %v186_v2 = vld [vmem:[%s165_s8 + $0x48] sm:$0xf] (%p776_p3) }
  0x18   : > { %183 = vst [vmem:[%s160_s9] sm:$0xf] (%p776_p3), %v182_v0  ;;  %v188_v3 = vld [vmem:[%s165_s8 + $0x6c] sm:$0xf] (%p776_p3) }
  0x19   : > { %185 = vst [vmem:[%s160_s9 + $0x4] sm:$0xf] %v184_v1 }
  0x1a   : > { %187 = vst [vmem:[%s160_s9 + $0x8] sm:$0xf] %v186_v2 }
  0x1b   : > { %189 = vst [vmem:[%s160_s9 + $0xc] sm:$0xf] %v188_v3 }
  0x1c PF: > { %233 = sbr.rel (%p784_p7) target bundleno = 228 (0xe4), region = 69  ;;  %s236_s10 = sand.u32 (!%p784_p7), 1, %s703_s12  }
  0x1d   : > { %s813_s11 = sshll.u32 (!%p784_p7), %s236_s10, 4 }
  0x1e   : > { %s238_s17 = scalar_lea.vmem (!%p784_p7), [#allocation3], %s813_s11 }
  0x21   : > { %698 = dma.done.wait (%p788_p8), [#allocation5], 16  }
  0x22   : > { %700 = vsyncadd (%p788_p8), [#allocation5], 4294967280  ;;  %s528_s19 = sshll.u32 %s711_s14, 4  ;;  %p530_p13 = scmp.ne.s32.totalorder %s711_s14, 0 }
  0x23   : > { %p271_p12 = scmp.lt.s32.totalorder %s528_s19, 143 }
  0x24   : > { %285 = sbr.rel (%p530_p13) target bundleno = 46 (0x2e), region = 81 }
  0x25   : > { %s871_s19 = smov (!%p271_p12, %s528_s19), 143 }
  0x26   : > { %s529_s20 = sshll.u32 %s871_s19, 2 }
  0x27   : > { %s274_s25 = scalar_lea.vmem %s858_s1, %s529_s20 }
  0x29   : > { %v722_v4 = vmov 0.0  }
  0x2a   : > { %286 = vst [vmem:[#allocation2 + $0x10] sm:$0xff] %v722_v4 }
  0x2b   : > { %287 = vst [vmem:[#allocation2] sm:$0xff] %v722_v4 }
  0x2c   : > { %288 = vst [vmem:[#allocation2 + $0x18] sm:$0xff] %v722_v4 }
  0x2d   : > { %289 = vst [vmem:[#allocation2 + $0x8] sm:$0xff] %v722_v4 }
  0x2e PF: > { %v585_v5 = vld [vmem:[%s274_s25 + $0x38] sm:$0xff]  ;;  %v584_v6 = vld [vmem:[%s274_s25 + $0x30] sm:$0xff]  ;;  %v583_v7 = vld [vmem:[%s274_s25 + $0x28] sm:$0xff]  ;;  %p571_p0 = scmp.ne.s32.totalorder %s711_s14, 8 }
  0x2f   : > { %374 = vmatpush.bf16.msra.mxu0 %v585_v5  ;;  %586 = vmatpush.bf16.msra.mxu1 %v585_v5  ;;  %v582_v8 = vld [vmem:[%s274_s25 + $0x20] sm:$0xff]  ;;  %v581_v9 = vld [vmem:[%s274_s25 + $0x18] sm:$0xff]  ;;  %v580_v10 = vld [vmem:[%s274_s25 + $0x10] sm:$0xff] }
  0x30   : > { %v579_v11 = vld [vmem:[%s274_s25 + $0x8] sm:$0xff]  ;;  %v578_v12 = vld [vmem:[%s274_s25] sm:$0xff] }
  0x31   : > { %v576_v13 = vld [vmem:[%s238_s17] sm:$0xff]  ;;  %v577_v14 = vld [vmem:[%s238_s17 + $0x8] sm:$0xff] }
  0x32   : > { %v290_v15 = vld [vmem:[#allocation2 + $0x10] sm:$0xff]  ;;  %v291_v21 = vld [vmem:[#allocation2] sm:$0xff] }
  0x33   : > { %375 = vmatpush.bf16.msra.mxu0 %v584_v6  ;;  %587 = vmatpush.bf16.msra.mxu1 %v584_v6  ;;  %v292_v16 = vld [vmem:[#allocation2 + $0x18] sm:$0xff] }
  0x34   : > { %v293_v22 = vld [vmem:[#allocation2 + $0x8] sm:$0xff] }
  0x37   : > { %376 = vmatpush.bf16.msra.mxu0 %v583_v7  ;;  %588 = vmatpush.bf16.msra.mxu1 %v583_v7 }
  0x3b   : > { %377 = vmatpush.bf16.msra.mxu0 %v582_v8  ;;  %589 = vmatpush.bf16.msra.mxu1 %v582_v8 }
  0x3f   : > { %378 = vmatpush.bf16.msra.mxu0 %v581_v9  ;;  %590 = vmatpush.bf16.msra.mxu1 %v581_v9 }
  0x43   : > { %379 = vmatpush.bf16.msra.mxu0 %v580_v10  ;;  %591 = vmatpush.bf16.msra.mxu1 %v580_v10 }
  0x47   : > { %380 = vmatpush.bf16.msra.mxu0 %v579_v11  ;;  %592 = vmatpush.bf16.msra.mxu1 %v579_v11 }
  0x4b   : > { %381 = vmatpush.bf16.msra.mxu0 %v578_v12  ;;  %593 = vmatpush.bf16.msra.mxu1 %v578_v12 }
  0x4e   : > { %382 = vmatmul.bf16.vlgmr.msra.gmra.mxu0 %v576_v13  ;;  %387 = vmatmul.bf16.vlgmr.msra.gmra.mxu1 %v577_v14 }
  0xcb   : > { %v383_v17 = vpop.f32.mrf.mxu0  ;;  %v388_v18 = vpop.f32.mrf.mxu1 }
  0xcc   : > { %v393_v19 = vadd.f32 %v383_v17, %v290_v15  ;;  %v395_v20 = vadd.f32 %v388_v18, %v292_v16 }
  0xce   : > { %397 = vst [vmem:[#allocation2 + $0x10] sm:$0xff] %v393_v19 }
  0xcf   : > { %399 = vst [vmem:[#allocation2 + $0x18] sm:$0xff] %v395_v20 }
  0xd3   : > { %v385_v23 = vpop.f32.mrf.mxu0  ;;  %v390_v24 = vpop.f32.mrf.mxu1  ;;  %404 = sbr.rel (%p571_p0) target bundleno = 228 (0xe4), region = 85 }
  0xd4   : > { %v394_v25 = vadd.f32 %v385_v23, %v291_v21  ;;  %v396_v26 = vadd.f32 %v390_v24, %v293_v22 }
  0xd6   : > { %398 = vst [vmem:[#allocation2] sm:$0xff] %v394_v25 }
  0xd7   : > { %400 = vst [vmem:[#allocation2 + $0x8] sm:$0xff] %v396_v26 }
  0xd8   : > { %v405_v27 = vld [vmem:[#allocation2 + $0x10] sm:$0xff]  ;;  %v646_v28 = vld [vmem:[#allocation4] ss:$0 sm:$0xff]  ;;  %v407_v30 = vld [vmem:[#allocation2 + $0x18] sm:$0xff] }
  0xd9   : > { %v413_v32 = vadd.f32 %v646_v28, %v405_v27  ;;  %v415_v34 = vadd.f32 %v646_v28, %v407_v30 }
  0xdb   : > { %v417_v36 = vmax.f32 %v413_v32, 0.0  ;;  %v419_v38 = vmax.f32 %v415_v34, 0.0 }
  0xdd   : > { %v406_v29 = vld [vmem:[#allocation2] sm:$0xff]  ;;  %421 = vst [vmem:[%s860_s3] sm:$0xff] %v417_v36 }
  0xde   : > { %v408_v31 = vld [vmem:[#allocation2 + $0x8] sm:$0xff]  ;;  %v414_v33 = vadd.f32 %v646_v28, %v406_v29  ;;  %423 = vst [vmem:[%s860_s3 + $0x10] sm:$0xff] %v419_v38 }
  0xdf   : > { %v416_v35 = vadd.f32 %v646_v28, %v408_v31 }
  0xe0   : > { %v418_v37 = vmax.f32 %v414_v33, 0.0 }
  0xe1   : > { %v420_v39 = vmax.f32 %v416_v35, 0.0 }
  0xe2   : > { %422 = vst [vmem:[%s860_s3 + $0x8] sm:$0xff] %v418_v37 }
  0xe3   : > { %424 = vst [vmem:[%s860_s3 + $0x18] sm:$0xff] %v420_v39 }
  0xe4 PF: > { %s14_s16 = sadd.s32 1, %s719_s16   ;;  %s864_s12 = smov %s707_s13 }
  0xe5   : > { %p11_p1 = scmp.ge.s32.totalorder %s14_s16, 11   ;;  %s865_s13 = smov %s793_s24 }
  0xe6   : > { %s866_s14 = smov %s715_s15  ;;  %s867_s15 = smov %s869_s18 }
  0xe7   :  { %13 = sbr.rel (!%p11_p1) target bundleno = 3 (0x3), region = 124 }
  0xec   :  { %447 = vsyncpa [#allocation5], 1 }
  0xed   :  { %449 = vsyncpa [#allocation5 + $0x1], 1 }

// kernel: resnet_encoder_mtan_forward.27
= control target key start
LH: loop header
LB: loop body
LE: loop exit
PB: predicated region body
PF: predicated region fallthrough
CT: control target
= control target key end

     0   :  { %s746_s15 = smov 0   ;;  %s748_s16 = smov 0   ;;  %s857_s0 = inlined_call_operand.vmem [shape: bf16[32,1152], index: 0, kind: input, shape index: {}]   ;;  %s858_s1 = inlined_call_operand.vmem [shape: bf16[1152,128], index: 1, kind: input, shape index: {}]   ;;  %s859_s2 = inlined_call_operand.vmem [shape: f32[1,128], index: 2, kind: input, shape index: {}]   ;;  %s860_s3 = inlined_call_operand.vmem [shape: f32[32,128], index: 3, kind: input, shape index: {}]   ;;  %s861_s4 = inlined_call_operand.vmem [shape: f32[32,128], index: 4, kind: output, shape index: {}]  }
   0x1   :  { %s750_s17 = smov 0   ;;  %s752_s18 = smov 0  }
   0x2   :  { %s754_s19 = smov 0  }
   0x3 LB: > { %s23_s20 = sadd.s32 1, %s714_s18  ;;  %p42_p1 = scmp.ne.s32.totalorder %s706_s16, %s702_s15  ;;  %s718_s19 = sphi %s754_s19, %s14_s19   ;;  %s714_s18 = sphi %s752_s18, %s865_s18   ;;  %s710_s17 = sphi %s750_s17, %s864_s17   ;;  %s706_s16 = sphi %s748_s16, %s863_s16   ;;  %s702_s15 = sphi %s746_s15, %s862_s15  }
   0x4   : > { %p24_p0 = scmp.ge.s32.totalorder %s23_s20, 9  ;;  %p43_p2 = scmp.eq.s32.totalorder %s718_s19, 0 }
   0x5   : > { %s35_s22 = sadd.s32 1, %s706_s16  ;;  %p567_p5 = scmp.ge.s32.totalorder %s718_s19, 9 }
   0x6   : > { %s867_s20 = smov (%p24_p0, %s23_s20), 0  ;;  %p44_p3 = por %p43_p2, %p42_p1 }
   0x7   : > { %s31_s21 = ssub.s32 %s714_s18, %s867_s20  ;;  %179 = sbr.rel (%p567_p5) target bundleno = 20 (0x14), region = 24 }
   0x8   : > { %p33_p4 = scmp.eq.s32.totalorder %s31_s21, 0 }
   0xa   : > { %s781_s23 = scalar_select %p33_p4, %s706_s16, %s35_s22  }
   0xc   : > { %182 = sbr.rel (!%p44_p3) target bundleno = 20 (0x14), region = 28  ;;  %s184_s24 = sand.u32 (%p44_p3), 1, %s706_s16  }
   0xd   : > { %s569_s25 = sshll.u32 (%p44_p3), %s714_s18, 2  ;;  %s568_s26 = sshll.u32 (%p44_p3), %s184_s24, 4 }
   0xe   : > { %s191_s29 = scalar_lea.vmem (%p44_p3), %s857_s0, %s569_s25  ;;  %s186_s30 = scalar_lea.vmem (%p44_p3), [#allocation3], %s568_s26 }
   0xf   : > { %v208_v0 = vld [vmem:[%s191_s29] sm:$0xf] (%p44_p3)  ;;  %v210_v1 = vld [vmem:[%s191_s29 + $0x24] sm:$0xf] (%p44_p3)  ;;  %v212_v2 = vld [vmem:[%s191_s29 + $0x48] sm:$0xf] (%p44_p3) }
  0x10   : > { %209 = vst [vmem:[%s186_s30] sm:$0xf] (%p44_p3), %v208_v0  ;;  %v214_v3 = vld [vmem:[%s191_s29 + $0x6c] sm:$0xf] (%p44_p3) }
  0x11   : > { %211 = vst [vmem:[%s186_s30 + $0x4] sm:$0xf] %v210_v1 }
  0x12   : > { %213 = vst [vmem:[%s186_s30 + $0x8] sm:$0xf] %v212_v2 }
  0x13   : > { %215 = vst [vmem:[%s186_s30 + $0xc] sm:$0xf] %v214_v3 }
  0x14 PF: > { %p570_p6 = scmp.ge.s32.totalorder %s718_s19, 1  ;;  %p255_p7 = scmp.lt.s32.totalorder %s718_s19, 10 }
  0x16   : > { %p256_p8 = pnand %p570_p6, %p255_p7 }
  0x17   : > { %s262_s5 = sand.u32 (!%p256_p8), 1, %s702_s15   ;;  %s572_s6 = sshll.u32 (!%p256_p8), %s710_s17, 4 }
  0x18   : > { %259 = sbr.rel (%p256_p8) target bundleno = 223 (0xdf), region = 73  ;;  %s793_s7 = sshll.u32 (!%p256_p8), %s262_s5, 4 }
  0x19   : > { %p299_p9 = scmp.lt.s32.totalorder (!%p256_p8), %s572_s6, 143  ;;  %s264_s12 = scalar_lea.vmem (!%p256_p8), [#allocation3], %s793_s7 }
  0x1a   : > { %p574_p10 = scmp.ne.s32.totalorder (!%p256_p8), %s710_s17, 0 }
  0x1d   : > { %s869_s6 = smov (!%p299_p9, %s572_s6), 143  ;;  %319 = sbr.rel (%p574_p10) target bundleno = 39 (0x27), region = 81 }
  0x1e   : > { %s573_s8 = sshll.u32 %s869_s6, 2 }
  0x1f   : > { %s798_s11 = scalar_lea.vmem %s858_s1, %s573_s8 }
  0x22   : > { %v720_v4 = vmov 0.0  }
  0x23   : > { %320 = vst [vmem:[#allocation2 + $0x10] sm:$0xff] %v720_v4 }
  0x24   : > { %321 = vst [vmem:[#allocation2] sm:$0xff] %v720_v4 }
  0x25   : > { %322 = vst [vmem:[#allocation2 + $0x18] sm:$0xff] %v720_v4 }
  0x26   : > { %323 = vst [vmem:[#allocation2 + $0x8] sm:$0xff] %v720_v4 }
  0x27 PF: > { %v629_v5 = vld [vmem:[%s798_s11 + $0x38] sm:$0xff]  ;;  %v628_v6 = vld [vmem:[%s798_s11 + $0x30] sm:$0xff]  ;;  %v627_v7 = vld [vmem:[%s798_s11 + $0x28] sm:$0xff]  ;;  %p615_p11 = scmp.ne.s32.totalorder %s710_s17, 8 }
  0x28   : > { %408 = vmatpush.bf16.msra.mxu0 %v629_v5  ;;  %630 = vmatpush.bf16.msra.mxu1 %v629_v5  ;;  %v626_v8 = vld [vmem:[%s798_s11 + $0x20] sm:$0xff]  ;;  %v625_v9 = vld [vmem:[%s798_s11 + $0x18] sm:$0xff]  ;;  %v624_v10 = vld [vmem:[%s798_s11 + $0x10] sm:$0xff] }
  0x29   : > { %v623_v11 = vld [vmem:[%s798_s11 + $0x8] sm:$0xff]  ;;  %v622_v12 = vld [vmem:[%s798_s11] sm:$0xff] }
  0x2a   : > { %v620_v13 = vld [vmem:[%s264_s12] sm:$0xff]  ;;  %v621_v14 = vld [vmem:[%s264_s12 + $0x8] sm:$0xff] }
  0x2b   : > { %v324_v15 = vld [vmem:[#allocation2 + $0x10] sm:$0xff]  ;;  %v325_v21 = vld [vmem:[#allocation2] sm:$0xff] }
  0x2c   : > { %409 = vmatpush.bf16.msra.mxu0 %v628_v6  ;;  %631 = vmatpush.bf16.msra.mxu1 %v628_v6  ;;  %v326_v16 = vld [vmem:[#allocation2 + $0x18] sm:$0xff] }
  0x2d   : > { %v327_v22 = vld [vmem:[#allocation2 + $0x8] sm:$0xff] }
  0x30   : > { %410 = vmatpush.bf16.msra.mxu0 %v627_v7  ;;  %632 = vmatpush.bf16.msra.mxu1 %v627_v7 }
  0x34   : > { %411 = vmatpush.bf16.msra.mxu0 %v626_v8  ;;  %633 = vmatpush.bf16.msra.mxu1 %v626_v8 }
  0x38   : > { %412 = vmatpush.bf16.msra.mxu0 %v625_v9  ;;  %634 = vmatpush.bf16.msra.mxu1 %v625_v9 }
  0x3c   : > { %413 = vmatpush.bf16.msra.mxu0 %v624_v10  ;;  %635 = vmatpush.bf16.msra.mxu1 %v624_v10 }
  0x40   : > { %414 = vmatpush.bf16.msra.mxu0 %v623_v11  ;;  %636 = vmatpush.bf16.msra.mxu1 %v623_v11 }
  0x44   : > { %415 = vmatpush.bf16.msra.mxu0 %v622_v12  ;;  %637 = vmatpush.bf16.msra.mxu1 %v622_v12 }
  0x47   : > { %416 = vmatmul.bf16.vlgmr.msra.gmra.mxu0 %v620_v13  ;;  %421 = vmatmul.bf16.vlgmr.msra.gmra.mxu1 %v621_v14 }
  0xc4   : > { %v417_v17 = vpop.f32.mrf.mxu0  ;;  %v422_v18 = vpop.f32.mrf.mxu1 }
  0xc5   : > { %v427_v19 = vadd.f32 %v417_v17, %v324_v15  ;;  %v429_v20 = vadd.f32 %v422_v18, %v326_v16 }
  0xc7   : > { %431 = vst [vmem:[#allocation2 + $0x10] sm:$0xff] %v427_v19 }
  0xc8   : > { %433 = vst [vmem:[#allocation2 + $0x18] sm:$0xff] %v429_v20 }
  0xcc   : > { %v419_v23 = vpop.f32.mrf.mxu0  ;;  %v424_v24 = vpop.f32.mrf.mxu1  ;;  %438 = sbr.rel (%p615_p11) target bundleno = 223 (0xdf), region = 85 }
  0xcd   : > { %v428_v25 = vadd.f32 %v419_v23, %v325_v21  ;;  %v430_v26 = vadd.f32 %v424_v24, %v327_v22 }
  0xcf   : > { %432 = vst [vmem:[#allocation2] sm:$0xff] %v428_v25 }
  0xd0   : > { %434 = vst [vmem:[#allocation2 + $0x8] sm:$0xff] %v430_v26 }
  0xd1   : > { %v439_v27 = vld [vmem:[#allocation2 + $0x10] sm:$0xff]  ;;  %v679_v28 = vld [vmem:[%s859_s2] ss:$0 sm:$0xff]  ;;  %v452_v31 = vld [vmem:[%s860_s3 + $0x8] sm:$0xff] }
  0xd2   : > { %v451_v29 = vld [vmem:[%s860_s3] sm:$0xff]  ;;  %v447_v32 = vadd.f32 %v679_v28, %v439_v27  ;;  %v441_v34 = vld [vmem:[#allocation2 + $0x18] sm:$0xff]  ;;  %v453_v35 = vld [vmem:[%s860_s3 + $0x10] sm:$0xff] }
  0xd3   : > { %v449_v37 = vadd.f32 %v679_v28, %v441_v34  ;;  %v454_v39 = vld [vmem:[%s860_s3 + $0x18] sm:$0xff] }
  0xd4   : > { %v455_v40 = vadd.f32 %v451_v29, %v447_v32 }
  0xd5   : > { %v457_v42 = vadd.f32 %v453_v35, %v449_v37 }
  0xd6   : > { %v440_v30 = vld [vmem:[#allocation2] sm:$0xff]  ;;  %v459_v44 = vmax.f32 %v455_v40, 0.0 }
  0xd7   : > { %v448_v33 = vadd.f32 %v679_v28, %v440_v30  ;;  %v442_v36 = vld [vmem:[#allocation2 + $0x8] sm:$0xff]  ;;  %v461_v46 = vmax.f32 %v457_v42, 0.0 }
  0xd8   : > { %v450_v38 = vadd.f32 %v679_v28, %v442_v36  ;;  %463 = vst [vmem:[%s861_s4] sm:$0xff] %v459_v44 }
  0xd9   : > { %v456_v41 = vadd.f32 %v452_v31, %v448_v33  ;;  %465 = vst [vmem:[%s861_s4 + $0x10] sm:$0xff] %v461_v46 }
  0xda   : > { %v458_v43 = vadd.f32 %v454_v39, %v450_v38 }
  0xdb   : > { %v460_v45 = vmax.f32 %v456_v41, 0.0 }
  0xdc   : > { %v462_v47 = vmax.f32 %v458_v43, 0.0 }
  0xdd   : > { %464 = vst [vmem:[%s861_s4 + $0x8] sm:$0xff] %v460_v45 }
  0xde   : > { %466 = vst [vmem:[%s861_s4 + $0x18] sm:$0xff] %v462_v47 }
  0xdf PF: > { %s14_s19 = sadd.s32 1, %s718_s19   ;;  %s862_s15 = smov %s706_s16 }
  0xe0   : > { %p11_p12 = scmp.ge.s32.totalorder %s14_s19, 11   ;;  %s863_s16 = smov %s781_s23 }
  0xe1   : > { %s864_s17 = smov %s714_s18  ;;  %s865_s18 = smov %s867_s20 }
  0xe2   :  { %13 = sbr.rel (!%p11_p12) target bundleno = 3 (0x3), region = 126 }

// kernel: resnet_encoder_mtan_forward.26
= control target key start
LH: loop header
LB: loop body
LE: loop exit
PB: predicated region body
PF: predicated region fallthrough
CT: control target
= control target key end

     0   :  { %s280_s1 = inlined_call_operand.vmem [shape: bf16[128,128], index: 1, kind: input, shape index: {}]   ;;  %s281_s2 = inlined_call_operand.vmem [shape: f32[1,128], index: 2, kind: input, shape index: {}]   ;;  %s282_s0 = inlined_call_operand.vmem [shape: bf16[32,128], index: 0, kind: input, shape index: {}]   ;;  %s283_s3 = inlined_call_operand.vmem [shape: f32[32,128], index: 3, kind: output, shape index: {}]  }
   0x1   :  { %v205_v0 = vld [vmem:[%s280_s1 + $0x38] sm:$0xff]  ;;  %v204_v1 = vld [vmem:[%s280_s1 + $0x30] sm:$0xff]  ;;  %v203_v2 = vld [vmem:[%s280_s1 + $0x28] sm:$0xff] }
   0x2   :  { %106 = vmatpush.bf16.msra.mxu0 %v205_v0  ;;  %206 = vmatpush.bf16.msra.mxu1 %v205_v0  ;;  %v202_v3 = vld [vmem:[%s280_s1 + $0x20] sm:$0xff]  ;;  %v201_v4 = vld [vmem:[%s280_s1 + $0x18] sm:$0xff]  ;;  %v200_v5 = vld [vmem:[%s280_s1 + $0x10] sm:$0xff] }
   0x3   :  { %v199_v6 = vld [vmem:[%s280_s1 + $0x8] sm:$0xff]  ;;  %v198_v7 = vld [vmem:[%s280_s1] sm:$0xff] }
   0x4   :  { %v196_v8 = vld [vmem:[%s282_s0] sm:$0xff]  ;;  %v197_v9 = vld [vmem:[%s282_s0 + $0x8] sm:$0xff] }
   0x5   :  { %v214_v10 = vld [vmem:[%s281_s2] ss:$0 sm:$0xff] }
   0x6   :  { %107 = vmatpush.bf16.msra.mxu0 %v204_v1  ;;  %207 = vmatpush.bf16.msra.mxu1 %v204_v1 }
   0xa   :  { %108 = vmatpush.bf16.msra.mxu0 %v203_v2  ;;  %208 = vmatpush.bf16.msra.mxu1 %v203_v2 }
   0xe   :  { %109 = vmatpush.bf16.msra.mxu0 %v202_v3  ;;  %209 = vmatpush.bf16.msra.mxu1 %v202_v3 }
  0x12   :  { %110 = vmatpush.bf16.msra.mxu0 %v201_v4  ;;  %210 = vmatpush.bf16.msra.mxu1 %v201_v4 }
  0x16   :  { %111 = vmatpush.bf16.msra.mxu0 %v200_v5  ;;  %211 = vmatpush.bf16.msra.mxu1 %v200_v5 }
  0x1a   :  { %112 = vmatpush.bf16.msra.mxu0 %v199_v6  ;;  %212 = vmatpush.bf16.msra.mxu1 %v199_v6 }
  0x1e   :  { %113 = vmatpush.bf16.msra.mxu0 %v198_v7  ;;  %213 = vmatpush.bf16.msra.mxu1 %v198_v7 }
  0x21   :  { %114 = vmatmul.bf16.vlgmr.msra.gmra.mxu0 %v196_v8  ;;  %119 = vmatmul.bf16.vlgmr.msra.gmra.mxu1 %v197_v9 }
  0x9e   :  { %v115_v11 = vpop.f32.mrf.mxu0  ;;  %v120_v12 = vpop.f32.mrf.mxu1 }
  0x9f   :  { %v144_v13 = vadd.f32 %v214_v10, %v115_v11  ;;  %v146_v14 = vadd.f32 %v214_v10, %v120_v12 }
  0xa1   :  { %148 = vst [vmem:[%s283_s3] sm:$0xff] %v144_v13 }
  0xa2   :  { %150 = vst [vmem:[%s283_s3 + $0x10] sm:$0xff] %v146_v14 }
  0xa6   :  { %v117_v15 = vpop.f32.mrf.mxu0  ;;  %v122_v16 = vpop.f32.mrf.mxu1 }
  0xa7   :  { %v145_v17 = vadd.f32 %v214_v10, %v117_v15  ;;  %v147_v18 = vadd.f32 %v214_v10, %v122_v16 }
  0xa9   :  { %149 = vst [vmem:[%s283_s3 + $0x8] sm:$0xff] %v145_v17 }
  0xaa   :  { %151 = vst [vmem:[%s283_s3 + $0x18] sm:$0xff] %v147_v18 }

// kernel: resnet_encoder_mtan_forward.29
= control target key start
LH: loop header
LB: loop body
LE: loop exit
PB: predicated region body
PF: predicated region fallthrough
CT: control target
= control target key end

     0   :  { %9 = vsyncpa [#allocation5], 0  ;;  %s821_s15 = smov 0   ;;  %s823_s16 = smov 0   ;;  %s947_s0 = inlined_call_operand.vmem [shape: bf16[32,1152], index: 0, kind: input, shape index: {}]   ;;  %s948_s1 = inlined_call_operand.vmem [shape: bf16[1152,128], index: 1, kind: input, shape index: {}]   ;;  %s949_s2 = inlined_call_operand.hbm [shape: f32[1,128], index: 2, kind: input, shape index: {}]   ;;  %s950_s3 = inlined_call_operand.vmem [shape: f32[32,128], index: 3, kind: input, shape index: {}]   ;;  %s951_s4 = inlined_call_operand.vmem [shape: f32[32,128], index: 4, kind: output, shape index: {}]  }
   0x1   :  { %s825_s17 = smov 0   ;;  %s827_s18 = smov 0  }
   0x2   :  { %s829_s19 = smov 0  }
   0x3 LB: > { %s591_s20 = sadd.s32 4294967295, %s792_s19   ;;  %s24_s21 = sadd.s32 1, %s788_s18  ;;  %s792_s19 = sphi %s829_s19, %s15_s19   ;;  %s788_s18 = sphi %s827_s18, %s958_s18   ;;  %s784_s17 = sphi %s825_s17, %s957_s17   ;;  %s780_s16 = sphi %s823_s16, %s956_s16   ;;  %s776_s15 = sphi %s821_s15, %s955_s15  }
   0x4   : > { %p25_p0 = scmp.ge.s32.totalorder %s24_s21, 9  ;;  %s36_s22 = sadd.s32 1, %s780_s16 }
   0x5   : > { %p43_p1 = scmp.ne.s32.totalorder %s780_s16, %s776_s15  ;;  %p44_p2 = scmp.eq.s32.totalorder %s792_s19, 0 }
   0x6   : > { %s960_s21 = smov (%p25_p0, %s24_s21), 0  ;;  %p592_p4 = scmp.ge.s32.totalorder %s792_s19, 1 }
   0x7   : > { %p854_p3 = por %p44_p2, %p43_p1  ;;  %s32_s24 = ssub.s32 %s788_s18, %s960_s21 }
   0x8   : > { %p159_p5 = scmp.lt.s32.totalorder %s792_s19, 10  ;;  %p34_p6 = scmp.eq.s32.totalorder %s32_s24, 0 }
   0x9   : > { %p866_p8 = scmp.eq.s32.totalorder %s591_s20, 0  ;;  %s171_s30 = sshll.u32 %s949_s2, 4  ;;  %s172_s30 = int_to_ptr.hbm [resolvable:$true] %s171_s30 }
   0xa   : > { %p862_p7 = pnand %p592_p4, %p159_p5  ;;  %s794_s5 = smov [#allocation4]  }
   0xb   : > { %s871_s27 = scalar_select %p34_p6, %s780_s16, %s36_s22  }
   0xc   : > { %p671_p9 = pneg %p862_p7  ;;  %s173_s6 = sshll.u32 %s794_s5, 4  ;;  %s174_s6 = int_to_ptr.vmem [resolvable:$true] %s173_s6 }
   0xd   : > { %p595_p11 = scmp.ge.s32.totalorder %s792_s19, 9 }
   0xe   : > { %p672_p10 = pnand %p866_p8, %p671_p9 }
   0xf   : > { %189 = sbr.rel (%p595_p11) target bundleno = 28 (0x1c), region = 24 }
  0x10   : > { %674 = dma.hbm_to_vmem [thread:$0]  (!%p672_p10), %s172_s30, 16, %s174_s6, [#allocation5]  }
  0x14   : > { %192 = sbr.rel (!%p854_p3) target bundleno = 28 (0x1c), region = 28  ;;  %s194_s7 = sand.u32 (%p854_p3), 1, %s780_s16  }
  0x15   : > { %s597_s8 = sshll.u32 (%p854_p3), %s788_s18, 2  ;;  %s596_s9 = sshll.u32 (%p854_p3), %s194_s7, 4 }
  0x16   : > { %s201_s12 = scalar_lea.vmem (%p854_p3), %s947_s0, %s597_s8  ;;  %s196_s13 = scalar_lea.vmem (%p854_p3), [#allocation3], %s596_s9 }
  0x17   : > { %v218_v0 = vld [vmem:[%s201_s12] sm:$0xf] (%p854_p3)  ;;  %v220_v1 = vld [vmem:[%s201_s12 + $0x24] sm:$0xf] (%p854_p3)  ;;  %v222_v2 = vld [vmem:[%s201_s12 + $0x48] sm:$0xf] (%p854_p3) }
  0x18   : > { %219 = vst [vmem:[%s196_s13] sm:$0xf] (%p854_p3), %v218_v0  ;;  %v224_v3 = vld [vmem:[%s201_s12 + $0x6c] sm:$0xf] (%p854_p3) }
  0x19   : > { %221 = vst [vmem:[%s196_s13 + $0x4] sm:$0xf] %v220_v1 }
  0x1a   : > { %223 = vst [vmem:[%s196_s13 + $0x8] sm:$0xf] %v222_v2 }
  0x1b   : > { %225 = vst [vmem:[%s196_s13 + $0xc] sm:$0xf] %v224_v3 }
  0x1c PF: > { %269 = sbr.rel (%p862_p7) target bundleno = 230 (0xe6), region = 73  ;;  %s272_s14 = sand.u32 (!%p862_p7), 1, %s776_s15  }
  0x1d   : > { %s891_s20 = sshll.u32 (!%p862_p7), %s272_s14, 4 }
  0x1e   : > { %s274_s22 = scalar_lea.vmem (!%p862_p7), [#allocation3], %s891_s20 }
  0x21   : > { %771 = dma.done.wait (%p866_p8), [#allocation5], 16  }
  0x22   : > { %773 = vsyncadd (%p866_p8), [#allocation5], 4294967280  ;;  %s601_s23 = sshll.u32 %s784_s17, 4  ;;  %p603_p13 = scmp.ne.s32.totalorder %s784_s17, 0 }
  0x23   : > { %p314_p12 = scmp.lt.s32.totalorder %s601_s23, 143 }
  0x24   : > { %334 = sbr.rel (%p603_p13) target bundleno = 46 (0x2e), region = 85 }
  0x25   : > { %s962_s23 = smov (!%p314_p12, %s601_s23), 143 }
  0x26   : > { %s602_s24 = sshll.u32 %s962_s23, 2 }
  0x27   : > { %s317_s29 = scalar_lea.vmem %s948_s1, %s602_s24 }
  0x29   : > { %v795_v4 = vmov 0.0  }
  0x2a   : > { %335 = vst [vmem:[#allocation2 + $0x10] sm:$0xff] %v795_v4 }
  0x2b   : > { %336 = vst [vmem:[#allocation2] sm:$0xff] %v795_v4 }
  0x2c   : > { %337 = vst [vmem:[#allocation2 + $0x18] sm:$0xff] %v795_v4 }
  0x2d   : > { %338 = vst [vmem:[#allocation2 + $0x8] sm:$0xff] %v795_v4 }
  0x2e PF: > { %v658_v5 = vld [vmem:[%s317_s29 + $0x38] sm:$0xff]  ;;  %v657_v6 = vld [vmem:[%s317_s29 + $0x30] sm:$0xff]  ;;  %v656_v7 = vld [vmem:[%s317_s29 + $0x28] sm:$0xff]  ;;  %p644_p0 = scmp.ne.s32.totalorder %s784_s17, 8 }
  0x2f   : > { %423 = vmatpush.bf16.msra.mxu0 %v658_v5  ;;  %659 = vmatpush.bf16.msra.mxu1 %v658_v5  ;;  %v655_v8 = vld [vmem:[%s317_s29 + $0x20] sm:$0xff]  ;;  %v654_v9 = vld [vmem:[%s317_s29 + $0x18] sm:$0xff]  ;;  %v653_v10 = vld [vmem:[%s317_s29 + $0x10] sm:$0xff] }
  0x30   : > { %v652_v11 = vld [vmem:[%s317_s29 + $0x8] sm:$0xff]  ;;  %v651_v12 = vld [vmem:[%s317_s29] sm:$0xff] }
  0x31   : > { %v649_v13 = vld [vmem:[%s274_s22] sm:$0xff]  ;;  %v650_v14 = vld [vmem:[%s274_s22 + $0x8] sm:$0xff] }
  0x32   : > { %v339_v15 = vld [vmem:[#allocation2 + $0x10] sm:$0xff]  ;;  %v340_v21 = vld [vmem:[#allocation2] sm:$0xff] }
  0x33   : > { %424 = vmatpush.bf16.msra.mxu0 %v657_v6  ;;  %660 = vmatpush.bf16.msra.mxu1 %v657_v6  ;;  %v341_v16 = vld [vmem:[#allocation2 + $0x18] sm:$0xff] }
  0x34   : > { %v342_v22 = vld [vmem:[#allocation2 + $0x8] sm:$0xff] }
  0x37   : > { %425 = vmatpush.bf16.msra.mxu0 %v656_v7  ;;  %661 = vmatpush.bf16.msra.mxu1 %v656_v7 }
  0x3b   : > { %426 = vmatpush.bf16.msra.mxu0 %v655_v8  ;;  %662 = vmatpush.bf16.msra.mxu1 %v655_v8 }
  0x3f   : > { %427 = vmatpush.bf16.msra.mxu0 %v654_v9  ;;  %663 = vmatpush.bf16.msra.mxu1 %v654_v9 }
  0x43   : > { %428 = vmatpush.bf16.msra.mxu0 %v653_v10  ;;  %664 = vmatpush.bf16.msra.mxu1 %v653_v10 }
  0x47   : > { %429 = vmatpush.bf16.msra.mxu0 %v652_v11  ;;  %665 = vmatpush.bf16.msra.mxu1 %v652_v11 }
  0x4b   : > { %430 = vmatpush.bf16.msra.mxu0 %v651_v12  ;;  %666 = vmatpush.bf16.msra.mxu1 %v651_v12 }
  0x4e   : > { %431 = vmatmul.bf16.vlgmr.msra.gmra.mxu0 %v649_v13  ;;  %436 = vmatmul.bf16.vlgmr.msra.gmra.mxu1 %v650_v14 }
  0xcb   : > { %v432_v17 = vpop.f32.mrf.mxu0  ;;  %v437_v18 = vpop.f32.mrf.mxu1 }
  0xcc   : > { %v442_v19 = vadd.f32 %v432_v17, %v339_v15  ;;  %v444_v20 = vadd.f32 %v437_v18, %v341_v16 }
  0xce   : > { %446 = vst [vmem:[#allocation2 + $0x10] sm:$0xff] %v442_v19 }
  0xcf   : > { %448 = vst [vmem:[#allocation2 + $0x18] sm:$0xff] %v444_v20 }
  0xd3   : > { %v434_v23 = vpop.f32.mrf.mxu0  ;;  %v439_v24 = vpop.f32.mrf.mxu1  ;;  %453 = sbr.rel (%p644_p0) target bundleno = 230 (0xe6), region = 89 }
  0xd4   : > { %v443_v25 = vadd.f32 %v434_v23, %v340_v21  ;;  %v445_v26 = vadd.f32 %v439_v24, %v342_v22 }
  0xd6   : > { %447 = vst [vmem:[#allocation2] sm:$0xff] %v443_v25 }
  0xd7   : > { %449 = vst [vmem:[#allocation2 + $0x8] sm:$0xff] %v445_v26 }
  0xd8   : > { %v454_v27 = vld [vmem:[#allocation2 + $0x10] sm:$0xff]  ;;  %v719_v28 = vld [vmem:[#allocation4] ss:$0 sm:$0xff]  ;;  %v467_v31 = vld [vmem:[%s950_s3 + $0x8] sm:$0xff] }
  0xd9   : > { %v466_v29 = vld [vmem:[%s950_s3] sm:$0xff]  ;;  %v462_v32 = vadd.f32 %v719_v28, %v454_v27  ;;  %v456_v34 = vld [vmem:[#allocation2 + $0x18] sm:$0xff]  ;;  %v468_v35 = vld [vmem:[%s950_s3 + $0x10] sm:$0xff] }
  0xda   : > { %v464_v37 = vadd.f32 %v719_v28, %v456_v34  ;;  %v469_v39 = vld [vmem:[%s950_s3 + $0x18] sm:$0xff] }
  0xdb   : > { %v470_v40 = vadd.f32 %v466_v29, %v462_v32 }
  0xdc   : > { %v472_v42 = vadd.f32 %v468_v35, %v464_v37 }
  0xdd   : > { %v455_v30 = vld [vmem:[#allocation2] sm:$0xff]  ;;  %v474_v44 = vmax.f32 %v470_v40, 0.0 }
  0xde   : > { %v463_v33 = vadd.f32 %v719_v28, %v455_v30  ;;  %v457_v36 = vld [vmem:[#allocation2 + $0x8] sm:$0xff]  ;;  %v476_v46 = vmax.f32 %v472_v42, 0.0 }
  0xdf   : > { %v465_v38 = vadd.f32 %v719_v28, %v457_v36  ;;  %478 = vst [vmem:[%s951_s4] sm:$0xff] %v474_v44 }
  0xe0   : > { %v471_v41 = vadd.f32 %v467_v31, %v463_v33  ;;  %480 = vst [vmem:[%s951_s4 + $0x10] sm:$0xff] %v476_v46 }
  0xe1   : > { %v473_v43 = vadd.f32 %v469_v39, %v465_v38 }
  0xe2   : > { %v475_v45 = vmax.f32 %v471_v41, 0.0 }
  0xe3   : > { %v477_v47 = vmax.f32 %v473_v43, 0.0 }
  0xe4   : > { %479 = vst [vmem:[%s951_s4 + $0x8] sm:$0xff] %v475_v45 }
  0xe5   : > { %481 = vst [vmem:[%s951_s4 + $0x18] sm:$0xff] %v477_v47 }
  0xe6 PF: > { %s15_s19 = sadd.s32 1, %s792_s19   ;;  %s955_s15 = smov %s780_s16 }
  0xe7   : > { %p12_p1 = scmp.ge.s32.totalorder %s15_s19, 11   ;;  %s956_s16 = smov %s871_s27 }
  0xe8   : > { %s957_s17 = smov %s788_s18  ;;  %s958_s18 = smov %s960_s21 }
  0xe9   :  { %14 = sbr.rel (!%p12_p1) target bundleno = 3 (0x3), region = 131 }
  0xee   :  { %504 = vsyncpa [#allocation5], 1 }
  0xef   :  { %506 = vsyncpa [#allocation5 + $0x1], 1 }

// kernel: resnet_encoder_mtan_forward.30
= control target key start
LH: loop header
LB: loop body
LE: loop exit
PB: predicated region body
PF: predicated region fallthrough
CT: control target
= control target key end

     0   :  { %s809_s12 = smov 0   ;;  %s811_s13 = smov 0   ;;  %s944_s0 = inlined_call_operand.vmem [shape: bf16[32,1152], index: 0, kind: input, shape index: {}]   ;;  %s945_s1 = inlined_call_operand.vmem [shape: bf16[1152,256], index: 1, kind: input, shape index: {}]   ;;  %s946_s2 = inlined_call_operand.vmem [shape: f32[1,256], index: 2, kind: input, shape index: {}]   ;;  %s947_s3 = inlined_call_operand.vmem [shape: f32[32,256], index: 3, kind: output, shape index: {}]  }
   0x1   :  { %s813_s14 = smov 0   ;;  %s815_s15 = smov 0  }
   0x2   :  { %s817_s16 = smov 0  }
   0x3 LB: > { %s22_s17 = sadd.s32 1, %s782_s15  ;;  %p41_p1 = scmp.ne.s32.totalorder %s774_s13, %s770_s12  ;;  %s786_s16 = sphi %s817_s16, %s13_s16   ;;  %s782_s15 = sphi %s815_s15, %s951_s15   ;;  %s778_s14 = sphi %s813_s14, %s950_s14   ;;  %s774_s13 = sphi %s811_s13, %s949_s13   ;;  %s770_s12 = sphi %s809_s12, %s948_s12  }
   0x4   : > { %p23_p0 = scmp.ge.s32.totalorder %s22_s17, 9  ;;  %p42_p2 = scmp.eq.s32.totalorder %s786_s16, 0 }
   0x5   : > { %s34_s19 = sadd.s32 1, %s774_s13  ;;  %p586_p5 = scmp.ge.s32.totalorder %s786_s16, 9 }
   0x6   : > { %s953_s17 = smov (%p23_p0, %s22_s17), 0  ;;  %p43_p3 = por %p42_p2, %p41_p1 }
   0x7   : > { %s30_s18 = ssub.s32 %s782_s15, %s953_s17  ;;  %143 = sbr.rel (%p586_p5) target bundleno = 20 (0x14), region = 20 }
   0x8   : > { %p32_p4 = scmp.eq.s32.totalorder %s30_s18, 0 }
   0xa   : > { %s844_s20 = scalar_select %p32_p4, %s774_s13, %s34_s19  }
   0xc   : > { %146 = sbr.rel (!%p43_p3) target bundleno = 20 (0x14), region = 24  ;;  %s148_s21 = sand.u32 (%p43_p3), 1, %s774_s13  }
   0xd   : > { %s588_s22 = sshll.u32 (%p43_p3), %s782_s15, 2  ;;  %s587_s23 = sshll.u32 (%p43_p3), %s148_s21, 4 }
   0xe   : > { %s155_s26 = scalar_lea.vmem (%p43_p3), %s944_s0, %s588_s22  ;;  %s150_s27 = scalar_lea.vmem (%p43_p3), [#allocation3], %s587_s23 }
   0xf   : > { %v172_v0 = vld [vmem:[%s155_s26] sm:$0xf] (%p43_p3)  ;;  %v174_v1 = vld [vmem:[%s155_s26 + $0x24] sm:$0xf] (%p43_p3)  ;;  %v176_v2 = vld [vmem:[%s155_s26 + $0x48] sm:$0xf] (%p43_p3) }
  0x10   : > { %173 = vst [vmem:[%s150_s27] sm:$0xf] (%p43_p3), %v172_v0  ;;  %v178_v3 = vld [vmem:[%s155_s26 + $0x6c] sm:$0xf] (%p43_p3) }
  0x11   : > { %175 = vst [vmem:[%s150_s27 + $0x4] sm:$0xf] %v174_v1 }
  0x12   : > { %177 = vst [vmem:[%s150_s27 + $0x8] sm:$0xf] %v176_v2 }
  0x13   : > { %179 = vst [vmem:[%s150_s27 + $0xc] sm:$0xf] %v178_v3 }
  0x14 PF: > { %p589_p6 = scmp.ge.s32.totalorder %s786_s16, 1  ;;  %p220_p7 = scmp.lt.s32.totalorder %s786_s16, 10 }
  0x16   : > { %p221_p8 = pnand %p589_p6, %p220_p7 }
  0x17   : > { %s227_s28 = sand.u32 (!%p221_p8), 1, %s770_s12   ;;  %s591_s29 = sshll.u32 (!%p221_p8), %s778_s14, 4 }
  0x18   : > { %224 = sbr.rel (%p221_p8) target bundleno = 236 (0xec), region = 69  ;;  %s856_s30 = sshll.u32 (!%p221_p8), %s227_s28, 4 }
  0x19   : > { %p259_p9 = scmp.lt.s32.totalorder (!%p221_p8), %s591_s29, 143  ;;  %s229_s8 = scalar_lea.vmem (!%p221_p8), [#allocation3], %s856_s30 }
  0x1a   : > { %p594_p10 = scmp.ne.s32.totalorder (!%p221_p8), %s778_s14, 0 }
  0x1d   : > { %s955_s29 = smov (!%p259_p9, %s591_s29), 143  ;;  %275 = sbr.rel (%p594_p10) target bundleno = 43 (0x2b), region = 77 }
  0x1e   : > { %s672_s4 = sshll.u32 %s955_s29, 3 }
  0x1f   : > { %s861_s7 = scalar_lea.vmem %s945_s1, %s672_s4 }
  0x22   : > { %v788_v4 = vmov 0.0  }
  0x23   : > { %276 = vst [vmem:[#allocation2 + $0x30] sm:$0xff] %v788_v4 }
  0x24   : > { %277 = vst [vmem:[#allocation2] sm:$0xff] %v788_v4 }
  0x25   : > { %278 = vst [vmem:[#allocation2 + $0x18] sm:$0xff] %v788_v4 }
  0x26   : > { %279 = vst [vmem:[#allocation2 + $0x10] sm:$0xff] %v788_v4 }
  0x27   : > { %280 = vst [vmem:[#allocation2 + $0x8] sm:$0xff] %v788_v4 }
  0x28   : > { %281 = vst [vmem:[#allocation2 + $0x20] sm:$0xff] %v788_v4 }
  0x29   : > { %282 = vst [vmem:[#allocation2 + $0x28] sm:$0xff] %v788_v4 }
  0x2a   : > { %283 = vst [vmem:[#allocation2 + $0x38] sm:$0xff] %v788_v4 }
  0x2b PF: > { %v661_v5 = vld [vmem:[%s861_s7 + $0x70] sm:$0xf]  ;;  %v690_v6 = vld [vmem:[%s861_s7 + $0x74] sm:$0xf0]  ;;  %v689_v7 = vld [vmem:[%s861_s7 + $0x74] sm:$0xf] }
  0x2c   : > { %v662_v8 = vor.u32 %v690_v6, %v661_v5  ;;  %v663_v9 = vld [vmem:[%s861_s7 + $0x78] sm:$0xf0]  ;;  %v653_v10 = vld [vmem:[%s861_s7 + $0x60] sm:$0xf]  ;;  %v688_v11 = vld [vmem:[%s861_s7 + $0x64] sm:$0xf0] }
  0x2d   : > { %v666_v12 = vor.u32 %v689_v7, %v663_v9  ;;  %v687_v13 = vld [vmem:[%s861_s7 + $0x64] sm:$0xf]  ;;  %v655_v14 = vld [vmem:[%s861_s7 + $0x68] sm:$0xf0]  ;;  %v654_v15 = vor.u32 %v688_v11, %v653_v10  ;;  %v645_v17 = vld [vmem:[%s861_s7 + $0x50] sm:$0xf] }
  0x2e   : > { %404 = vmatpush.bf16.msra.mxu0 %v662_v8  ;;  %691 = vmatpush.bf16.msra.mxu2 %v662_v8  ;;  %v658_v16 = vor.u32 %v687_v13, %v655_v14  ;;  %v686_v18 = vld [vmem:[%s861_s7 + $0x54] sm:$0xf0]  ;;  %v685_v19 = vld [vmem:[%s861_s7 + $0x54] sm:$0xf]  ;;  %v647_v20 = vld [vmem:[%s861_s7 + $0x58] sm:$0xf0] }
  0x2f   : > { %423 = vmatpush.bf16.msra.mxu1 %v666_v12  ;;  %699 = vmatpush.bf16.msra.mxu3 %v666_v12  ;;  %v646_v21 = vor.u32 %v686_v18, %v645_v17  ;;  %v650_v22 = vor.u32 %v685_v19, %v647_v20  ;;  %v637_v23 = vld [vmem:[%s861_s7 + $0x40] sm:$0xf]  ;;  %v684_v24 = vld [vmem:[%s861_s7 + $0x44] sm:$0xf0]  ;;  %v683_v25 = vld [vmem:[%s861_s7 + $0x44] sm:$0xf] }
  0x30   : > { %v639_v26 = vld [vmem:[%s861_s7 + $0x48] sm:$0xf0]  ;;  %v638_v27 = vor.u32 %v684_v24, %v637_v23  ;;  %v629_v29 = vld [vmem:[%s861_s7 + $0x30] sm:$0xf]  ;;  %v682_v30 = vld [vmem:[%s861_s7 + $0x34] sm:$0xf0] }
  0x31   : > { %v642_v28 = vor.u32 %v683_v25, %v639_v26  ;;  %v681_v31 = vld [vmem:[%s861_s7 + $0x34] sm:$0xf]  ;;  %v631_v32 = vld [vmem:[%s861_s7 + $0x38] sm:$0xf0]  ;;  %v630_v33 = vor.u32 %v682_v30, %v629_v29  ;;  %v621_v35 = vld [vmem:[%s861_s7 + $0x20] sm:$0xf] }
  0x32   : > { %405 = vmatpush.bf16.msra.mxu0 %v654_v15  ;;  %692 = vmatpush.bf16.msra.mxu2 %v654_v15  ;;  %v634_v34 = vor.u32 %v681_v31, %v631_v32  ;;  %v680_v36 = vld [vmem:[%s861_s7 + $0x24] sm:$0xf0]  ;;  %v679_v37 = vld [vmem:[%s861_s7 + $0x24] sm:$0xf]  ;;  %v623_v38 = vld [vmem:[%s861_s7 + $0x28] sm:$0xf0] }
  0x33   : > { %424 = vmatpush.bf16.msra.mxu1 %v658_v16  ;;  %700 = vmatpush.bf16.msra.mxu3 %v658_v16  ;;  %v622_v39 = vor.u32 %v680_v36, %v621_v35  ;;  %v626_v40 = vor.u32 %v679_v37, %v623_v38  ;;  %v613_v41 = vld [vmem:[%s861_s7 + $0x10] sm:$0xf]  ;;  %v678_v42 = vld [vmem:[%s861_s7 + $0x14] sm:$0xf0]  ;;  %v677_v43 = vld [vmem:[%s861_s7 + $0x14] sm:$0xf] }
  0x34   : > { %v615_v44 = vld [vmem:[%s861_s7 + $0x18] sm:$0xf0]  ;;  %v614_v45 = vor.u32 %v678_v42, %v613_v41  ;;  %v605_v47 = vld [vmem:[%s861_s7] sm:$0xf]  ;;  %v676_v48 = vld [vmem:[%s861_s7 + $0x4] sm:$0xf0] }
  0x35   : > { %v618_v46 = vor.u32 %v677_v43, %v615_v44  ;;  %v675_v49 = vld [vmem:[%s861_s7 + $0x4] sm:$0xf]  ;;  %v607_v50 = vld [vmem:[%s861_s7 + $0x8] sm:$0xf0]  ;;  %v606_v51 = vor.u32 %v676_v48, %v605_v47  ;;  %v284_v55 = vld [vmem:[#allocation2 + $0x30] sm:$0xff]  ;;  %p667_p11 = scmp.ne.s32.totalorder %s778_s14, 8 }
  0x36   : > { %406 = vmatpush.bf16.msra.mxu0 %v646_v21  ;;  %693 = vmatpush.bf16.msra.mxu2 %v646_v21  ;;  %v610_v52 = vor.u32 %v675_v49, %v607_v50  ;;  %v673_v53 = vld [vmem:[%s229_s8] sm:$0xff]  ;;  %v674_v54 = vld [vmem:[%s229_s8 + $0x8] sm:$0xff] }
  0x37   : > { %425 = vmatpush.bf16.msra.mxu1 %v650_v22  ;;  %701 = vmatpush.bf16.msra.mxu3 %v650_v22  ;;  %v285_v56 = vld [vmem:[#allocation2] sm:$0xff]  ;;  %v288_v61 = vld [vmem:[#allocation2 + $0x8] sm:$0xff]  ;;  %v286_v0 = vld [vmem:[#allocation2 + $0x18] sm:$0xff] }
  0x38   : > { %v289_v62 = vld [vmem:[#allocation2 + $0x20] sm:$0xff]  ;;  %v287_v3 = vld [vmem:[#allocation2 + $0x10] sm:$0xff]  ;;  %v290_v9 = vld [vmem:[#allocation2 + $0x28] sm:$0xff] }
  0x39   : > { %v291_v10 = vld [vmem:[#allocation2 + $0x38] sm:$0xff] }
  0x3a   : > { %407 = vmatpush.bf16.msra.mxu0 %v638_v27  ;;  %694 = vmatpush.bf16.msra.mxu2 %v638_v27 }
  0x3b   : > { %426 = vmatpush.bf16.msra.mxu1 %v642_v28  ;;  %702 = vmatpush.bf16.msra.mxu3 %v642_v28 }
  0x3e   : > { %408 = vmatpush.bf16.msra.mxu0 %v630_v33  ;;  %695 = vmatpush.bf16.msra.mxu2 %v630_v33 }
  0x3f   : > { %427 = vmatpush.bf16.msra.mxu1 %v634_v34  ;;  %703 = vmatpush.bf16.msra.mxu3 %v634_v34 }
  0x42   : > { %409 = vmatpush.bf16.msra.mxu0 %v622_v39  ;;  %696 = vmatpush.bf16.msra.mxu2 %v622_v39 }
  0x43   : > { %428 = vmatpush.bf16.msra.mxu1 %v626_v40  ;;  %704 = vmatpush.bf16.msra.mxu3 %v626_v40 }
  0x46   : > { %410 = vmatpush.bf16.msra.mxu0 %v614_v45  ;;  %697 = vmatpush.bf16.msra.mxu2 %v614_v45 }
  0x47   : > { %429 = vmatpush.bf16.msra.mxu1 %v618_v46  ;;  %705 = vmatpush.bf16.msra.mxu3 %v618_v46 }
  0x4a   : > { %411 = vmatpush.bf16.msra.mxu0 %v606_v51  ;;  %698 = vmatpush.bf16.msra.mxu2 %v606_v51 }
  0x4b   : > { %430 = vmatpush.bf16.msra.mxu1 %v610_v52  ;;  %706 = vmatpush.bf16.msra.mxu3 %v610_v52 }
  0x4d   : > { %412 = vmatmul.bf16.vlgmr.msra.gmra.mxu0 %v673_v53  ;;  %417 = vmatmul.bf16.vlgmr.msra.gmra.mxu2 %v674_v54 }
  0x4e   : > { %431 = vmatmul.bf16.vlgmr.msra.gmra.mxu1 %v673_v53  ;;  %436 = vmatmul.bf16.vlgmr.msra.gmra.mxu3 %v674_v54 }
  0xca   : > { %v413_v57 = vpop.f32.mrf.mxu0 }
  0xcb   : > { %v442_v58 = vadd.f32 %v413_v57, %v284_v55  ;;  %v432_v59 = vpop.f32.mrf.mxu1 }
  0xcc   : > { %v443_v60 = vadd.f32 %v432_v59, %v285_v56 }
  0xcd   : > { %450 = vst [vmem:[#allocation2 + $0x30] sm:$0xff] %v442_v58 }
  0xce   : > { %451 = vst [vmem:[#allocation2] sm:$0xff] %v443_v60 }
  0xd0   : > { %v418_v63 = vpop.f32.mrf.mxu2 }
  0xd1   : > { %v446_v1 = vadd.f32 %v418_v63, %v288_v61  ;;  %v437_v2 = vpop.f32.mrf.mxu3 }
  0xd2   : > { %v447_v4 = vadd.f32 %v437_v2, %v289_v62  ;;  %v415_v5 = vpop.f32.mrf.mxu0 }
  0xd3   : > { %454 = vst [vmem:[#allocation2 + $0x8] sm:$0xff] %v446_v1  ;;  %v444_v6 = vadd.f32 %v415_v5, %v286_v0  ;;  %v434_v7 = vpop.f32.mrf.mxu1 }
  0xd4   : > { %455 = vst [vmem:[#allocation2 + $0x20] sm:$0xff] %v447_v4  ;;  %v445_v8 = vadd.f32 %v434_v7, %v287_v3 }
  0xd5   : > { %452 = vst [vmem:[#allocation2 + $0x18] sm:$0xff] %v444_v6 }
  0xd6   : > { %453 = vst [vmem:[#allocation2 + $0x10] sm:$0xff] %v445_v8 }
  0xd8   : > { %v420_v11 = vpop.f32.mrf.mxu2  ;;  %461 = sbr.rel (%p667_p11) target bundleno = 236 (0xec), region = 81 }
  0xd9   : > { %v448_v12 = vadd.f32 %v420_v11, %v290_v9  ;;  %v439_v13 = vpop.f32.mrf.mxu3 }
  0xda   : > { %v449_v14 = vadd.f32 %v439_v13, %v291_v10 }
  0xdb   : > { %456 = vst [vmem:[#allocation2 + $0x28] sm:$0xff] %v448_v12 }
  0xdc   : > { %457 = vst [vmem:[#allocation2 + $0x38] sm:$0xff] %v449_v14 }
  0xdd   : > { %v462_v15 = vld [vmem:[#allocation2 + $0x30] sm:$0xff]  ;;  %v470_v16 = vld [vmem:[%s946_s2] sm:$0x3]  ;;  %v464_v20 = vld [vmem:[#allocation2 + $0x18] sm:$0xff] }
  0xde   : > { %v463_v17 = vld [vmem:[#allocation2] sm:$0xff]  ;;  %v472_v18 = vperm.slane %v470_v16, 0  ;;  %v473_v19 = vperm.slane %v470_v16, 1  ;;  %v465_v21 = vld [vmem:[#allocation2 + $0x10] sm:$0xff]  ;;  %v466_v22 = vld [vmem:[#allocation2 + $0x8] sm:$0xff] }
  0xdf   : > { %v467_v23 = vld [vmem:[#allocation2 + $0x20] sm:$0xff] }
  0xe0   : > { %v476_v25 = vadd.f32 %v472_v18, %v462_v15  ;;  %v477_v26 = vadd.f32 %v473_v19, %v463_v17  ;;  %v478_v27 = vadd.f32 %v472_v18, %v464_v20  ;;  %v479_v28 = vadd.f32 %v473_v19, %v465_v21 }
  0xe1   : > { %v480_v30 = vadd.f32 %v472_v18, %v466_v22  ;;  %v481_v31 = vadd.f32 %v473_v19, %v467_v23 }
  0xe2   : > { %v468_v24 = vld [vmem:[#allocation2 + $0x28] sm:$0xff]  ;;  %v484_v32 = vmax.f32 %v476_v25, 0.0  ;;  %v485_v33 = vmax.f32 %v477_v26, 0.0  ;;  %v486_v34 = vmax.f32 %v478_v27, 0.0  ;;  %v487_v36 = vmax.f32 %v479_v28, 0.0 }
  0xe3   : > { %v469_v29 = vld [vmem:[#allocation2 + $0x38] sm:$0xff]  ;;  %v482_v35 = vadd.f32 %v472_v18, %v468_v24  ;;  %v488_v38 = vmax.f32 %v480_v30, 0.0  ;;  %v489_v39 = vmax.f32 %v481_v31, 0.0 }
  0xe4   : > { %v483_v37 = vadd.f32 %v473_v19, %v469_v29  ;;  %492 = vst [vmem:[%s947_s3] sm:$0xff] %v484_v32 }
  0xe5   : > { %493 = vst [vmem:[%s947_s3 + $0x8] sm:$0xff] %v485_v33  ;;  %v490_v40 = vmax.f32 %v482_v35, 0.0 }
  0xe6   : > { %494 = vst [vmem:[%s947_s3 + $0x10] sm:$0xff] %v486_v34  ;;  %v491_v41 = vmax.f32 %v483_v37, 0.0 }
  0xe7   : > { %495 = vst [vmem:[%s947_s3 + $0x18] sm:$0xff] %v487_v36 }
  0xe8   : > { %496 = vst [vmem:[%s947_s3 + $0x20] sm:$0xff] %v488_v38 }
  0xe9   : > { %497 = vst [vmem:[%s947_s3 + $0x28] sm:$0xff] %v489_v39 }
  0xea   : > { %498 = vst [vmem:[%s947_s3 + $0x30] sm:$0xff] %v490_v40 }
  0xeb   : > { %499 = vst [vmem:[%s947_s3 + $0x38] sm:$0xff] %v491_v41 }
  0xec PF: > { %s13_s16 = sadd.s32 1, %s786_s16   ;;  %s948_s12 = smov %s774_s13 }
  0xed   : > { %p10_p12 = scmp.ge.s32.totalorder %s13_s16, 11   ;;  %s949_s13 = smov %s844_s20 }
  0xee   : > { %s950_s14 = smov %s782_s15  ;;  %s951_s15 = smov %s953_s17 }
  0xef   :  { %12 = sbr.rel (!%p10_p12) target bundleno = 3 (0x3), region = 119 }

// kernel: resnet_encoder_mtan_forward.31
= control target key start
LH: loop header
LB: loop body
LE: loop exit
PB: predicated region body
PF: predicated region fallthrough
CT: control target
= control target key end

     0   :  { %s492_s1 = inlined_call_operand.vmem [shape: bf16[128,256], index: 1, kind: input, shape index: {}]   ;;  %s493_s0 = inlined_call_operand.vmem [shape: bf16[32,128], index: 0, kind: input, shape index: {}]   ;;  %s494_s2 = inlined_call_operand.vmem [shape: f32[1,256], index: 2, kind: input, shape index: {}]   ;;  %s495_s3 = inlined_call_operand.vmem [shape: f32[32,256], index: 3, kind: output, shape index: {}]  }
   0x1   :  { %v303_v0 = vld [vmem:[%s492_s1 + $0x70] sm:$0xf]  ;;  %v326_v1 = vld [vmem:[%s492_s1 + $0x74] sm:$0xf0]  ;;  %v325_v2 = vld [vmem:[%s492_s1 + $0x74] sm:$0xf] }
   0x2   :  { %v304_v3 = vor.u32 %v326_v1, %v303_v0  ;;  %v305_v4 = vld [vmem:[%s492_s1 + $0x78] sm:$0xf0]  ;;  %v295_v5 = vld [vmem:[%s492_s1 + $0x60] sm:$0xf]  ;;  %v324_v6 = vld [vmem:[%s492_s1 + $0x64] sm:$0xf0] }
   0x3   :  { %v308_v7 = vor.u32 %v325_v2, %v305_v4  ;;  %v323_v8 = vld [vmem:[%s492_s1 + $0x64] sm:$0xf]  ;;  %v297_v9 = vld [vmem:[%s492_s1 + $0x68] sm:$0xf0]  ;;  %v296_v10 = vor.u32 %v324_v6, %v295_v5  ;;  %v287_v12 = vld [vmem:[%s492_s1 + $0x50] sm:$0xf] }
   0x4   :  { %146 = vmatpush.bf16.msra.mxu0 %v304_v3  ;;  %327 = vmatpush.bf16.msra.mxu2 %v304_v3  ;;  %v300_v11 = vor.u32 %v323_v8, %v297_v9  ;;  %v322_v13 = vld [vmem:[%s492_s1 + $0x54] sm:$0xf0]  ;;  %v321_v14 = vld [vmem:[%s492_s1 + $0x54] sm:$0xf]  ;;  %v289_v15 = vld [vmem:[%s492_s1 + $0x58] sm:$0xf0] }
   0x5   :  { %165 = vmatpush.bf16.msra.mxu1 %v308_v7  ;;  %335 = vmatpush.bf16.msra.mxu3 %v308_v7  ;;  %v288_v16 = vor.u32 %v322_v13, %v287_v12  ;;  %v292_v17 = vor.u32 %v321_v14, %v289_v15  ;;  %v279_v18 = vld [vmem:[%s492_s1 + $0x40] sm:$0xf]  ;;  %v320_v19 = vld [vmem:[%s492_s1 + $0x44] sm:$0xf0]  ;;  %v319_v20 = vld [vmem:[%s492_s1 + $0x44] sm:$0xf] }
   0x6   :  { %v281_v21 = vld [vmem:[%s492_s1 + $0x48] sm:$0xf0]  ;;  %v280_v22 = vor.u32 %v320_v19, %v279_v18  ;;  %v271_v24 = vld [vmem:[%s492_s1 + $0x30] sm:$0xf]  ;;  %v318_v25 = vld [vmem:[%s492_s1 + $0x34] sm:$0xf0] }
   0x7   :  { %v284_v23 = vor.u32 %v319_v20, %v281_v21  ;;  %v317_v26 = vld [vmem:[%s492_s1 + $0x34] sm:$0xf]  ;;  %v273_v27 = vld [vmem:[%s492_s1 + $0x38] sm:$0xf0]  ;;  %v272_v28 = vor.u32 %v318_v25, %v271_v24  ;;  %v263_v30 = vld [vmem:[%s492_s1 + $0x20] sm:$0xf] }
   0x8   :  { %147 = vmatpush.bf16.msra.mxu0 %v296_v10  ;;  %328 = vmatpush.bf16.msra.mxu2 %v296_v10  ;;  %v276_v29 = vor.u32 %v317_v26, %v273_v27  ;;  %v316_v31 = vld [vmem:[%s492_s1 + $0x24] sm:$0xf0]  ;;  %v315_v32 = vld [vmem:[%s492_s1 + $0x24] sm:$0xf]  ;;  %v265_v33 = vld [vmem:[%s492_s1 + $0x28] sm:$0xf0] }
   0x9   :  { %166 = vmatpush.bf16.msra.mxu1 %v300_v11  ;;  %336 = vmatpush.bf16.msra.mxu3 %v300_v11  ;;  %v264_v34 = vor.u32 %v316_v31, %v263_v30  ;;  %v268_v35 = vor.u32 %v315_v32, %v265_v33  ;;  %v255_v36 = vld [vmem:[%s492_s1 + $0x10] sm:$0xf]  ;;  %v314_v37 = vld [vmem:[%s492_s1 + $0x14] sm:$0xf0]  ;;  %v313_v38 = vld [vmem:[%s492_s1 + $0x14] sm:$0xf] }
   0xa   :  { %v257_v39 = vld [vmem:[%s492_s1 + $0x18] sm:$0xf0]  ;;  %v256_v40 = vor.u32 %v314_v37, %v255_v36  ;;  %v247_v42 = vld [vmem:[%s492_s1] sm:$0xf]  ;;  %v312_v43 = vld [vmem:[%s492_s1 + $0x4] sm:$0xf0] }
   0xb   :  { %v260_v41 = vor.u32 %v313_v38, %v257_v39  ;;  %v311_v44 = vld [vmem:[%s492_s1 + $0x4] sm:$0xf]  ;;  %v249_v45 = vld [vmem:[%s492_s1 + $0x8] sm:$0xf0]  ;;  %v248_v46 = vor.u32 %v312_v43, %v247_v42  ;;  %v211_v50 = vld [vmem:[%s494_s2] sm:$0x3] }
   0xc   :  { %148 = vmatpush.bf16.msra.mxu0 %v288_v16  ;;  %329 = vmatpush.bf16.msra.mxu2 %v288_v16  ;;  %v252_v47 = vor.u32 %v311_v44, %v249_v45  ;;  %v309_v48 = vld [vmem:[%s493_s0] sm:$0xff]  ;;  %v310_v49 = vld [vmem:[%s493_s0 + $0x8] sm:$0xff]  ;;  %v213_v51 = vperm.slane %v211_v50, 0  ;;  %v214_v52 = vperm.slane %v211_v50, 1 }
   0xd   :  { %167 = vmatpush.bf16.msra.mxu1 %v292_v17  ;;  %337 = vmatpush.bf16.msra.mxu3 %v292_v17 }
  0x10   :  { %149 = vmatpush.bf16.msra.mxu0 %v280_v22  ;;  %330 = vmatpush.bf16.msra.mxu2 %v280_v22 }
  0x11   :  { %168 = vmatpush.bf16.msra.mxu1 %v284_v23  ;;  %338 = vmatpush.bf16.msra.mxu3 %v284_v23 }
  0x14   :  { %150 = vmatpush.bf16.msra.mxu0 %v272_v28  ;;  %331 = vmatpush.bf16.msra.mxu2 %v272_v28 }
  0x15   :  { %169 = vmatpush.bf16.msra.mxu1 %v276_v29  ;;  %339 = vmatpush.bf16.msra.mxu3 %v276_v29 }
  0x18   :  { %151 = vmatpush.bf16.msra.mxu0 %v264_v34  ;;  %332 = vmatpush.bf16.msra.mxu2 %v264_v34 }
  0x19   :  { %170 = vmatpush.bf16.msra.mxu1 %v268_v35  ;;  %340 = vmatpush.bf16.msra.mxu3 %v268_v35 }
  0x1c   :  { %152 = vmatpush.bf16.msra.mxu0 %v256_v40  ;;  %333 = vmatpush.bf16.msra.mxu2 %v256_v40 }
  0x1d   :  { %171 = vmatpush.bf16.msra.mxu1 %v260_v41  ;;  %341 = vmatpush.bf16.msra.mxu3 %v260_v41 }
  0x20   :  { %153 = vmatpush.bf16.msra.mxu0 %v248_v46  ;;  %334 = vmatpush.bf16.msra.mxu2 %v248_v46 }
  0x21   :  { %172 = vmatpush.bf16.msra.mxu1 %v252_v47  ;;  %342 = vmatpush.bf16.msra.mxu3 %v252_v47 }
  0x23   :  { %154 = vmatmul.bf16.vlgmr.msra.gmra.mxu0 %v309_v48  ;;  %159 = vmatmul.bf16.vlgmr.msra.gmra.mxu2 %v310_v49 }
  0x24   :  { %173 = vmatmul.bf16.vlgmr.msra.gmra.mxu1 %v309_v48  ;;  %178 = vmatmul.bf16.vlgmr.msra.gmra.mxu3 %v310_v49 }
  0xa0   :  { %v155_v53 = vpop.f32.mrf.mxu0 }
  0xa1   :  { %v217_v54 = vadd.f32 %v213_v51, %v155_v53  ;;  %v174_v55 = vpop.f32.mrf.mxu1 }
  0xa2   :  { %v218_v56 = vadd.f32 %v214_v52, %v174_v55 }
  0xa3   :  { %225 = vst [vmem:[%s495_s3] sm:$0xff] %v217_v54 }
  0xa4   :  { %226 = vst [vmem:[%s495_s3 + $0x8] sm:$0xff] %v218_v56 }
  0xa6   :  { %v160_v57 = vpop.f32.mrf.mxu2 }
  0xa7   :  { %v221_v58 = vadd.f32 %v213_v51, %v160_v57  ;;  %v179_v59 = vpop.f32.mrf.mxu3 }
  0xa8   :  { %v222_v60 = vadd.f32 %v214_v52, %v179_v59  ;;  %v157_v61 = vpop.f32.mrf.mxu0 }
  0xa9   :  { %229 = vst [vmem:[%s495_s3 + $0x20] sm:$0xff] %v221_v58  ;;  %v219_v62 = vadd.f32 %v213_v51, %v157_v61  ;;  %v176_v63 = vpop.f32.mrf.mxu1 }
  0xaa   :  { %230 = vst [vmem:[%s495_s3 + $0x28] sm:$0xff] %v222_v60  ;;  %v220_v0 = vadd.f32 %v214_v52, %v176_v63 }
  0xab   :  { %227 = vst [vmem:[%s495_s3 + $0x10] sm:$0xff] %v219_v62 }
  0xac   :  { %228 = vst [vmem:[%s495_s3 + $0x18] sm:$0xff] %v220_v0 }
  0xae   :  { %v162_v1 = vpop.f32.mrf.mxu2 }
  0xaf   :  { %v223_v2 = vadd.f32 %v213_v51, %v162_v1  ;;  %v181_v3 = vpop.f32.mrf.mxu3 }
  0xb0   :  { %v224_v4 = vadd.f32 %v214_v52, %v181_v3 }
  0xb1   :  { %231 = vst [vmem:[%s495_s3 + $0x30] sm:$0xff] %v223_v2 }
  0xb2   :  { %232 = vst [vmem:[%s495_s3 + $0x38] sm:$0xff] %v224_v4 }

// kernel: resnet_encoder_mtan_forward.33
= control target key start
LH: loop header
LB: loop body
LE: loop exit
PB: predicated region body
PF: predicated region fallthrough
CT: control target
= control target key end

     0   :  { %s1022_s12 = smov 0   ;;  %s1024_s13 = smov 0   ;;  %s1192_s0 = inlined_call_operand.vmem [shape: bf16[32,2304], index: 0, kind: input, shape index: {}]   ;;  %s1193_s1 = inlined_call_operand.vmem [shape: bf16[2304,256], index: 1, kind: input, shape index: {}]   ;;  %s1194_s2 = inlined_call_operand.vmem [shape: f32[1,256], index: 2, kind: input, shape index: {}]   ;;  %s1195_s3 = inlined_call_operand.vmem [shape: f32[32,256], index: 3, kind: output, shape index: {}]  }
   0x1   :  { %s1026_s14 = smov 0   ;;  %s1028_s15 = smov 0  }
   0x2   :  { %s1030_s16 = smov 0  }
   0x3 LB: > { %s22_s17 = sadd.s32 1, %s995_s15  ;;  %p41_p1 = scmp.ne.s32.totalorder %s987_s13, %s983_s12  ;;  %s999_s16 = sphi %s1030_s16, %s13_s16   ;;  %s995_s15 = sphi %s1028_s15, %s1199_s15   ;;  %s991_s14 = sphi %s1026_s14, %s1198_s14   ;;  %s987_s13 = sphi %s1024_s13, %s1197_s13   ;;  %s983_s12 = sphi %s1022_s12, %s1196_s12  }
   0x4   : > { %p23_p0 = scmp.ge.s32.totalorder %s22_s17, 9  ;;  %p42_p2 = scmp.eq.s32.totalorder %s999_s16, 0 }
   0x5   : > { %s34_s19 = sadd.s32 1, %s987_s13  ;;  %p723_p5 = scmp.ge.s32.totalorder %s999_s16, 9 }
   0x6   : > { %s1201_s17 = smov (%p23_p0, %s22_s17), 0  ;;  %p43_p3 = por %p42_p2, %p41_p1 }
   0x7   : > { %s30_s18 = ssub.s32 %s995_s15, %s1201_s17  ;;  %143 = sbr.rel (%p723_p5) target bundleno = 20 (0x14), region = 20 }
   0x8   : > { %p32_p4 = scmp.eq.s32.totalorder %s30_s18, 0 }
   0xa   : > { %s1057_s20 = scalar_select %p32_p4, %s987_s13, %s34_s19  }
   0xc   : > { %146 = sbr.rel (!%p43_p3) target bundleno = 20 (0x14), region = 24  ;;  %s148_s21 = sand.u32 (%p43_p3), 1, %s987_s13  }
   0xd   : > { %s882_s22 = sshll.u32 (%p43_p3), %s995_s15, 3  ;;  %s724_s23 = sshll.u32 (%p43_p3), %s148_s21, 5 }
   0xe   : > { %s156_s26 = scalar_lea.vmem (%p43_p3), %s1192_s0, %s882_s22  ;;  %s150_s27 = scalar_lea.vmem (%p43_p3), [#allocation3], %s724_s23 }
   0xf   : > { %v191_v0 = vld [vmem:[%s156_s26] sm:$0xff] (%p43_p3)  ;;  %v193_v1 = vld [vmem:[%s156_s26 + $0x48] sm:$0xff] (%p43_p3)  ;;  %v195_v2 = vld [vmem:[%s156_s26 + $0x90] sm:$0xff] (%p43_p3) }
  0x10   : > { %192 = vst [vmem:[%s150_s27] sm:$0xff] (%p43_p3), %v191_v0  ;;  %v197_v3 = vld [vmem:[%s156_s26 + $0xd8] sm:$0xff] (%p43_p3) }
  0x11   : > { %194 = vst [vmem:[%s150_s27 + $0x8] sm:$0xff] %v193_v1 }
  0x12   : > { %196 = vst [vmem:[%s150_s27 + $0x10] sm:$0xff] %v195_v2 }
  0x13   : > { %198 = vst [vmem:[%s150_s27 + $0x18] sm:$0xff] %v197_v3 }
  0x14 PF: > { %p727_p6 = scmp.ge.s32.totalorder %s999_s16, 1  ;;  %p213_p7 = scmp.lt.s32.totalorder %s999_s16, 10 }
  0x16   : > { %p214_p8 = pnand %p727_p6, %p213_p7 }
  0x17   : > { %s220_s28 = sand.u32 (!%p214_p8), 1, %s983_s12   ;;  %s729_s29 = sshll.u32 (!%p214_p8), %s991_s14, 5 }
  0x18   : > { %217 = sbr.rel (%p214_p8) target bundleno = 255 (0xff), region = 66  ;;  %s728_s30 = sshll.u32 (!%p214_p8), %s220_s28, 5 }
  0x19   : > { %p253_p9 = scmp.lt.s32.totalorder (!%p214_p8), %s729_s29, 287  ;;  %s1074_s8 = scalar_lea.vmem (!%p214_p8), [#allocation3], %s728_s30 }
  0x1a   : > { %p732_p10 = scmp.ne.s32.totalorder (!%p214_p8), %s991_s14, 0 }
  0x1d   : > { %s1203_s29 = smov (!%p253_p9, %s729_s29), 287  ;;  %269 = sbr.rel (%p732_p10) target bundleno = 43 (0x2b), region = 74 }
  0x1e   : > { %s883_s4 = sshll.u32 %s1203_s29, 3 }
  0x1f   : > { %s1072_s7 = scalar_lea.vmem %s1193_s1, %s883_s4 }
  0x22   : > { %v1001_v4 = vmov 0.0  }
  0x23   : > { %270 = vst [vmem:[#allocation2 + $0x30] sm:$0xff] %v1001_v4 }
  0x24   : > { %271 = vst [vmem:[#allocation2] sm:$0xff] %v1001_v4 }
  0x25   : > { %272 = vst [vmem:[#allocation2 + $0x18] sm:$0xff] %v1001_v4 }
  0x26   : > { %273 = vst [vmem:[#allocation2 + $0x10] sm:$0xff] %v1001_v4 }
  0x27   : > { %274 = vst [vmem:[#allocation2 + $0x8] sm:$0xff] %v1001_v4 }
  0x28   : > { %275 = vst [vmem:[#allocation2 + $0x20] sm:$0xff] %v1001_v4 }
  0x29   : > { %276 = vst [vmem:[#allocation2 + $0x28] sm:$0xff] %v1001_v4 }
  0x2a   : > { %277 = vst [vmem:[#allocation2 + $0x38] sm:$0xff] %v1001_v4 }
  0x2b PF: > { %v807_v5 = vld [vmem:[%s1072_s7 + $0x70] sm:$0xf]  ;;  %v903_v6 = vld [vmem:[%s1072_s7 + $0x74] sm:$0xf0]  ;;  %v902_v10 = vld [vmem:[%s1072_s7 + $0x74] sm:$0xf] }
  0x2c   : > { %v871_v7 = vld [vmem:[%s1072_s7 + $0xf0] sm:$0xf]  ;;  %v808_v8 = vor.u32 %v903_v6, %v807_v5  ;;  %v919_v9 = vld [vmem:[%s1072_s7 + $0xf4] sm:$0xf0]  ;;  %v809_v11 = vld [vmem:[%s1072_s7 + $0x78] sm:$0xf0] }
  0x2d   : > { %v872_v12 = vor.u32 %v919_v9, %v871_v7  ;;  %v812_v13 = vor.u32 %v902_v10, %v809_v11  ;;  %v918_v14 = vld [vmem:[%s1072_s7 + $0xf4] sm:$0xf]  ;;  %v873_v15 = vld [vmem:[%s1072_s7 + $0xf8] sm:$0xf0]  ;;  %v799_v16 = vld [vmem:[%s1072_s7 + $0x60] sm:$0xf] }
  0x2e   : > { %502 = vmatpush.bf16.msra.mxu0 %v808_v8  ;;  %v876_v17 = vor.u32 %v918_v14, %v873_v15  ;;  %v901_v18 = vld [vmem:[%s1072_s7 + $0x64] sm:$0xf0]  ;;  %v863_v19 = vld [vmem:[%s1072_s7 + $0xe0] sm:$0xf]  ;;  %v900_v23 = vld [vmem:[%s1072_s7 + $0x64] sm:$0xf] }
  0x2f   : > { %v917_v20 = vld [vmem:[%s1072_s7 + $0xe4] sm:$0xf0]  ;;  %521 = vmatpush.bf16.msra.mxu1 %v872_v12  ;;  %540 = vmatpush.bf16.msra.mxu2 %v812_v13  ;;  %v800_v21 = vor.u32 %v901_v18, %v799_v16  ;;  %v801_v24 = vld [vmem:[%s1072_s7 + $0x68] sm:$0xf0]  ;;  %v916_v25 = vld [vmem:[%s1072_s7 + $0xe4] sm:$0xf] }
  0x30   : > { %v864_v22 = vor.u32 %v917_v20, %v863_v19  ;;  %559 = vmatpush.bf16.msra.mxu3 %v876_v17  ;;  %v804_v26 = vor.u32 %v900_v23, %v801_v24  ;;  %v865_v27 = vld [vmem:[%s1072_s7 + $0xe8] sm:$0xf0]  ;;  %v791_v28 = vld [vmem:[%s1072_s7 + $0x50] sm:$0xf]  ;;  %v899_v29 = vld [vmem:[%s1072_s7 + $0x54] sm:$0xf0] }
  0x31   : > { %v868_v30 = vor.u32 %v916_v25, %v865_v27  ;;  %v855_v31 = vld [vmem:[%s1072_s7 + $0xd0] sm:$0xf]  ;;  %v915_v32 = vld [vmem:[%s1072_s7 + $0xd4] sm:$0xf0]  ;;  %v898_v33 = vld [vmem:[%s1072_s7 + $0x54] sm:$0xf]  ;;  %v792_v34 = vor.u32 %v899_v29, %v791_v28 }
  0x32   : > { %503 = vmatpush.bf16.msra.mxu0 %v800_v21  ;;  %v793_v35 = vld [vmem:[%s1072_s7 + $0x58] sm:$0xf0]  ;;  %v914_v36 = vld [vmem:[%s1072_s7 + $0xd4] sm:$0xf]  ;;  %v856_v38 = vor.u32 %v915_v32, %v855_v31  ;;  %v783_v40 = vld [vmem:[%s1072_s7 + $0x40] sm:$0xf] }
  0x33   : > { %v857_v37 = vld [vmem:[%s1072_s7 + $0xd8] sm:$0xf0]  ;;  %522 = vmatpush.bf16.msra.mxu1 %v864_v22  ;;  %541 = vmatpush.bf16.msra.mxu2 %v804_v26  ;;  %v796_v39 = vor.u32 %v898_v33, %v793_v35  ;;  %v897_v41 = vld [vmem:[%s1072_s7 + $0x44] sm:$0xf0]  ;;  %v847_v42 = vld [vmem:[%s1072_s7 + $0xc0] sm:$0xf] }
  0x34   : > { %560 = vmatpush.bf16.msra.mxu3 %v868_v30  ;;  %v860_v43 = vor.u32 %v914_v36, %v857_v37  ;;  %v913_v44 = vld [vmem:[%s1072_s7 + $0xc4] sm:$0xf0]  ;;  %v896_v45 = vld [vmem:[%s1072_s7 + $0x44] sm:$0xf]  ;;  %v785_v46 = vld [vmem:[%s1072_s7 + $0x48] sm:$0xf0]  ;;  %v784_v49 = vor.u32 %v897_v41, %v783_v40 }
  0x35   : > { %v912_v47 = vld [vmem:[%s1072_s7 + $0xc4] sm:$0xf]  ;;  %v849_v48 = vld [vmem:[%s1072_s7 + $0xc8] sm:$0xf0]  ;;  %v848_v50 = vor.u32 %v913_v44, %v847_v42  ;;  %v788_v51 = vor.u32 %v896_v45, %v785_v46  ;;  %v775_v52 = vld [vmem:[%s1072_s7 + $0x30] sm:$0xf] }
  0x36   : > { %504 = vmatpush.bf16.msra.mxu0 %v792_v34  ;;  %v895_v53 = vld [vmem:[%s1072_s7 + $0x34] sm:$0xf0]  ;;  %v839_v54 = vld [vmem:[%s1072_s7 + $0xb0] sm:$0xf]  ;;  %v852_v55 = vor.u32 %v912_v47, %v849_v48  ;;  %v894_v57 = vld [vmem:[%s1072_s7 + $0x34] sm:$0xf] }
  0x37   : > { %523 = vmatpush.bf16.msra.mxu1 %v856_v38  ;;  %542 = vmatpush.bf16.msra.mxu2 %v796_v39  ;;  %v911_v56 = vld [vmem:[%s1072_s7 + $0xb4] sm:$0xf0]  ;;  %v777_v58 = vld [vmem:[%s1072_s7 + $0x38] sm:$0xf0]  ;;  %v910_v59 = vld [vmem:[%s1072_s7 + $0xb4] sm:$0xf]  ;;  %v776_v61 = vor.u32 %v895_v53, %v775_v52 }
  0x38   : > { %561 = vmatpush.bf16.msra.mxu3 %v860_v43  ;;  %v841_v60 = vld [vmem:[%s1072_s7 + $0xb8] sm:$0xf0]  ;;  %v840_v62 = vor.u32 %v911_v56, %v839_v54  ;;  %v780_v63 = vor.u32 %v894_v57, %v777_v58  ;;  %v767_v0 = vld [vmem:[%s1072_s7 + $0x20] sm:$0xf]  ;;  %v893_v1 = vld [vmem:[%s1072_s7 + $0x24] sm:$0xf0] }
  0x39   : > { %v831_v2 = vld [vmem:[%s1072_s7 + $0xa0] sm:$0xf]  ;;  %v844_v3 = vor.u32 %v910_v59, %v841_v60  ;;  %v909_v4 = vld [vmem:[%s1072_s7 + $0xa4] sm:$0xf0]  ;;  %v892_v5 = vld [vmem:[%s1072_s7 + $0x24] sm:$0xf]  ;;  %v768_v9 = vor.u32 %v893_v1, %v767_v0 }
  0x3a   : > { %505 = vmatpush.bf16.msra.mxu0 %v784_v49  ;;  %v769_v6 = vld [vmem:[%s1072_s7 + $0x28] sm:$0xf0]  ;;  %v908_v7 = vld [vmem:[%s1072_s7 + $0xa4] sm:$0xf]  ;;  %v832_v10 = vor.u32 %v909_v4, %v831_v2  ;;  %v759_v12 = vld [vmem:[%s1072_s7 + $0x10] sm:$0xf] }
  0x3b   : > { %524 = vmatpush.bf16.msra.mxu1 %v848_v50  ;;  %543 = vmatpush.bf16.msra.mxu2 %v788_v51  ;;  %v833_v8 = vld [vmem:[%s1072_s7 + $0xa8] sm:$0xf0]  ;;  %v772_v11 = vor.u32 %v892_v5, %v769_v6  ;;  %v891_v13 = vld [vmem:[%s1072_s7 + $0x14] sm:$0xf0]  ;;  %v823_v14 = vld [vmem:[%s1072_s7 + $0x90] sm:$0xf] }
  0x3c   : > { %562 = vmatpush.bf16.msra.mxu3 %v852_v55  ;;  %v836_v15 = vor.u32 %v908_v7, %v833_v8  ;;  %v907_v16 = vld [vmem:[%s1072_s7 + $0x94] sm:$0xf0]  ;;  %v890_v17 = vld [vmem:[%s1072_s7 + $0x14] sm:$0xf]  ;;  %v761_v18 = vld [vmem:[%s1072_s7 + $0x18] sm:$0xf0]  ;;  %v760_v21 = vor.u32 %v891_v13, %v759_v12 }
  0x3d   : > { %v906_v19 = vld [vmem:[%s1072_s7 + $0x94] sm:$0xf]  ;;  %v825_v20 = vld [vmem:[%s1072_s7 + $0x98] sm:$0xf0]  ;;  %v824_v22 = vor.u32 %v907_v16, %v823_v14  ;;  %v764_v23 = vor.u32 %v890_v17, %v761_v18  ;;  %v751_v24 = vld [vmem:[%s1072_s7] sm:$0xf] }
  0x3e   : > { %506 = vmatpush.bf16.msra.mxu0 %v776_v61  ;;  %v889_v25 = vld [vmem:[%s1072_s7 + $0x4] sm:$0xf0]  ;;  %v815_v26 = vld [vmem:[%s1072_s7 + $0x80] sm:$0xf]  ;;  %v828_v27 = vor.u32 %v906_v19, %v825_v20  ;;  %v888_v29 = vld [vmem:[%s1072_s7 + $0x4] sm:$0xf] }
  0x3f   : > { %525 = vmatpush.bf16.msra.mxu1 %v840_v62  ;;  %544 = vmatpush.bf16.msra.mxu2 %v780_v63  ;;  %v905_v28 = vld [vmem:[%s1072_s7 + $0x84] sm:$0xf0]  ;;  %v753_v30 = vld [vmem:[%s1072_s7 + $0x8] sm:$0xf0]  ;;  %v904_v31 = vld [vmem:[%s1072_s7 + $0x84] sm:$0xf]  ;;  %v752_v33 = vor.u32 %v889_v25, %v751_v24 }
  0x40   : > { %563 = vmatpush.bf16.msra.mxu3 %v844_v3  ;;  %v817_v32 = vld [vmem:[%s1072_s7 + $0x88] sm:$0xf0]  ;;  %v735_v34 = vld [vmem:[%s1074_s8] sm:$0xf]  ;;  %v885_v35 = vld [vmem:[%s1074_s8 + $0x4] sm:$0xf0]  ;;  %v816_v36 = vor.u32 %v905_v28, %v815_v26  ;;  %v756_v37 = vor.u32 %v888_v29, %v753_v30 }
  0x41   : > { %v884_v38 = vld [vmem:[%s1074_s8 + $0x4] sm:$0xf]  ;;  %v737_v39 = vld [vmem:[%s1074_s8 + $0x8] sm:$0xf0]  ;;  %v820_v40 = vor.u32 %v904_v31, %v817_v32  ;;  %v736_v41 = vor.u32 %v885_v35, %v735_v34  ;;  %v743_v43 = vld [vmem:[%s1074_s8 + $0x10] sm:$0xf] }
  0x42   : > { %507 = vmatpush.bf16.msra.mxu0 %v768_v9  ;;  %v740_v42 = vor.u32 %v884_v38, %v737_v39  ;;  %v887_v44 = vld [vmem:[%s1074_s8 + $0x14] sm:$0xf0]  ;;  %v886_v45 = vld [vmem:[%s1074_s8 + $0x14] sm:$0xf]  ;;  %v745_v46 = vld [vmem:[%s1074_s8 + $0x18] sm:$0xf0] }
  0x43   : > { %526 = vmatpush.bf16.msra.mxu1 %v832_v10  ;;  %545 = vmatpush.bf16.msra.mxu2 %v772_v11  ;;  %v744_v47 = vor.u32 %v887_v44, %v743_v43  ;;  %v748_v48 = vor.u32 %v886_v45, %v745_v46  ;;  %v278_v50 = vld [vmem:[#allocation2 + $0x30] sm:$0xff]  ;;  %v279_v55 = vld [vmem:[#allocation2] sm:$0xff]  ;;  %v280_v59 = vld [vmem:[#allocation2 + $0x18] sm:$0xff]  ;;  %p877_p11 = scmp.ne.s32.totalorder %s991_s14, 8 }
  0x44   : > { %564 = vmatpush.bf16.msra.mxu3 %v836_v15  ;;  %v281_v1 = vld [vmem:[#allocation2 + $0x10] sm:$0xff]  ;;  %v282_v5 = vld [vmem:[#allocation2 + $0x8] sm:$0xff]  ;;  %v283_v11 = vld [vmem:[#allocation2 + $0x20] sm:$0xff] }
  0x45   : > { %v284_v15 = vld [vmem:[#allocation2 + $0x28] sm:$0xff] }
  0x46   : > { %508 = vmatpush.bf16.msra.mxu0 %v760_v21  ;;  %v285_v21 = vld [vmem:[#allocation2 + $0x38] sm:$0xff] }
  0x47   : > { %527 = vmatpush.bf16.msra.mxu1 %v824_v22  ;;  %546 = vmatpush.bf16.msra.mxu2 %v764_v23 }
  0x48   : > { %565 = vmatpush.bf16.msra.mxu3 %v828_v27 }
  0x4a   : > { %509 = vmatpush.bf16.msra.mxu0 %v752_v33 }
  0x4b   : > { %528 = vmatpush.bf16.msra.mxu1 %v816_v36  ;;  %547 = vmatpush.bf16.msra.mxu2 %v756_v37 }
  0x4c   : > { %566 = vmatpush.bf16.msra.mxu3 %v820_v40 }
  0x4d   : > { %510 = vmatmul.bf16.vlgmr.msra.gmra.mxu0 %v736_v41 }
  0x4e   : > { %529 = vmatmul.bf16.vlgmr.msra.gmra.mxu1 %v740_v42  ;;  %548 = vmatmul.bf16.vlgmr.msra.gmra.mxu2 %v736_v41 }
  0x4f   : > { %567 = vmatmul.bf16.vlgmr.msra.gmra.mxu3 %v740_v42 }
  0x5d   : > { %515 = vmatmul.bf16.gmra.mxu0 %v744_v47 }
  0x5e   : > { %534 = vmatmul.bf16.gmra.mxu1 %v748_v48  ;;  %553 = vmatmul.bf16.gmra.mxu2 %v744_v47 }
  0x5f   : > { %572 = vmatmul.bf16.gmra.mxu3 %v748_v48 }
  0xca   : > { %v511_v49 = vpop.f32.mrf.mxu0 }
  0xcb   : > { %v530_v51 = vpop.f32.mrf.mxu1 }
  0xcc   : > { %v531_v52 = vadd.f32 %v530_v51, %v511_v49 }
  0xce   : > { %v578_v53 = vadd.f32 %v531_v52, %v278_v50 }
  0xd0   : > { %586 = vst [vmem:[#allocation2 + $0x30] sm:$0xff] %v578_v53 }
  0xd1   : > { %v549_v54 = vpop.f32.mrf.mxu2 }
  0xd2   : > { %v568_v56 = vpop.f32.mrf.mxu3  ;;  %v513_v57 = vpop.f32.mrf.mxu0 }
  0xd3   : > { %v569_v58 = vadd.f32 %v568_v56, %v549_v54  ;;  %v532_v60 = vpop.f32.mrf.mxu1 }
  0xd4   : > { %v533_v61 = vadd.f32 %v532_v60, %v513_v57 }
  0xd5   : > { %v579_v62 = vadd.f32 %v569_v58, %v279_v55 }
  0xd6   : > { %v580_v63 = vadd.f32 %v533_v61, %v280_v59 }
  0xd7   : > { %587 = vst [vmem:[#allocation2] sm:$0xff] %v579_v62 }
  0xd8   : > { %588 = vst [vmem:[#allocation2 + $0x18] sm:$0xff] %v580_v63 }
  0xd9   : > { %v551_v0 = vpop.f32.mrf.mxu2 }
  0xda   : > { %v570_v2 = vpop.f32.mrf.mxu3  ;;  %v516_v3 = vpop.f32.mrf.mxu0 }
  0xdb   : > { %v571_v4 = vadd.f32 %v570_v2, %v551_v0  ;;  %v535_v6 = vpop.f32.mrf.mxu1 }
  0xdc   : > { %v536_v7 = vadd.f32 %v535_v6, %v516_v3 }
  0xdd   : > { %v581_v8 = vadd.f32 %v571_v4, %v281_v1 }
  0xde   : > { %v582_v9 = vadd.f32 %v536_v7, %v282_v5 }
  0xdf   : > { %589 = vst [vmem:[#allocation2 + $0x10] sm:$0xff] %v581_v8 }
  0xe0   : > { %590 = vst [vmem:[#allocation2 + $0x8] sm:$0xff] %v582_v9 }
  0xe1   : > { %v554_v10 = vpop.f32.mrf.mxu2 }
  0xe2   : > { %v573_v12 = vpop.f32.mrf.mxu3  ;;  %v518_v13 = vpop.f32.mrf.mxu0 }
  0xe3   : > { %v574_v14 = vadd.f32 %v573_v12, %v554_v10  ;;  %v537_v16 = vpop.f32.mrf.mxu1 }
  0xe4   : > { %v538_v17 = vadd.f32 %v537_v16, %v518_v13 }
  0xe5   : > { %v583_v18 = vadd.f32 %v574_v14, %v283_v11 }
  0xe6   : > { %v584_v19 = vadd.f32 %v538_v17, %v284_v15 }
  0xe7   : > { %591 = vst [vmem:[#allocation2 + $0x20] sm:$0xff] %v583_v18 }
  0xe8   : > { %592 = vst [vmem:[#allocation2 + $0x28] sm:$0xff] %v584_v19 }
  0xe9   : > { %v556_v20 = vpop.f32.mrf.mxu2 }
  0xea   : > { %v575_v22 = vpop.f32.mrf.mxu3 }
  0xeb   : > { %v576_v23 = vadd.f32 %v575_v22, %v556_v20  ;;  %597 = sbr.rel (%p877_p11) target bundleno = 255 (0xff), region = 78 }
  0xed   : > { %v585_v24 = vadd.f32 %v576_v23, %v285_v21 }
  0xef   : > { %593 = vst [vmem:[#allocation2 + $0x38] sm:$0xff] %v585_v24 }
  0xf0   : > { %v598_v25 = vld [vmem:[#allocation2 + $0x30] sm:$0xff]  ;;  %v606_v26 = vld [vmem:[%s1194_s2] sm:$0x3]  ;;  %v600_v30 = vld [vmem:[#allocation2 + $0x18] sm:$0xff] }
  0xf1   : > { %v599_v27 = vld [vmem:[#allocation2] sm:$0xff]  ;;  %v608_v28 = vperm.slane %v606_v26, 0  ;;  %v609_v29 = vperm.slane %v606_v26, 1  ;;  %v601_v31 = vld [vmem:[#allocation2 + $0x10] sm:$0xff]  ;;  %v602_v32 = vld [vmem:[#allocation2 + $0x8] sm:$0xff] }
  0xf2   : > { %v603_v33 = vld [vmem:[#allocation2 + $0x20] sm:$0xff]  ;;  %v604_v34 = vld [vmem:[#allocation2 + $0x28] sm:$0xff] }
  0xf3   : > { %v612_v35 = vadd.f32 %v608_v28, %v598_v25  ;;  %v613_v36 = vadd.f32 %v609_v29, %v599_v27  ;;  %v614_v37 = vadd.f32 %v608_v28, %v600_v30  ;;  %v615_v38 = vadd.f32 %v609_v29, %v601_v31 }
  0xf4   : > { %v616_v40 = vadd.f32 %v608_v28, %v602_v32  ;;  %v617_v41 = vadd.f32 %v609_v29, %v603_v33  ;;  %v618_v45 = vadd.f32 %v608_v28, %v604_v34 }
  0xf5   : > { %v620_v42 = vmax.f32 %v612_v35, 0.0  ;;  %v621_v43 = vmax.f32 %v613_v36, 0.0  ;;  %v622_v44 = vmax.f32 %v614_v37, 0.0  ;;  %v623_v46 = vmax.f32 %v615_v38, 0.0 }
  0xf6   : > { %v605_v39 = vld [vmem:[#allocation2 + $0x38] sm:$0xff]  ;;  %v624_v48 = vmax.f32 %v616_v40, 0.0  ;;  %v625_v49 = vmax.f32 %v617_v41, 0.0  ;;  %v626_v50 = vmax.f32 %v618_v45, 0.0 }
  0xf7   : > { %v619_v47 = vadd.f32 %v609_v29, %v605_v39  ;;  %628 = vst [vmem:[%s1195_s3] sm:$0xff] %v620_v42 }
  0xf8   : > { %629 = vst [vmem:[%s1195_s3 + $0x8] sm:$0xff] %v621_v43 }
  0xf9   : > { %630 = vst [vmem:[%s1195_s3 + $0x10] sm:$0xff] %v622_v44  ;;  %v627_v51 = vmax.f32 %v619_v47, 0.0 }
  0xfa   : > { %631 = vst [vmem:[%s1195_s3 + $0x18] sm:$0xff] %v623_v46 }
  0xfb   : > { %632 = vst [vmem:[%s1195_s3 + $0x20] sm:$0xff] %v624_v48 }
  0xfc   : > { %633 = vst [vmem:[%s1195_s3 + $0x28] sm:$0xff] %v625_v49 }
  0xfd   : > { %634 = vst [vmem:[%s1195_s3 + $0x30] sm:$0xff] %v626_v50 }
  0xfe   : > { %635 = vst [vmem:[%s1195_s3 + $0x38] sm:$0xff] %v627_v51 }
  0xff PF: > { %s13_s16 = sadd.s32 1, %s999_s16   ;;  %s1196_s12 = smov %s987_s13 }
 0x100   : > { %p10_p12 = scmp.ge.s32.totalorder %s13_s16, 11   ;;  %s1197_s13 = smov %s1057_s20 }
 0x101   : > { %s1198_s14 = smov %s995_s15  ;;  %s1199_s15 = smov %s1201_s17 }
 0x102   :  { %12 = sbr.rel (!%p10_p12) target bundleno = 3 (0x3), region = 116 }

// kernel: resnet_encoder_mtan_forward.32
= control target key start
LH: loop header
LB: loop body
LE: loop exit
PB: predicated region body
PF: predicated region fallthrough
CT: control target
= control target key end

     0   :  { %s1111_s15 = smov 0   ;;  %s1113_s16 = smov 0   ;;  %s1305_s0 = inlined_call_operand.vmem [shape: bf16[32,2304], index: 0, kind: input, shape index: {}]   ;;  %s1306_s1 = inlined_call_operand.vmem [shape: bf16[2304,256], index: 1, kind: input, shape index: {}]   ;;  %s1307_s2 = inlined_call_operand.vmem [shape: f32[1,256], index: 2, kind: input, shape index: {}]   ;;  %s1308_s3 = inlined_call_operand.vmem [shape: f32[32,256], index: 3, kind: input, shape index: {}]   ;;  %s1309_s4 = inlined_call_operand.vmem [shape: f32[32,256], index: 4, kind: output, shape index: {}]  }
   0x1   :  { %s1115_s17 = smov 0   ;;  %s1117_s18 = smov 0  }
   0x2   :  { %s1119_s19 = smov 0  }
   0x3 LB: > { %s23_s20 = sadd.s32 1, %s1079_s18  ;;  %p42_p1 = scmp.ne.s32.totalorder %s1071_s16, %s1067_s15  ;;  %s1083_s19 = sphi %s1119_s19, %s14_s19   ;;  %s1079_s18 = sphi %s1117_s18, %s1313_s18   ;;  %s1075_s17 = sphi %s1115_s17, %s1312_s17   ;;  %s1071_s16 = sphi %s1113_s16, %s1311_s16   ;;  %s1067_s15 = sphi %s1111_s15, %s1310_s15  }
   0x4   : > { %p24_p0 = scmp.ge.s32.totalorder %s23_s20, 9  ;;  %p43_p2 = scmp.eq.s32.totalorder %s1083_s19, 0 }
   0x5   : > { %s35_s22 = sadd.s32 1, %s1071_s16  ;;  %p807_p5 = scmp.ge.s32.totalorder %s1083_s19, 9 }
   0x6   : > { %s1315_s20 = smov (%p24_p0, %s23_s20), 0  ;;  %p44_p3 = por %p43_p2, %p42_p1 }
   0x7   : > { %s31_s21 = ssub.s32 %s1079_s18, %s1315_s20  ;;  %180 = sbr.rel (%p807_p5) target bundleno = 20 (0x14), region = 24 }
   0x8   : > { %p33_p4 = scmp.eq.s32.totalorder %s31_s21, 0 }
   0xa   : > { %s1146_s23 = scalar_select %p33_p4, %s1071_s16, %s35_s22  }
   0xc   : > { %183 = sbr.rel (!%p44_p3) target bundleno = 20 (0x14), region = 28  ;;  %s185_s24 = sand.u32 (%p44_p3), 1, %s1071_s16  }
   0xd   : > { %s966_s25 = sshll.u32 (%p44_p3), %s1079_s18, 3  ;;  %s808_s26 = sshll.u32 (%p44_p3), %s185_s24, 5 }
   0xe   : > { %s193_s29 = scalar_lea.vmem (%p44_p3), %s1305_s0, %s966_s25  ;;  %s187_s30 = scalar_lea.vmem (%p44_p3), [#allocation3], %s808_s26 }
   0xf   : > { %v228_v0 = vld [vmem:[%s193_s29] sm:$0xff] (%p44_p3)  ;;  %v230_v1 = vld [vmem:[%s193_s29 + $0x48] sm:$0xff] (%p44_p3)  ;;  %v232_v2 = vld [vmem:[%s193_s29 + $0x90] sm:$0xff] (%p44_p3) }
  0x10   : > { %229 = vst [vmem:[%s187_s30] sm:$0xff] (%p44_p3), %v228_v0  ;;  %v234_v3 = vld [vmem:[%s193_s29 + $0xd8] sm:$0xff] (%p44_p3) }
  0x11   : > { %231 = vst [vmem:[%s187_s30 + $0x8] sm:$0xff] %v230_v1 }
  0x12   : > { %233 = vst [vmem:[%s187_s30 + $0x10] sm:$0xff] %v232_v2 }
  0x13   : > { %235 = vst [vmem:[%s187_s30 + $0x18] sm:$0xff] %v234_v3 }
  0x14 PF: > { %p811_p6 = scmp.ge.s32.totalorder %s1083_s19, 1  ;;  %p250_p7 = scmp.lt.s32.totalorder %s1083_s19, 10 }
  0x16   : > { %p251_p8 = pnand %p811_p6, %p250_p7 }
  0x17   : > { %s257_s5 = sand.u32 (!%p251_p8), 1, %s1067_s15   ;;  %s813_s6 = sshll.u32 (!%p251_p8), %s1075_s17, 5 }
  0x18   : > { %254 = sbr.rel (%p251_p8) target bundleno = 257 (0x101), region = 70  ;;  %s812_s7 = sshll.u32 (!%p251_p8), %s257_s5, 5 }
  0x19   : > { %p298_p9 = scmp.lt.s32.totalorder (!%p251_p8), %s813_s6, 287  ;;  %s1163_s12 = scalar_lea.vmem (!%p251_p8), [#allocation3], %s812_s7 }
  0x1a   : > { %p816_p10 = scmp.ne.s32.totalorder (!%p251_p8), %s1075_s17, 0 }
  0x1d   : > { %s1317_s6 = smov (!%p298_p9, %s813_s6), 287  ;;  %321 = sbr.rel (%p816_p10) target bundleno = 43 (0x2b), region = 78 }
  0x1e   : > { %s967_s8 = sshll.u32 %s1317_s6, 3 }
  0x1f   : > { %s1161_s11 = scalar_lea.vmem %s1306_s1, %s967_s8 }
  0x22   : > { %v1085_v4 = vmov 0.0  }
  0x23   : > { %322 = vst [vmem:[#allocation2 + $0x30] sm:$0xff] %v1085_v4 }
  0x24   : > { %323 = vst [vmem:[#allocation2] sm:$0xff] %v1085_v4 }
  0x25   : > { %324 = vst [vmem:[#allocation2 + $0x18] sm:$0xff] %v1085_v4 }
  0x26   : > { %325 = vst [vmem:[#allocation2 + $0x10] sm:$0xff] %v1085_v4 }
  0x27   : > { %326 = vst [vmem:[#allocation2 + $0x8] sm:$0xff] %v1085_v4 }
  0x28   : > { %327 = vst [vmem:[#allocation2 + $0x20] sm:$0xff] %v1085_v4 }
  0x29   : > { %328 = vst [vmem:[#allocation2 + $0x28] sm:$0xff] %v1085_v4 }
  0x2a   : > { %329 = vst [vmem:[#allocation2 + $0x38] sm:$0xff] %v1085_v4 }
  0x2b PF: > { %v891_v5 = vld [vmem:[%s1161_s11 + $0x70] sm:$0xf]  ;;  %v987_v6 = vld [vmem:[%s1161_s11 + $0x74] sm:$0xf0]  ;;  %v986_v10 = vld [vmem:[%s1161_s11 + $0x74] sm:$0xf] }
  0x2c   : > { %v955_v7 = vld [vmem:[%s1161_s11 + $0xf0] sm:$0xf]  ;;  %v892_v8 = vor.u32 %v987_v6, %v891_v5  ;;  %v1003_v9 = vld [vmem:[%s1161_s11 + $0xf4] sm:$0xf0]  ;;  %v893_v11 = vld [vmem:[%s1161_s11 + $0x78] sm:$0xf0] }
  0x2d   : > { %v956_v12 = vor.u32 %v1003_v9, %v955_v7  ;;  %v896_v13 = vor.u32 %v986_v10, %v893_v11  ;;  %v1002_v14 = vld [vmem:[%s1161_s11 + $0xf4] sm:$0xf]  ;;  %v957_v15 = vld [vmem:[%s1161_s11 + $0xf8] sm:$0xf0]  ;;  %v883_v16 = vld [vmem:[%s1161_s11 + $0x60] sm:$0xf] }
  0x2e   : > { %554 = vmatpush.bf16.msra.mxu0 %v892_v8  ;;  %v960_v17 = vor.u32 %v1002_v14, %v957_v15  ;;  %v985_v18 = vld [vmem:[%s1161_s11 + $0x64] sm:$0xf0]  ;;  %v947_v19 = vld [vmem:[%s1161_s11 + $0xe0] sm:$0xf]  ;;  %v984_v23 = vld [vmem:[%s1161_s11 + $0x64] sm:$0xf] }
  0x2f   : > { %v1001_v20 = vld [vmem:[%s1161_s11 + $0xe4] sm:$0xf0]  ;;  %573 = vmatpush.bf16.msra.mxu1 %v956_v12  ;;  %592 = vmatpush.bf16.msra.mxu2 %v896_v13  ;;  %v884_v21 = vor.u32 %v985_v18, %v883_v16  ;;  %v885_v24 = vld [vmem:[%s1161_s11 + $0x68] sm:$0xf0]  ;;  %v1000_v25 = vld [vmem:[%s1161_s11 + $0xe4] sm:$0xf] }
  0x30   : > { %v948_v22 = vor.u32 %v1001_v20, %v947_v19  ;;  %611 = vmatpush.bf16.msra.mxu3 %v960_v17  ;;  %v888_v26 = vor.u32 %v984_v23, %v885_v24  ;;  %v949_v27 = vld [vmem:[%s1161_s11 + $0xe8] sm:$0xf0]  ;;  %v875_v28 = vld [vmem:[%s1161_s11 + $0x50] sm:$0xf]  ;;  %v983_v29 = vld [vmem:[%s1161_s11 + $0x54] sm:$0xf0] }
  0x31   : > { %v952_v30 = vor.u32 %v1000_v25, %v949_v27  ;;  %v939_v31 = vld [vmem:[%s1161_s11 + $0xd0] sm:$0xf]  ;;  %v999_v32 = vld [vmem:[%s1161_s11 + $0xd4] sm:$0xf0]  ;;  %v982_v33 = vld [vmem:[%s1161_s11 + $0x54] sm:$0xf]  ;;  %v876_v34 = vor.u32 %v983_v29, %v875_v28 }
  0x32   : > { %555 = vmatpush.bf16.msra.mxu0 %v884_v21  ;;  %v877_v35 = vld [vmem:[%s1161_s11 + $0x58] sm:$0xf0]  ;;  %v998_v36 = vld [vmem:[%s1161_s11 + $0xd4] sm:$0xf]  ;;  %v940_v38 = vor.u32 %v999_v32, %v939_v31  ;;  %v867_v40 = vld [vmem:[%s1161_s11 + $0x40] sm:$0xf] }
  0x33   : > { %v941_v37 = vld [vmem:[%s1161_s11 + $0xd8] sm:$0xf0]  ;;  %574 = vmatpush.bf16.msra.mxu1 %v948_v22  ;;  %593 = vmatpush.bf16.msra.mxu2 %v888_v26  ;;  %v880_v39 = vor.u32 %v982_v33, %v877_v35  ;;  %v981_v41 = vld [vmem:[%s1161_s11 + $0x44] sm:$0xf0]  ;;  %v931_v42 = vld [vmem:[%s1161_s11 + $0xc0] sm:$0xf] }
  0x34   : > { %612 = vmatpush.bf16.msra.mxu3 %v952_v30  ;;  %v944_v43 = vor.u32 %v998_v36, %v941_v37  ;;  %v997_v44 = vld [vmem:[%s1161_s11 + $0xc4] sm:$0xf0]  ;;  %v980_v45 = vld [vmem:[%s1161_s11 + $0x44] sm:$0xf]  ;;  %v869_v46 = vld [vmem:[%s1161_s11 + $0x48] sm:$0xf0]  ;;  %v868_v49 = vor.u32 %v981_v41, %v867_v40 }
  0x35   : > { %v996_v47 = vld [vmem:[%s1161_s11 + $0xc4] sm:$0xf]  ;;  %v933_v48 = vld [vmem:[%s1161_s11 + $0xc8] sm:$0xf0]  ;;  %v932_v50 = vor.u32 %v997_v44, %v931_v42  ;;  %v872_v51 = vor.u32 %v980_v45, %v869_v46  ;;  %v859_v52 = vld [vmem:[%s1161_s11 + $0x30] sm:$0xf] }
  0x36   : > { %556 = vmatpush.bf16.msra.mxu0 %v876_v34  ;;  %v979_v53 = vld [vmem:[%s1161_s11 + $0x34] sm:$0xf0]  ;;  %v923_v54 = vld [vmem:[%s1161_s11 + $0xb0] sm:$0xf]  ;;  %v936_v55 = vor.u32 %v996_v47, %v933_v48  ;;  %v978_v57 = vld [vmem:[%s1161_s11 + $0x34] sm:$0xf] }
  0x37   : > { %575 = vmatpush.bf16.msra.mxu1 %v940_v38  ;;  %594 = vmatpush.bf16.msra.mxu2 %v880_v39  ;;  %v995_v56 = vld [vmem:[%s1161_s11 + $0xb4] sm:$0xf0]  ;;  %v861_v58 = vld [vmem:[%s1161_s11 + $0x38] sm:$0xf0]  ;;  %v994_v59 = vld [vmem:[%s1161_s11 + $0xb4] sm:$0xf]  ;;  %v860_v61 = vor.u32 %v979_v53, %v859_v52 }
  0x38   : > { %613 = vmatpush.bf16.msra.mxu3 %v944_v43  ;;  %v925_v60 = vld [vmem:[%s1161_s11 + $0xb8] sm:$0xf0]  ;;  %v924_v62 = vor.u32 %v995_v56, %v923_v54  ;;  %v864_v63 = vor.u32 %v978_v57, %v861_v58  ;;  %v851_v0 = vld [vmem:[%s1161_s11 + $0x20] sm:$0xf]  ;;  %v977_v1 = vld [vmem:[%s1161_s11 + $0x24] sm:$0xf0] }
  0x39   : > { %v915_v2 = vld [vmem:[%s1161_s11 + $0xa0] sm:$0xf]  ;;  %v928_v3 = vor.u32 %v994_v59, %v925_v60  ;;  %v993_v4 = vld [vmem:[%s1161_s11 + $0xa4] sm:$0xf0]  ;;  %v976_v5 = vld [vmem:[%s1161_s11 + $0x24] sm:$0xf]  ;;  %v852_v9 = vor.u32 %v977_v1, %v851_v0 }
  0x3a   : > { %557 = vmatpush.bf16.msra.mxu0 %v868_v49  ;;  %v853_v6 = vld [vmem:[%s1161_s11 + $0x28] sm:$0xf0]  ;;  %v992_v7 = vld [vmem:[%s1161_s11 + $0xa4] sm:$0xf]  ;;  %v916_v10 = vor.u32 %v993_v4, %v915_v2  ;;  %v843_v12 = vld [vmem:[%s1161_s11 + $0x10] sm:$0xf] }
  0x3b   : > { %576 = vmatpush.bf16.msra.mxu1 %v932_v50  ;;  %595 = vmatpush.bf16.msra.mxu2 %v872_v51  ;;  %v917_v8 = vld [vmem:[%s1161_s11 + $0xa8] sm:$0xf0]  ;;  %v856_v11 = vor.u32 %v976_v5, %v853_v6  ;;  %v975_v13 = vld [vmem:[%s1161_s11 + $0x14] sm:$0xf0]  ;;  %v907_v14 = vld [vmem:[%s1161_s11 + $0x90] sm:$0xf] }
  0x3c   : > { %614 = vmatpush.bf16.msra.mxu3 %v936_v55  ;;  %v920_v15 = vor.u32 %v992_v7, %v917_v8  ;;  %v991_v16 = vld [vmem:[%s1161_s11 + $0x94] sm:$0xf0]  ;;  %v974_v17 = vld [vmem:[%s1161_s11 + $0x14] sm:$0xf]  ;;  %v845_v18 = vld [vmem:[%s1161_s11 + $0x18] sm:$0xf0]  ;;  %v844_v21 = vor.u32 %v975_v13, %v843_v12 }
  0x3d   : > { %v990_v19 = vld [vmem:[%s1161_s11 + $0x94] sm:$0xf]  ;;  %v909_v20 = vld [vmem:[%s1161_s11 + $0x98] sm:$0xf0]  ;;  %v908_v22 = vor.u32 %v991_v16, %v907_v14  ;;  %v848_v23 = vor.u32 %v974_v17, %v845_v18  ;;  %v835_v24 = vld [vmem:[%s1161_s11] sm:$0xf] }
  0x3e   : > { %558 = vmatpush.bf16.msra.mxu0 %v860_v61  ;;  %v973_v25 = vld [vmem:[%s1161_s11 + $0x4] sm:$0xf0]  ;;  %v899_v26 = vld [vmem:[%s1161_s11 + $0x80] sm:$0xf]  ;;  %v912_v27 = vor.u32 %v990_v19, %v909_v20  ;;  %v972_v29 = vld [vmem:[%s1161_s11 + $0x4] sm:$0xf] }
  0x3f   : > { %577 = vmatpush.bf16.msra.mxu1 %v924_v62  ;;  %596 = vmatpush.bf16.msra.mxu2 %v864_v63  ;;  %v989_v28 = vld [vmem:[%s1161_s11 + $0x84] sm:$0xf0]  ;;  %v837_v30 = vld [vmem:[%s1161_s11 + $0x8] sm:$0xf0]  ;;  %v988_v31 = vld [vmem:[%s1161_s11 + $0x84] sm:$0xf]  ;;  %v836_v33 = vor.u32 %v973_v25, %v835_v24 }
  0x40   : > { %615 = vmatpush.bf16.msra.mxu3 %v928_v3  ;;  %v901_v32 = vld [vmem:[%s1161_s11 + $0x88] sm:$0xf0]  ;;  %v819_v34 = vld [vmem:[%s1163_s12] sm:$0xf]  ;;  %v969_v35 = vld [vmem:[%s1163_s12 + $0x4] sm:$0xf0]  ;;  %v900_v36 = vor.u32 %v989_v28, %v899_v26  ;;  %v840_v37 = vor.u32 %v972_v29, %v837_v30 }
  0x41   : > { %v968_v38 = vld [vmem:[%s1163_s12 + $0x4] sm:$0xf]  ;;  %v821_v39 = vld [vmem:[%s1163_s12 + $0x8] sm:$0xf0]  ;;  %v904_v40 = vor.u32 %v988_v31, %v901_v32  ;;  %v820_v41 = vor.u32 %v969_v35, %v819_v34  ;;  %v827_v43 = vld [vmem:[%s1163_s12 + $0x10] sm:$0xf] }
  0x42   : > { %559 = vmatpush.bf16.msra.mxu0 %v852_v9  ;;  %v824_v42 = vor.u32 %v968_v38, %v821_v39  ;;  %v971_v44 = vld [vmem:[%s1163_s12 + $0x14] sm:$0xf0]  ;;  %v970_v45 = vld [vmem:[%s1163_s12 + $0x14] sm:$0xf]  ;;  %v829_v46 = vld [vmem:[%s1163_s12 + $0x18] sm:$0xf0] }
  0x43   : > { %578 = vmatpush.bf16.msra.mxu1 %v916_v10  ;;  %597 = vmatpush.bf16.msra.mxu2 %v856_v11  ;;  %v828_v47 = vor.u32 %v971_v44, %v827_v43  ;;  %v832_v48 = vor.u32 %v970_v45, %v829_v46  ;;  %v330_v50 = vld [vmem:[#allocation2 + $0x30] sm:$0xff]  ;;  %v331_v55 = vld [vmem:[#allocation2] sm:$0xff]  ;;  %v332_v59 = vld [vmem:[#allocation2 + $0x18] sm:$0xff]  ;;  %p961_p11 = scmp.ne.s32.totalorder %s1075_s17, 8 }
  0x44   : > { %616 = vmatpush.bf16.msra.mxu3 %v920_v15  ;;  %v333_v1 = vld [vmem:[#allocation2 + $0x10] sm:$0xff]  ;;  %v334_v5 = vld [vmem:[#allocation2 + $0x8] sm:$0xff]  ;;  %v335_v11 = vld [vmem:[#allocation2 + $0x20] sm:$0xff] }
  0x45   : > { %v336_v15 = vld [vmem:[#allocation2 + $0x28] sm:$0xff] }
  0x46   : > { %560 = vmatpush.bf16.msra.mxu0 %v844_v21  ;;  %v337_v21 = vld [vmem:[#allocation2 + $0x38] sm:$0xff] }
  0x47   : > { %579 = vmatpush.bf16.msra.mxu1 %v908_v22  ;;  %598 = vmatpush.bf16.msra.mxu2 %v848_v23 }
  0x48   : > { %617 = vmatpush.bf16.msra.mxu3 %v912_v27 }
  0x4a   : > { %561 = vmatpush.bf16.msra.mxu0 %v836_v33 }
  0x4b   : > { %580 = vmatpush.bf16.msra.mxu1 %v900_v36  ;;  %599 = vmatpush.bf16.msra.mxu2 %v840_v37 }
  0x4c   : > { %618 = vmatpush.bf16.msra.mxu3 %v904_v40 }
  0x4d   : > { %562 = vmatmul.bf16.vlgmr.msra.gmra.mxu0 %v820_v41 }
  0x4e   : > { %581 = vmatmul.bf16.vlgmr.msra.gmra.mxu1 %v824_v42  ;;  %600 = vmatmul.bf16.vlgmr.msra.gmra.mxu2 %v820_v41 }
  0x4f   : > { %619 = vmatmul.bf16.vlgmr.msra.gmra.mxu3 %v824_v42 }
  0x5d   : > { %567 = vmatmul.bf16.gmra.mxu0 %v828_v47 }
  0x5e   : > { %586 = vmatmul.bf16.gmra.mxu1 %v832_v48  ;;  %605 = vmatmul.bf16.gmra.mxu2 %v828_v47 }
  0x5f   : > { %624 = vmatmul.bf16.gmra.mxu3 %v832_v48 }
  0xca   : > { %v563_v49 = vpop.f32.mrf.mxu0 }
  0xcb   : > { %v582_v51 = vpop.f32.mrf.mxu1 }
  0xcc   : > { %v583_v52 = vadd.f32 %v582_v51, %v563_v49 }
  0xce   : > { %v630_v53 = vadd.f32 %v583_v52, %v330_v50 }
  0xd0   : > { %638 = vst [vmem:[#allocation2 + $0x30] sm:$0xff] %v630_v53 }
  0xd1   : > { %v601_v54 = vpop.f32.mrf.mxu2 }
  0xd2   : > { %v620_v56 = vpop.f32.mrf.mxu3  ;;  %v565_v57 = vpop.f32.mrf.mxu0 }
  0xd3   : > { %v621_v58 = vadd.f32 %v620_v56, %v601_v54  ;;  %v584_v60 = vpop.f32.mrf.mxu1 }
  0xd4   : > { %v585_v61 = vadd.f32 %v584_v60, %v565_v57 }
  0xd5   : > { %v631_v62 = vadd.f32 %v621_v58, %v331_v55 }
  0xd6   : > { %v632_v63 = vadd.f32 %v585_v61, %v332_v59 }
  0xd7   : > { %639 = vst [vmem:[#allocation2] sm:$0xff] %v631_v62 }
  0xd8   : > { %640 = vst [vmem:[#allocation2 + $0x18] sm:$0xff] %v632_v63 }
  0xd9   : > { %v603_v0 = vpop.f32.mrf.mxu2 }
  0xda   : > { %v622_v2 = vpop.f32.mrf.mxu3  ;;  %v568_v3 = vpop.f32.mrf.mxu0 }
  0xdb   : > { %v623_v4 = vadd.f32 %v622_v2, %v603_v0  ;;  %v587_v6 = vpop.f32.mrf.mxu1 }
  0xdc   : > { %v588_v7 = vadd.f32 %v587_v6, %v568_v3 }
  0xdd   : > { %v633_v8 = vadd.f32 %v623_v4, %v333_v1 }
  0xde   : > { %v634_v9 = vadd.f32 %v588_v7, %v334_v5 }
  0xdf   : > { %641 = vst [vmem:[#allocation2 + $0x10] sm:$0xff] %v633_v8 }
  0xe0   : > { %642 = vst [vmem:[#allocation2 + $0x8] sm:$0xff] %v634_v9 }
  0xe1   : > { %v606_v10 = vpop.f32.mrf.mxu2 }
  0xe2   : > { %v625_v12 = vpop.f32.mrf.mxu3  ;;  %v570_v13 = vpop.f32.mrf.mxu0 }
  0xe3   : > { %v626_v14 = vadd.f32 %v625_v12, %v606_v10  ;;  %v589_v16 = vpop.f32.mrf.mxu1 }
  0xe4   : > { %v590_v17 = vadd.f32 %v589_v16, %v570_v13 }
  0xe5   : > { %v635_v18 = vadd.f32 %v626_v14, %v335_v11 }
  0xe6   : > { %v636_v19 = vadd.f32 %v590_v17, %v336_v15 }
  0xe7   : > { %643 = vst [vmem:[#allocation2 + $0x20] sm:$0xff] %v635_v18 }
  0xe8   : > { %644 = vst [vmem:[#allocation2 + $0x28] sm:$0xff] %v636_v19 }
  0xe9   : > { %v608_v20 = vpop.f32.mrf.mxu2 }
  0xea   : > { %v627_v22 = vpop.f32.mrf.mxu3 }
  0xeb   : > { %v628_v23 = vadd.f32 %v627_v22, %v608_v20  ;;  %649 = sbr.rel (%p961_p11) target bundleno = 257 (0x101), region = 82 }
  0xed   : > { %v637_v24 = vadd.f32 %v628_v23, %v337_v21 }
  0xef   : > { %645 = vst [vmem:[#allocation2 + $0x38] sm:$0xff] %v637_v24 }
  0xf0   : > { %v650_v25 = vld [vmem:[#allocation2 + $0x30] sm:$0xff]  ;;  %v658_v26 = vld [vmem:[%s1307_s2] sm:$0x3]  ;;  %v673_v31 = vld [vmem:[%s1308_s3 + $0x8] sm:$0xff] }
  0xf1   : > { %v672_v27 = vld [vmem:[%s1308_s3] sm:$0xff]  ;;  %v660_v28 = vperm.slane %v658_v26, 0  ;;  %v661_v30 = vperm.slane %v658_v26, 1  ;;  %v652_v32 = vld [vmem:[#allocation2 + $0x18] sm:$0xff]  ;;  %v674_v33 = vld [vmem:[%s1308_s3 + $0x10] sm:$0xff] }
  0xf2   : > { %v651_v29 = vld [vmem:[#allocation2] sm:$0xff]  ;;  %v653_v34 = vld [vmem:[#allocation2 + $0x10] sm:$0xff]  ;;  %v675_v35 = vld [vmem:[%s1308_s3 + $0x18] sm:$0xff] }
  0xf3   : > { %v664_v36 = vadd.f32 %v660_v28, %v650_v25  ;;  %v665_v37 = vadd.f32 %v661_v30, %v651_v29  ;;  %v666_v38 = vadd.f32 %v660_v28, %v652_v32  ;;  %v667_v39 = vadd.f32 %v661_v30, %v653_v34  ;;  %v654_v40 = vld [vmem:[#allocation2 + $0x8] sm:$0xff]  ;;  %v676_v41 = vld [vmem:[%s1308_s3 + $0x20] sm:$0xff]  ;;  %v678_v51 = vld [vmem:[%s1308_s3 + $0x30] sm:$0xff] }
  0xf4   : > { %v655_v42 = vld [vmem:[#allocation2 + $0x20] sm:$0xff]  ;;  %v668_v43 = vadd.f32 %v660_v28, %v654_v40  ;;  %v677_v45 = vld [vmem:[%s1308_s3 + $0x28] sm:$0xff]  ;;  %v679_v53 = vld [vmem:[%s1308_s3 + $0x38] sm:$0xff] }
  0xf5   : > { %v669_v44 = vadd.f32 %v661_v30, %v655_v42  ;;  %v656_v46 = vld [vmem:[#allocation2 + $0x28] sm:$0xff]  ;;  %v680_v47 = vadd.f32 %v672_v27, %v664_v36  ;;  %v681_v48 = vadd.f32 %v673_v31, %v665_v37  ;;  %v682_v49 = vadd.f32 %v674_v33, %v666_v38 }
  0xf6   : > { %v683_v50 = vadd.f32 %v675_v35, %v667_v39  ;;  %v657_v52 = vld [vmem:[#allocation2 + $0x38] sm:$0xff]  ;;  %v684_v54 = vadd.f32 %v676_v41, %v668_v43  ;;  %v670_v56 = vadd.f32 %v660_v28, %v656_v46 }
  0xf7   : > { %v685_v55 = vadd.f32 %v677_v45, %v669_v44  ;;  %v671_v57 = vadd.f32 %v661_v30, %v657_v52  ;;  %v688_v58 = vmax.f32 %v680_v47, 0.0  ;;  %v689_v59 = vmax.f32 %v681_v48, 0.0 }
  0xf8   : > { %v690_v60 = vmax.f32 %v682_v49, 0.0  ;;  %v691_v61 = vmax.f32 %v683_v50, 0.0  ;;  %v686_v62 = vadd.f32 %v678_v51, %v670_v56  ;;  %v692_v0 = vmax.f32 %v684_v54, 0.0 }
  0xf9   : > { %v687_v63 = vadd.f32 %v679_v53, %v671_v57  ;;  %696 = vst [vmem:[%s1309_s4] sm:$0xff] %v688_v58  ;;  %v693_v1 = vmax.f32 %v685_v55, 0.0 }
  0xfa   : > { %697 = vst [vmem:[%s1309_s4 + $0x8] sm:$0xff] %v689_v59  ;;  %v694_v2 = vmax.f32 %v686_v62, 0.0 }
  0xfb   : > { %698 = vst [vmem:[%s1309_s4 + $0x10] sm:$0xff] %v690_v60  ;;  %v695_v3 = vmax.f32 %v687_v63, 0.0 }
  0xfc   : > { %699 = vst [vmem:[%s1309_s4 + $0x18] sm:$0xff] %v691_v61 }
  0xfd   : > { %700 = vst [vmem:[%s1309_s4 + $0x20] sm:$0xff] %v692_v0 }
  0xfe   : > { %701 = vst [vmem:[%s1309_s4 + $0x28] sm:$0xff] %v693_v1 }
  0xff   : > { %702 = vst [vmem:[%s1309_s4 + $0x30] sm:$0xff] %v694_v2 }
 0x100   : > { %703 = vst [vmem:[%s1309_s4 + $0x38] sm:$0xff] %v695_v3 }
 0x101 PF: > { %s14_s19 = sadd.s32 1, %s1083_s19   ;;  %s1310_s15 = smov %s1071_s16 }
 0x102   : > { %p11_p12 = scmp.ge.s32.totalorder %s14_s19, 11   ;;  %s1311_s16 = smov %s1146_s23 }
 0x103   : > { %s1312_s17 = smov %s1079_s18  ;;  %s1313_s18 = smov %s1315_s20 }
 0x104   :  { %13 = sbr.rel (!%p11_p12) target bundleno = 3 (0x3), region = 123 }

// kernel: resnet_encoder_mtan_forward.35
= control target key start
LH: loop header
LB: loop body
LE: loop exit
PB: predicated region body
PF: predicated region fallthrough
CT: control target
= control target key end

     0   :  { %s1518_s12 = smov 0   ;;  %s1520_s13 = smov 0   ;;  %s1800_s0 = inlined_call_operand.vmem [shape: bf16[32,2304], index: 0, kind: input, shape index: {}]   ;;  %s1801_s1 = inlined_call_operand.vmem [shape: bf16[2304,512], index: 1, kind: input, shape index: {}]   ;;  %s1802_s2 = inlined_call_operand.vmem [shape: f32[1,512], index: 2, kind: input, shape index: {}]   ;;  %s1803_s3 = inlined_call_operand.vmem [shape: f32[32,512], index: 3, kind: output, shape index: {}]  }
   0x1   :  { %s1522_s14 = smov 0   ;;  %s1524_s15 = smov 0  }
   0x2   :  { %s1526_s16 = smov 0  }
   0x3 LB: > { %s22_s17 = sadd.s32 1, %s1491_s15  ;;  %p41_p1 = scmp.ne.s32.totalorder %s1483_s13, %s1479_s12  ;;  %s1495_s16 = sphi %s1526_s16, %s13_s16   ;;  %s1491_s15 = sphi %s1524_s15, %s1807_s15   ;;  %s1487_s14 = sphi %s1522_s14, %s1806_s14   ;;  %s1483_s13 = sphi %s1520_s13, %s1805_s13   ;;  %s1479_s12 = sphi %s1518_s12, %s1804_s12  }
   0x4   : > { %p23_p0 = scmp.ge.s32.totalorder %s22_s17, 9  ;;  %p42_p2 = scmp.eq.s32.totalorder %s1495_s16, 0 }
   0x5   : > { %s34_s19 = sadd.s32 1, %s1483_s13  ;;  %p1059_p5 = scmp.ge.s32.totalorder %s1495_s16, 9 }
   0x6   : > { %s1809_s17 = smov (%p23_p0, %s22_s17), 0  ;;  %p43_p3 = por %p42_p2, %p41_p1 }
   0x7   : > { %s30_s18 = ssub.s32 %s1491_s15, %s1809_s17  ;;  %143 = sbr.rel (%p1059_p5) target bundleno = 20 (0x14), region = 20 }
   0x8   : > { %p32_p4 = scmp.eq.s32.totalorder %s30_s18, 0 }
   0xa   : > { %s1553_s20 = scalar_select %p32_p4, %s1483_s13, %s34_s19  }
   0xc   : > { %146 = sbr.rel (!%p43_p3) target bundleno = 20 (0x14), region = 24  ;;  %s148_s21 = sand.u32 (%p43_p3), 1, %s1483_s13  }
   0xd   : > { %s1346_s22 = sshll.u32 (%p43_p3), %s1491_s15, 3  ;;  %s1060_s23 = sshll.u32 (%p43_p3), %s148_s21, 5 }
   0xe   : > { %s156_s26 = scalar_lea.vmem (%p43_p3), %s1800_s0, %s1346_s22  ;;  %s150_s27 = scalar_lea.vmem (%p43_p3), [#allocation3], %s1060_s23 }
   0xf   : > { %v191_v0 = vld [vmem:[%s156_s26] sm:$0xff] (%p43_p3)  ;;  %v193_v1 = vld [vmem:[%s156_s26 + $0x48] sm:$0xff] (%p43_p3)  ;;  %v195_v2 = vld [vmem:[%s156_s26 + $0x90] sm:$0xff] (%p43_p3) }
  0x10   : > { %192 = vst [vmem:[%s150_s27] sm:$0xff] (%p43_p3), %v191_v0  ;;  %v197_v3 = vld [vmem:[%s156_s26 + $0xd8] sm:$0xff] (%p43_p3) }
  0x11   : > { %194 = vst [vmem:[%s150_s27 + $0x8] sm:$0xff] %v193_v1 }
  0x12   : > { %196 = vst [vmem:[%s150_s27 + $0x10] sm:$0xff] %v195_v2 }
  0x13   : > { %198 = vst [vmem:[%s150_s27 + $0x18] sm:$0xff] %v197_v3 }
  0x14 PF: > { %p1063_p6 = scmp.ge.s32.totalorder %s1495_s16, 1  ;;  %p213_p7 = scmp.lt.s32.totalorder %s1495_s16, 10 }
  0x16   : > { %p214_p8 = pnand %p1063_p6, %p213_p7 }
  0x17   : > { %s220_s28 = sand.u32 (!%p214_p8), 1, %s1479_s12   ;;  %s1065_s29 = sshll.u32 (!%p214_p8), %s1487_s14, 5 }
  0x18   : > { %217 = sbr.rel (%p214_p8) target bundleno = 303 (0x12f), region = 66  ;;  %s1064_s30 = sshll.u32 (!%p214_p8), %s220_s28, 5 }
  0x19   : > { %p253_p9 = scmp.lt.s32.totalorder (!%p214_p8), %s1065_s29, 287  ;;  %s1570_s8 = scalar_lea.vmem (!%p214_p8), [#allocation3], %s1064_s30 }
  0x1a   : > { %p1068_p10 = scmp.ne.s32.totalorder (!%p214_p8), %s1487_s14, 0 }
  0x1d   : > { %s1811_s29 = smov (!%p253_p9, %s1065_s29), 287  ;;  %269 = sbr.rel (%p1068_p10) target bundleno = 51 (0x33), region = 74 }
  0x1e   : > { %s1347_s4 = sshll.u32 %s1811_s29, 4 }
  0x1f   : > { %s1568_s7 = scalar_lea.vmem %s1801_s1, %s1347_s4 }
  0x22   : > { %v1497_v4 = vmov 0.0  }
  0x23   : > { %270 = vst [vmem:[#allocation2 + $0x30] sm:$0xff] %v1497_v4 }
  0x24   : > { %271 = vst [vmem:[#allocation2] sm:$0xff] %v1497_v4 }
  0x25   : > { %272 = vst [vmem:[#allocation2 + $0x58] sm:$0xff] %v1497_v4 }
  0x26   : > { %273 = vst [vmem:[#allocation2 + $0x18] sm:$0xff] %v1497_v4 }
  0x27   : > { %274 = vst [vmem:[#allocation2 + $0x50] sm:$0xff] %v1497_v4 }
  0x28   : > { %275 = vst [vmem:[#allocation2 + $0x68] sm:$0xff] %v1497_v4 }
  0x29   : > { %276 = vst [vmem:[#allocation2 + $0x8] sm:$0xff] %v1497_v4 }
  0x2a   : > { %277 = vst [vmem:[#allocation2 + $0x48] sm:$0xff] %v1497_v4 }
  0x2b   : > { %278 = vst [vmem:[#allocation2 + $0x40] sm:$0xff] %v1497_v4 }
  0x2c   : > { %279 = vst [vmem:[#allocation2 + $0x20] sm:$0xff] %v1497_v4 }
  0x2d   : > { %280 = vst [vmem:[#allocation2 + $0x10] sm:$0xff] %v1497_v4 }
  0x2e   : > { %281 = vst [vmem:[#allocation2 + $0x38] sm:$0xff] %v1497_v4 }
  0x2f   : > { %282 = vst [vmem:[#allocation2 + $0x60] sm:$0xff] %v1497_v4 }
  0x30   : > { %283 = vst [vmem:[#allocation2 + $0x70] sm:$0xff] %v1497_v4 }
  0x31   : > { %284 = vst [vmem:[#allocation2 + $0x78] sm:$0xff] %v1497_v4 }
  0x32   : > { %285 = vst [vmem:[#allocation2 + $0x28] sm:$0xff] %v1497_v4 }
  0x33 PF: > { %v1199_v5 = vld [vmem:[%s1568_s7 + $0xe0] sm:$0xf]  ;;  %v1382_v6 = vld [vmem:[%s1568_s7 + $0xec] sm:$0xf0]  ;;  %v1380_v10 = vld [vmem:[%s1568_s7 + $0xe4] sm:$0xf] }
  0x34   : > { %v1327_v7 = vld [vmem:[%s1568_s7 + $0x1e0] sm:$0xf]  ;;  %v1200_v8 = vor.u32 %v1382_v6, %v1199_v5  ;;  %v1414_v9 = vld [vmem:[%s1568_s7 + $0x1ec] sm:$0xf0]  ;;  %v1201_v11 = vld [vmem:[%s1568_s7 + $0xf0] sm:$0xf0] }
  0x35   : > { %v1328_v12 = vor.u32 %v1414_v9, %v1327_v7  ;;  %v1204_v13 = vor.u32 %v1380_v10, %v1201_v11  ;;  %v1412_v14 = vld [vmem:[%s1568_s7 + $0x1e4] sm:$0xf]  ;;  %v1329_v15 = vld [vmem:[%s1568_s7 + $0x1f0] sm:$0xf0]  ;;  %v1183_v16 = vld [vmem:[%s1568_s7 + $0xc0] sm:$0xf] }
  0x36   : > { %710 = vmatpush.bf16.msra.mxu0 %v1200_v8  ;;  %v1332_v17 = vor.u32 %v1412_v14, %v1329_v15  ;;  %v1378_v18 = vld [vmem:[%s1568_s7 + $0xcc] sm:$0xf0]  ;;  %v1311_v19 = vld [vmem:[%s1568_s7 + $0x1c0] sm:$0xf]  ;;  %v1376_v23 = vld [vmem:[%s1568_s7 + $0xc4] sm:$0xf] }
  0x37   : > { %v1410_v20 = vld [vmem:[%s1568_s7 + $0x1cc] sm:$0xf0]  ;;  %729 = vmatpush.bf16.msra.mxu1 %v1328_v12  ;;  %748 = vmatpush.bf16.msra.mxu2 %v1204_v13  ;;  %v1184_v21 = vor.u32 %v1378_v18, %v1183_v16  ;;  %v1185_v24 = vld [vmem:[%s1568_s7 + $0xd0] sm:$0xf0]  ;;  %v1408_v25 = vld [vmem:[%s1568_s7 + $0x1c4] sm:$0xf] }
  0x38   : > { %v1312_v22 = vor.u32 %v1410_v20, %v1311_v19  ;;  %767 = vmatpush.bf16.msra.mxu3 %v1332_v17  ;;  %v1188_v26 = vor.u32 %v1376_v23, %v1185_v24  ;;  %v1313_v27 = vld [vmem:[%s1568_s7 + $0x1d0] sm:$0xf0]  ;;  %v1167_v28 = vld [vmem:[%s1568_s7 + $0xa0] sm:$0xf]  ;;  %v1374_v29 = vld [vmem:[%s1568_s7 + $0xac] sm:$0xf0] }
  0x39   : > { %v1316_v30 = vor.u32 %v1408_v25, %v1313_v27  ;;  %v1295_v31 = vld [vmem:[%s1568_s7 + $0x1a0] sm:$0xf]  ;;  %v1406_v32 = vld [vmem:[%s1568_s7 + $0x1ac] sm:$0xf0]  ;;  %v1372_v33 = vld [vmem:[%s1568_s7 + $0xa4] sm:$0xf]  ;;  %v1168_v34 = vor.u32 %v1374_v29, %v1167_v28 }
  0x3a   : > { %711 = vmatpush.bf16.msra.mxu0 %v1184_v21  ;;  %v1169_v35 = vld [vmem:[%s1568_s7 + $0xb0] sm:$0xf0]  ;;  %v1404_v36 = vld [vmem:[%s1568_s7 + $0x1a4] sm:$0xf]  ;;  %v1296_v38 = vor.u32 %v1406_v32, %v1295_v31  ;;  %v1151_v40 = vld [vmem:[%s1568_s7 + $0x80] sm:$0xf] }
  0x3b   : > { %v1297_v37 = vld [vmem:[%s1568_s7 + $0x1b0] sm:$0xf0]  ;;  %730 = vmatpush.bf16.msra.mxu1 %v1312_v22  ;;  %749 = vmatpush.bf16.msra.mxu2 %v1188_v26  ;;  %v1172_v39 = vor.u32 %v1372_v33, %v1169_v35  ;;  %v1370_v41 = vld [vmem:[%s1568_s7 + $0x8c] sm:$0xf0]  ;;  %v1279_v42 = vld [vmem:[%s1568_s7 + $0x180] sm:$0xf] }
  0x3c   : > { %768 = vmatpush.bf16.msra.mxu3 %v1316_v30  ;;  %v1300_v43 = vor.u32 %v1404_v36, %v1297_v37  ;;  %v1402_v44 = vld [vmem:[%s1568_s7 + $0x18c] sm:$0xf0]  ;;  %v1368_v45 = vld [vmem:[%s1568_s7 + $0x84] sm:$0xf]  ;;  %v1153_v46 = vld [vmem:[%s1568_s7 + $0x90] sm:$0xf0]  ;;  %v1152_v49 = vor.u32 %v1370_v41, %v1151_v40 }
  0x3d   : > { %v1400_v47 = vld [vmem:[%s1568_s7 + $0x184] sm:$0xf]  ;;  %v1281_v48 = vld [vmem:[%s1568_s7 + $0x190] sm:$0xf0]  ;;  %v1280_v50 = vor.u32 %v1402_v44, %v1279_v42  ;;  %v1156_v51 = vor.u32 %v1368_v45, %v1153_v46  ;;  %v1135_v52 = vld [vmem:[%s1568_s7 + $0x60] sm:$0xf] }
  0x3e   : > { %712 = vmatpush.bf16.msra.mxu0 %v1168_v34  ;;  %v1366_v53 = vld [vmem:[%s1568_s7 + $0x6c] sm:$0xf0]  ;;  %v1263_v54 = vld [vmem:[%s1568_s7 + $0x160] sm:$0xf]  ;;  %v1284_v55 = vor.u32 %v1400_v47, %v1281_v48  ;;  %v1364_v57 = vld [vmem:[%s1568_s7 + $0x64] sm:$0xf] }
  0x3f   : > { %731 = vmatpush.bf16.msra.mxu1 %v1296_v38  ;;  %750 = vmatpush.bf16.msra.mxu2 %v1172_v39  ;;  %v1398_v56 = vld [vmem:[%s1568_s7 + $0x16c] sm:$0xf0]  ;;  %v1137_v58 = vld [vmem:[%s1568_s7 + $0x70] sm:$0xf0]  ;;  %v1396_v59 = vld [vmem:[%s1568_s7 + $0x164] sm:$0xf]  ;;  %v1136_v61 = vor.u32 %v1366_v53, %v1135_v52 }
  0x40   : > { %769 = vmatpush.bf16.msra.mxu3 %v1300_v43  ;;  %v1265_v60 = vld [vmem:[%s1568_s7 + $0x170] sm:$0xf0]  ;;  %v1264_v62 = vor.u32 %v1398_v56, %v1263_v54  ;;  %v1140_v63 = vor.u32 %v1364_v57, %v1137_v58  ;;  %v1119_v0 = vld [vmem:[%s1568_s7 + $0x40] sm:$0xf]  ;;  %v1362_v1 = vld [vmem:[%s1568_s7 + $0x4c] sm:$0xf0] }
  0x41   : > { %v1247_v2 = vld [vmem:[%s1568_s7 + $0x140] sm:$0xf]  ;;  %v1268_v3 = vor.u32 %v1396_v59, %v1265_v60  ;;  %v1394_v4 = vld [vmem:[%s1568_s7 + $0x14c] sm:$0xf0]  ;;  %v1360_v5 = vld [vmem:[%s1568_s7 + $0x44] sm:$0xf]  ;;  %v1120_v9 = vor.u32 %v1362_v1, %v1119_v0 }
  0x42   : > { %713 = vmatpush.bf16.msra.mxu0 %v1152_v49  ;;  %v1121_v6 = vld [vmem:[%s1568_s7 + $0x50] sm:$0xf0]  ;;  %v1392_v7 = vld [vmem:[%s1568_s7 + $0x144] sm:$0xf]  ;;  %v1248_v10 = vor.u32 %v1394_v4, %v1247_v2  ;;  %v1103_v12 = vld [vmem:[%s1568_s7 + $0x20] sm:$0xf] }
  0x43   : > { %732 = vmatpush.bf16.msra.mxu1 %v1280_v50  ;;  %751 = vmatpush.bf16.msra.mxu2 %v1156_v51  ;;  %v1249_v8 = vld [vmem:[%s1568_s7 + $0x150] sm:$0xf0]  ;;  %v1124_v11 = vor.u32 %v1360_v5, %v1121_v6  ;;  %v1358_v13 = vld [vmem:[%s1568_s7 + $0x2c] sm:$0xf0]  ;;  %v1231_v14 = vld [vmem:[%s1568_s7 + $0x120] sm:$0xf] }
  0x44   : > { %770 = vmatpush.bf16.msra.mxu3 %v1284_v55  ;;  %v1252_v15 = vor.u32 %v1392_v7, %v1249_v8  ;;  %v1390_v16 = vld [vmem:[%s1568_s7 + $0x12c] sm:$0xf0]  ;;  %v1356_v17 = vld [vmem:[%s1568_s7 + $0x24] sm:$0xf]  ;;  %v1105_v18 = vld [vmem:[%s1568_s7 + $0x30] sm:$0xf0]  ;;  %v1104_v21 = vor.u32 %v1358_v13, %v1103_v12 }
  0x45   : > { %v1388_v19 = vld [vmem:[%s1568_s7 + $0x124] sm:$0xf]  ;;  %v1233_v20 = vld [vmem:[%s1568_s7 + $0x130] sm:$0xf0]  ;;  %v1087_v22 = vld [vmem:[%s1568_s7] sm:$0xf]  ;;  %v1232_v24 = vor.u32 %v1390_v16, %v1231_v14  ;;  %v1108_v25 = vor.u32 %v1356_v17, %v1105_v18 }
  0x46   : > { %714 = vmatpush.bf16.msra.mxu0 %v1136_v61  ;;  %v1354_v23 = vld [vmem:[%s1568_s7 + $0xc] sm:$0xf0]  ;;  %v1215_v26 = vld [vmem:[%s1568_s7 + $0x100] sm:$0xf]  ;;  %v1352_v28 = vld [vmem:[%s1568_s7 + $0x4] sm:$0xf]  ;;  %v1236_v29 = vor.u32 %v1388_v19, %v1233_v20 }
  0x47   : > { %733 = vmatpush.bf16.msra.mxu1 %v1264_v62  ;;  %752 = vmatpush.bf16.msra.mxu2 %v1140_v63  ;;  %v1386_v27 = vld [vmem:[%s1568_s7 + $0x10c] sm:$0xf0]  ;;  %v1089_v30 = vld [vmem:[%s1568_s7 + $0x10] sm:$0xf0]  ;;  %v1384_v31 = vld [vmem:[%s1568_s7 + $0x104] sm:$0xf]  ;;  %v1088_v36 = vor.u32 %v1354_v23, %v1087_v22 }
  0x48   : > { %771 = vmatpush.bf16.msra.mxu3 %v1268_v3  ;;  %v1217_v32 = vld [vmem:[%s1568_s7 + $0x110] sm:$0xf0]  ;;  %v1071_v33 = vld [vmem:[%s1570_s8] sm:$0xf]  ;;  %v1381_v34 = vld [vmem:[%s1568_s7 + $0xec] sm:$0xf]  ;;  %v1216_v40 = vor.u32 %v1386_v27, %v1215_v26  ;;  %v1092_v41 = vor.u32 %v1352_v28, %v1089_v30 }
  0x49   : > { %v1209_v35 = vld [vmem:[%s1568_s7 + $0xf8] sm:$0xf0]  ;;  %v1349_v37 = vld [vmem:[%s1570_s8 + $0x4] sm:$0xf0]  ;;  %v1413_v38 = vld [vmem:[%s1568_s7 + $0x1ec] sm:$0xf]  ;;  %v1220_v44 = vor.u32 %v1384_v31, %v1217_v32 }
  0x4a   : > { %715 = vmatpush.bf16.msra.mxu0 %v1120_v9  ;;  %v1337_v39 = vld [vmem:[%s1568_s7 + $0x1f8] sm:$0xf0]  ;;  %v1348_v42 = vld [vmem:[%s1570_s8 + $0x4] sm:$0xf]  ;;  %v1073_v43 = vld [vmem:[%s1570_s8 + $0x8] sm:$0xf0]  ;;  %v1212_v45 = vor.u32 %v1381_v34, %v1209_v35  ;;  %v1648_v49 = vor.u32 %v1349_v37, %v1071_v33 }
  0x4b   : > { %734 = vmatpush.bf16.msra.mxu1 %v1248_v10  ;;  %753 = vmatpush.bf16.msra.mxu2 %v1124_v11  ;;  %v1207_v46 = vld [vmem:[%s1568_s7 + $0xe8] sm:$0xf]  ;;  %v1383_v47 = vld [vmem:[%s1568_s7 + $0xf4] sm:$0xf0]  ;;  %v1340_v50 = vor.u32 %v1413_v38, %v1337_v39  ;;  %v1377_v52 = vld [vmem:[%s1568_s7 + $0xcc] sm:$0xf]  ;;  %v1653_v54 = vor.u32 %v1348_v42, %v1073_v43 }
  0x4c   : > { %772 = vmatpush.bf16.msra.mxu3 %v1252_v15  ;;  %v1335_v48 = vld [vmem:[%s1568_s7 + $0x1e8] sm:$0xf]  ;;  %v1415_v51 = vld [vmem:[%s1568_s7 + $0x1f4] sm:$0xf0]  ;;  %v1193_v53 = vld [vmem:[%s1568_s7 + $0xd8] sm:$0xf0]  ;;  %v1208_v57 = vor.u32 %v1383_v47, %v1207_v46 }
  0x4d   : > { %v1409_v55 = vld [vmem:[%s1568_s7 + $0x1cc] sm:$0xf]  ;;  %v1321_v56 = vld [vmem:[%s1568_s7 + $0x1d8] sm:$0xf0]  ;;  %v1336_v58 = vor.u32 %v1415_v51, %v1335_v48  ;;  %v1196_v59 = vor.u32 %v1377_v52, %v1193_v53  ;;  %v1191_v60 = vld [vmem:[%s1568_s7 + $0xc8] sm:$0xf] }
  0x4e   : > { %716 = vmatpush.bf16.msra.mxu0 %v1104_v21  ;;  %v1379_v61 = vld [vmem:[%s1568_s7 + $0xd4] sm:$0xf0]  ;;  %v1319_v62 = vld [vmem:[%s1568_s7 + $0x1c8] sm:$0xf]  ;;  %v1324_v63 = vor.u32 %v1409_v55, %v1321_v56  ;;  %v1373_v1 = vld [vmem:[%s1568_s7 + $0xac] sm:$0xf] }
  0x4f   : > { %735 = vmatpush.bf16.msra.mxu1 %v1232_v24  ;;  %754 = vmatpush.bf16.msra.mxu2 %v1108_v25  ;;  %v1411_v0 = vld [vmem:[%s1568_s7 + $0x1d4] sm:$0xf0]  ;;  %v1177_v2 = vld [vmem:[%s1568_s7 + $0xb8] sm:$0xf0]  ;;  %v1405_v3 = vld [vmem:[%s1568_s7 + $0x1ac] sm:$0xf]  ;;  %v1192_v5 = vor.u32 %v1379_v61, %v1191_v60 }
  0x50   : > { %773 = vmatpush.bf16.msra.mxu3 %v1236_v29  ;;  %v1305_v4 = vld [vmem:[%s1568_s7 + $0x1b8] sm:$0xf0]  ;;  %v1320_v6 = vor.u32 %v1411_v0, %v1319_v62  ;;  %v1180_v7 = vor.u32 %v1373_v1, %v1177_v2  ;;  %v1175_v8 = vld [vmem:[%s1568_s7 + $0xa8] sm:$0xf]  ;;  %v1375_v9 = vld [vmem:[%s1568_s7 + $0xb4] sm:$0xf0] }
  0x51   : > { %v1303_v10 = vld [vmem:[%s1568_s7 + $0x1a8] sm:$0xf]  ;;  %v1308_v11 = vor.u32 %v1405_v3, %v1305_v4  ;;  %v1407_v12 = vld [vmem:[%s1568_s7 + $0x1b4] sm:$0xf0]  ;;  %v1369_v13 = vld [vmem:[%s1568_s7 + $0x8c] sm:$0xf]  ;;  %v1176_v17 = vor.u32 %v1375_v9, %v1175_v8 }
  0x52   : > { %717 = vmatpush.bf16.msra.mxu0 %v1088_v36  ;;  %v1161_v14 = vld [vmem:[%s1568_s7 + $0x98] sm:$0xf0]  ;;  %v1401_v15 = vld [vmem:[%s1568_s7 + $0x18c] sm:$0xf]  ;;  %v1159_v18 = vld [vmem:[%s1568_s7 + $0x88] sm:$0xf]  ;;  %v1304_v19 = vor.u32 %v1407_v12, %v1303_v10 }
  0x53   : > { %736 = vmatpush.bf16.msra.mxu1 %v1216_v40  ;;  %755 = vmatpush.bf16.msra.mxu2 %v1092_v41  ;;  %v1289_v16 = vld [vmem:[%s1568_s7 + $0x198] sm:$0xf0]  ;;  %v1164_v20 = vor.u32 %v1369_v13, %v1161_v14  ;;  %v1371_v21 = vld [vmem:[%s1568_s7 + $0x94] sm:$0xf0]  ;;  %v1287_v22 = vld [vmem:[%s1568_s7 + $0x188] sm:$0xf] }
  0x54   : > { %774 = vmatpush.bf16.msra.mxu3 %v1220_v44  ;;  %v1403_v23 = vld [vmem:[%s1568_s7 + $0x194] sm:$0xf0]  ;;  %v1292_v24 = vor.u32 %v1401_v15, %v1289_v16  ;;  %v1079_v25 = vld [vmem:[%s1570_s8 + $0x10] sm:$0xf]  ;;  %v1365_v26 = vld [vmem:[%s1568_s7 + $0x6c] sm:$0xf]  ;;  %v1160_v31 = vor.u32 %v1371_v21, %v1159_v18 }
  0x55   : > { %718 = vmatmul.bf16.vlgmr.msra.gmra.mxu0 %v1648_v49  ;;  %v1145_v27 = vld [vmem:[%s1568_s7 + $0x78] sm:$0xf0]  ;;  %v1351_v28 = vld [vmem:[%s1570_s8 + $0x14] sm:$0xf0]  ;;  %v1397_v29 = vld [vmem:[%s1568_s7 + $0x16c] sm:$0xf]  ;;  %v1288_v34 = vor.u32 %v1403_v23, %v1287_v22 }
  0x56   : > { %737 = vmatmul.bf16.vlgmr.msra.gmra.mxu1 %v1653_v54  ;;  %756 = vmatmul.bf16.vlgmr.msra.gmra.mxu2 %v1648_v49  ;;  %v1273_v30 = vld [vmem:[%s1568_s7 + $0x178] sm:$0xf0]  ;;  %v1350_v32 = vld [vmem:[%s1570_s8 + $0x14] sm:$0xf]  ;;  %v1148_v35 = vor.u32 %v1365_v26, %v1145_v27  ;;  %v1143_v36 = vld [vmem:[%s1568_s7 + $0x68] sm:$0xf]  ;;  %v1692_v39 = vor.u32 %v1351_v28, %v1079_v25 }
  0x57   : > { %824 = vmatpush.bf16.msrb.mxu2 %v1212_v45  ;;  %775 = vmatmul.bf16.vlgmr.msra.gmra.mxu3 %v1653_v54  ;;  %v1081_v33 = vld [vmem:[%s1570_s8 + $0x18] sm:$0xf0]  ;;  %v1367_v37 = vld [vmem:[%s1568_s7 + $0x74] sm:$0xf0]  ;;  %v1271_v38 = vld [vmem:[%s1568_s7 + $0x168] sm:$0xf]  ;;  %v1276_v40 = vor.u32 %v1397_v29, %v1273_v30 }
  0x58   : > { %843 = vmatpush.bf16.msrb.mxu3 %v1340_v50  ;;  %786 = vmatpush.bf16.msrb.mxu0 %v1208_v57  ;;  %v1399_v41 = vld [vmem:[%s1568_s7 + $0x174] sm:$0xf0]  ;;  %v1361_v42 = vld [vmem:[%s1568_s7 + $0x4c] sm:$0xf]  ;;  %v1129_v43 = vld [vmem:[%s1568_s7 + $0x58] sm:$0xf0]  ;;  %v1697_v44 = vor.u32 %v1350_v32, %v1081_v33  ;;  %v1144_v47 = vor.u32 %v1367_v37, %v1143_v36 }
  0x59   : > { %805 = vmatpush.bf16.msrb.mxu1 %v1336_v58  ;;  %v1393_v45 = vld [vmem:[%s1568_s7 + $0x14c] sm:$0xf]  ;;  %v1257_v46 = vld [vmem:[%s1568_s7 + $0x158] sm:$0xf0]  ;;  %v1272_v48 = vor.u32 %v1399_v41, %v1271_v38  ;;  %v1132_v50 = vor.u32 %v1361_v42, %v1129_v43  ;;  %v1127_v51 = vld [vmem:[%s1568_s7 + $0x48] sm:$0xf] }
  0x5a   : > { %v1363_v52 = vld [vmem:[%s1568_s7 + $0x54] sm:$0xf0]  ;;  %v1255_v53 = vld [vmem:[%s1568_s7 + $0x148] sm:$0xf]  ;;  %v1260_v55 = vor.u32 %v1393_v45, %v1257_v46  ;;  %v1357_v57 = vld [vmem:[%s1568_s7 + $0x2c] sm:$0xf] }
  0x5b   : > { %825 = vmatpush.bf16.msrb.mxu2 %v1196_v59  ;;  %v1395_v56 = vld [vmem:[%s1568_s7 + $0x154] sm:$0xf0]  ;;  %v1113_v58 = vld [vmem:[%s1568_s7 + $0x38] sm:$0xf0]  ;;  %v1389_v59 = vld [vmem:[%s1568_s7 + $0x12c] sm:$0xf]  ;;  %v1128_v61 = vor.u32 %v1363_v52, %v1127_v51 }
  0x5c   : > { %844 = vmatpush.bf16.msrb.mxu3 %v1324_v63  ;;  %787 = vmatpush.bf16.msrb.mxu0 %v1192_v5  ;;  %v1241_v60 = vld [vmem:[%s1568_s7 + $0x138] sm:$0xf0]  ;;  %v1256_v62 = vor.u32 %v1395_v56, %v1255_v53  ;;  %v1116_v63 = vor.u32 %v1357_v57, %v1113_v58  ;;  %v1111_v0 = vld [vmem:[%s1568_s7 + $0x28] sm:$0xf]  ;;  %v1359_v1 = vld [vmem:[%s1568_s7 + $0x34] sm:$0xf0] }
  0x5d   : > { %806 = vmatpush.bf16.msrb.mxu1 %v1320_v6  ;;  %v1239_v2 = vld [vmem:[%s1568_s7 + $0x128] sm:$0xf]  ;;  %v1244_v3 = vor.u32 %v1389_v59, %v1241_v60  ;;  %v1391_v4 = vld [vmem:[%s1568_s7 + $0x134] sm:$0xf0]  ;;  %v1353_v5 = vld [vmem:[%s1568_s7 + $0xc] sm:$0xf]  ;;  %v1112_v9 = vor.u32 %v1359_v1, %v1111_v0 }
  0x5e   : > { %v1097_v6 = vld [vmem:[%s1568_s7 + $0x18] sm:$0xf0]  ;;  %v1240_v10 = vor.u32 %v1391_v4, %v1239_v2  ;;  %v1095_v12 = vld [vmem:[%s1568_s7 + $0x8] sm:$0xf]  ;;  %v1355_v13 = vld [vmem:[%s1568_s7 + $0x14] sm:$0xf0] }
  0x5f   : > { %826 = vmatpush.bf16.msrb.mxu2 %v1180_v7  ;;  %v1385_v7 = vld [vmem:[%s1568_s7 + $0x10c] sm:$0xf]  ;;  %v1225_v8 = vld [vmem:[%s1568_s7 + $0x118] sm:$0xf0]  ;;  %v1223_v15 = vld [vmem:[%s1568_s7 + $0x108] sm:$0xf] }
  0x60   : > { %845 = vmatpush.bf16.msrb.mxu3 %v1308_v11  ;;  %788 = vmatpush.bf16.msrb.mxu0 %v1176_v17  ;;  %v1100_v11 = vor.u32 %v1353_v5, %v1097_v6  ;;  %v1228_v14 = vor.u32 %v1385_v7, %v1225_v8  ;;  %v1387_v16 = vld [vmem:[%s1568_s7 + $0x114] sm:$0xf0]  ;;  %v1096_v17 = vor.u32 %v1355_v13, %v1095_v12  ;;  %v291_v33 = vld [vmem:[#allocation2 + $0x68] sm:$0xff]  ;;  %v294_v37 = vld [vmem:[#allocation2 + $0x40] sm:$0xff]  ;;  %p1341_p11 = scmp.ne.s32.totalorder %s1487_s14, 8 }
  0x61   : > { %807 = vmatpush.bf16.msrb.mxu1 %v1304_v19  ;;  %v1224_v18 = vor.u32 %v1387_v16, %v1223_v15  ;;  %v295_v43 = vld [vmem:[#allocation2 + $0x20] sm:$0xff]  ;;  %v288_v59 = vld [vmem:[#allocation2 + $0x58] sm:$0xff]  ;;  %v292_v5 = vld [vmem:[#allocation2 + $0x8] sm:$0xff] }
  0x62   : > { %v289_v1 = vld [vmem:[#allocation2 + $0x18] sm:$0xff]  ;;  %v296_v15 = vld [vmem:[#allocation2 + $0x10] sm:$0xff] }
  0x63   : > { %827 = vmatpush.bf16.msrb.mxu2 %v1164_v20  ;;  %v286_v20 = vld [vmem:[#allocation2 + $0x30] sm:$0xff] }
  0x64   : > { %846 = vmatpush.bf16.msrb.mxu3 %v1292_v24  ;;  %789 = vmatpush.bf16.msrb.mxu0 %v1160_v31 }
  0x65   : > { %808 = vmatpush.bf16.msrb.mxu1 %v1288_v34  ;;  %723 = vmatmul.bf16.gmra.mxu0 %v1692_v39 }
  0x66   : > { %742 = vmatmul.bf16.gmra.mxu1 %v1697_v44  ;;  %761 = vmatmul.bf16.gmra.mxu2 %v1692_v39 }
  0x67   : > { %828 = vmatpush.bf16.msrb.mxu2 %v1148_v35  ;;  %780 = vmatmul.bf16.gmra.mxu3 %v1697_v44 }
  0x68   : > { %847 = vmatpush.bf16.msrb.mxu3 %v1276_v40  ;;  %790 = vmatpush.bf16.msrb.mxu0 %v1144_v47  ;;  %v298_v47 = vld [vmem:[#allocation2 + $0x60] sm:$0xff] }
  0x69   : > { %809 = vmatpush.bf16.msrb.mxu1 %v1272_v48 }
  0x6b   : > { %829 = vmatpush.bf16.msrb.mxu2 %v1132_v50 }
  0x6c   : > { %848 = vmatpush.bf16.msrb.mxu3 %v1260_v55  ;;  %791 = vmatpush.bf16.msrb.mxu0 %v1128_v61  ;;  %v299_v55 = vld [vmem:[#allocation2 + $0x70] sm:$0xff] }
  0x6d   : > { %810 = vmatpush.bf16.msrb.mxu1 %v1256_v62 }
  0x6f   : > { %830 = vmatpush.bf16.msrb.mxu2 %v1116_v63 }
  0x70   : > { %849 = vmatpush.bf16.msrb.mxu3 %v1244_v3  ;;  %792 = vmatpush.bf16.msrb.mxu0 %v1112_v9 }
  0x71   : > { %811 = vmatpush.bf16.msrb.mxu1 %v1240_v10 }
  0x73   : > { %831 = vmatpush.bf16.msrb.mxu2 %v1100_v11  ;;  %v293_v11 = vld [vmem:[#allocation2 + $0x48] sm:$0xff] }
  0x74   : > { %850 = vmatpush.bf16.msrb.mxu3 %v1228_v14  ;;  %793 = vmatpush.bf16.msrb.mxu0 %v1096_v17 }
  0x75   : > { %812 = vmatpush.bf16.msrb.mxu1 %v1224_v18 }
  0x76   : > { %832 = vmatmul.bf16.vlgmr.msrb.gmra.mxu2 %v1648_v49 }
  0x77   : > { %794 = vmatmul.bf16.vlgmr.msrb.gmra.mxu0 %v1648_v49  ;;  %851 = vmatmul.bf16.vlgmr.msrb.gmra.mxu3 %v1653_v54  ;;  %v287_v49 = vld [vmem:[#allocation2] sm:$0xff] }
  0x78   : > { %813 = vmatmul.bf16.vlgmr.msrb.gmra.mxu1 %v1653_v54  ;;  %v290_v54 = vld [vmem:[#allocation2 + $0x50] sm:$0xff] }
  0x86   : > { %837 = vmatmul.bf16.gmra.mxu2 %v1692_v39 }
  0x87   : > { %799 = vmatmul.bf16.gmra.mxu0 %v1692_v39  ;;  %856 = vmatmul.bf16.gmra.mxu3 %v1697_v44 }
  0x88   : > { %818 = vmatmul.bf16.gmra.mxu1 %v1697_v44 }
  0xd2   : > { %v719_v19 = vpop.f32.mrf.mxu0 }
  0xd3   : > { %v738_v21 = vpop.f32.mrf.mxu1 }
  0xd4   : > { %v739_v22 = vadd.f32 %v738_v21, %v719_v19  ;;  %v297_v21 = vld [vmem:[#allocation2 + $0x38] sm:$0xff] }
  0xd6   : > { %v862_v23 = vadd.f32 %v739_v22, %v286_v20 }
  0xd8   : > { %878 = vst [vmem:[#allocation2 + $0x30] sm:$0xff] %v862_v23 }
  0xd9   : > { %v757_v24 = vpop.f32.mrf.mxu2 }
  0xda   : > { %v776_v25 = vpop.f32.mrf.mxu3  ;;  %v721_v26 = vpop.f32.mrf.mxu0 }
  0xdb   : > { %v777_v27 = vadd.f32 %v776_v25, %v757_v24  ;;  %v740_v28 = vpop.f32.mrf.mxu1 }
  0xdc   : > { %v741_v29 = vadd.f32 %v740_v28, %v721_v26 }
  0xdd   : > { %v863_v30 = vadd.f32 %v777_v27, %v287_v49  ;;  %v300_v49 = vld [vmem:[#allocation2 + $0x78] sm:$0xff] }
  0xde   : > { %v866_v31 = vadd.f32 %v741_v29, %v290_v54  ;;  %v301_v29 = vld [vmem:[#allocation2 + $0x28] sm:$0xff] }
  0xdf   : > { %879 = vst [vmem:[#allocation2] sm:$0xff] %v863_v30 }
  0xe0   : > { %882 = vst [vmem:[#allocation2 + $0x50] sm:$0xff] %v866_v31 }
  0xe1   : > { %v759_v32 = vpop.f32.mrf.mxu2 }
  0xe2   : > { %v778_v34 = vpop.f32.mrf.mxu3  ;;  %v724_v35 = vpop.f32.mrf.mxu0 }
  0xe3   : > { %v779_v36 = vadd.f32 %v778_v34, %v759_v32  ;;  %v743_v38 = vpop.f32.mrf.mxu1 }
  0xe4   : > { %v744_v39 = vadd.f32 %v743_v38, %v724_v35 }
  0xe5   : > { %v867_v40 = vadd.f32 %v779_v36, %v291_v33 }
  0xe6   : > { %v870_v41 = vadd.f32 %v744_v39, %v294_v37 }
  0xe7   : > { %883 = vst [vmem:[#allocation2 + $0x68] sm:$0xff] %v867_v40 }
  0xe8   : > { %886 = vst [vmem:[#allocation2 + $0x40] sm:$0xff] %v870_v41 }
  0xe9   : > { %v762_v42 = vpop.f32.mrf.mxu2 }
  0xea   : > { %v781_v44 = vpop.f32.mrf.mxu3  ;;  %v726_v45 = vpop.f32.mrf.mxu0 }
  0xeb   : > { %v782_v46 = vadd.f32 %v781_v44, %v762_v42  ;;  %v745_v48 = vpop.f32.mrf.mxu1 }
  0xec   : > { %v746_v50 = vadd.f32 %v745_v48, %v726_v45 }
  0xed   : > { %v871_v51 = vadd.f32 %v782_v46, %v295_v43 }
  0xee   : > { %v874_v52 = vadd.f32 %v746_v50, %v298_v47 }
  0xef   : > { %887 = vst [vmem:[#allocation2 + $0x20] sm:$0xff] %v871_v51 }
  0xf0   : > { %890 = vst [vmem:[#allocation2 + $0x60] sm:$0xff] %v874_v52 }
  0xf1   : > { %v764_v53 = vpop.f32.mrf.mxu2 }
  0xf2   : > { %v783_v56 = vpop.f32.mrf.mxu3 }
  0xf3   : > { %v784_v57 = vadd.f32 %v783_v56, %v764_v53 }
  0xf4   : > { %v795_v58 = vpop.f32.mrf.mxu0 }
  0xf5   : > { %v814_v60 = vpop.f32.mrf.mxu1  ;;  %v875_v61 = vadd.f32 %v784_v57, %v299_v55 }
  0xf6   : > { %v815_v62 = vadd.f32 %v814_v60, %v795_v58 }
  0xf7   : > { %891 = vst [vmem:[#allocation2 + $0x70] sm:$0xff] %v875_v61 }
  0xf8   : > { %v864_v63 = vadd.f32 %v815_v62, %v288_v59 }
  0xf9   : > { %v833_v0 = vpop.f32.mrf.mxu2 }
  0xfa   : > { %880 = vst [vmem:[#allocation2 + $0x58] sm:$0xff] %v864_v63  ;;  %v852_v2 = vpop.f32.mrf.mxu3 }
  0xfb   : > { %v853_v3 = vadd.f32 %v852_v2, %v833_v0 }
  0xfc   : > { %v797_v4 = vpop.f32.mrf.mxu0 }
  0xfd   : > { %v816_v6 = vpop.f32.mrf.mxu1  ;;  %v865_v7 = vadd.f32 %v853_v3, %v289_v1 }
  0xfe   : > { %v817_v8 = vadd.f32 %v816_v6, %v797_v4 }
  0xff   : > { %881 = vst [vmem:[#allocation2 + $0x18] sm:$0xff] %v865_v7 }
 0x100   : > { %v868_v9 = vadd.f32 %v817_v8, %v292_v5 }
 0x101   : > { %v835_v10 = vpop.f32.mrf.mxu2 }
 0x102   : > { %884 = vst [vmem:[#allocation2 + $0x8] sm:$0xff] %v868_v9  ;;  %v854_v12 = vpop.f32.mrf.mxu3 }
 0x103   : > { %v855_v13 = vadd.f32 %v854_v12, %v835_v10 }
 0x104   : > { %v800_v14 = vpop.f32.mrf.mxu0 }
 0x105   : > { %v819_v16 = vpop.f32.mrf.mxu1  ;;  %v869_v17 = vadd.f32 %v855_v13, %v293_v11 }
 0x106   : > { %v820_v18 = vadd.f32 %v819_v16, %v800_v14 }
 0x107   : > { %885 = vst [vmem:[#allocation2 + $0x48] sm:$0xff] %v869_v17 }
 0x108   : > { %v872_v19 = vadd.f32 %v820_v18, %v296_v15 }
 0x109   : > { %v838_v20 = vpop.f32.mrf.mxu2 }
 0x10a   : > { %888 = vst [vmem:[#allocation2 + $0x10] sm:$0xff] %v872_v19  ;;  %v857_v22 = vpop.f32.mrf.mxu3 }
 0x10b   : > { %v858_v23 = vadd.f32 %v857_v22, %v838_v20 }
 0x10c   : > { %v802_v24 = vpop.f32.mrf.mxu0 }
 0x10d   : > { %v821_v25 = vpop.f32.mrf.mxu1  ;;  %v873_v26 = vadd.f32 %v858_v23, %v297_v21 }
 0x10e   : > { %v822_v27 = vadd.f32 %v821_v25, %v802_v24 }
 0x10f   : > { %889 = vst [vmem:[#allocation2 + $0x38] sm:$0xff] %v873_v26 }
 0x110   : > { %v876_v54 = vadd.f32 %v822_v27, %v300_v49 }
 0x111   : > { %v840_v28 = vpop.f32.mrf.mxu2 }
 0x112   : > { %892 = vst [vmem:[#allocation2 + $0x78] sm:$0xff] %v876_v54  ;;  %v859_v30 = vpop.f32.mrf.mxu3 }
 0x113   : > { %v860_v31 = vadd.f32 %v859_v30, %v840_v28  ;;  %897 = sbr.rel (%p1341_p11) target bundleno = 303 (0x12f), region = 78 }
 0x115   : > { %v877_v32 = vadd.f32 %v860_v31, %v301_v29 }
 0x117   : > { %893 = vst [vmem:[#allocation2 + $0x28] sm:$0xff] %v877_v32 }
 0x118   : > { %v898_v33 = vld [vmem:[#allocation2 + $0x30] sm:$0xff]  ;;  %v914_v34 = vld [vmem:[%s1802_s2] sm:$0xf]  ;;  %v900_v38 = vld [vmem:[#allocation2 + $0x58] sm:$0xff] }
 0x119   : > { %v899_v35 = vld [vmem:[#allocation2] sm:$0xff]  ;;  %v916_v36 = vperm.slane %v914_v34, 0  ;;  %v917_v37 = vperm.slane %v914_v34, 1  ;;  %v918_v39 = vperm.slane %v914_v34, 2  ;;  %v901_v40 = vld [vmem:[#allocation2 + $0x18] sm:$0xff]  ;;  %v919_v41 = vperm.slane %v914_v34, 3 }
 0x11a   : > { %v902_v42 = vld [vmem:[#allocation2 + $0x50] sm:$0xff]  ;;  %v903_v43 = vld [vmem:[#allocation2 + $0x68] sm:$0xff]  ;;  %v906_v53 = vld [vmem:[#allocation2 + $0x40] sm:$0xff] }
 0x11b   : > { %v904_v44 = vld [vmem:[#allocation2 + $0x8] sm:$0xff]  ;;  %v924_v45 = vadd.f32 %v916_v36, %v898_v33  ;;  %v925_v46 = vadd.f32 %v917_v37, %v899_v35  ;;  %v926_v47 = vadd.f32 %v918_v39, %v900_v38  ;;  %v927_v48 = vadd.f32 %v919_v41, %v901_v40  ;;  %v907_v59 = vld [vmem:[#allocation2 + $0x20] sm:$0xff]  ;;  %v908_v62 = vld [vmem:[#allocation2 + $0x10] sm:$0xff] }
 0x11c   : > { %v905_v50 = vld [vmem:[#allocation2 + $0x48] sm:$0xff]  ;;  %v928_v51 = vadd.f32 %v916_v36, %v902_v42  ;;  %v929_v52 = vadd.f32 %v917_v37, %v903_v43  ;;  %v930_v58 = vadd.f32 %v918_v39, %v904_v44  ;;  %v932_v0 = vadd.f32 %v916_v36, %v906_v53  ;;  %v909_v1 = vld [vmem:[#allocation2 + $0x38] sm:$0xff]  ;;  %v910_v4 = vld [vmem:[#allocation2 + $0x60] sm:$0xff] }
 0x11d   : > { %v940_v55 = vmax.f32 %v924_v45, 0.0  ;;  %v941_v56 = vmax.f32 %v925_v46, 0.0  ;;  %v942_v57 = vmax.f32 %v926_v47, 0.0  ;;  %v943_v60 = vmax.f32 %v927_v48, 0.0  ;;  %v911_v7 = vld [vmem:[#allocation2 + $0x70] sm:$0xff]  ;;  %v912_v10 = vld [vmem:[#allocation2 + $0x78] sm:$0xff] }
 0x11e   : > { %v931_v61 = vadd.f32 %v919_v41, %v905_v50  ;;  %v944_v63 = vmax.f32 %v928_v51, 0.0  ;;  %v945_v2 = vmax.f32 %v929_v52, 0.0  ;;  %v933_v3 = vadd.f32 %v917_v37, %v907_v59  ;;  %v913_v13 = vld [vmem:[#allocation2 + $0x28] sm:$0xff] }
 0x11f   : > { %956 = vst [vmem:[%s1803_s3] sm:$0xff] %v940_v55  ;;  %v946_v5 = vmax.f32 %v930_v58, 0.0  ;;  %v934_v6 = vadd.f32 %v918_v39, %v908_v62  ;;  %v935_v9 = vadd.f32 %v919_v41, %v909_v1  ;;  %v948_v11 = vmax.f32 %v932_v0, 0.0 }
 0x120   : > { %957 = vst [vmem:[%s1803_s3 + $0x8] sm:$0xff] %v941_v56  ;;  %v947_v8 = vmax.f32 %v931_v61, 0.0  ;;  %v936_v12 = vadd.f32 %v916_v36, %v910_v4  ;;  %v949_v14 = vmax.f32 %v933_v3, 0.0  ;;  %v937_v15 = vadd.f32 %v917_v37, %v911_v7 }
 0x121   : > { %958 = vst [vmem:[%s1803_s3 + $0x10] sm:$0xff] %v942_v57  ;;  %v950_v16 = vmax.f32 %v934_v6, 0.0  ;;  %v938_v17 = vadd.f32 %v918_v39, %v912_v10  ;;  %v951_v18 = vmax.f32 %v935_v9, 0.0  ;;  %v939_v19 = vadd.f32 %v919_v41, %v913_v13 }
 0x122   : > { %959 = vst [vmem:[%s1803_s3 + $0x18] sm:$0xff] %v943_v60  ;;  %v952_v20 = vmax.f32 %v936_v12, 0.0  ;;  %v953_v21 = vmax.f32 %v937_v15, 0.0 }
 0x123   : > { %960 = vst [vmem:[%s1803_s3 + $0x20] sm:$0xff] %v944_v63  ;;  %v954_v22 = vmax.f32 %v938_v17, 0.0  ;;  %v955_v23 = vmax.f32 %v939_v19, 0.0 }
 0x124   : > { %961 = vst [vmem:[%s1803_s3 + $0x28] sm:$0xff] %v945_v2 }
 0x125   : > { %962 = vst [vmem:[%s1803_s3 + $0x30] sm:$0xff] %v946_v5 }
 0x126   : > { %963 = vst [vmem:[%s1803_s3 + $0x38] sm:$0xff] %v947_v8 }
 0x127   : > { %964 = vst [vmem:[%s1803_s3 + $0x40] sm:$0xff] %v948_v11 }
 0x128   : > { %965 = vst [vmem:[%s1803_s3 + $0x48] sm:$0xff] %v949_v14 }
 0x129   : > { %966 = vst [vmem:[%s1803_s3 + $0x50] sm:$0xff] %v950_v16 }
 0x12a   : > { %967 = vst [vmem:[%s1803_s3 + $0x58] sm:$0xff] %v951_v18 }
 0x12b   : > { %968 = vst [vmem:[%s1803_s3 + $0x60] sm:$0xff] %v952_v20 }
 0x12c   : > { %969 = vst [vmem:[%s1803_s3 + $0x68] sm:$0xff] %v953_v21 }
 0x12d   : > { %970 = vst [vmem:[%s1803_s3 + $0x70] sm:$0xff] %v954_v22 }
 0x12e   : > { %971 = vst [vmem:[%s1803_s3 + $0x78] sm:$0xff] %v955_v23 }
 0x12f PF: > { %s13_s16 = sadd.s32 1, %s1495_s16   ;;  %s1804_s12 = smov %s1483_s13 }
 0x130   : > { %p10_p12 = scmp.ge.s32.totalorder %s13_s16, 11   ;;  %s1805_s13 = smov %s1553_s20 }
 0x131   : > { %s1806_s14 = smov %s1491_s15  ;;  %s1807_s15 = smov %s1809_s17 }
 0x132   :  { %12 = sbr.rel (!%p10_p12) target bundleno = 3 (0x3), region = 116 }

// kernel: resnet_encoder_mtan_forward.36
= control target key start
LH: loop header
LB: loop body
LE: loop exit
PB: predicated region body
PF: predicated region fallthrough
CT: control target
= control target key end

     0   :  { %s1550_s1 = inlined_call_operand.vmem [shape: bf16[256,512], index: 1, kind: input, shape index: {}]   ;;  %s1551_s0 = inlined_call_operand.vmem [shape: bf16[32,256], index: 0, kind: input, shape index: {}]   ;;  %s1552_s2 = inlined_call_operand.vmem [shape: f32[1,512], index: 2, kind: input, shape index: {}]   ;;  %s1553_s3 = inlined_call_operand.vmem [shape: f32[32,512], index: 3, kind: output, shape index: {}]  }
   0x1   :  { %v837_v0 = vld [vmem:[%s1550_s1 + $0xe0] sm:$0xf]  ;;  %v1013_v1 = vld [vmem:[%s1550_s1 + $0xec] sm:$0xf0]  ;;  %v1011_v5 = vld [vmem:[%s1550_s1 + $0xe4] sm:$0xf] }
   0x2   :  { %v965_v2 = vld [vmem:[%s1550_s1 + $0x1e0] sm:$0xf]  ;;  %v838_v3 = vor.u32 %v1013_v1, %v837_v0  ;;  %v1045_v4 = vld [vmem:[%s1550_s1 + $0x1ec] sm:$0xf0]  ;;  %v839_v6 = vld [vmem:[%s1550_s1 + $0xf0] sm:$0xf0] }
   0x3   :  { %v966_v7 = vor.u32 %v1045_v4, %v965_v2  ;;  %v842_v8 = vor.u32 %v1011_v5, %v839_v6  ;;  %v1043_v9 = vld [vmem:[%s1550_s1 + $0x1e4] sm:$0xf]  ;;  %v967_v10 = vld [vmem:[%s1550_s1 + $0x1f0] sm:$0xf0]  ;;  %v821_v11 = vld [vmem:[%s1550_s1 + $0xc0] sm:$0xf] }
   0x4   :  { %458 = vmatpush.bf16.msra.mxu0 %v838_v3  ;;  %v970_v12 = vor.u32 %v1043_v9, %v967_v10  ;;  %v1009_v13 = vld [vmem:[%s1550_s1 + $0xcc] sm:$0xf0]  ;;  %v949_v14 = vld [vmem:[%s1550_s1 + $0x1c0] sm:$0xf]  ;;  %v1007_v18 = vld [vmem:[%s1550_s1 + $0xc4] sm:$0xf] }
   0x5   :  { %v1041_v15 = vld [vmem:[%s1550_s1 + $0x1cc] sm:$0xf0]  ;;  %477 = vmatpush.bf16.msra.mxu1 %v966_v7  ;;  %496 = vmatpush.bf16.msra.mxu2 %v842_v8  ;;  %v822_v16 = vor.u32 %v1009_v13, %v821_v11  ;;  %v823_v19 = vld [vmem:[%s1550_s1 + $0xd0] sm:$0xf0]  ;;  %v1039_v20 = vld [vmem:[%s1550_s1 + $0x1c4] sm:$0xf] }
   0x6   :  { %v950_v17 = vor.u32 %v1041_v15, %v949_v14  ;;  %515 = vmatpush.bf16.msra.mxu3 %v970_v12  ;;  %v826_v21 = vor.u32 %v1007_v18, %v823_v19  ;;  %v951_v22 = vld [vmem:[%s1550_s1 + $0x1d0] sm:$0xf0]  ;;  %v805_v23 = vld [vmem:[%s1550_s1 + $0xa0] sm:$0xf]  ;;  %v1005_v24 = vld [vmem:[%s1550_s1 + $0xac] sm:$0xf0] }
   0x7   :  { %v954_v25 = vor.u32 %v1039_v20, %v951_v22  ;;  %v933_v26 = vld [vmem:[%s1550_s1 + $0x1a0] sm:$0xf]  ;;  %v1037_v27 = vld [vmem:[%s1550_s1 + $0x1ac] sm:$0xf0]  ;;  %v1003_v28 = vld [vmem:[%s1550_s1 + $0xa4] sm:$0xf]  ;;  %v806_v29 = vor.u32 %v1005_v24, %v805_v23 }
   0x8   :  { %459 = vmatpush.bf16.msra.mxu0 %v822_v16  ;;  %v807_v30 = vld [vmem:[%s1550_s1 + $0xb0] sm:$0xf0]  ;;  %v1035_v31 = vld [vmem:[%s1550_s1 + $0x1a4] sm:$0xf]  ;;  %v934_v33 = vor.u32 %v1037_v27, %v933_v26  ;;  %v789_v35 = vld [vmem:[%s1550_s1 + $0x80] sm:$0xf] }
   0x9   :  { %v935_v32 = vld [vmem:[%s1550_s1 + $0x1b0] sm:$0xf0]  ;;  %478 = vmatpush.bf16.msra.mxu1 %v950_v17  ;;  %497 = vmatpush.bf16.msra.mxu2 %v826_v21  ;;  %v810_v34 = vor.u32 %v1003_v28, %v807_v30  ;;  %v1001_v36 = vld [vmem:[%s1550_s1 + $0x8c] sm:$0xf0]  ;;  %v917_v37 = vld [vmem:[%s1550_s1 + $0x180] sm:$0xf] }
   0xa   :  { %516 = vmatpush.bf16.msra.mxu3 %v954_v25  ;;  %v938_v38 = vor.u32 %v1035_v31, %v935_v32  ;;  %v1033_v39 = vld [vmem:[%s1550_s1 + $0x18c] sm:$0xf0]  ;;  %v999_v40 = vld [vmem:[%s1550_s1 + $0x84] sm:$0xf]  ;;  %v791_v41 = vld [vmem:[%s1550_s1 + $0x90] sm:$0xf0]  ;;  %v790_v44 = vor.u32 %v1001_v36, %v789_v35 }
   0xb   :  { %v1031_v42 = vld [vmem:[%s1550_s1 + $0x184] sm:$0xf]  ;;  %v919_v43 = vld [vmem:[%s1550_s1 + $0x190] sm:$0xf0]  ;;  %v918_v45 = vor.u32 %v1033_v39, %v917_v37  ;;  %v794_v46 = vor.u32 %v999_v40, %v791_v41  ;;  %v773_v47 = vld [vmem:[%s1550_s1 + $0x60] sm:$0xf] }
   0xc   :  { %460 = vmatpush.bf16.msra.mxu0 %v806_v29  ;;  %v997_v48 = vld [vmem:[%s1550_s1 + $0x6c] sm:$0xf0]  ;;  %v901_v49 = vld [vmem:[%s1550_s1 + $0x160] sm:$0xf]  ;;  %v922_v50 = vor.u32 %v1031_v42, %v919_v43  ;;  %v995_v52 = vld [vmem:[%s1550_s1 + $0x64] sm:$0xf] }
   0xd   :  { %479 = vmatpush.bf16.msra.mxu1 %v934_v33  ;;  %498 = vmatpush.bf16.msra.mxu2 %v810_v34  ;;  %v1029_v51 = vld [vmem:[%s1550_s1 + $0x16c] sm:$0xf0]  ;;  %v775_v53 = vld [vmem:[%s1550_s1 + $0x70] sm:$0xf0]  ;;  %v1027_v54 = vld [vmem:[%s1550_s1 + $0x164] sm:$0xf]  ;;  %v774_v56 = vor.u32 %v997_v48, %v773_v47 }
   0xe   :  { %517 = vmatpush.bf16.msra.mxu3 %v938_v38  ;;  %v903_v55 = vld [vmem:[%s1550_s1 + $0x170] sm:$0xf0]  ;;  %v902_v57 = vor.u32 %v1029_v51, %v901_v49  ;;  %v778_v58 = vor.u32 %v995_v52, %v775_v53  ;;  %v757_v59 = vld [vmem:[%s1550_s1 + $0x40] sm:$0xf]  ;;  %v993_v60 = vld [vmem:[%s1550_s1 + $0x4c] sm:$0xf0] }
   0xf   :  { %v885_v61 = vld [vmem:[%s1550_s1 + $0x140] sm:$0xf]  ;;  %v906_v62 = vor.u32 %v1027_v54, %v903_v55  ;;  %v1025_v63 = vld [vmem:[%s1550_s1 + $0x14c] sm:$0xf0]  ;;  %v991_v0 = vld [vmem:[%s1550_s1 + $0x44] sm:$0xf]  ;;  %v758_v4 = vor.u32 %v993_v60, %v757_v59 }
  0x10   :  { %461 = vmatpush.bf16.msra.mxu0 %v790_v44  ;;  %v759_v1 = vld [vmem:[%s1550_s1 + $0x50] sm:$0xf0]  ;;  %v1023_v2 = vld [vmem:[%s1550_s1 + $0x144] sm:$0xf]  ;;  %v886_v5 = vor.u32 %v1025_v63, %v885_v61  ;;  %v741_v7 = vld [vmem:[%s1550_s1 + $0x20] sm:$0xf] }
  0x11   :  { %480 = vmatpush.bf16.msra.mxu1 %v918_v45  ;;  %499 = vmatpush.bf16.msra.mxu2 %v794_v46  ;;  %v887_v3 = vld [vmem:[%s1550_s1 + $0x150] sm:$0xf0]  ;;  %v762_v6 = vor.u32 %v991_v0, %v759_v1  ;;  %v989_v8 = vld [vmem:[%s1550_s1 + $0x2c] sm:$0xf0]  ;;  %v869_v9 = vld [vmem:[%s1550_s1 + $0x120] sm:$0xf] }
  0x12   :  { %518 = vmatpush.bf16.msra.mxu3 %v922_v50  ;;  %v890_v10 = vor.u32 %v1023_v2, %v887_v3  ;;  %v1021_v11 = vld [vmem:[%s1550_s1 + $0x12c] sm:$0xf0]  ;;  %v987_v12 = vld [vmem:[%s1550_s1 + $0x24] sm:$0xf]  ;;  %v743_v13 = vld [vmem:[%s1550_s1 + $0x30] sm:$0xf0]  ;;  %v742_v16 = vor.u32 %v989_v8, %v741_v7 }
  0x13   :  { %v1019_v14 = vld [vmem:[%s1550_s1 + $0x124] sm:$0xf]  ;;  %v871_v15 = vld [vmem:[%s1550_s1 + $0x130] sm:$0xf0]  ;;  %v725_v17 = vld [vmem:[%s1550_s1] sm:$0xf]  ;;  %v870_v19 = vor.u32 %v1021_v11, %v869_v9  ;;  %v746_v20 = vor.u32 %v987_v12, %v743_v13 }
  0x14   :  { %462 = vmatpush.bf16.msra.mxu0 %v774_v56  ;;  %v985_v18 = vld [vmem:[%s1550_s1 + $0xc] sm:$0xf0]  ;;  %v853_v21 = vld [vmem:[%s1550_s1 + $0x100] sm:$0xf]  ;;  %v983_v23 = vld [vmem:[%s1550_s1 + $0x4] sm:$0xf]  ;;  %v874_v24 = vor.u32 %v1019_v14, %v871_v15 }
  0x15   :  { %481 = vmatpush.bf16.msra.mxu1 %v902_v57  ;;  %500 = vmatpush.bf16.msra.mxu2 %v778_v58  ;;  %v1017_v22 = vld [vmem:[%s1550_s1 + $0x10c] sm:$0xf0]  ;;  %v727_v25 = vld [vmem:[%s1550_s1 + $0x10] sm:$0xf0]  ;;  %v1015_v26 = vld [vmem:[%s1550_s1 + $0x104] sm:$0xf]  ;;  %v726_v31 = vor.u32 %v985_v18, %v725_v17 }
  0x16   :  { %519 = vmatpush.bf16.msra.mxu3 %v906_v62  ;;  %v855_v27 = vld [vmem:[%s1550_s1 + $0x110] sm:$0xf0]  ;;  %v709_v28 = vld [vmem:[%s1551_s0] sm:$0xf]  ;;  %v1012_v29 = vld [vmem:[%s1550_s1 + $0xec] sm:$0xf]  ;;  %v854_v35 = vor.u32 %v1017_v22, %v853_v21  ;;  %v730_v36 = vor.u32 %v983_v23, %v727_v25 }
  0x17   :  { %v847_v30 = vld [vmem:[%s1550_s1 + $0xf8] sm:$0xf0]  ;;  %v980_v32 = vld [vmem:[%s1551_s0 + $0x4] sm:$0xf0]  ;;  %v1044_v33 = vld [vmem:[%s1550_s1 + $0x1ec] sm:$0xf]  ;;  %v858_v39 = vor.u32 %v1015_v26, %v855_v27 }
  0x18   :  { %463 = vmatpush.bf16.msra.mxu0 %v758_v4  ;;  %v975_v34 = vld [vmem:[%s1550_s1 + $0x1f8] sm:$0xf0]  ;;  %v979_v37 = vld [vmem:[%s1551_s0 + $0x4] sm:$0xf]  ;;  %v711_v38 = vld [vmem:[%s1551_s0 + $0x8] sm:$0xf0]  ;;  %v850_v40 = vor.u32 %v1012_v29, %v847_v30  ;;  %v1292_v44 = vor.u32 %v980_v32, %v709_v28 }
  0x19   :  { %482 = vmatpush.bf16.msra.mxu1 %v886_v5  ;;  %501 = vmatpush.bf16.msra.mxu2 %v762_v6  ;;  %v845_v41 = vld [vmem:[%s1550_s1 + $0xe8] sm:$0xf]  ;;  %v1014_v42 = vld [vmem:[%s1550_s1 + $0xf4] sm:$0xf0]  ;;  %v978_v45 = vor.u32 %v1044_v33, %v975_v34  ;;  %v1008_v47 = vld [vmem:[%s1550_s1 + $0xcc] sm:$0xf]  ;;  %v1303_v49 = vor.u32 %v979_v37, %v711_v38 }
  0x1a   :  { %520 = vmatpush.bf16.msra.mxu3 %v890_v10  ;;  %v973_v43 = vld [vmem:[%s1550_s1 + $0x1e8] sm:$0xf]  ;;  %v1046_v46 = vld [vmem:[%s1550_s1 + $0x1f4] sm:$0xf0]  ;;  %v831_v48 = vld [vmem:[%s1550_s1 + $0xd8] sm:$0xf0]  ;;  %v846_v52 = vor.u32 %v1014_v42, %v845_v41 }
  0x1b   :  { %v1040_v50 = vld [vmem:[%s1550_s1 + $0x1cc] sm:$0xf]  ;;  %v959_v51 = vld [vmem:[%s1550_s1 + $0x1d8] sm:$0xf0]  ;;  %v974_v53 = vor.u32 %v1046_v46, %v973_v43  ;;  %v834_v54 = vor.u32 %v1008_v47, %v831_v48  ;;  %v829_v55 = vld [vmem:[%s1550_s1 + $0xc8] sm:$0xf] }
  0x1c   :  { %464 = vmatpush.bf16.msra.mxu0 %v742_v16  ;;  %v1010_v56 = vld [vmem:[%s1550_s1 + $0xd4] sm:$0xf0]  ;;  %v957_v57 = vld [vmem:[%s1550_s1 + $0x1c8] sm:$0xf]  ;;  %v962_v58 = vor.u32 %v1040_v50, %v959_v51  ;;  %v1004_v60 = vld [vmem:[%s1550_s1 + $0xac] sm:$0xf] }
  0x1d   :  { %483 = vmatpush.bf16.msra.mxu1 %v870_v19  ;;  %502 = vmatpush.bf16.msra.mxu2 %v746_v20  ;;  %v1042_v59 = vld [vmem:[%s1550_s1 + $0x1d4] sm:$0xf0]  ;;  %v815_v61 = vld [vmem:[%s1550_s1 + $0xb8] sm:$0xf0]  ;;  %v1036_v62 = vld [vmem:[%s1550_s1 + $0x1ac] sm:$0xf]  ;;  %v830_v0 = vor.u32 %v1010_v56, %v829_v55 }
  0x1e   :  { %521 = vmatpush.bf16.msra.mxu3 %v874_v24  ;;  %v943_v63 = vld [vmem:[%s1550_s1 + $0x1b8] sm:$0xf0]  ;;  %v958_v1 = vor.u32 %v1042_v59, %v957_v57  ;;  %v818_v2 = vor.u32 %v1004_v60, %v815_v61  ;;  %v813_v3 = vld [vmem:[%s1550_s1 + $0xa8] sm:$0xf]  ;;  %v1006_v4 = vld [vmem:[%s1550_s1 + $0xb4] sm:$0xf0] }
  0x1f   :  { %v941_v5 = vld [vmem:[%s1550_s1 + $0x1a8] sm:$0xf]  ;;  %v946_v6 = vor.u32 %v1036_v62, %v943_v63  ;;  %v1038_v7 = vld [vmem:[%s1550_s1 + $0x1b4] sm:$0xf0]  ;;  %v1000_v8 = vld [vmem:[%s1550_s1 + $0x8c] sm:$0xf]  ;;  %v814_v12 = vor.u32 %v1006_v4, %v813_v3 }
  0x20   :  { %465 = vmatpush.bf16.msra.mxu0 %v726_v31  ;;  %v799_v9 = vld [vmem:[%s1550_s1 + $0x98] sm:$0xf0]  ;;  %v1032_v10 = vld [vmem:[%s1550_s1 + $0x18c] sm:$0xf]  ;;  %v797_v13 = vld [vmem:[%s1550_s1 + $0x88] sm:$0xf]  ;;  %v942_v14 = vor.u32 %v1038_v7, %v941_v5 }
  0x21   :  { %484 = vmatpush.bf16.msra.mxu1 %v854_v35  ;;  %503 = vmatpush.bf16.msra.mxu2 %v730_v36  ;;  %v927_v11 = vld [vmem:[%s1550_s1 + $0x198] sm:$0xf0]  ;;  %v802_v15 = vor.u32 %v1000_v8, %v799_v9  ;;  %v1002_v16 = vld [vmem:[%s1550_s1 + $0x94] sm:$0xf0]  ;;  %v925_v17 = vld [vmem:[%s1550_s1 + $0x188] sm:$0xf] }
  0x22   :  { %522 = vmatpush.bf16.msra.mxu3 %v858_v39  ;;  %v1034_v18 = vld [vmem:[%s1550_s1 + $0x194] sm:$0xf0]  ;;  %v930_v19 = vor.u32 %v1032_v10, %v927_v11  ;;  %v717_v20 = vld [vmem:[%s1551_s0 + $0x10] sm:$0xf]  ;;  %v996_v21 = vld [vmem:[%s1550_s1 + $0x6c] sm:$0xf]  ;;  %v798_v26 = vor.u32 %v1002_v16, %v797_v13 }
  0x23   :  { %466 = vmatmul.bf16.vlgmr.msra.gmra.mxu0 %v1292_v44  ;;  %v783_v22 = vld [vmem:[%s1550_s1 + $0x78] sm:$0xf0]  ;;  %v982_v23 = vld [vmem:[%s1551_s0 + $0x14] sm:$0xf0]  ;;  %v1028_v24 = vld [vmem:[%s1550_s1 + $0x16c] sm:$0xf]  ;;  %v926_v29 = vor.u32 %v1034_v18, %v925_v17 }
  0x24   :  { %485 = vmatmul.bf16.vlgmr.msra.gmra.mxu1 %v1303_v49  ;;  %504 = vmatmul.bf16.vlgmr.msra.gmra.mxu2 %v1292_v44  ;;  %v911_v25 = vld [vmem:[%s1550_s1 + $0x178] sm:$0xf0]  ;;  %v981_v27 = vld [vmem:[%s1551_s0 + $0x14] sm:$0xf]  ;;  %v786_v30 = vor.u32 %v996_v21, %v783_v22  ;;  %v781_v31 = vld [vmem:[%s1550_s1 + $0x68] sm:$0xf]  ;;  %v1408_v34 = vor.u32 %v982_v23, %v717_v20 }
  0x25   :  { %572 = vmatpush.bf16.msrb.mxu2 %v850_v40  ;;  %523 = vmatmul.bf16.vlgmr.msra.gmra.mxu3 %v1303_v49  ;;  %v719_v28 = vld [vmem:[%s1551_s0 + $0x18] sm:$0xf0]  ;;  %v998_v32 = vld [vmem:[%s1550_s1 + $0x74] sm:$0xf0]  ;;  %v909_v33 = vld [vmem:[%s1550_s1 + $0x168] sm:$0xf]  ;;  %v914_v35 = vor.u32 %v1028_v24, %v911_v25 }
  0x26   :  { %591 = vmatpush.bf16.msrb.mxu3 %v978_v45  ;;  %534 = vmatpush.bf16.msrb.mxu0 %v846_v52  ;;  %v1030_v36 = vld [vmem:[%s1550_s1 + $0x174] sm:$0xf0]  ;;  %v992_v37 = vld [vmem:[%s1550_s1 + $0x4c] sm:$0xf]  ;;  %v767_v38 = vld [vmem:[%s1550_s1 + $0x58] sm:$0xf0]  ;;  %v1419_v39 = vor.u32 %v981_v27, %v719_v28  ;;  %v782_v42 = vor.u32 %v998_v32, %v781_v31 }
  0x27   :  { %553 = vmatpush.bf16.msrb.mxu1 %v974_v53  ;;  %v1024_v40 = vld [vmem:[%s1550_s1 + $0x14c] sm:$0xf]  ;;  %v895_v41 = vld [vmem:[%s1550_s1 + $0x158] sm:$0xf0]  ;;  %v910_v43 = vor.u32 %v1030_v36, %v909_v33  ;;  %v770_v45 = vor.u32 %v992_v37, %v767_v38  ;;  %v765_v46 = vld [vmem:[%s1550_s1 + $0x48] sm:$0xf] }
  0x28   :  { %v994_v47 = vld [vmem:[%s1550_s1 + $0x54] sm:$0xf0]  ;;  %v893_v48 = vld [vmem:[%s1550_s1 + $0x148] sm:$0xf]  ;;  %v898_v50 = vor.u32 %v1024_v40, %v895_v41  ;;  %v988_v52 = vld [vmem:[%s1550_s1 + $0x2c] sm:$0xf] }
  0x29   :  { %573 = vmatpush.bf16.msrb.mxu2 %v834_v54  ;;  %v1026_v51 = vld [vmem:[%s1550_s1 + $0x154] sm:$0xf0]  ;;  %v751_v53 = vld [vmem:[%s1550_s1 + $0x38] sm:$0xf0]  ;;  %v1020_v54 = vld [vmem:[%s1550_s1 + $0x12c] sm:$0xf]  ;;  %v766_v56 = vor.u32 %v994_v47, %v765_v46 }
  0x2a   :  { %592 = vmatpush.bf16.msrb.mxu3 %v962_v58  ;;  %535 = vmatpush.bf16.msrb.mxu0 %v830_v0  ;;  %v879_v55 = vld [vmem:[%s1550_s1 + $0x138] sm:$0xf0]  ;;  %v894_v57 = vor.u32 %v1026_v51, %v893_v48  ;;  %v754_v58 = vor.u32 %v988_v52, %v751_v53  ;;  %v749_v59 = vld [vmem:[%s1550_s1 + $0x28] sm:$0xf]  ;;  %v990_v60 = vld [vmem:[%s1550_s1 + $0x34] sm:$0xf0] }
  0x2b   :  { %554 = vmatpush.bf16.msrb.mxu1 %v958_v1  ;;  %v877_v61 = vld [vmem:[%s1550_s1 + $0x128] sm:$0xf]  ;;  %v882_v62 = vor.u32 %v1020_v54, %v879_v55  ;;  %v1022_v63 = vld [vmem:[%s1550_s1 + $0x134] sm:$0xf0]  ;;  %v984_v0 = vld [vmem:[%s1550_s1 + $0xc] sm:$0xf]  ;;  %v750_v4 = vor.u32 %v990_v60, %v749_v59 }
  0x2c   :  { %v735_v1 = vld [vmem:[%s1550_s1 + $0x18] sm:$0xf0]  ;;  %v878_v5 = vor.u32 %v1022_v63, %v877_v61  ;;  %v733_v7 = vld [vmem:[%s1550_s1 + $0x8] sm:$0xf]  ;;  %v986_v8 = vld [vmem:[%s1550_s1 + $0x14] sm:$0xf0] }
  0x2d   :  { %574 = vmatpush.bf16.msrb.mxu2 %v818_v2  ;;  %v1016_v2 = vld [vmem:[%s1550_s1 + $0x10c] sm:$0xf]  ;;  %v863_v3 = vld [vmem:[%s1550_s1 + $0x118] sm:$0xf0]  ;;  %v861_v10 = vld [vmem:[%s1550_s1 + $0x108] sm:$0xf] }
  0x2e   :  { %593 = vmatpush.bf16.msrb.mxu3 %v946_v6  ;;  %536 = vmatpush.bf16.msrb.mxu0 %v814_v12  ;;  %v738_v6 = vor.u32 %v984_v0, %v735_v1  ;;  %v866_v9 = vor.u32 %v1016_v2, %v863_v3  ;;  %v1018_v11 = vld [vmem:[%s1550_s1 + $0x114] sm:$0xf0]  ;;  %v734_v12 = vor.u32 %v986_v8, %v733_v7 }
  0x2f   :  { %555 = vmatpush.bf16.msrb.mxu1 %v942_v14  ;;  %v862_v13 = vor.u32 %v1018_v11, %v861_v10  ;;  %v661_v14 = vld [vmem:[%s1552_s2] sm:$0xf] }
  0x30   :  { %v663_v16 = vperm.slane %v661_v14, 0  ;;  %v665_v48 = vperm.slane %v661_v14, 2  ;;  %v666_v55 = vperm.slane %v661_v14, 3 }
  0x31   :  { %575 = vmatpush.bf16.msrb.mxu2 %v802_v15 }
  0x32   :  { %594 = vmatpush.bf16.msrb.mxu3 %v930_v19  ;;  %537 = vmatpush.bf16.msrb.mxu0 %v798_v26  ;;  %v664_v19 = vperm.slane %v661_v14, 1 }
  0x33   :  { %556 = vmatpush.bf16.msrb.mxu1 %v926_v29  ;;  %471 = vmatmul.bf16.gmra.mxu0 %v1408_v34 }
  0x34   :  { %490 = vmatmul.bf16.gmra.mxu1 %v1419_v39  ;;  %509 = vmatmul.bf16.gmra.mxu2 %v1408_v34 }
  0x35   :  { %576 = vmatpush.bf16.msrb.mxu2 %v786_v30  ;;  %528 = vmatmul.bf16.gmra.mxu3 %v1419_v39 }
  0x36   :  { %595 = vmatpush.bf16.msrb.mxu3 %v914_v35  ;;  %538 = vmatpush.bf16.msrb.mxu0 %v782_v42 }
  0x37   :  { %557 = vmatpush.bf16.msrb.mxu1 %v910_v43 }
  0x39   :  { %577 = vmatpush.bf16.msrb.mxu2 %v770_v45 }
  0x3a   :  { %596 = vmatpush.bf16.msrb.mxu3 %v898_v50  ;;  %539 = vmatpush.bf16.msrb.mxu0 %v766_v56 }
  0x3b   :  { %558 = vmatpush.bf16.msrb.mxu1 %v894_v57 }
  0x3d   :  { %578 = vmatpush.bf16.msrb.mxu2 %v754_v58 }
  0x3e   :  { %597 = vmatpush.bf16.msrb.mxu3 %v882_v62  ;;  %540 = vmatpush.bf16.msrb.mxu0 %v750_v4 }
  0x3f   :  { %559 = vmatpush.bf16.msrb.mxu1 %v878_v5 }
  0x41   :  { %579 = vmatpush.bf16.msrb.mxu2 %v738_v6 }
  0x42   :  { %598 = vmatpush.bf16.msrb.mxu3 %v866_v9  ;;  %541 = vmatpush.bf16.msrb.mxu0 %v734_v12 }
  0x43   :  { %560 = vmatpush.bf16.msrb.mxu1 %v862_v13 }
  0x44   :  { %580 = vmatmul.bf16.vlgmr.msrb.gmra.mxu2 %v1292_v44 }
  0x45   :  { %542 = vmatmul.bf16.vlgmr.msrb.gmra.mxu0 %v1292_v44  ;;  %599 = vmatmul.bf16.vlgmr.msrb.gmra.mxu3 %v1303_v49 }
  0x46   :  { %561 = vmatmul.bf16.vlgmr.msrb.gmra.mxu1 %v1303_v49 }
  0x54   :  { %585 = vmatmul.bf16.gmra.mxu2 %v1408_v34 }
  0x55   :  { %547 = vmatmul.bf16.gmra.mxu0 %v1408_v34  ;;  %604 = vmatmul.bf16.gmra.mxu3 %v1419_v39 }
  0x56   :  { %566 = vmatmul.bf16.gmra.mxu1 %v1419_v39 }
  0xa0   :  { %v467_v15 = vpop.f32.mrf.mxu0 }
  0xa1   :  { %v486_v17 = vpop.f32.mrf.mxu1 }
  0xa2   :  { %v487_v44 = vadd.f32 %v486_v17, %v467_v15 }
  0xa4   :  { %v671_v18 = vadd.f32 %v663_v16, %v487_v44 }
  0xa6   :  { %687 = vst [vmem:[%s1553_s3] sm:$0xff] %v671_v18 }
  0xa7   :  { %v505_v49 = vpop.f32.mrf.mxu2 }
  0xa8   :  { %v524_v20 = vpop.f32.mrf.mxu3  ;;  %v469_v21 = vpop.f32.mrf.mxu0 }
  0xa9   :  { %v525_v22 = vadd.f32 %v524_v20, %v505_v49  ;;  %v488_v23 = vpop.f32.mrf.mxu1 }
  0xaa   :  { %v489_v24 = vadd.f32 %v488_v23, %v469_v21 }
  0xab   :  { %v672_v25 = vadd.f32 %v664_v19, %v525_v22 }
  0xac   :  { %v675_v26 = vadd.f32 %v663_v16, %v489_v24 }
  0xad   :  { %688 = vst [vmem:[%s1553_s3 + $0x8] sm:$0xff] %v672_v25 }
  0xae   :  { %691 = vst [vmem:[%s1553_s3 + $0x20] sm:$0xff] %v675_v26 }
  0xaf   :  { %v507_v27 = vpop.f32.mrf.mxu2 }
  0xb0   :  { %v526_v28 = vpop.f32.mrf.mxu3  ;;  %v472_v29 = vpop.f32.mrf.mxu0 }
  0xb1   :  { %v527_v30 = vadd.f32 %v526_v28, %v507_v27  ;;  %v491_v31 = vpop.f32.mrf.mxu1 }
  0xb2   :  { %v492_v32 = vadd.f32 %v491_v31, %v472_v29 }
  0xb3   :  { %v676_v33 = vadd.f32 %v664_v19, %v527_v30 }
  0xb4   :  { %v679_v34 = vadd.f32 %v663_v16, %v492_v32 }
  0xb5   :  { %692 = vst [vmem:[%s1553_s3 + $0x28] sm:$0xff] %v676_v33 }
  0xb6   :  { %695 = vst [vmem:[%s1553_s3 + $0x40] sm:$0xff] %v679_v34 }
  0xb7   :  { %v510_v35 = vpop.f32.mrf.mxu2 }
  0xb8   :  { %v529_v36 = vpop.f32.mrf.mxu3  ;;  %v474_v37 = vpop.f32.mrf.mxu0 }
  0xb9   :  { %v530_v38 = vadd.f32 %v529_v36, %v510_v35  ;;  %v493_v39 = vpop.f32.mrf.mxu1 }
  0xba   :  { %v494_v40 = vadd.f32 %v493_v39, %v474_v37 }
  0xbb   :  { %v680_v41 = vadd.f32 %v664_v19, %v530_v38 }
  0xbc   :  { %v683_v42 = vadd.f32 %v663_v16, %v494_v40 }
  0xbd   :  { %696 = vst [vmem:[%s1553_s3 + $0x48] sm:$0xff] %v680_v41 }
  0xbe   :  { %699 = vst [vmem:[%s1553_s3 + $0x60] sm:$0xff] %v683_v42 }
  0xbf   :  { %v512_v43 = vpop.f32.mrf.mxu2 }
  0xc0   :  { %v531_v45 = vpop.f32.mrf.mxu3 }
  0xc1   :  { %v532_v46 = vadd.f32 %v531_v45, %v512_v43 }
  0xc2   :  { %v543_v47 = vpop.f32.mrf.mxu0 }
  0xc3   :  { %v562_v50 = vpop.f32.mrf.mxu1  ;;  %v684_v51 = vadd.f32 %v664_v19, %v532_v46 }
  0xc4   :  { %v563_v52 = vadd.f32 %v562_v50, %v543_v47 }
  0xc5   :  { %700 = vst [vmem:[%s1553_s3 + $0x68] sm:$0xff] %v684_v51 }
  0xc6   :  { %v673_v53 = vadd.f32 %v665_v48, %v563_v52 }
  0xc7   :  { %v581_v54 = vpop.f32.mrf.mxu2 }
  0xc8   :  { %689 = vst [vmem:[%s1553_s3 + $0x10] sm:$0xff] %v673_v53  ;;  %v600_v56 = vpop.f32.mrf.mxu3 }
  0xc9   :  { %v601_v57 = vadd.f32 %v600_v56, %v581_v54 }
  0xca   :  { %v545_v58 = vpop.f32.mrf.mxu0 }
  0xcb   :  { %v564_v59 = vpop.f32.mrf.mxu1  ;;  %v674_v60 = vadd.f32 %v666_v55, %v601_v57 }
  0xcc   :  { %v565_v61 = vadd.f32 %v564_v59, %v545_v58 }
  0xcd   :  { %690 = vst [vmem:[%s1553_s3 + $0x18] sm:$0xff] %v674_v60 }
  0xce   :  { %v677_v62 = vadd.f32 %v665_v48, %v565_v61 }
  0xcf   :  { %v583_v63 = vpop.f32.mrf.mxu2 }
  0xd0   :  { %693 = vst [vmem:[%s1553_s3 + $0x30] sm:$0xff] %v677_v62  ;;  %v602_v0 = vpop.f32.mrf.mxu3 }
  0xd1   :  { %v603_v1 = vadd.f32 %v602_v0, %v583_v63 }
  0xd2   :  { %v548_v2 = vpop.f32.mrf.mxu0 }
  0xd3   :  { %v567_v3 = vpop.f32.mrf.mxu1  ;;  %v678_v4 = vadd.f32 %v666_v55, %v603_v1 }
  0xd4   :  { %v568_v5 = vadd.f32 %v567_v3, %v548_v2 }
  0xd5   :  { %694 = vst [vmem:[%s1553_s3 + $0x38] sm:$0xff] %v678_v4 }
  0xd6   :  { %v681_v6 = vadd.f32 %v665_v48, %v568_v5 }
  0xd7   :  { %v586_v7 = vpop.f32.mrf.mxu2 }
  0xd8   :  { %697 = vst [vmem:[%s1553_s3 + $0x50] sm:$0xff] %v681_v6  ;;  %v605_v8 = vpop.f32.mrf.mxu3 }
  0xd9   :  { %v606_v9 = vadd.f32 %v605_v8, %v586_v7 }
  0xda   :  { %v550_v10 = vpop.f32.mrf.mxu0 }
  0xdb   :  { %v569_v11 = vpop.f32.mrf.mxu1  ;;  %v682_v12 = vadd.f32 %v666_v55, %v606_v9 }
  0xdc   :  { %v570_v13 = vadd.f32 %v569_v11, %v550_v10 }
  0xdd   :  { %698 = vst [vmem:[%s1553_s3 + $0x58] sm:$0xff] %v682_v12 }
  0xde   :  { %v685_v14 = vadd.f32 %v665_v48, %v570_v13 }
  0xdf   :  { %v588_v15 = vpop.f32.mrf.mxu2 }
  0xe0   :  { %701 = vst [vmem:[%s1553_s3 + $0x70] sm:$0xff] %v685_v14  ;;  %v607_v16 = vpop.f32.mrf.mxu3 }
  0xe1   :  { %v608_v17 = vadd.f32 %v607_v16, %v588_v15 }
  0xe3   :  { %v686_v44 = vadd.f32 %v666_v55, %v608_v17 }
  0xe5   :  { %702 = vst [vmem:[%s1553_s3 + $0x78] sm:$0xff] %v686_v44 }

// kernel: resnet_encoder_mtan_forward.38
= control target key start
LH: loop header
LB: loop body
LE: loop exit
PB: predicated region body
PF: predicated region fallthrough
CT: control target
= control target key end

     0   :  { %s1518_s12 = smov 0   ;;  %s1520_s13 = smov 0   ;;  %s1800_s0 = inlined_call_operand.vmem [shape: bf16[32,4608], index: 0, kind: input, shape index: {}]   ;;  %s1801_s1 = inlined_call_operand.vmem [shape: bf16[4608,512], index: 1, kind: input, shape index: {}]   ;;  %s1802_s2 = inlined_call_operand.vmem [shape: f32[1,512], index: 2, kind: input, shape index: {}]   ;;  %s1803_s3 = inlined_call_operand.vmem [shape: f32[32,512], index: 3, kind: output, shape index: {}]  }
   0x1   :  { %s1522_s14 = smov 0   ;;  %s1524_s15 = smov 0  }
   0x2   :  { %s1526_s16 = smov 0  }
   0x3 LB: > { %s22_s17 = sadd.s32 1, %s1491_s15  ;;  %p41_p1 = scmp.ne.s32.totalorder %s1483_s13, %s1479_s12  ;;  %s1495_s16 = sphi %s1526_s16, %s13_s16   ;;  %s1491_s15 = sphi %s1524_s15, %s1807_s15   ;;  %s1487_s14 = sphi %s1522_s14, %s1806_s14   ;;  %s1483_s13 = sphi %s1520_s13, %s1805_s13   ;;  %s1479_s12 = sphi %s1518_s12, %s1804_s12  }
   0x4   : > { %p23_p0 = scmp.ge.s32.totalorder %s22_s17, 18  ;;  %p42_p2 = scmp.eq.s32.totalorder %s1495_s16, 0 }
   0x5   : > { %s34_s19 = sadd.s32 1, %s1483_s13  ;;  %p1059_p5 = scmp.ge.s32.totalorder %s1495_s16, 18 }
   0x6   : > { %s1809_s17 = smov (%p23_p0, %s22_s17), 0  ;;  %p43_p3 = por %p42_p2, %p41_p1 }
   0x7   : > { %s30_s18 = ssub.s32 %s1491_s15, %s1809_s17  ;;  %143 = sbr.rel (%p1059_p5) target bundleno = 20 (0x14), region = 20 }
   0x8   : > { %p32_p4 = scmp.eq.s32.totalorder %s30_s18, 0 }
   0xa   : > { %s1553_s20 = scalar_select %p32_p4, %s1483_s13, %s34_s19  }
   0xc   : > { %146 = sbr.rel (!%p43_p3) target bundleno = 20 (0x14), region = 24  ;;  %s148_s21 = sand.u32 (%p43_p3), 1, %s1483_s13  }
   0xd   : > { %s1346_s22 = sshll.u32 (%p43_p3), %s1491_s15, 3  ;;  %s1060_s23 = sshll.u32 (%p43_p3), %s148_s21, 5 }
   0xe   : > { %s156_s26 = scalar_lea.vmem (%p43_p3), %s1800_s0, %s1346_s22  ;;  %s150_s27 = scalar_lea.vmem (%p43_p3), [#allocation3], %s1060_s23 }
   0xf   : > { %v191_v0 = vld [vmem:[%s156_s26] sm:$0xff] (%p43_p3)  ;;  %v193_v1 = vld [vmem:[%s156_s26 + $0x90] sm:$0xff] (%p43_p3) }
  0x10   : > { %v195_v2 = vld [vmem:[%s156_s26 + $0x120] sm:$0xff] (%p43_p3)  ;;  %192 = vst [vmem:[%s150_s27] sm:$0xff] (%p43_p3), %v191_v0  ;;  %v197_v3 = vld [vmem:[%s156_s26 + $0x1b0] sm:$0xff] (%p43_p3) }
  0x11   : > { %194 = vst [vmem:[%s150_s27 + $0x8] sm:$0xff] %v193_v1 }
  0x12   : > { %196 = vst [vmem:[%s150_s27 + $0x10] sm:$0xff] %v195_v2 }
  0x13   : > { %198 = vst [vmem:[%s150_s27 + $0x18] sm:$0xff] %v197_v3 }
  0x14 PF: > { %p1063_p6 = scmp.ge.s32.totalorder %s1495_s16, 1  ;;  %p213_p7 = scmp.lt.s32.totalorder %s1495_s16, 19 }
  0x16   : > { %p214_p8 = pnand %p1063_p6, %p213_p7 }
  0x17   : > { %s220_s28 = sand.u32 (!%p214_p8), 1, %s1479_s12   ;;  %s1065_s29 = sshll.u32 (!%p214_p8), %s1487_s14, 5 }
  0x18   : > { %217 = sbr.rel (%p214_p8) target bundleno = 303 (0x12f), region = 66  ;;  %s1064_s30 = sshll.u32 (!%p214_p8), %s220_s28, 5 }
  0x19   : > { %p253_p9 = scmp.lt.s32.totalorder (!%p214_p8), %s1065_s29, 575  ;;  %s1570_s8 = scalar_lea.vmem (!%p214_p8), [#allocation3], %s1064_s30 }
  0x1a   : > { %p1068_p10 = scmp.ne.s32.totalorder (!%p214_p8), %s1487_s14, 0 }
  0x1d   : > { %s1811_s29 = smov (!%p253_p9, %s1065_s29), 575  ;;  %269 = sbr.rel (%p1068_p10) target bundleno = 51 (0x33), region = 74 }
  0x1e   : > { %s1347_s4 = sshll.u32 %s1811_s29, 4 }
  0x1f   : > { %s1568_s7 = scalar_lea.vmem %s1801_s1, %s1347_s4 }
  0x22   : > { %v1497_v4 = vmov 0.0  }
  0x23   : > { %270 = vst [vmem:[#allocation2 + $0x30] sm:$0xff] %v1497_v4 }
  0x24   : > { %271 = vst [vmem:[#allocation2] sm:$0xff] %v1497_v4 }
  0x25   : > { %272 = vst [vmem:[#allocation2 + $0x58] sm:$0xff] %v1497_v4 }
  0x26   : > { %273 = vst [vmem:[#allocation2 + $0x18] sm:$0xff] %v1497_v4 }
  0x27   : > { %274 = vst [vmem:[#allocation2 + $0x50] sm:$0xff] %v1497_v4 }
  0x28   : > { %275 = vst [vmem:[#allocation2 + $0x68] sm:$0xff] %v1497_v4 }
  0x29   : > { %276 = vst [vmem:[#allocation2 + $0x8] sm:$0xff] %v1497_v4 }
  0x2a   : > { %277 = vst [vmem:[#allocation2 + $0x48] sm:$0xff] %v1497_v4 }
  0x2b   : > { %278 = vst [vmem:[#allocation2 + $0x40] sm:$0xff] %v1497_v4 }
  0x2c   : > { %279 = vst [vmem:[#allocation2 + $0x20] sm:$0xff] %v1497_v4 }
  0x2d   : > { %280 = vst [vmem:[#allocation2 + $0x10] sm:$0xff] %v1497_v4 }
  0x2e   : > { %281 = vst [vmem:[#allocation2 + $0x38] sm:$0xff] %v1497_v4 }
  0x2f   : > { %282 = vst [vmem:[#allocation2 + $0x60] sm:$0xff] %v1497_v4 }
  0x30   : > { %283 = vst [vmem:[#allocation2 + $0x70] sm:$0xff] %v1497_v4 }
  0x31   : > { %284 = vst [vmem:[#allocation2 + $0x78] sm:$0xff] %v1497_v4 }
  0x32   : > { %285 = vst [vmem:[#allocation2 + $0x28] sm:$0xff] %v1497_v4 }
  0x33 PF: > { %v1199_v5 = vld [vmem:[%s1568_s7 + $0xe0] sm:$0xf]  ;;  %v1382_v6 = vld [vmem:[%s1568_s7 + $0xec] sm:$0xf0]  ;;  %v1380_v10 = vld [vmem:[%s1568_s7 + $0xe4] sm:$0xf] }
  0x34   : > { %v1327_v7 = vld [vmem:[%s1568_s7 + $0x1e0] sm:$0xf]  ;;  %v1200_v8 = vor.u32 %v1382_v6, %v1199_v5  ;;  %v1414_v9 = vld [vmem:[%s1568_s7 + $0x1ec] sm:$0xf0]  ;;  %v1201_v11 = vld [vmem:[%s1568_s7 + $0xf0] sm:$0xf0] }
  0x35   : > { %v1328_v12 = vor.u32 %v1414_v9, %v1327_v7  ;;  %v1204_v13 = vor.u32 %v1380_v10, %v1201_v11  ;;  %v1412_v14 = vld [vmem:[%s1568_s7 + $0x1e4] sm:$0xf]  ;;  %v1329_v15 = vld [vmem:[%s1568_s7 + $0x1f0] sm:$0xf0]  ;;  %v1183_v16 = vld [vmem:[%s1568_s7 + $0xc0] sm:$0xf] }
  0x36   : > { %710 = vmatpush.bf16.msra.mxu0 %v1200_v8  ;;  %v1332_v17 = vor.u32 %v1412_v14, %v1329_v15  ;;  %v1378_v18 = vld [vmem:[%s1568_s7 + $0xcc] sm:$0xf0]  ;;  %v1311_v19 = vld [vmem:[%s1568_s7 + $0x1c0] sm:$0xf]  ;;  %v1376_v23 = vld [vmem:[%s1568_s7 + $0xc4] sm:$0xf] }
  0x37   : > { %v1410_v20 = vld [vmem:[%s1568_s7 + $0x1cc] sm:$0xf0]  ;;  %729 = vmatpush.bf16.msra.mxu1 %v1328_v12  ;;  %748 = vmatpush.bf16.msra.mxu2 %v1204_v13  ;;  %v1184_v21 = vor.u32 %v1378_v18, %v1183_v16  ;;  %v1185_v24 = vld [vmem:[%s1568_s7 + $0xd0] sm:$0xf0]  ;;  %v1408_v25 = vld [vmem:[%s1568_s7 + $0x1c4] sm:$0xf] }
  0x38   : > { %v1312_v22 = vor.u32 %v1410_v20, %v1311_v19  ;;  %767 = vmatpush.bf16.msra.mxu3 %v1332_v17  ;;  %v1188_v26 = vor.u32 %v1376_v23, %v1185_v24  ;;  %v1313_v27 = vld [vmem:[%s1568_s7 + $0x1d0] sm:$0xf0]  ;;  %v1167_v28 = vld [vmem:[%s1568_s7 + $0xa0] sm:$0xf]  ;;  %v1374_v29 = vld [vmem:[%s1568_s7 + $0xac] sm:$0xf0] }
  0x39   : > { %v1316_v30 = vor.u32 %v1408_v25, %v1313_v27  ;;  %v1295_v31 = vld [vmem:[%s1568_s7 + $0x1a0] sm:$0xf]  ;;  %v1406_v32 = vld [vmem:[%s1568_s7 + $0x1ac] sm:$0xf0]  ;;  %v1372_v33 = vld [vmem:[%s1568_s7 + $0xa4] sm:$0xf]  ;;  %v1168_v34 = vor.u32 %v1374_v29, %v1167_v28 }
  0x3a   : > { %711 = vmatpush.bf16.msra.mxu0 %v1184_v21  ;;  %v1169_v35 = vld [vmem:[%s1568_s7 + $0xb0] sm:$0xf0]  ;;  %v1404_v36 = vld [vmem:[%s1568_s7 + $0x1a4] sm:$0xf]  ;;  %v1296_v38 = vor.u32 %v1406_v32, %v1295_v31  ;;  %v1151_v40 = vld [vmem:[%s1568_s7 + $0x80] sm:$0xf] }
  0x3b   : > { %v1297_v37 = vld [vmem:[%s1568_s7 + $0x1b0] sm:$0xf0]  ;;  %730 = vmatpush.bf16.msra.mxu1 %v1312_v22  ;;  %749 = vmatpush.bf16.msra.mxu2 %v1188_v26  ;;  %v1172_v39 = vor.u32 %v1372_v33, %v1169_v35  ;;  %v1370_v41 = vld [vmem:[%s1568_s7 + $0x8c] sm:$0xf0]  ;;  %v1279_v42 = vld [vmem:[%s1568_s7 + $0x180] sm:$0xf] }
  0x3c   : > { %768 = vmatpush.bf16.msra.mxu3 %v1316_v30  ;;  %v1300_v43 = vor.u32 %v1404_v36, %v1297_v37  ;;  %v1402_v44 = vld [vmem:[%s1568_s7 + $0x18c] sm:$0xf0]  ;;  %v1368_v45 = vld [vmem:[%s1568_s7 + $0x84] sm:$0xf]  ;;  %v1153_v46 = vld [vmem:[%s1568_s7 + $0x90] sm:$0xf0]  ;;  %v1152_v49 = vor.u32 %v1370_v41, %v1151_v40 }
  0x3d   : > { %v1400_v47 = vld [vmem:[%s1568_s7 + $0x184] sm:$0xf]  ;;  %v1281_v48 = vld [vmem:[%s1568_s7 + $0x190] sm:$0xf0]  ;;  %v1280_v50 = vor.u32 %v1402_v44, %v1279_v42  ;;  %v1156_v51 = vor.u32 %v1368_v45, %v1153_v46  ;;  %v1135_v52 = vld [vmem:[%s1568_s7 + $0x60] sm:$0xf] }
  0x3e   : > { %712 = vmatpush.bf16.msra.mxu0 %v1168_v34  ;;  %v1366_v53 = vld [vmem:[%s1568_s7 + $0x6c] sm:$0xf0]  ;;  %v1263_v54 = vld [vmem:[%s1568_s7 + $0x160] sm:$0xf]  ;;  %v1284_v55 = vor.u32 %v1400_v47, %v1281_v48  ;;  %v1364_v57 = vld [vmem:[%s1568_s7 + $0x64] sm:$0xf] }
  0x3f   : > { %731 = vmatpush.bf16.msra.mxu1 %v1296_v38  ;;  %750 = vmatpush.bf16.msra.mxu2 %v1172_v39  ;;  %v1398_v56 = vld [vmem:[%s1568_s7 + $0x16c] sm:$0xf0]  ;;  %v1137_v58 = vld [vmem:[%s1568_s7 + $0x70] sm:$0xf0]  ;;  %v1396_v59 = vld [vmem:[%s1568_s7 + $0x164] sm:$0xf]  ;;  %v1136_v61 = vor.u32 %v1366_v53, %v1135_v52 }
  0x40   : > { %769 = vmatpush.bf16.msra.mxu3 %v1300_v43  ;;  %v1265_v60 = vld [vmem:[%s1568_s7 + $0x170] sm:$0xf0]  ;;  %v1264_v62 = vor.u32 %v1398_v56, %v1263_v54  ;;  %v1140_v63 = vor.u32 %v1364_v57, %v1137_v58  ;;  %v1119_v0 = vld [vmem:[%s1568_s7 + $0x40] sm:$0xf]  ;;  %v1362_v1 = vld [vmem:[%s1568_s7 + $0x4c] sm:$0xf0] }
  0x41   : > { %v1247_v2 = vld [vmem:[%s1568_s7 + $0x140] sm:$0xf]  ;;  %v1268_v3 = vor.u32 %v1396_v59, %v1265_v60  ;;  %v1394_v4 = vld [vmem:[%s1568_s7 + $0x14c] sm:$0xf0]  ;;  %v1360_v5 = vld [vmem:[%s1568_s7 + $0x44] sm:$0xf]  ;;  %v1120_v9 = vor.u32 %v1362_v1, %v1119_v0 }
  0x42   : > { %713 = vmatpush.bf16.msra.mxu0 %v1152_v49  ;;  %v1121_v6 = vld [vmem:[%s1568_s7 + $0x50] sm:$0xf0]  ;;  %v1392_v7 = vld [vmem:[%s1568_s7 + $0x144] sm:$0xf]  ;;  %v1248_v10 = vor.u32 %v1394_v4, %v1247_v2  ;;  %v1103_v12 = vld [vmem:[%s1568_s7 + $0x20] sm:$0xf] }
  0x43   : > { %732 = vmatpush.bf16.msra.mxu1 %v1280_v50  ;;  %751 = vmatpush.bf16.msra.mxu2 %v1156_v51  ;;  %v1249_v8 = vld [vmem:[%s1568_s7 + $0x150] sm:$0xf0]  ;;  %v1124_v11 = vor.u32 %v1360_v5, %v1121_v6  ;;  %v1358_v13 = vld [vmem:[%s1568_s7 + $0x2c] sm:$0xf0]  ;;  %v1231_v14 = vld [vmem:[%s1568_s7 + $0x120] sm:$0xf] }
  0x44   : > { %770 = vmatpush.bf16.msra.mxu3 %v1284_v55  ;;  %v1252_v15 = vor.u32 %v1392_v7, %v1249_v8  ;;  %v1390_v16 = vld [vmem:[%s1568_s7 + $0x12c] sm:$0xf0]  ;;  %v1356_v17 = vld [vmem:[%s1568_s7 + $0x24] sm:$0xf]  ;;  %v1105_v18 = vld [vmem:[%s1568_s7 + $0x30] sm:$0xf0]  ;;  %v1104_v21 = vor.u32 %v1358_v13, %v1103_v12 }
  0x45   : > { %v1388_v19 = vld [vmem:[%s1568_s7 + $0x124] sm:$0xf]  ;;  %v1233_v20 = vld [vmem:[%s1568_s7 + $0x130] sm:$0xf0]  ;;  %v1087_v22 = vld [vmem:[%s1568_s7] sm:$0xf]  ;;  %v1232_v24 = vor.u32 %v1390_v16, %v1231_v14  ;;  %v1108_v25 = vor.u32 %v1356_v17, %v1105_v18 }
  0x46   : > { %714 = vmatpush.bf16.msra.mxu0 %v1136_v61  ;;  %v1354_v23 = vld [vmem:[%s1568_s7 + $0xc] sm:$0xf0]  ;;  %v1215_v26 = vld [vmem:[%s1568_s7 + $0x100] sm:$0xf]  ;;  %v1352_v28 = vld [vmem:[%s1568_s7 + $0x4] sm:$0xf]  ;;  %v1236_v29 = vor.u32 %v1388_v19, %v1233_v20 }
  0x47   : > { %733 = vmatpush.bf16.msra.mxu1 %v1264_v62  ;;  %752 = vmatpush.bf16.msra.mxu2 %v1140_v63  ;;  %v1386_v27 = vld [vmem:[%s1568_s7 + $0x10c] sm:$0xf0]  ;;  %v1089_v30 = vld [vmem:[%s1568_s7 + $0x10] sm:$0xf0]  ;;  %v1384_v31 = vld [vmem:[%s1568_s7 + $0x104] sm:$0xf]  ;;  %v1088_v36 = vor.u32 %v1354_v23, %v1087_v22 }
  0x48   : > { %771 = vmatpush.bf16.msra.mxu3 %v1268_v3  ;;  %v1217_v32 = vld [vmem:[%s1568_s7 + $0x110] sm:$0xf0]  ;;  %v1071_v33 = vld [vmem:[%s1570_s8] sm:$0xf]  ;;  %v1381_v34 = vld [vmem:[%s1568_s7 + $0xec] sm:$0xf]  ;;  %v1216_v40 = vor.u32 %v1386_v27, %v1215_v26  ;;  %v1092_v41 = vor.u32 %v1352_v28, %v1089_v30 }
  0x49   : > { %v1209_v35 = vld [vmem:[%s1568_s7 + $0xf8] sm:$0xf0]  ;;  %v1349_v37 = vld [vmem:[%s1570_s8 + $0x4] sm:$0xf0]  ;;  %v1413_v38 = vld [vmem:[%s1568_s7 + $0x1ec] sm:$0xf]  ;;  %v1220_v44 = vor.u32 %v1384_v31, %v1217_v32 }
  0x4a   : > { %715 = vmatpush.bf16.msra.mxu0 %v1120_v9  ;;  %v1337_v39 = vld [vmem:[%s1568_s7 + $0x1f8] sm:$0xf0]  ;;  %v1348_v42 = vld [vmem:[%s1570_s8 + $0x4] sm:$0xf]  ;;  %v1073_v43 = vld [vmem:[%s1570_s8 + $0x8] sm:$0xf0]  ;;  %v1212_v45 = vor.u32 %v1381_v34, %v1209_v35  ;;  %v1648_v49 = vor.u32 %v1349_v37, %v1071_v33 }
  0x4b   : > { %734 = vmatpush.bf16.msra.mxu1 %v1248_v10  ;;  %753 = vmatpush.bf16.msra.mxu2 %v1124_v11  ;;  %v1207_v46 = vld [vmem:[%s1568_s7 + $0xe8] sm:$0xf]  ;;  %v1383_v47 = vld [vmem:[%s1568_s7 + $0xf4] sm:$0xf0]  ;;  %v1340_v50 = vor.u32 %v1413_v38, %v1337_v39  ;;  %v1377_v52 = vld [vmem:[%s1568_s7 + $0xcc] sm:$0xf]  ;;  %v1653_v54 = vor.u32 %v1348_v42, %v1073_v43 }
  0x4c   : > { %772 = vmatpush.bf16.msra.mxu3 %v1252_v15  ;;  %v1335_v48 = vld [vmem:[%s1568_s7 + $0x1e8] sm:$0xf]  ;;  %v1415_v51 = vld [vmem:[%s1568_s7 + $0x1f4] sm:$0xf0]  ;;  %v1193_v53 = vld [vmem:[%s1568_s7 + $0xd8] sm:$0xf0]  ;;  %v1208_v57 = vor.u32 %v1383_v47, %v1207_v46 }
  0x4d   : > { %v1409_v55 = vld [vmem:[%s1568_s7 + $0x1cc] sm:$0xf]  ;;  %v1321_v56 = vld [vmem:[%s1568_s7 + $0x1d8] sm:$0xf0]  ;;  %v1336_v58 = vor.u32 %v1415_v51, %v1335_v48  ;;  %v1196_v59 = vor.u32 %v1377_v52, %v1193_v53  ;;  %v1191_v60 = vld [vmem:[%s1568_s7 + $0xc8] sm:$0xf] }
  0x4e   : > { %716 = vmatpush.bf16.msra.mxu0 %v1104_v21  ;;  %v1379_v61 = vld [vmem:[%s1568_s7 + $0xd4] sm:$0xf0]  ;;  %v1319_v62 = vld [vmem:[%s1568_s7 + $0x1c8] sm:$0xf]  ;;  %v1324_v63 = vor.u32 %v1409_v55, %v1321_v56  ;;  %v1373_v1 = vld [vmem:[%s1568_s7 + $0xac] sm:$0xf] }
  0x4f   : > { %735 = vmatpush.bf16.msra.mxu1 %v1232_v24  ;;  %754 = vmatpush.bf16.msra.mxu2 %v1108_v25  ;;  %v1411_v0 = vld [vmem:[%s1568_s7 + $0x1d4] sm:$0xf0]  ;;  %v1177_v2 = vld [vmem:[%s1568_s7 + $0xb8] sm:$0xf0]  ;;  %v1405_v3 = vld [vmem:[%s1568_s7 + $0x1ac] sm:$0xf]  ;;  %v1192_v5 = vor.u32 %v1379_v61, %v1191_v60 }
  0x50   : > { %773 = vmatpush.bf16.msra.mxu3 %v1236_v29  ;;  %v1305_v4 = vld [vmem:[%s1568_s7 + $0x1b8] sm:$0xf0]  ;;  %v1320_v6 = vor.u32 %v1411_v0, %v1319_v62  ;;  %v1180_v7 = vor.u32 %v1373_v1, %v1177_v2  ;;  %v1175_v8 = vld [vmem:[%s1568_s7 + $0xa8] sm:$0xf]  ;;  %v1375_v9 = vld [vmem:[%s1568_s7 + $0xb4] sm:$0xf0] }
  0x51   : > { %v1303_v10 = vld [vmem:[%s1568_s7 + $0x1a8] sm:$0xf]  ;;  %v1308_v11 = vor.u32 %v1405_v3, %v1305_v4  ;;  %v1407_v12 = vld [vmem:[%s1568_s7 + $0x1b4] sm:$0xf0]  ;;  %v1369_v13 = vld [vmem:[%s1568_s7 + $0x8c] sm:$0xf]  ;;  %v1176_v17 = vor.u32 %v1375_v9, %v1175_v8 }
  0x52   : > { %717 = vmatpush.bf16.msra.mxu0 %v1088_v36  ;;  %v1161_v14 = vld [vmem:[%s1568_s7 + $0x98] sm:$0xf0]  ;;  %v1401_v15 = vld [vmem:[%s1568_s7 + $0x18c] sm:$0xf]  ;;  %v1159_v18 = vld [vmem:[%s1568_s7 + $0x88] sm:$0xf]  ;;  %v1304_v19 = vor.u32 %v1407_v12, %v1303_v10 }
  0x53   : > { %736 = vmatpush.bf16.msra.mxu1 %v1216_v40  ;;  %755 = vmatpush.bf16.msra.mxu2 %v1092_v41  ;;  %v1289_v16 = vld [vmem:[%s1568_s7 + $0x198] sm:$0xf0]  ;;  %v1164_v20 = vor.u32 %v1369_v13, %v1161_v14  ;;  %v1371_v21 = vld [vmem:[%s1568_s7 + $0x94] sm:$0xf0]  ;;  %v1287_v22 = vld [vmem:[%s1568_s7 + $0x188] sm:$0xf] }
  0x54   : > { %774 = vmatpush.bf16.msra.mxu3 %v1220_v44  ;;  %v1403_v23 = vld [vmem:[%s1568_s7 + $0x194] sm:$0xf0]  ;;  %v1292_v24 = vor.u32 %v1401_v15, %v1289_v16  ;;  %v1079_v25 = vld [vmem:[%s1570_s8 + $0x10] sm:$0xf]  ;;  %v1365_v26 = vld [vmem:[%s1568_s7 + $0x6c] sm:$0xf]  ;;  %v1160_v31 = vor.u32 %v1371_v21, %v1159_v18 }
  0x55   : > { %718 = vmatmul.bf16.vlgmr.msra.gmra.mxu0 %v1648_v49  ;;  %v1145_v27 = vld [vmem:[%s1568_s7 + $0x78] sm:$0xf0]  ;;  %v1351_v28 = vld [vmem:[%s1570_s8 + $0x14] sm:$0xf0]  ;;  %v1397_v29 = vld [vmem:[%s1568_s7 + $0x16c] sm:$0xf]  ;;  %v1288_v34 = vor.u32 %v1403_v23, %v1287_v22 }
  0x56   : > { %737 = vmatmul.bf16.vlgmr.msra.gmra.mxu1 %v1653_v54  ;;  %756 = vmatmul.bf16.vlgmr.msra.gmra.mxu2 %v1648_v49  ;;  %v1273_v30 = vld [vmem:[%s1568_s7 + $0x178] sm:$0xf0]  ;;  %v1350_v32 = vld [vmem:[%s1570_s8 + $0x14] sm:$0xf]  ;;  %v1148_v35 = vor.u32 %v1365_v26, %v1145_v27  ;;  %v1143_v36 = vld [vmem:[%s1568_s7 + $0x68] sm:$0xf]  ;;  %v1692_v39 = vor.u32 %v1351_v28, %v1079_v25 }
  0x57   : > { %824 = vmatpush.bf16.msrb.mxu2 %v1212_v45  ;;  %775 = vmatmul.bf16.vlgmr.msra.gmra.mxu3 %v1653_v54  ;;  %v1081_v33 = vld [vmem:[%s1570_s8 + $0x18] sm:$0xf0]  ;;  %v1367_v37 = vld [vmem:[%s1568_s7 + $0x74] sm:$0xf0]  ;;  %v1271_v38 = vld [vmem:[%s1568_s7 + $0x168] sm:$0xf]  ;;  %v1276_v40 = vor.u32 %v1397_v29, %v1273_v30 }
  0x58   : > { %843 = vmatpush.bf16.msrb.mxu3 %v1340_v50  ;;  %786 = vmatpush.bf16.msrb.mxu0 %v1208_v57  ;;  %v1399_v41 = vld [vmem:[%s1568_s7 + $0x174] sm:$0xf0]  ;;  %v1361_v42 = vld [vmem:[%s1568_s7 + $0x4c] sm:$0xf]  ;;  %v1129_v43 = vld [vmem:[%s1568_s7 + $0x58] sm:$0xf0]  ;;  %v1697_v44 = vor.u32 %v1350_v32, %v1081_v33  ;;  %v1144_v47 = vor.u32 %v1367_v37, %v1143_v36 }
  0x59   : > { %805 = vmatpush.bf16.msrb.mxu1 %v1336_v58  ;;  %v1393_v45 = vld [vmem:[%s1568_s7 + $0x14c] sm:$0xf]  ;;  %v1257_v46 = vld [vmem:[%s1568_s7 + $0x158] sm:$0xf0]  ;;  %v1272_v48 = vor.u32 %v1399_v41, %v1271_v38  ;;  %v1132_v50 = vor.u32 %v1361_v42, %v1129_v43  ;;  %v1127_v51 = vld [vmem:[%s1568_s7 + $0x48] sm:$0xf] }
  0x5a   : > { %v1363_v52 = vld [vmem:[%s1568_s7 + $0x54] sm:$0xf0]  ;;  %v1255_v53 = vld [vmem:[%s1568_s7 + $0x148] sm:$0xf]  ;;  %v1260_v55 = vor.u32 %v1393_v45, %v1257_v46  ;;  %v1357_v57 = vld [vmem:[%s1568_s7 + $0x2c] sm:$0xf] }
  0x5b   : > { %825 = vmatpush.bf16.msrb.mxu2 %v1196_v59  ;;  %v1395_v56 = vld [vmem:[%s1568_s7 + $0x154] sm:$0xf0]  ;;  %v1113_v58 = vld [vmem:[%s1568_s7 + $0x38] sm:$0xf0]  ;;  %v1389_v59 = vld [vmem:[%s1568_s7 + $0x12c] sm:$0xf]  ;;  %v1128_v61 = vor.u32 %v1363_v52, %v1127_v51 }
  0x5c   : > { %844 = vmatpush.bf16.msrb.mxu3 %v1324_v63  ;;  %787 = vmatpush.bf16.msrb.mxu0 %v1192_v5  ;;  %v1241_v60 = vld [vmem:[%s1568_s7 + $0x138] sm:$0xf0]  ;;  %v1256_v62 = vor.u32 %v1395_v56, %v1255_v53  ;;  %v1116_v63 = vor.u32 %v1357_v57, %v1113_v58  ;;  %v1111_v0 = vld [vmem:[%s1568_s7 + $0x28] sm:$0xf]  ;;  %v1359_v1 = vld [vmem:[%s1568_s7 + $0x34] sm:$0xf0] }
  0x5d   : > { %806 = vmatpush.bf16.msrb.mxu1 %v1320_v6  ;;  %v1239_v2 = vld [vmem:[%s1568_s7 + $0x128] sm:$0xf]  ;;  %v1244_v3 = vor.u32 %v1389_v59, %v1241_v60  ;;  %v1391_v4 = vld [vmem:[%s1568_s7 + $0x134] sm:$0xf0]  ;;  %v1353_v5 = vld [vmem:[%s1568_s7 + $0xc] sm:$0xf]  ;;  %v1112_v9 = vor.u32 %v1359_v1, %v1111_v0 }
  0x5e   : > { %v1097_v6 = vld [vmem:[%s1568_s7 + $0x18] sm:$0xf0]  ;;  %v1240_v10 = vor.u32 %v1391_v4, %v1239_v2  ;;  %v1095_v12 = vld [vmem:[%s1568_s7 + $0x8] sm:$0xf]  ;;  %v1355_v13 = vld [vmem:[%s1568_s7 + $0x14] sm:$0xf0] }
  0x5f   : > { %826 = vmatpush.bf16.msrb.mxu2 %v1180_v7  ;;  %v1385_v7 = vld [vmem:[%s1568_s7 + $0x10c] sm:$0xf]  ;;  %v1225_v8 = vld [vmem:[%s1568_s7 + $0x118] sm:$0xf0]  ;;  %v1223_v15 = vld [vmem:[%s1568_s7 + $0x108] sm:$0xf] }
  0x60   : > { %845 = vmatpush.bf16.msrb.mxu3 %v1308_v11  ;;  %788 = vmatpush.bf16.msrb.mxu0 %v1176_v17  ;;  %v1100_v11 = vor.u32 %v1353_v5, %v1097_v6  ;;  %v1228_v14 = vor.u32 %v1385_v7, %v1225_v8  ;;  %v1387_v16 = vld [vmem:[%s1568_s7 + $0x114] sm:$0xf0]  ;;  %v1096_v17 = vor.u32 %v1355_v13, %v1095_v12  ;;  %v291_v33 = vld [vmem:[#allocation2 + $0x68] sm:$0xff]  ;;  %v294_v37 = vld [vmem:[#allocation2 + $0x40] sm:$0xff]  ;;  %p1341_p11 = scmp.ne.s32.totalorder %s1487_s14, 17 }
  0x61   : > { %807 = vmatpush.bf16.msrb.mxu1 %v1304_v19  ;;  %v1224_v18 = vor.u32 %v1387_v16, %v1223_v15  ;;  %v295_v43 = vld [vmem:[#allocation2 + $0x20] sm:$0xff]  ;;  %v288_v59 = vld [vmem:[#allocation2 + $0x58] sm:$0xff]  ;;  %v292_v5 = vld [vmem:[#allocation2 + $0x8] sm:$0xff] }
  0x62   : > { %v289_v1 = vld [vmem:[#allocation2 + $0x18] sm:$0xff]  ;;  %v296_v15 = vld [vmem:[#allocation2 + $0x10] sm:$0xff] }
  0x63   : > { %827 = vmatpush.bf16.msrb.mxu2 %v1164_v20  ;;  %v286_v20 = vld [vmem:[#allocation2 + $0x30] sm:$0xff] }
  0x64   : > { %846 = vmatpush.bf16.msrb.mxu3 %v1292_v24  ;;  %789 = vmatpush.bf16.msrb.mxu0 %v1160_v31 }
  0x65   : > { %808 = vmatpush.bf16.msrb.mxu1 %v1288_v34  ;;  %723 = vmatmul.bf16.gmra.mxu0 %v1692_v39 }
  0x66   : > { %742 = vmatmul.bf16.gmra.mxu1 %v1697_v44  ;;  %761 = vmatmul.bf16.gmra.mxu2 %v1692_v39 }
  0x67   : > { %828 = vmatpush.bf16.msrb.mxu2 %v1148_v35  ;;  %780 = vmatmul.bf16.gmra.mxu3 %v1697_v44 }
  0x68   : > { %847 = vmatpush.bf16.msrb.mxu3 %v1276_v40  ;;  %790 = vmatpush.bf16.msrb.mxu0 %v1144_v47  ;;  %v298_v47 = vld [vmem:[#allocation2 + $0x60] sm:$0xff] }
  0x69   : > { %809 = vmatpush.bf16.msrb.mxu1 %v1272_v48 }
  0x6b   : > { %829 = vmatpush.bf16.msrb.mxu2 %v1132_v50 }
  0x6c   : > { %848 = vmatpush.bf16.msrb.mxu3 %v1260_v55  ;;  %791 = vmatpush.bf16.msrb.mxu0 %v1128_v61  ;;  %v299_v55 = vld [vmem:[#allocation2 + $0x70] sm:$0xff] }
  0x6d   : > { %810 = vmatpush.bf16.msrb.mxu1 %v1256_v62 }
  0x6f   : > { %830 = vmatpush.bf16.msrb.mxu2 %v1116_v63 }
  0x70   : > { %849 = vmatpush.bf16.msrb.mxu3 %v1244_v3  ;;  %792 = vmatpush.bf16.msrb.mxu0 %v1112_v9 }
  0x71   : > { %811 = vmatpush.bf16.msrb.mxu1 %v1240_v10 }
  0x73   : > { %831 = vmatpush.bf16.msrb.mxu2 %v1100_v11  ;;  %v293_v11 = vld [vmem:[#allocation2 + $0x48] sm:$0xff] }
  0x74   : > { %850 = vmatpush.bf16.msrb.mxu3 %v1228_v14  ;;  %793 = vmatpush.bf16.msrb.mxu0 %v1096_v17 }
  0x75   : > { %812 = vmatpush.bf16.msrb.mxu1 %v1224_v18 }
  0x76   : > { %832 = vmatmul.bf16.vlgmr.msrb.gmra.mxu2 %v1648_v49 }
  0x77   : > { %794 = vmatmul.bf16.vlgmr.msrb.gmra.mxu0 %v1648_v49  ;;  %851 = vmatmul.bf16.vlgmr.msrb.gmra.mxu3 %v1653_v54  ;;  %v287_v49 = vld [vmem:[#allocation2] sm:$0xff] }
  0x78   : > { %813 = vmatmul.bf16.vlgmr.msrb.gmra.mxu1 %v1653_v54  ;;  %v290_v54 = vld [vmem:[#allocation2 + $0x50] sm:$0xff] }
  0x86   : > { %837 = vmatmul.bf16.gmra.mxu2 %v1692_v39 }
  0x87   : > { %799 = vmatmul.bf16.gmra.mxu0 %v1692_v39  ;;  %856 = vmatmul.bf16.gmra.mxu3 %v1697_v44 }
  0x88   : > { %818 = vmatmul.bf16.gmra.mxu1 %v1697_v44 }
  0xd2   : > { %v719_v19 = vpop.f32.mrf.mxu0 }
  0xd3   : > { %v738_v21 = vpop.f32.mrf.mxu1 }
  0xd4   : > { %v739_v22 = vadd.f32 %v738_v21, %v719_v19  ;;  %v297_v21 = vld [vmem:[#allocation2 + $0x38] sm:$0xff] }
  0xd6   : > { %v862_v23 = vadd.f32 %v739_v22, %v286_v20 }
  0xd8   : > { %878 = vst [vmem:[#allocation2 + $0x30] sm:$0xff] %v862_v23 }
  0xd9   : > { %v757_v24 = vpop.f32.mrf.mxu2 }
  0xda   : > { %v776_v25 = vpop.f32.mrf.mxu3  ;;  %v721_v26 = vpop.f32.mrf.mxu0 }
  0xdb   : > { %v777_v27 = vadd.f32 %v776_v25, %v757_v24  ;;  %v740_v28 = vpop.f32.mrf.mxu1 }
  0xdc   : > { %v741_v29 = vadd.f32 %v740_v28, %v721_v26 }
  0xdd   : > { %v863_v30 = vadd.f32 %v777_v27, %v287_v49  ;;  %v300_v49 = vld [vmem:[#allocation2 + $0x78] sm:$0xff] }
  0xde   : > { %v866_v31 = vadd.f32 %v741_v29, %v290_v54  ;;  %v301_v29 = vld [vmem:[#allocation2 + $0x28] sm:$0xff] }
  0xdf   : > { %879 = vst [vmem:[#allocation2] sm:$0xff] %v863_v30 }
  0xe0   : > { %882 = vst [vmem:[#allocation2 + $0x50] sm:$0xff] %v866_v31 }
  0xe1   : > { %v759_v32 = vpop.f32.mrf.mxu2 }
  0xe2   : > { %v778_v34 = vpop.f32.mrf.mxu3  ;;  %v724_v35 = vpop.f32.mrf.mxu0 }
  0xe3   : > { %v779_v36 = vadd.f32 %v778_v34, %v759_v32  ;;  %v743_v38 = vpop.f32.mrf.mxu1 }
  0xe4   : > { %v744_v39 = vadd.f32 %v743_v38, %v724_v35 }
  0xe5   : > { %v867_v40 = vadd.f32 %v779_v36, %v291_v33 }
  0xe6   : > { %v870_v41 = vadd.f32 %v744_v39, %v294_v37 }
  0xe7   : > { %883 = vst [vmem:[#allocation2 + $0x68] sm:$0xff] %v867_v40 }
  0xe8   : > { %886 = vst [vmem:[#allocation2 + $0x40] sm:$0xff] %v870_v41 }
  0xe9   : > { %v762_v42 = vpop.f32.mrf.mxu2 }
  0xea   : > { %v781_v44 = vpop.f32.mrf.mxu3  ;;  %v726_v45 = vpop.f32.mrf.mxu0 }
  0xeb   : > { %v782_v46 = vadd.f32 %v781_v44, %v762_v42  ;;  %v745_v48 = vpop.f32.mrf.mxu1 }
  0xec   : > { %v746_v50 = vadd.f32 %v745_v48, %v726_v45 }
  0xed   : > { %v871_v51 = vadd.f32 %v782_v46, %v295_v43 }
  0xee   : > { %v874_v52 = vadd.f32 %v746_v50, %v298_v47 }
  0xef   : > { %887 = vst [vmem:[#allocation2 + $0x20] sm:$0xff] %v871_v51 }
  0xf0   : > { %890 = vst [vmem:[#allocation2 + $0x60] sm:$0xff] %v874_v52 }
  0xf1   : > { %v764_v53 = vpop.f32.mrf.mxu2 }
  0xf2   : > { %v783_v56 = vpop.f32.mrf.mxu3 }
  0xf3   : > { %v784_v57 = vadd.f32 %v783_v56, %v764_v53 }
  0xf4   : > { %v795_v58 = vpop.f32.mrf.mxu0 }
  0xf5   : > { %v814_v60 = vpop.f32.mrf.mxu1  ;;  %v875_v61 = vadd.f32 %v784_v57, %v299_v55 }
  0xf6   : > { %v815_v62 = vadd.f32 %v814_v60, %v795_v58 }
  0xf7   : > { %891 = vst [vmem:[#allocation2 + $0x70] sm:$0xff] %v875_v61 }
  0xf8   : > { %v864_v63 = vadd.f32 %v815_v62, %v288_v59 }
  0xf9   : > { %v833_v0 = vpop.f32.mrf.mxu2 }
  0xfa   : > { %880 = vst [vmem:[#allocation2 + $0x58] sm:$0xff] %v864_v63  ;;  %v852_v2 = vpop.f32.mrf.mxu3 }
  0xfb   : > { %v853_v3 = vadd.f32 %v852_v2, %v833_v0 }
  0xfc   : > { %v797_v4 = vpop.f32.mrf.mxu0 }
  0xfd   : > { %v816_v6 = vpop.f32.mrf.mxu1  ;;  %v865_v7 = vadd.f32 %v853_v3, %v289_v1 }
  0xfe   : > { %v817_v8 = vadd.f32 %v816_v6, %v797_v4 }
  0xff   : > { %881 = vst [vmem:[#allocation2 + $0x18] sm:$0xff] %v865_v7 }
 0x100   : > { %v868_v9 = vadd.f32 %v817_v8, %v292_v5 }
 0x101   : > { %v835_v10 = vpop.f32.mrf.mxu2 }
 0x102   : > { %884 = vst [vmem:[#allocation2 + $0x8] sm:$0xff] %v868_v9  ;;  %v854_v12 = vpop.f32.mrf.mxu3 }
 0x103   : > { %v855_v13 = vadd.f32 %v854_v12, %v835_v10 }
 0x104   : > { %v800_v14 = vpop.f32.mrf.mxu0 }
 0x105   : > { %v819_v16 = vpop.f32.mrf.mxu1  ;;  %v869_v17 = vadd.f32 %v855_v13, %v293_v11 }
 0x106   : > { %v820_v18 = vadd.f32 %v819_v16, %v800_v14 }
 0x107   : > { %885 = vst [vmem:[#allocation2 + $0x48] sm:$0xff] %v869_v17 }
 0x108   : > { %v872_v19 = vadd.f32 %v820_v18, %v296_v15 }
 0x109   : > { %v838_v20 = vpop.f32.mrf.mxu2 }
 0x10a   : > { %888 = vst [vmem:[#allocation2 + $0x10] sm:$0xff] %v872_v19  ;;  %v857_v22 = vpop.f32.mrf.mxu3 }
 0x10b   : > { %v858_v23 = vadd.f32 %v857_v22, %v838_v20 }
 0x10c   : > { %v802_v24 = vpop.f32.mrf.mxu0 }
 0x10d   : > { %v821_v25 = vpop.f32.mrf.mxu1  ;;  %v873_v26 = vadd.f32 %v858_v23, %v297_v21 }
 0x10e   : > { %v822_v27 = vadd.f32 %v821_v25, %v802_v24 }
 0x10f   : > { %889 = vst [vmem:[#allocation2 + $0x38] sm:$0xff] %v873_v26 }
 0x110   : > { %v876_v54 = vadd.f32 %v822_v27, %v300_v49 }
 0x111   : > { %v840_v28 = vpop.f32.mrf.mxu2 }
 0x112   : > { %892 = vst [vmem:[#allocation2 + $0x78] sm:$0xff] %v876_v54  ;;  %v859_v30 = vpop.f32.mrf.mxu3 }
 0x113   : > { %v860_v31 = vadd.f32 %v859_v30, %v840_v28  ;;  %897 = sbr.rel (%p1341_p11) target bundleno = 303 (0x12f), region = 78 }
 0x115   : > { %v877_v32 = vadd.f32 %v860_v31, %v301_v29 }
 0x117   : > { %893 = vst [vmem:[#allocation2 + $0x28] sm:$0xff] %v877_v32 }
 0x118   : > { %v898_v33 = vld [vmem:[#allocation2 + $0x30] sm:$0xff]  ;;  %v914_v34 = vld [vmem:[%s1802_s2] sm:$0xf]  ;;  %v900_v38 = vld [vmem:[#allocation2 + $0x58] sm:$0xff] }
 0x119   : > { %v899_v35 = vld [vmem:[#allocation2] sm:$0xff]  ;;  %v916_v36 = vperm.slane %v914_v34, 0  ;;  %v917_v37 = vperm.slane %v914_v34, 1  ;;  %v918_v39 = vperm.slane %v914_v34, 2  ;;  %v901_v40 = vld [vmem:[#allocation2 + $0x18] sm:$0xff]  ;;  %v919_v41 = vperm.slane %v914_v34, 3 }
 0x11a   : > { %v902_v42 = vld [vmem:[#allocation2 + $0x50] sm:$0xff]  ;;  %v903_v43 = vld [vmem:[#allocation2 + $0x68] sm:$0xff]  ;;  %v906_v53 = vld [vmem:[#allocation2 + $0x40] sm:$0xff] }
 0x11b   : > { %v904_v44 = vld [vmem:[#allocation2 + $0x8] sm:$0xff]  ;;  %v924_v45 = vadd.f32 %v916_v36, %v898_v33  ;;  %v925_v46 = vadd.f32 %v917_v37, %v899_v35  ;;  %v926_v47 = vadd.f32 %v918_v39, %v900_v38  ;;  %v927_v48 = vadd.f32 %v919_v41, %v901_v40  ;;  %v907_v59 = vld [vmem:[#allocation2 + $0x20] sm:$0xff]  ;;  %v908_v62 = vld [vmem:[#allocation2 + $0x10] sm:$0xff] }
 0x11c   : > { %v905_v50 = vld [vmem:[#allocation2 + $0x48] sm:$0xff]  ;;  %v928_v51 = vadd.f32 %v916_v36, %v902_v42  ;;  %v929_v52 = vadd.f32 %v917_v37, %v903_v43  ;;  %v930_v58 = vadd.f32 %v918_v39, %v904_v44  ;;  %v932_v0 = vadd.f32 %v916_v36, %v906_v53  ;;  %v909_v1 = vld [vmem:[#allocation2 + $0x38] sm:$0xff]  ;;  %v910_v4 = vld [vmem:[#allocation2 + $0x60] sm:$0xff] }
 0x11d   : > { %v940_v55 = vmax.f32 %v924_v45, 0.0  ;;  %v941_v56 = vmax.f32 %v925_v46, 0.0  ;;  %v942_v57 = vmax.f32 %v926_v47, 0.0  ;;  %v943_v60 = vmax.f32 %v927_v48, 0.0  ;;  %v911_v7 = vld [vmem:[#allocation2 + $0x70] sm:$0xff]  ;;  %v912_v10 = vld [vmem:[#allocation2 + $0x78] sm:$0xff] }
 0x11e   : > { %v931_v61 = vadd.f32 %v919_v41, %v905_v50  ;;  %v944_v63 = vmax.f32 %v928_v51, 0.0  ;;  %v945_v2 = vmax.f32 %v929_v52, 0.0  ;;  %v933_v3 = vadd.f32 %v917_v37, %v907_v59  ;;  %v913_v13 = vld [vmem:[#allocation2 + $0x28] sm:$0xff] }
 0x11f   : > { %956 = vst [vmem:[%s1803_s3] sm:$0xff] %v940_v55  ;;  %v946_v5 = vmax.f32 %v930_v58, 0.0  ;;  %v934_v6 = vadd.f32 %v918_v39, %v908_v62  ;;  %v935_v9 = vadd.f32 %v919_v41, %v909_v1  ;;  %v948_v11 = vmax.f32 %v932_v0, 0.0 }
 0x120   : > { %957 = vst [vmem:[%s1803_s3 + $0x8] sm:$0xff] %v941_v56  ;;  %v947_v8 = vmax.f32 %v931_v61, 0.0  ;;  %v936_v12 = vadd.f32 %v916_v36, %v910_v4  ;;  %v949_v14 = vmax.f32 %v933_v3, 0.0  ;;  %v937_v15 = vadd.f32 %v917_v37, %v911_v7 }
 0x121   : > { %958 = vst [vmem:[%s1803_s3 + $0x10] sm:$0xff] %v942_v57  ;;  %v950_v16 = vmax.f32 %v934_v6, 0.0  ;;  %v938_v17 = vadd.f32 %v918_v39, %v912_v10  ;;  %v951_v18 = vmax.f32 %v935_v9, 0.0  ;;  %v939_v19 = vadd.f32 %v919_v41, %v913_v13 }
 0x122   : > { %959 = vst [vmem:[%s1803_s3 + $0x18] sm:$0xff] %v943_v60  ;;  %v952_v20 = vmax.f32 %v936_v12, 0.0  ;;  %v953_v21 = vmax.f32 %v937_v15, 0.0 }
 0x123   : > { %960 = vst [vmem:[%s1803_s3 + $0x20] sm:$0xff] %v944_v63  ;;  %v954_v22 = vmax.f32 %v938_v17, 0.0  ;;  %v955_v23 = vmax.f32 %v939_v19, 0.0 }
 0x124   : > { %961 = vst [vmem:[%s1803_s3 + $0x28] sm:$0xff] %v945_v2 }
 0x125   : > { %962 = vst [vmem:[%s1803_s3 + $0x30] sm:$0xff] %v946_v5 }
 0x126   : > { %963 = vst [vmem:[%s1803_s3 + $0x38] sm:$0xff] %v947_v8 }
 0x127   : > { %964 = vst [vmem:[%s1803_s3 + $0x40] sm:$0xff] %v948_v11 }
 0x128   : > { %965 = vst [vmem:[%s1803_s3 + $0x48] sm:$0xff] %v949_v14 }
 0x129   : > { %966 = vst [vmem:[%s1803_s3 + $0x50] sm:$0xff] %v950_v16 }
 0x12a   : > { %967 = vst [vmem:[%s1803_s3 + $0x58] sm:$0xff] %v951_v18 }
 0x12b   : > { %968 = vst [vmem:[%s1803_s3 + $0x60] sm:$0xff] %v952_v20 }
 0x12c   : > { %969 = vst [vmem:[%s1803_s3 + $0x68] sm:$0xff] %v953_v21 }
 0x12d   : > { %970 = vst [vmem:[%s1803_s3 + $0x70] sm:$0xff] %v954_v22 }
 0x12e   : > { %971 = vst [vmem:[%s1803_s3 + $0x78] sm:$0xff] %v955_v23 }
 0x12f PF: > { %s13_s16 = sadd.s32 1, %s1495_s16   ;;  %s1804_s12 = smov %s1483_s13 }
 0x130   : > { %p10_p12 = scmp.ge.s32.totalorder %s13_s16, 20   ;;  %s1805_s13 = smov %s1553_s20 }
 0x131   : > { %s1806_s14 = smov %s1491_s15  ;;  %s1807_s15 = smov %s1809_s17 }
 0x132   :  { %12 = sbr.rel (!%p10_p12) target bundleno = 3 (0x3), region = 116 }

// kernel: resnet_encoder_mtan_forward.37
= control target key start
LH: loop header
LB: loop body
LE: loop exit
PB: predicated region body
PF: predicated region fallthrough
CT: control target
= control target key end

     0   :  { %s1623_s15 = smov 0   ;;  %s1625_s16 = smov 0   ;;  %s1959_s0 = inlined_call_operand.vmem [shape: bf16[32,4608], index: 0, kind: input, shape index: {}]   ;;  %s1960_s1 = inlined_call_operand.vmem [shape: bf16[4608,512], index: 1, kind: input, shape index: {}]   ;;  %s1961_s2 = inlined_call_operand.vmem [shape: f32[1,512], index: 2, kind: input, shape index: {}]   ;;  %s1962_s3 = inlined_call_operand.vmem [shape: f32[32,512], index: 3, kind: input, shape index: {}]   ;;  %s1963_s4 = inlined_call_operand.vmem [shape: f32[32,512], index: 4, kind: output, shape index: {}]  }
   0x1   :  { %s1627_s17 = smov 0   ;;  %s1629_s18 = smov 0  }
   0x2   :  { %s1631_s19 = smov 0  }
   0x3 LB: > { %s23_s20 = sadd.s32 1, %s1591_s18  ;;  %p42_p1 = scmp.ne.s32.totalorder %s1583_s16, %s1579_s15  ;;  %s1595_s19 = sphi %s1631_s19, %s14_s19   ;;  %s1591_s18 = sphi %s1629_s18, %s1967_s18   ;;  %s1587_s17 = sphi %s1627_s17, %s1966_s17   ;;  %s1583_s16 = sphi %s1625_s16, %s1965_s16   ;;  %s1579_s15 = sphi %s1623_s15, %s1964_s15  }
   0x4   : > { %p24_p0 = scmp.ge.s32.totalorder %s23_s20, 18  ;;  %p43_p2 = scmp.eq.s32.totalorder %s1595_s19, 0 }
   0x5   : > { %s35_s22 = sadd.s32 1, %s1583_s16  ;;  %p1159_p5 = scmp.ge.s32.totalorder %s1595_s19, 18 }
   0x6   : > { %s1969_s20 = smov (%p24_p0, %s23_s20), 0  ;;  %p44_p3 = por %p43_p2, %p42_p1 }
   0x7   : > { %s31_s21 = ssub.s32 %s1591_s18, %s1969_s20  ;;  %180 = sbr.rel (%p1159_p5) target bundleno = 20 (0x14), region = 24 }
   0x8   : > { %p33_p4 = scmp.eq.s32.totalorder %s31_s21, 0 }
   0xa   : > { %s1658_s23 = scalar_select %p33_p4, %s1583_s16, %s35_s22  }
   0xc   : > { %183 = sbr.rel (!%p44_p3) target bundleno = 20 (0x14), region = 28  ;;  %s185_s24 = sand.u32 (%p44_p3), 1, %s1583_s16  }
   0xd   : > { %s1446_s25 = sshll.u32 (%p44_p3), %s1591_s18, 3  ;;  %s1160_s26 = sshll.u32 (%p44_p3), %s185_s24, 5 }
   0xe   : > { %s193_s29 = scalar_lea.vmem (%p44_p3), %s1959_s0, %s1446_s25  ;;  %s187_s30 = scalar_lea.vmem (%p44_p3), [#allocation3], %s1160_s26 }
   0xf   : > { %v228_v0 = vld [vmem:[%s193_s29] sm:$0xff] (%p44_p3)  ;;  %v230_v1 = vld [vmem:[%s193_s29 + $0x90] sm:$0xff] (%p44_p3) }
  0x10   : > { %v232_v2 = vld [vmem:[%s193_s29 + $0x120] sm:$0xff] (%p44_p3)  ;;  %229 = vst [vmem:[%s187_s30] sm:$0xff] (%p44_p3), %v228_v0  ;;  %v234_v3 = vld [vmem:[%s193_s29 + $0x1b0] sm:$0xff] (%p44_p3) }
  0x11   : > { %231 = vst [vmem:[%s187_s30 + $0x8] sm:$0xff] %v230_v1 }
  0x12   : > { %233 = vst [vmem:[%s187_s30 + $0x10] sm:$0xff] %v232_v2 }
  0x13   : > { %235 = vst [vmem:[%s187_s30 + $0x18] sm:$0xff] %v234_v3 }
  0x14 PF: > { %p1163_p6 = scmp.ge.s32.totalorder %s1595_s19, 1  ;;  %p250_p7 = scmp.lt.s32.totalorder %s1595_s19, 19 }
  0x16   : > { %p251_p8 = pnand %p1163_p6, %p250_p7 }
  0x17   : > { %s257_s5 = sand.u32 (!%p251_p8), 1, %s1579_s15   ;;  %s1165_s6 = sshll.u32 (!%p251_p8), %s1587_s17, 5 }
  0x18   : > { %254 = sbr.rel (%p251_p8) target bundleno = 305 (0x131), region = 70  ;;  %s1164_s7 = sshll.u32 (!%p251_p8), %s257_s5, 5 }
  0x19   : > { %p298_p9 = scmp.lt.s32.totalorder (!%p251_p8), %s1165_s6, 575  ;;  %s1675_s12 = scalar_lea.vmem (!%p251_p8), [#allocation3], %s1164_s7 }
  0x1a   : > { %p1168_p10 = scmp.ne.s32.totalorder (!%p251_p8), %s1587_s17, 0 }
  0x1d   : > { %s1971_s6 = smov (!%p298_p9, %s1165_s6), 575  ;;  %321 = sbr.rel (%p1168_p10) target bundleno = 51 (0x33), region = 78 }
  0x1e   : > { %s1447_s8 = sshll.u32 %s1971_s6, 4 }
  0x1f   : > { %s1673_s11 = scalar_lea.vmem %s1960_s1, %s1447_s8 }
  0x22   : > { %v1597_v4 = vmov 0.0  }
  0x23   : > { %322 = vst [vmem:[#allocation2 + $0x30] sm:$0xff] %v1597_v4 }
  0x24   : > { %323 = vst [vmem:[#allocation2] sm:$0xff] %v1597_v4 }
  0x25   : > { %324 = vst [vmem:[#allocation2 + $0x58] sm:$0xff] %v1597_v4 }
  0x26   : > { %325 = vst [vmem:[#allocation2 + $0x18] sm:$0xff] %v1597_v4 }
  0x27   : > { %326 = vst [vmem:[#allocation2 + $0x50] sm:$0xff] %v1597_v4 }
  0x28   : > { %327 = vst [vmem:[#allocation2 + $0x68] sm:$0xff] %v1597_v4 }
  0x29   : > { %328 = vst [vmem:[#allocation2 + $0x8] sm:$0xff] %v1597_v4 }
  0x2a   : > { %329 = vst [vmem:[#allocation2 + $0x48] sm:$0xff] %v1597_v4 }
  0x2b   : > { %330 = vst [vmem:[#allocation2 + $0x40] sm:$0xff] %v1597_v4 }
  0x2c   : > { %331 = vst [vmem:[#allocation2 + $0x20] sm:$0xff] %v1597_v4 }
  0x2d   : > { %332 = vst [vmem:[#allocation2 + $0x10] sm:$0xff] %v1597_v4 }
  0x2e   : > { %333 = vst [vmem:[#allocation2 + $0x38] sm:$0xff] %v1597_v4 }
  0x2f   : > { %334 = vst [vmem:[#allocation2 + $0x60] sm:$0xff] %v1597_v4 }
  0x30   : > { %335 = vst [vmem:[#allocation2 + $0x70] sm:$0xff] %v1597_v4 }
  0x31   : > { %336 = vst [vmem:[#allocation2 + $0x78] sm:$0xff] %v1597_v4 }
  0x32   : > { %337 = vst [vmem:[#allocation2 + $0x28] sm:$0xff] %v1597_v4 }
  0x33 PF: > { %v1299_v5 = vld [vmem:[%s1673_s11 + $0xe0] sm:$0xf]  ;;  %v1482_v6 = vld [vmem:[%s1673_s11 + $0xec] sm:$0xf0]  ;;  %v1480_v10 = vld [vmem:[%s1673_s11 + $0xe4] sm:$0xf] }
  0x34   : > { %v1427_v7 = vld [vmem:[%s1673_s11 + $0x1e0] sm:$0xf]  ;;  %v1300_v8 = vor.u32 %v1482_v6, %v1299_v5  ;;  %v1514_v9 = vld [vmem:[%s1673_s11 + $0x1ec] sm:$0xf0]  ;;  %v1301_v11 = vld [vmem:[%s1673_s11 + $0xf0] sm:$0xf0] }
  0x35   : > { %v1428_v12 = vor.u32 %v1514_v9, %v1427_v7  ;;  %v1304_v13 = vor.u32 %v1480_v10, %v1301_v11  ;;  %v1512_v14 = vld [vmem:[%s1673_s11 + $0x1e4] sm:$0xf]  ;;  %v1429_v15 = vld [vmem:[%s1673_s11 + $0x1f0] sm:$0xf0]  ;;  %v1283_v16 = vld [vmem:[%s1673_s11 + $0xc0] sm:$0xf] }
  0x36   : > { %762 = vmatpush.bf16.msra.mxu0 %v1300_v8  ;;  %v1432_v17 = vor.u32 %v1512_v14, %v1429_v15  ;;  %v1478_v18 = vld [vmem:[%s1673_s11 + $0xcc] sm:$0xf0]  ;;  %v1411_v19 = vld [vmem:[%s1673_s11 + $0x1c0] sm:$0xf]  ;;  %v1476_v23 = vld [vmem:[%s1673_s11 + $0xc4] sm:$0xf] }
  0x37   : > { %v1510_v20 = vld [vmem:[%s1673_s11 + $0x1cc] sm:$0xf0]  ;;  %781 = vmatpush.bf16.msra.mxu1 %v1428_v12  ;;  %800 = vmatpush.bf16.msra.mxu2 %v1304_v13  ;;  %v1284_v21 = vor.u32 %v1478_v18, %v1283_v16  ;;  %v1285_v24 = vld [vmem:[%s1673_s11 + $0xd0] sm:$0xf0]  ;;  %v1508_v25 = vld [vmem:[%s1673_s11 + $0x1c4] sm:$0xf] }
  0x38   : > { %v1412_v22 = vor.u32 %v1510_v20, %v1411_v19  ;;  %819 = vmatpush.bf16.msra.mxu3 %v1432_v17  ;;  %v1288_v26 = vor.u32 %v1476_v23, %v1285_v24  ;;  %v1413_v27 = vld [vmem:[%s1673_s11 + $0x1d0] sm:$0xf0]  ;;  %v1267_v28 = vld [vmem:[%s1673_s11 + $0xa0] sm:$0xf]  ;;  %v1474_v29 = vld [vmem:[%s1673_s11 + $0xac] sm:$0xf0] }
  0x39   : > { %v1416_v30 = vor.u32 %v1508_v25, %v1413_v27  ;;  %v1395_v31 = vld [vmem:[%s1673_s11 + $0x1a0] sm:$0xf]  ;;  %v1506_v32 = vld [vmem:[%s1673_s11 + $0x1ac] sm:$0xf0]  ;;  %v1472_v33 = vld [vmem:[%s1673_s11 + $0xa4] sm:$0xf]  ;;  %v1268_v34 = vor.u32 %v1474_v29, %v1267_v28 }
  0x3a   : > { %763 = vmatpush.bf16.msra.mxu0 %v1284_v21  ;;  %v1269_v35 = vld [vmem:[%s1673_s11 + $0xb0] sm:$0xf0]  ;;  %v1504_v36 = vld [vmem:[%s1673_s11 + $0x1a4] sm:$0xf]  ;;  %v1396_v38 = vor.u32 %v1506_v32, %v1395_v31  ;;  %v1251_v40 = vld [vmem:[%s1673_s11 + $0x80] sm:$0xf] }
  0x3b   : > { %v1397_v37 = vld [vmem:[%s1673_s11 + $0x1b0] sm:$0xf0]  ;;  %782 = vmatpush.bf16.msra.mxu1 %v1412_v22  ;;  %801 = vmatpush.bf16.msra.mxu2 %v1288_v26  ;;  %v1272_v39 = vor.u32 %v1472_v33, %v1269_v35  ;;  %v1470_v41 = vld [vmem:[%s1673_s11 + $0x8c] sm:$0xf0]  ;;  %v1379_v42 = vld [vmem:[%s1673_s11 + $0x180] sm:$0xf] }
  0x3c   : > { %820 = vmatpush.bf16.msra.mxu3 %v1416_v30  ;;  %v1400_v43 = vor.u32 %v1504_v36, %v1397_v37  ;;  %v1502_v44 = vld [vmem:[%s1673_s11 + $0x18c] sm:$0xf0]  ;;  %v1468_v45 = vld [vmem:[%s1673_s11 + $0x84] sm:$0xf]  ;;  %v1253_v46 = vld [vmem:[%s1673_s11 + $0x90] sm:$0xf0]  ;;  %v1252_v49 = vor.u32 %v1470_v41, %v1251_v40 }
  0x3d   : > { %v1500_v47 = vld [vmem:[%s1673_s11 + $0x184] sm:$0xf]  ;;  %v1381_v48 = vld [vmem:[%s1673_s11 + $0x190] sm:$0xf0]  ;;  %v1380_v50 = vor.u32 %v1502_v44, %v1379_v42  ;;  %v1256_v51 = vor.u32 %v1468_v45, %v1253_v46  ;;  %v1235_v52 = vld [vmem:[%s1673_s11 + $0x60] sm:$0xf] }
  0x3e   : > { %764 = vmatpush.bf16.msra.mxu0 %v1268_v34  ;;  %v1466_v53 = vld [vmem:[%s1673_s11 + $0x6c] sm:$0xf0]  ;;  %v1363_v54 = vld [vmem:[%s1673_s11 + $0x160] sm:$0xf]  ;;  %v1384_v55 = vor.u32 %v1500_v47, %v1381_v48  ;;  %v1464_v57 = vld [vmem:[%s1673_s11 + $0x64] sm:$0xf] }
  0x3f   : > { %783 = vmatpush.bf16.msra.mxu1 %v1396_v38  ;;  %802 = vmatpush.bf16.msra.mxu2 %v1272_v39  ;;  %v1498_v56 = vld [vmem:[%s1673_s11 + $0x16c] sm:$0xf0]  ;;  %v1237_v58 = vld [vmem:[%s1673_s11 + $0x70] sm:$0xf0]  ;;  %v1496_v59 = vld [vmem:[%s1673_s11 + $0x164] sm:$0xf]  ;;  %v1236_v61 = vor.u32 %v1466_v53, %v1235_v52 }
  0x40   : > { %821 = vmatpush.bf16.msra.mxu3 %v1400_v43  ;;  %v1365_v60 = vld [vmem:[%s1673_s11 + $0x170] sm:$0xf0]  ;;  %v1364_v62 = vor.u32 %v1498_v56, %v1363_v54  ;;  %v1240_v63 = vor.u32 %v1464_v57, %v1237_v58  ;;  %v1219_v0 = vld [vmem:[%s1673_s11 + $0x40] sm:$0xf]  ;;  %v1462_v1 = vld [vmem:[%s1673_s11 + $0x4c] sm:$0xf0] }
  0x41   : > { %v1347_v2 = vld [vmem:[%s1673_s11 + $0x140] sm:$0xf]  ;;  %v1368_v3 = vor.u32 %v1496_v59, %v1365_v60  ;;  %v1494_v4 = vld [vmem:[%s1673_s11 + $0x14c] sm:$0xf0]  ;;  %v1460_v5 = vld [vmem:[%s1673_s11 + $0x44] sm:$0xf]  ;;  %v1220_v9 = vor.u32 %v1462_v1, %v1219_v0 }
  0x42   : > { %765 = vmatpush.bf16.msra.mxu0 %v1252_v49  ;;  %v1221_v6 = vld [vmem:[%s1673_s11 + $0x50] sm:$0xf0]  ;;  %v1492_v7 = vld [vmem:[%s1673_s11 + $0x144] sm:$0xf]  ;;  %v1348_v10 = vor.u32 %v1494_v4, %v1347_v2  ;;  %v1203_v12 = vld [vmem:[%s1673_s11 + $0x20] sm:$0xf] }
  0x43   : > { %784 = vmatpush.bf16.msra.mxu1 %v1380_v50  ;;  %803 = vmatpush.bf16.msra.mxu2 %v1256_v51  ;;  %v1349_v8 = vld [vmem:[%s1673_s11 + $0x150] sm:$0xf0]  ;;  %v1224_v11 = vor.u32 %v1460_v5, %v1221_v6  ;;  %v1458_v13 = vld [vmem:[%s1673_s11 + $0x2c] sm:$0xf0]  ;;  %v1331_v14 = vld [vmem:[%s1673_s11 + $0x120] sm:$0xf] }
  0x44   : > { %822 = vmatpush.bf16.msra.mxu3 %v1384_v55  ;;  %v1352_v15 = vor.u32 %v1492_v7, %v1349_v8  ;;  %v1490_v16 = vld [vmem:[%s1673_s11 + $0x12c] sm:$0xf0]  ;;  %v1456_v17 = vld [vmem:[%s1673_s11 + $0x24] sm:$0xf]  ;;  %v1205_v18 = vld [vmem:[%s1673_s11 + $0x30] sm:$0xf0]  ;;  %v1204_v21 = vor.u32 %v1458_v13, %v1203_v12 }
  0x45   : > { %v1488_v19 = vld [vmem:[%s1673_s11 + $0x124] sm:$0xf]  ;;  %v1333_v20 = vld [vmem:[%s1673_s11 + $0x130] sm:$0xf0]  ;;  %v1187_v22 = vld [vmem:[%s1673_s11] sm:$0xf]  ;;  %v1332_v24 = vor.u32 %v1490_v16, %v1331_v14  ;;  %v1208_v25 = vor.u32 %v1456_v17, %v1205_v18 }
  0x46   : > { %766 = vmatpush.bf16.msra.mxu0 %v1236_v61  ;;  %v1454_v23 = vld [vmem:[%s1673_s11 + $0xc] sm:$0xf0]  ;;  %v1315_v26 = vld [vmem:[%s1673_s11 + $0x100] sm:$0xf]  ;;  %v1452_v28 = vld [vmem:[%s1673_s11 + $0x4] sm:$0xf]  ;;  %v1336_v29 = vor.u32 %v1488_v19, %v1333_v20 }
  0x47   : > { %785 = vmatpush.bf16.msra.mxu1 %v1364_v62  ;;  %804 = vmatpush.bf16.msra.mxu2 %v1240_v63  ;;  %v1486_v27 = vld [vmem:[%s1673_s11 + $0x10c] sm:$0xf0]  ;;  %v1189_v30 = vld [vmem:[%s1673_s11 + $0x10] sm:$0xf0]  ;;  %v1484_v31 = vld [vmem:[%s1673_s11 + $0x104] sm:$0xf]  ;;  %v1188_v36 = vor.u32 %v1454_v23, %v1187_v22 }
  0x48   : > { %823 = vmatpush.bf16.msra.mxu3 %v1368_v3  ;;  %v1317_v32 = vld [vmem:[%s1673_s11 + $0x110] sm:$0xf0]  ;;  %v1171_v33 = vld [vmem:[%s1675_s12] sm:$0xf]  ;;  %v1481_v34 = vld [vmem:[%s1673_s11 + $0xec] sm:$0xf]  ;;  %v1316_v40 = vor.u32 %v1486_v27, %v1315_v26  ;;  %v1192_v41 = vor.u32 %v1452_v28, %v1189_v30 }
  0x49   : > { %v1309_v35 = vld [vmem:[%s1673_s11 + $0xf8] sm:$0xf0]  ;;  %v1449_v37 = vld [vmem:[%s1675_s12 + $0x4] sm:$0xf0]  ;;  %v1513_v38 = vld [vmem:[%s1673_s11 + $0x1ec] sm:$0xf]  ;;  %v1320_v44 = vor.u32 %v1484_v31, %v1317_v32 }
  0x4a   : > { %767 = vmatpush.bf16.msra.mxu0 %v1220_v9  ;;  %v1437_v39 = vld [vmem:[%s1673_s11 + $0x1f8] sm:$0xf0]  ;;  %v1448_v42 = vld [vmem:[%s1675_s12 + $0x4] sm:$0xf]  ;;  %v1173_v43 = vld [vmem:[%s1675_s12 + $0x8] sm:$0xf0]  ;;  %v1312_v45 = vor.u32 %v1481_v34, %v1309_v35  ;;  %v1753_v49 = vor.u32 %v1449_v37, %v1171_v33 }
  0x4b   : > { %786 = vmatpush.bf16.msra.mxu1 %v1348_v10  ;;  %805 = vmatpush.bf16.msra.mxu2 %v1224_v11  ;;  %v1307_v46 = vld [vmem:[%s1673_s11 + $0xe8] sm:$0xf]  ;;  %v1483_v47 = vld [vmem:[%s1673_s11 + $0xf4] sm:$0xf0]  ;;  %v1440_v50 = vor.u32 %v1513_v38, %v1437_v39  ;;  %v1477_v52 = vld [vmem:[%s1673_s11 + $0xcc] sm:$0xf]  ;;  %v1758_v54 = vor.u32 %v1448_v42, %v1173_v43 }
  0x4c   : > { %824 = vmatpush.bf16.msra.mxu3 %v1352_v15  ;;  %v1435_v48 = vld [vmem:[%s1673_s11 + $0x1e8] sm:$0xf]  ;;  %v1515_v51 = vld [vmem:[%s1673_s11 + $0x1f4] sm:$0xf0]  ;;  %v1293_v53 = vld [vmem:[%s1673_s11 + $0xd8] sm:$0xf0]  ;;  %v1308_v57 = vor.u32 %v1483_v47, %v1307_v46 }
  0x4d   : > { %v1509_v55 = vld [vmem:[%s1673_s11 + $0x1cc] sm:$0xf]  ;;  %v1421_v56 = vld [vmem:[%s1673_s11 + $0x1d8] sm:$0xf0]  ;;  %v1436_v58 = vor.u32 %v1515_v51, %v1435_v48  ;;  %v1296_v59 = vor.u32 %v1477_v52, %v1293_v53  ;;  %v1291_v60 = vld [vmem:[%s1673_s11 + $0xc8] sm:$0xf] }
  0x4e   : > { %768 = vmatpush.bf16.msra.mxu0 %v1204_v21  ;;  %v1479_v61 = vld [vmem:[%s1673_s11 + $0xd4] sm:$0xf0]  ;;  %v1419_v62 = vld [vmem:[%s1673_s11 + $0x1c8] sm:$0xf]  ;;  %v1424_v63 = vor.u32 %v1509_v55, %v1421_v56  ;;  %v1473_v1 = vld [vmem:[%s1673_s11 + $0xac] sm:$0xf] }
  0x4f   : > { %787 = vmatpush.bf16.msra.mxu1 %v1332_v24  ;;  %806 = vmatpush.bf16.msra.mxu2 %v1208_v25  ;;  %v1511_v0 = vld [vmem:[%s1673_s11 + $0x1d4] sm:$0xf0]  ;;  %v1277_v2 = vld [vmem:[%s1673_s11 + $0xb8] sm:$0xf0]  ;;  %v1505_v3 = vld [vmem:[%s1673_s11 + $0x1ac] sm:$0xf]  ;;  %v1292_v5 = vor.u32 %v1479_v61, %v1291_v60 }
  0x50   : > { %825 = vmatpush.bf16.msra.mxu3 %v1336_v29  ;;  %v1405_v4 = vld [vmem:[%s1673_s11 + $0x1b8] sm:$0xf0]  ;;  %v1420_v6 = vor.u32 %v1511_v0, %v1419_v62  ;;  %v1280_v7 = vor.u32 %v1473_v1, %v1277_v2  ;;  %v1275_v8 = vld [vmem:[%s1673_s11 + $0xa8] sm:$0xf]  ;;  %v1475_v9 = vld [vmem:[%s1673_s11 + $0xb4] sm:$0xf0] }
  0x51   : > { %v1403_v10 = vld [vmem:[%s1673_s11 + $0x1a8] sm:$0xf]  ;;  %v1408_v11 = vor.u32 %v1505_v3, %v1405_v4  ;;  %v1507_v12 = vld [vmem:[%s1673_s11 + $0x1b4] sm:$0xf0]  ;;  %v1469_v13 = vld [vmem:[%s1673_s11 + $0x8c] sm:$0xf]  ;;  %v1276_v17 = vor.u32 %v1475_v9, %v1275_v8 }
  0x52   : > { %769 = vmatpush.bf16.msra.mxu0 %v1188_v36  ;;  %v1261_v14 = vld [vmem:[%s1673_s11 + $0x98] sm:$0xf0]  ;;  %v1501_v15 = vld [vmem:[%s1673_s11 + $0x18c] sm:$0xf]  ;;  %v1259_v18 = vld [vmem:[%s1673_s11 + $0x88] sm:$0xf]  ;;  %v1404_v19 = vor.u32 %v1507_v12, %v1403_v10 }
  0x53   : > { %788 = vmatpush.bf16.msra.mxu1 %v1316_v40  ;;  %807 = vmatpush.bf16.msra.mxu2 %v1192_v41  ;;  %v1389_v16 = vld [vmem:[%s1673_s11 + $0x198] sm:$0xf0]  ;;  %v1264_v20 = vor.u32 %v1469_v13, %v1261_v14  ;;  %v1471_v21 = vld [vmem:[%s1673_s11 + $0x94] sm:$0xf0]  ;;  %v1387_v22 = vld [vmem:[%s1673_s11 + $0x188] sm:$0xf] }
  0x54   : > { %826 = vmatpush.bf16.msra.mxu3 %v1320_v44  ;;  %v1503_v23 = vld [vmem:[%s1673_s11 + $0x194] sm:$0xf0]  ;;  %v1392_v24 = vor.u32 %v1501_v15, %v1389_v16  ;;  %v1179_v25 = vld [vmem:[%s1675_s12 + $0x10] sm:$0xf]  ;;  %v1465_v26 = vld [vmem:[%s1673_s11 + $0x6c] sm:$0xf]  ;;  %v1260_v31 = vor.u32 %v1471_v21, %v1259_v18 }
  0x55   : > { %770 = vmatmul.bf16.vlgmr.msra.gmra.mxu0 %v1753_v49  ;;  %v1245_v27 = vld [vmem:[%s1673_s11 + $0x78] sm:$0xf0]  ;;  %v1451_v28 = vld [vmem:[%s1675_s12 + $0x14] sm:$0xf0]  ;;  %v1497_v29 = vld [vmem:[%s1673_s11 + $0x16c] sm:$0xf]  ;;  %v1388_v34 = vor.u32 %v1503_v23, %v1387_v22 }
  0x56   : > { %789 = vmatmul.bf16.vlgmr.msra.gmra.mxu1 %v1758_v54  ;;  %808 = vmatmul.bf16.vlgmr.msra.gmra.mxu2 %v1753_v49  ;;  %v1373_v30 = vld [vmem:[%s1673_s11 + $0x178] sm:$0xf0]  ;;  %v1450_v32 = vld [vmem:[%s1675_s12 + $0x14] sm:$0xf]  ;;  %v1248_v35 = vor.u32 %v1465_v26, %v1245_v27  ;;  %v1243_v36 = vld [vmem:[%s1673_s11 + $0x68] sm:$0xf]  ;;  %v1797_v39 = vor.u32 %v1451_v28, %v1179_v25 }
  0x57   : > { %876 = vmatpush.bf16.msrb.mxu2 %v1312_v45  ;;  %827 = vmatmul.bf16.vlgmr.msra.gmra.mxu3 %v1758_v54  ;;  %v1181_v33 = vld [vmem:[%s1675_s12 + $0x18] sm:$0xf0]  ;;  %v1467_v37 = vld [vmem:[%s1673_s11 + $0x74] sm:$0xf0]  ;;  %v1371_v38 = vld [vmem:[%s1673_s11 + $0x168] sm:$0xf]  ;;  %v1376_v40 = vor.u32 %v1497_v29, %v1373_v30 }
  0x58   : > { %895 = vmatpush.bf16.msrb.mxu3 %v1440_v50  ;;  %838 = vmatpush.bf16.msrb.mxu0 %v1308_v57  ;;  %v1499_v41 = vld [vmem:[%s1673_s11 + $0x174] sm:$0xf0]  ;;  %v1461_v42 = vld [vmem:[%s1673_s11 + $0x4c] sm:$0xf]  ;;  %v1229_v43 = vld [vmem:[%s1673_s11 + $0x58] sm:$0xf0]  ;;  %v1802_v44 = vor.u32 %v1450_v32, %v1181_v33  ;;  %v1244_v47 = vor.u32 %v1467_v37, %v1243_v36 }
  0x59   : > { %857 = vmatpush.bf16.msrb.mxu1 %v1436_v58  ;;  %v1493_v45 = vld [vmem:[%s1673_s11 + $0x14c] sm:$0xf]  ;;  %v1357_v46 = vld [vmem:[%s1673_s11 + $0x158] sm:$0xf0]  ;;  %v1372_v48 = vor.u32 %v1499_v41, %v1371_v38  ;;  %v1232_v50 = vor.u32 %v1461_v42, %v1229_v43  ;;  %v1227_v51 = vld [vmem:[%s1673_s11 + $0x48] sm:$0xf] }
  0x5a   : > { %v1463_v52 = vld [vmem:[%s1673_s11 + $0x54] sm:$0xf0]  ;;  %v1355_v53 = vld [vmem:[%s1673_s11 + $0x148] sm:$0xf]  ;;  %v1360_v55 = vor.u32 %v1493_v45, %v1357_v46  ;;  %v1457_v57 = vld [vmem:[%s1673_s11 + $0x2c] sm:$0xf] }
  0x5b   : > { %877 = vmatpush.bf16.msrb.mxu2 %v1296_v59  ;;  %v1495_v56 = vld [vmem:[%s1673_s11 + $0x154] sm:$0xf0]  ;;  %v1213_v58 = vld [vmem:[%s1673_s11 + $0x38] sm:$0xf0]  ;;  %v1489_v59 = vld [vmem:[%s1673_s11 + $0x12c] sm:$0xf]  ;;  %v1228_v61 = vor.u32 %v1463_v52, %v1227_v51 }
  0x5c   : > { %896 = vmatpush.bf16.msrb.mxu3 %v1424_v63  ;;  %839 = vmatpush.bf16.msrb.mxu0 %v1292_v5  ;;  %v1341_v60 = vld [vmem:[%s1673_s11 + $0x138] sm:$0xf0]  ;;  %v1356_v62 = vor.u32 %v1495_v56, %v1355_v53  ;;  %v1216_v63 = vor.u32 %v1457_v57, %v1213_v58  ;;  %v1211_v0 = vld [vmem:[%s1673_s11 + $0x28] sm:$0xf]  ;;  %v1459_v1 = vld [vmem:[%s1673_s11 + $0x34] sm:$0xf0] }
  0x5d   : > { %858 = vmatpush.bf16.msrb.mxu1 %v1420_v6  ;;  %v1339_v2 = vld [vmem:[%s1673_s11 + $0x128] sm:$0xf]  ;;  %v1344_v3 = vor.u32 %v1489_v59, %v1341_v60  ;;  %v1491_v4 = vld [vmem:[%s1673_s11 + $0x134] sm:$0xf0]  ;;  %v1453_v5 = vld [vmem:[%s1673_s11 + $0xc] sm:$0xf]  ;;  %v1212_v9 = vor.u32 %v1459_v1, %v1211_v0 }
  0x5e   : > { %v1197_v6 = vld [vmem:[%s1673_s11 + $0x18] sm:$0xf0]  ;;  %v1340_v10 = vor.u32 %v1491_v4, %v1339_v2  ;;  %v1195_v12 = vld [vmem:[%s1673_s11 + $0x8] sm:$0xf]  ;;  %v1455_v13 = vld [vmem:[%s1673_s11 + $0x14] sm:$0xf0] }
  0x5f   : > { %878 = vmatpush.bf16.msrb.mxu2 %v1280_v7  ;;  %v1485_v7 = vld [vmem:[%s1673_s11 + $0x10c] sm:$0xf]  ;;  %v1325_v8 = vld [vmem:[%s1673_s11 + $0x118] sm:$0xf0]  ;;  %v1323_v15 = vld [vmem:[%s1673_s11 + $0x108] sm:$0xf] }
  0x60   : > { %897 = vmatpush.bf16.msrb.mxu3 %v1408_v11  ;;  %840 = vmatpush.bf16.msrb.mxu0 %v1276_v17  ;;  %v1200_v11 = vor.u32 %v1453_v5, %v1197_v6  ;;  %v1328_v14 = vor.u32 %v1485_v7, %v1325_v8  ;;  %v1487_v16 = vld [vmem:[%s1673_s11 + $0x114] sm:$0xf0]  ;;  %v1196_v17 = vor.u32 %v1455_v13, %v1195_v12  ;;  %v343_v33 = vld [vmem:[#allocation2 + $0x68] sm:$0xff]  ;;  %v346_v37 = vld [vmem:[#allocation2 + $0x40] sm:$0xff]  ;;  %p1441_p11 = scmp.ne.s32.totalorder %s1587_s17, 17 }
  0x61   : > { %859 = vmatpush.bf16.msrb.mxu1 %v1404_v19  ;;  %v1324_v18 = vor.u32 %v1487_v16, %v1323_v15  ;;  %v347_v43 = vld [vmem:[#allocation2 + $0x20] sm:$0xff]  ;;  %v340_v59 = vld [vmem:[#allocation2 + $0x58] sm:$0xff]  ;;  %v344_v5 = vld [vmem:[#allocation2 + $0x8] sm:$0xff] }
  0x62   : > { %v341_v1 = vld [vmem:[#allocation2 + $0x18] sm:$0xff]  ;;  %v348_v15 = vld [vmem:[#allocation2 + $0x10] sm:$0xff] }
  0x63   : > { %879 = vmatpush.bf16.msrb.mxu2 %v1264_v20  ;;  %v338_v20 = vld [vmem:[#allocation2 + $0x30] sm:$0xff] }
  0x64   : > { %898 = vmatpush.bf16.msrb.mxu3 %v1392_v24  ;;  %841 = vmatpush.bf16.msrb.mxu0 %v1260_v31 }
  0x65   : > { %860 = vmatpush.bf16.msrb.mxu1 %v1388_v34  ;;  %775 = vmatmul.bf16.gmra.mxu0 %v1797_v39 }
  0x66   : > { %794 = vmatmul.bf16.gmra.mxu1 %v1802_v44  ;;  %813 = vmatmul.bf16.gmra.mxu2 %v1797_v39 }
  0x67   : > { %880 = vmatpush.bf16.msrb.mxu2 %v1248_v35  ;;  %832 = vmatmul.bf16.gmra.mxu3 %v1802_v44 }
  0x68   : > { %899 = vmatpush.bf16.msrb.mxu3 %v1376_v40  ;;  %842 = vmatpush.bf16.msrb.mxu0 %v1244_v47  ;;  %v350_v47 = vld [vmem:[#allocation2 + $0x60] sm:$0xff] }
  0x69   : > { %861 = vmatpush.bf16.msrb.mxu1 %v1372_v48 }
  0x6b   : > { %881 = vmatpush.bf16.msrb.mxu2 %v1232_v50 }
  0x6c   : > { %900 = vmatpush.bf16.msrb.mxu3 %v1360_v55  ;;  %843 = vmatpush.bf16.msrb.mxu0 %v1228_v61  ;;  %v351_v55 = vld [vmem:[#allocation2 + $0x70] sm:$0xff] }
  0x6d   : > { %862 = vmatpush.bf16.msrb.mxu1 %v1356_v62 }
  0x6f   : > { %882 = vmatpush.bf16.msrb.mxu2 %v1216_v63 }
  0x70   : > { %901 = vmatpush.bf16.msrb.mxu3 %v1344_v3  ;;  %844 = vmatpush.bf16.msrb.mxu0 %v1212_v9 }
  0x71   : > { %863 = vmatpush.bf16.msrb.mxu1 %v1340_v10 }
  0x73   : > { %883 = vmatpush.bf16.msrb.mxu2 %v1200_v11  ;;  %v345_v11 = vld [vmem:[#allocation2 + $0x48] sm:$0xff] }
  0x74   : > { %902 = vmatpush.bf16.msrb.mxu3 %v1328_v14  ;;  %845 = vmatpush.bf16.msrb.mxu0 %v1196_v17 }
  0x75   : > { %864 = vmatpush.bf16.msrb.mxu1 %v1324_v18 }
  0x76   : > { %884 = vmatmul.bf16.vlgmr.msrb.gmra.mxu2 %v1753_v49 }
  0x77   : > { %846 = vmatmul.bf16.vlgmr.msrb.gmra.mxu0 %v1753_v49  ;;  %903 = vmatmul.bf16.vlgmr.msrb.gmra.mxu3 %v1758_v54  ;;  %v339_v49 = vld [vmem:[#allocation2] sm:$0xff] }
  0x78   : > { %865 = vmatmul.bf16.vlgmr.msrb.gmra.mxu1 %v1758_v54  ;;  %v342_v54 = vld [vmem:[#allocation2 + $0x50] sm:$0xff] }
  0x86   : > { %889 = vmatmul.bf16.gmra.mxu2 %v1797_v39 }
  0x87   : > { %851 = vmatmul.bf16.gmra.mxu0 %v1797_v39  ;;  %908 = vmatmul.bf16.gmra.mxu3 %v1802_v44 }
  0x88   : > { %870 = vmatmul.bf16.gmra.mxu1 %v1802_v44 }
  0xd2   : > { %v771_v19 = vpop.f32.mrf.mxu0 }
  0xd3   : > { %v790_v21 = vpop.f32.mrf.mxu1 }
  0xd4   : > { %v791_v22 = vadd.f32 %v790_v21, %v771_v19  ;;  %v349_v21 = vld [vmem:[#allocation2 + $0x38] sm:$0xff] }
  0xd6   : > { %v914_v23 = vadd.f32 %v791_v22, %v338_v20 }
  0xd8   : > { %930 = vst [vmem:[#allocation2 + $0x30] sm:$0xff] %v914_v23 }
  0xd9   : > { %v809_v24 = vpop.f32.mrf.mxu2 }
  0xda   : > { %v828_v25 = vpop.f32.mrf.mxu3  ;;  %v773_v26 = vpop.f32.mrf.mxu0 }
  0xdb   : > { %v829_v27 = vadd.f32 %v828_v25, %v809_v24  ;;  %v792_v28 = vpop.f32.mrf.mxu1 }
  0xdc   : > { %v793_v29 = vadd.f32 %v792_v28, %v773_v26 }
  0xdd   : > { %v915_v30 = vadd.f32 %v829_v27, %v339_v49  ;;  %v352_v49 = vld [vmem:[#allocation2 + $0x78] sm:$0xff] }
  0xde   : > { %v918_v31 = vadd.f32 %v793_v29, %v342_v54  ;;  %v353_v29 = vld [vmem:[#allocation2 + $0x28] sm:$0xff] }
  0xdf   : > { %931 = vst [vmem:[#allocation2] sm:$0xff] %v915_v30 }
  0xe0   : > { %934 = vst [vmem:[#allocation2 + $0x50] sm:$0xff] %v918_v31 }
  0xe1   : > { %v811_v32 = vpop.f32.mrf.mxu2 }
  0xe2   : > { %v830_v34 = vpop.f32.mrf.mxu3  ;;  %v776_v35 = vpop.f32.mrf.mxu0 }
  0xe3   : > { %v831_v36 = vadd.f32 %v830_v34, %v811_v32  ;;  %v795_v38 = vpop.f32.mrf.mxu1 }
  0xe4   : > { %v796_v39 = vadd.f32 %v795_v38, %v776_v35 }
  0xe5   : > { %v919_v40 = vadd.f32 %v831_v36, %v343_v33 }
  0xe6   : > { %v922_v41 = vadd.f32 %v796_v39, %v346_v37 }
  0xe7   : > { %935 = vst [vmem:[#allocation2 + $0x68] sm:$0xff] %v919_v40 }
  0xe8   : > { %938 = vst [vmem:[#allocation2 + $0x40] sm:$0xff] %v922_v41 }
  0xe9   : > { %v814_v42 = vpop.f32.mrf.mxu2 }
  0xea   : > { %v833_v44 = vpop.f32.mrf.mxu3  ;;  %v778_v45 = vpop.f32.mrf.mxu0 }
  0xeb   : > { %v834_v46 = vadd.f32 %v833_v44, %v814_v42  ;;  %v797_v48 = vpop.f32.mrf.mxu1 }
  0xec   : > { %v798_v50 = vadd.f32 %v797_v48, %v778_v45 }
  0xed   : > { %v923_v51 = vadd.f32 %v834_v46, %v347_v43 }
  0xee   : > { %v926_v52 = vadd.f32 %v798_v50, %v350_v47 }
  0xef   : > { %939 = vst [vmem:[#allocation2 + $0x20] sm:$0xff] %v923_v51 }
  0xf0   : > { %942 = vst [vmem:[#allocation2 + $0x60] sm:$0xff] %v926_v52 }
  0xf1   : > { %v816_v53 = vpop.f32.mrf.mxu2 }
  0xf2   : > { %v835_v56 = vpop.f32.mrf.mxu3 }
  0xf3   : > { %v836_v57 = vadd.f32 %v835_v56, %v816_v53 }
  0xf4   : > { %v847_v58 = vpop.f32.mrf.mxu0 }
  0xf5   : > { %v866_v60 = vpop.f32.mrf.mxu1  ;;  %v927_v61 = vadd.f32 %v836_v57, %v351_v55 }
  0xf6   : > { %v867_v62 = vadd.f32 %v866_v60, %v847_v58 }
  0xf7   : > { %943 = vst [vmem:[#allocation2 + $0x70] sm:$0xff] %v927_v61 }
  0xf8   : > { %v916_v63 = vadd.f32 %v867_v62, %v340_v59 }
  0xf9   : > { %v885_v0 = vpop.f32.mrf.mxu2 }
  0xfa   : > { %932 = vst [vmem:[#allocation2 + $0x58] sm:$0xff] %v916_v63  ;;  %v904_v2 = vpop.f32.mrf.mxu3 }
  0xfb   : > { %v905_v3 = vadd.f32 %v904_v2, %v885_v0 }
  0xfc   : > { %v849_v4 = vpop.f32.mrf.mxu0 }
  0xfd   : > { %v868_v6 = vpop.f32.mrf.mxu1  ;;  %v917_v7 = vadd.f32 %v905_v3, %v341_v1 }
  0xfe   : > { %v869_v8 = vadd.f32 %v868_v6, %v849_v4 }
  0xff   : > { %933 = vst [vmem:[#allocation2 + $0x18] sm:$0xff] %v917_v7 }
 0x100   : > { %v920_v9 = vadd.f32 %v869_v8, %v344_v5 }
 0x101   : > { %v887_v10 = vpop.f32.mrf.mxu2 }
 0x102   : > { %936 = vst [vmem:[#allocation2 + $0x8] sm:$0xff] %v920_v9  ;;  %v906_v12 = vpop.f32.mrf.mxu3 }
 0x103   : > { %v907_v13 = vadd.f32 %v906_v12, %v887_v10 }
 0x104   : > { %v852_v14 = vpop.f32.mrf.mxu0 }
 0x105   : > { %v871_v16 = vpop.f32.mrf.mxu1  ;;  %v921_v17 = vadd.f32 %v907_v13, %v345_v11 }
 0x106   : > { %v872_v18 = vadd.f32 %v871_v16, %v852_v14 }
 0x107   : > { %937 = vst [vmem:[#allocation2 + $0x48] sm:$0xff] %v921_v17 }
 0x108   : > { %v924_v19 = vadd.f32 %v872_v18, %v348_v15 }
 0x109   : > { %v890_v20 = vpop.f32.mrf.mxu2 }
 0x10a   : > { %940 = vst [vmem:[#allocation2 + $0x10] sm:$0xff] %v924_v19  ;;  %v909_v22 = vpop.f32.mrf.mxu3 }
 0x10b   : > { %v910_v23 = vadd.f32 %v909_v22, %v890_v20 }
 0x10c   : > { %v854_v24 = vpop.f32.mrf.mxu0 }
 0x10d   : > { %v873_v25 = vpop.f32.mrf.mxu1  ;;  %v925_v26 = vadd.f32 %v910_v23, %v349_v21 }
 0x10e   : > { %v874_v27 = vadd.f32 %v873_v25, %v854_v24 }
 0x10f   : > { %941 = vst [vmem:[#allocation2 + $0x38] sm:$0xff] %v925_v26 }
 0x110   : > { %v928_v54 = vadd.f32 %v874_v27, %v352_v49 }
 0x111   : > { %v892_v28 = vpop.f32.mrf.mxu2 }
 0x112   : > { %944 = vst [vmem:[#allocation2 + $0x78] sm:$0xff] %v928_v54  ;;  %v911_v30 = vpop.f32.mrf.mxu3 }
 0x113   : > { %v912_v31 = vadd.f32 %v911_v30, %v892_v28  ;;  %949 = sbr.rel (%p1441_p11) target bundleno = 305 (0x131), region = 82 }
 0x115   : > { %v929_v32 = vadd.f32 %v912_v31, %v353_v29 }
 0x117   : > { %945 = vst [vmem:[#allocation2 + $0x28] sm:$0xff] %v929_v32 }
 0x118   : > { %v950_v33 = vld [vmem:[#allocation2 + $0x30] sm:$0xff]  ;;  %v966_v34 = vld [vmem:[%s1961_s2] sm:$0xf]  ;;  %v993_v39 = vld [vmem:[%s1962_s3 + $0x8] sm:$0xff] }
 0x119   : > { %v992_v35 = vld [vmem:[%s1962_s3] sm:$0xff]  ;;  %v968_v36 = vperm.slane %v966_v34, 0  ;;  %v969_v38 = vperm.slane %v966_v34, 1  ;;  %v952_v40 = vld [vmem:[#allocation2 + $0x58] sm:$0xff]  ;;  %v970_v41 = vperm.slane %v966_v34, 2  ;;  %v994_v42 = vld [vmem:[%s1962_s3 + $0x10] sm:$0xff] }
 0x11a   : > { %v951_v37 = vld [vmem:[#allocation2] sm:$0xff]  ;;  %v953_v43 = vld [vmem:[#allocation2 + $0x18] sm:$0xff]  ;;  %v1851_v44 = vperm.slane %v966_v34, 3  ;;  %v954_v50 = vld [vmem:[#allocation2 + $0x50] sm:$0xff] }
 0x11b   : > { %v995_v45 = vld [vmem:[%s1962_s3 + $0x18] sm:$0xff]  ;;  %v976_v46 = vadd.f32 %v968_v36, %v950_v33  ;;  %v977_v47 = vadd.f32 %v969_v38, %v951_v37  ;;  %v978_v48 = vadd.f32 %v970_v41, %v952_v40  ;;  %v996_v51 = vld [vmem:[%s1962_s3 + $0x20] sm:$0xff]  ;;  %v955_v52 = vld [vmem:[#allocation2 + $0x68] sm:$0xff]  ;;  %v980_v55 = vadd.f32 %v968_v36, %v954_v50 }
 0x11c   : > { %v979_v53 = vadd.f32 %v1851_v44, %v953_v43  ;;  %v981_v56 = vadd.f32 %v969_v38, %v955_v52  ;;  %v997_v57 = vld [vmem:[%s1962_s3 + $0x28] sm:$0xff]  ;;  %v998_v59 = vld [vmem:[%s1962_s3 + $0x30] sm:$0xff]  ;;  %v999_v1 = vld [vmem:[%s1962_s3 + $0x38] sm:$0xff] }
 0x11d   : > { %v956_v58 = vld [vmem:[#allocation2 + $0x8] sm:$0xff]  ;;  %v1008_v60 = vadd.f32 %v992_v35, %v976_v46  ;;  %v1009_v61 = vadd.f32 %v993_v39, %v977_v47  ;;  %v1010_v62 = vadd.f32 %v994_v42, %v978_v48  ;;  %v1012_v3 = vadd.f32 %v996_v51, %v980_v55  ;;  %v958_v6 = vld [vmem:[#allocation2 + $0x40] sm:$0xff]  ;;  %v960_v13 = vld [vmem:[#allocation2 + $0x10] sm:$0xff] }
 0x11e   : > { %v982_v63 = vadd.f32 %v970_v41, %v956_v58  ;;  %v957_v0 = vld [vmem:[#allocation2 + $0x48] sm:$0xff]  ;;  %v1011_v2 = vadd.f32 %v995_v45, %v979_v53  ;;  %v1013_v4 = vadd.f32 %v997_v57, %v981_v56  ;;  %v959_v7 = vld [vmem:[#allocation2 + $0x20] sm:$0xff]  ;;  %v961_v14 = vld [vmem:[#allocation2 + $0x38] sm:$0xff]  ;;  %v984_v22 = vadd.f32 %v968_v36, %v958_v6 }
 0x11f   : > { %v983_v5 = vadd.f32 %v1851_v44, %v957_v0  ;;  %v1024_v8 = vmax.f32 %v1008_v60, 0.0  ;;  %v1025_v9 = vmax.f32 %v1009_v61, 0.0  ;;  %v1026_v10 = vmax.f32 %v1010_v62, 0.0  ;;  %v1000_v12 = vld [vmem:[%s1962_s3 + $0x40] sm:$0xff]  ;;  %v1001_v18 = vld [vmem:[%s1962_s3 + $0x48] sm:$0xff]  ;;  %v1002_v19 = vld [vmem:[%s1962_s3 + $0x50] sm:$0xff] }
 0x120   : > { %v1014_v11 = vadd.f32 %v998_v59, %v982_v63  ;;  %v1027_v15 = vmax.f32 %v1011_v2, 0.0  ;;  %v1028_v16 = vmax.f32 %v1012_v3, 0.0  ;;  %v962_v20 = vld [vmem:[#allocation2 + $0x60] sm:$0xff]  ;;  %v1029_v21 = vmax.f32 %v1013_v4, 0.0  ;;  %v1003_v49 = vld [vmem:[%s1962_s3 + $0x58] sm:$0xff]  ;;  %v963_v25 = vld [vmem:[#allocation2 + $0x70] sm:$0xff] }
 0x121   : > { %v1015_v17 = vadd.f32 %v999_v1, %v983_v5  ;;  %1040 = vst [vmem:[%s1963_s4] sm:$0xff] %v1024_v8  ;;  %v985_v23 = vadd.f32 %v969_v38, %v959_v7  ;;  %v986_v24 = vadd.f32 %v970_v41, %v960_v13  ;;  %v964_v26 = vld [vmem:[#allocation2 + $0x78] sm:$0xff]  ;;  %v987_v54 = vadd.f32 %v1851_v44, %v961_v14  ;;  %v1004_v29 = vld [vmem:[%s1962_s3 + $0x60] sm:$0xff]  ;;  %v965_v31 = vld [vmem:[#allocation2 + $0x28] sm:$0xff] }
 0x122   : > { %1041 = vst [vmem:[%s1963_s4 + $0x8] sm:$0xff] %v1025_v9  ;;  %v1030_v27 = vmax.f32 %v1014_v11, 0.0  ;;  %v988_v28 = vadd.f32 %v968_v36, %v962_v20  ;;  %v989_v30 = vadd.f32 %v969_v38, %v963_v25  ;;  %v1016_v32 = vadd.f32 %v1000_v12, %v984_v22  ;;  %v1005_v35 = vld [vmem:[%s1962_s3 + $0x68] sm:$0xff]  ;;  %v1006_v38 = vld [vmem:[%s1962_s3 + $0x70] sm:$0xff] }
 0x123   : > { %1042 = vst [vmem:[%s1963_s4 + $0x10] sm:$0xff] %v1026_v10  ;;  %v1017_v33 = vadd.f32 %v1001_v18, %v985_v23  ;;  %v1018_v34 = vadd.f32 %v1002_v19, %v986_v24  ;;  %v990_v37 = vadd.f32 %v970_v41, %v964_v26  ;;  %v1031_v36 = vmax.f32 %v1015_v17, 0.0  ;;  %v1007_v41 = vld [vmem:[%s1962_s3 + $0x78] sm:$0xff] }
 0x124   : > { %1043 = vst [vmem:[%s1963_s4 + $0x18] sm:$0xff] %v1027_v15  ;;  %v1019_v39 = vadd.f32 %v1003_v49, %v987_v54  ;;  %v991_v40 = vadd.f32 %v1851_v44, %v965_v31  ;;  %v1032_v42 = vmax.f32 %v1016_v32, 0.0  ;;  %v1020_v43 = vadd.f32 %v1004_v29, %v988_v28 }
 0x125   : > { %1044 = vst [vmem:[%s1963_s4 + $0x20] sm:$0xff] %v1028_v16  ;;  %v1033_v45 = vmax.f32 %v1017_v33, 0.0  ;;  %v1021_v46 = vadd.f32 %v1005_v35, %v989_v30  ;;  %v1034_v44 = vmax.f32 %v1018_v34, 0.0  ;;  %v1022_v47 = vadd.f32 %v1006_v38, %v990_v37 }
 0x126   : > { %1045 = vst [vmem:[%s1963_s4 + $0x28] sm:$0xff] %v1029_v21  ;;  %v1035_v48 = vmax.f32 %v1019_v39, 0.0  ;;  %v1023_v50 = vadd.f32 %v1007_v41, %v991_v40  ;;  %v1036_v51 = vmax.f32 %v1020_v43, 0.0 }
 0x127   : > { %1046 = vst [vmem:[%s1963_s4 + $0x30] sm:$0xff] %v1030_v27  ;;  %v1037_v52 = vmax.f32 %v1021_v46, 0.0  ;;  %v1038_v53 = vmax.f32 %v1022_v47, 0.0 }
 0x128   : > { %1047 = vst [vmem:[%s1963_s4 + $0x38] sm:$0xff] %v1031_v36  ;;  %v1039_v55 = vmax.f32 %v1023_v50, 0.0 }
 0x129   : > { %1048 = vst [vmem:[%s1963_s4 + $0x40] sm:$0xff] %v1032_v42 }
 0x12a   : > { %1049 = vst [vmem:[%s1963_s4 + $0x48] sm:$0xff] %v1033_v45 }
 0x12b   : > { %1050 = vst [vmem:[%s1963_s4 + $0x50] sm:$0xff] %v1034_v44 }
 0x12c   : > { %1051 = vst [vmem:[%s1963_s4 + $0x58] sm:$0xff] %v1035_v48 }
 0x12d   : > { %1052 = vst [vmem:[%s1963_s4 + $0x60] sm:$0xff] %v1036_v51 }
 0x12e   : > { %1053 = vst [vmem:[%s1963_s4 + $0x68] sm:$0xff] %v1037_v52 }
 0x12f   : > { %1054 = vst [vmem:[%s1963_s4 + $0x70] sm:$0xff] %v1038_v53 }
 0x130   : > { %1055 = vst [vmem:[%s1963_s4 + $0x78] sm:$0xff] %v1039_v55 }
 0x131 PF: > { %s14_s19 = sadd.s32 1, %s1595_s19   ;;  %s1964_s15 = smov %s1583_s16 }
 0x132   : > { %p11_p12 = scmp.ge.s32.totalorder %s14_s19, 20   ;;  %s1965_s16 = smov %s1658_s23 }
 0x133   : > { %s1966_s17 = smov %s1591_s18  ;;  %s1967_s18 = smov %s1969_s20 }
 0x134   :  { %13 = sbr.rel (!%p11_p12) target bundleno = 3 (0x3), region = 123 }

</bundles_post_ra>
